<compile_context>
chip_gen: v7x
topology: tpu7x:2x2x1
jax: 0.10.0
libtpu: 0.0.40
codegen_flags: <defaults>
</compile_context>

<pallas_src>
import functools

import jax
import jax.numpy as jnp
from jax.experimental import pallas as pl
from jax.experimental.pallas import tpu as pltpu

NUM_MIX = 3
NUM_PARAMS = 3 * NUM_MIX           # (mixture logit, mean, log-scale) per component
CTX_CHANNELS = 3
K = 5
PAD = K // 2


# ----------------------------------------------------------------------------
# causal-mask tap sets (only nonzero taps are ever materialized / computed)
# ----------------------------------------------------------------------------
def _mask_taps(k, mask_type):
    c = k // 2
    taps = []
    for kh in range(k):
        for kw in range(k):
            if kh < c or (kh == c and (kw < c or (mask_type == "B" and kw == c))):
                taps.append((kh, kw))
    return tuple(taps)          # 'A': 12 taps, 'B': 13 taps (K=5)


def _all_taps(k):
    return tuple((kh, kw) for kh in range(k) for kw in range(k))


# ----------------------------------------------------------------------------
# Pallas kernels
# ----------------------------------------------------------------------------
def _row_matmul_kernel(x_ref, w_ref, b_ref, o_ref, *, relu_out):
    """(1, TILE_P, F) @ (F, Cout) + b, optional fused ReLU. bf16 in, f32 acc."""
    acc = jnp.dot(x_ref[0], w_ref[...], preferred_element_type=jnp.float32)
    acc = acc + b_ref[0]
    if relu_out:
        acc = jnp.maximum(acc, 0.0)
    o_ref[0] = acc.astype(o_ref.dtype)


def _masked_conv_kernel(x_ref, w_ref, b_ref, *rest, taps, relu_out, n_res):
    """Masked 5x5 conv on one halo row-tile; nonzero taps only.

    x_ref:  (1, 1, TILE_H+4, W+4, Cin)   bf16 halo tile
    w_ref:  (n_taps, Cin, Cout)          bf16 (nonzero taps only)
    b_ref:  (1, Cout)                    f32
    rest:   n_res residual refs (1, 1, TILE_H, W, Cout) bf16, then the output ref.
    Epilogue fuses residual adds and ReLU.
    """
    res_refs = rest[:n_res]
    o_ref = rest[n_res]
    th, w, cout = o_ref.shape[2], o_ref.shape[3], o_ref.shape[4]
    cin = x_ref.shape[4]

    acc = jnp.zeros((th * w, cout), jnp.float32)
    for t, (dh, dw) in enumerate(taps):                       # static unroll
        patch = x_ref[0, 0, dh:dh + th, dw:dw + w, :].reshape(th * w, cin)
        acc = acc + jnp.dot(patch, w_ref[t], preferred_element_type=jnp.float32)
    acc = acc + b_ref[0]
    for r in res_refs:
        acc = acc + r[0, 0].reshape(th * w, cout).astype(jnp.float32)
    if relu_out:
        acc = jnp.maximum(acc, 0.0)
    o_ref[0, 0] = acc.reshape(th, w, cout).astype(o_ref.dtype)


def _head_mixture_kernel(h_ref, w2t_ref, b2_ref, low_ref, up_ref, o_ref, *, num_mix):
    """Fused conv2 (1x1 -> 9 params) + logistic-mixture likelihood, lane-dense.

    h_ref:  (1, TILE_P, nec)  bf16
    w2t:    (3*num_mix, nec)  bf16   b2: (3*num_mix, 1) f32
    low/up: (1, 1, 1, TILE_P) f32    o:  (1, 1, 1, TILE_P) f32  (pixels on lanes)
    """
    h = h_ref[0]                                              # (TILE_P, nec)
    # (9, nec) x (TILE_P, nec)^T -> (9, TILE_P): pixels land on the lane axis.
    params = jax.lax.dot_general(
        w2t_ref[...], h, (((1,), (1,)), ((), ())),
        preferred_element_type=jnp.float32)
    params = params + b2_ref[...]
    logits = params[0:num_mix]
    mu = params[num_mix:2 * num_mix]
    log_s = jnp.clip(params[2 * num_mix:3 * num_mix], -7.0, 7.0)

    # softmax over the (tiny) mixture axis
    m = jnp.max(logits, axis=0, keepdims=True)
    e = jnp.exp(logits - m)
    pi = e * pl.reciprocal(jnp.sum(e, axis=0, keepdims=True), approx=True)

    inv_s = jnp.exp(-log_s)
    low = low_ref[0, 0]                                       # (1, TILE_P)
    up = up_ref[0, 0]
    cdf_up = pl.reciprocal(1.0 + jnp.exp(-(up - mu) * inv_s), approx=True)
    cdf_low = pl.reciprocal(1.0 + jnp.exp(-(low - mu) * inv_s), approx=True)
    prob = jnp.sum(pi * (cdf_up - cdf_low), axis=0, keepdims=True)   # (1, TILE_P)
    o_ref[0, 0] = jnp.clip(prob, 1e-9, 1.0)


# ----------------------------------------------------------------------------
# Pallas wrappers (padding / halo-tiling / reshapes are the only XLA-side glue)
# ----------------------------------------------------------------------------
def _row_matmul(x, w, b, *, tile_p, relu_out=False, out_dtype=jnp.bfloat16):
    n, p, f = x.shape
    cout = w.shape[-1]
    nt = p // tile_p
    kernel = functools.partial(_row_matmul_kernel, relu_out=relu_out)
    return pl.pallas_call(
        kernel,
        out_shape=jax.ShapeDtypeStruct((n, p, cout), out_dtype),
        grid=(n, nt),
        in_specs=[
            pl.BlockSpec((1, tile_p, f), lambda i, j: (i, j, 0)),
            pl.BlockSpec((f, cout), lambda i, j: (0, 0)),
            pl.BlockSpec((1, cout), lambda i, j: (0, 0)),
        ],
        out_specs=pl.BlockSpec((1, tile_p, cout), lambda i, j: (i, j, 0)),
        compiler_params=pltpu.CompilerParams(
            dimension_semantics=("parallel", "parallel")),
    )(x.astype(jnp.bfloat16), w.astype(jnp.bfloat16),
      b.reshape(1, cout).astype(jnp.float32))


def _masked_conv2d(x, w_full, b, *, taps, tile_h, residuals=(), relu_out=False):
    """'same' masked KxK conv on NHWC input; halo row-tiles, nonzero taps only."""
    n, h, w, cin = x.shape
    cout = w_full.shape[-1]
    nt = h // tile_h
    xp = jnp.pad(x, ((0, 0), (PAD, PAD), (PAD, PAD), (0, 0)))
    # Row-tile halo expansion in the wrapper (overlap is only 2*PAD rows per tile,
    # negligible HBM cost vs. the old 25x im2col expansion).
    halo = jnp.stack(
        [xp[:, i * tile_h: i * tile_h + tile_h + 2 * PAD] for i in range(nt)],
        axis=1).astype(jnp.bfloat16)                    # (n, nt, tile_h+4, w+4, cin)
    w_taps = jnp.stack([w_full[dh, dw] for dh, dw in taps],
                       axis=0).astype(jnp.bfloat16)     # (n_taps, cin, cout)
    b2 = b.reshape(1, cout).astype(jnp.float32)
    res5 = [r.reshape(n, nt, tile_h, w, cout).astype(jnp.bfloat16) for r in residuals]

    kernel = functools.partial(_masked_conv_kernel, taps=taps,
                               relu_out=relu_out, n_res=len(res5))
    out = pl.pallas_call(
        kernel,
        out_shape=jax.ShapeDtypeStruct((n, nt, tile_h, w, cout), jnp.bfloat16),
        grid=(n, nt),
        in_specs=[
            pl.BlockSpec((1, 1, tile_h + 2 * PAD, w + 2 * PAD, cin),
                         lambda i, j: (i, j, 0, 0, 0)),
            pl.BlockSpec((len(taps), cin, cout), lambda i, j: (0, 0, 0)),
            pl.BlockSpec((1, cout), lambda i, j: (0, 0)),
        ] + [pl.BlockSpec((1, 1, tile_h, w, cout), lambda i, j: (i, j, 0, 0, 0))
             for _ in res5],
        out_specs=pl.BlockSpec((1, 1, tile_h, w, cout),
                               lambda i, j: (i, j, 0, 0, 0)),
        compiler_params=pltpu.CompilerParams(
            dimension_semantics=("parallel", "parallel")),
    )(halo, w_taps, b2, *res5)
    return out.reshape(n, h, w, cout)


def _head_mixture(h, w2, b2, low_nchw, up_nchw, *, tile_p, num_mix=NUM_MIX):
    n, p, nec = h.shape
    nt = p // tile_p
    w2t = w2.reshape(nec, 3 * num_mix).T.astype(jnp.bfloat16)       # (9, nec)
    b2c = b2.reshape(3 * num_mix, 1).astype(jnp.float32)
    low4 = low_nchw.reshape(n, nt, 1, tile_p).astype(jnp.float32)
    up4 = up_nchw.reshape(n, nt, 1, tile_p).astype(jnp.float32)
    kernel = functools.partial(_head_mixture_kernel, num_mix=num_mix)
    out = pl.pallas_call(
        kernel,
        out_shape=jax.ShapeDtypeStruct((n, nt, 1, tile_p), jnp.float32),
        grid=(n, nt),
        in_specs=[
            pl.BlockSpec((1, tile_p, nec), lambda i, j: (i, j, 0)),
            pl.BlockSpec((3 * num_mix, nec), lambda i, j: (0, 0)),
            pl.BlockSpec((3 * num_mix, 1), lambda i, j: (0, 0)),
            pl.BlockSpec((1, 1, 1, tile_p), lambda i, j: (i, j, 0, 0)),
            pl.BlockSpec((1, 1, 1, tile_p), lambda i, j: (i, j, 0, 0)),
        ],
        out_specs=pl.BlockSpec((1, 1, 1, tile_p), lambda i, j: (i, j, 0, 0)),
        compiler_params=pltpu.CompilerParams(
            dimension_semantics=("parallel", "parallel")),
    )(h.astype(jnp.bfloat16), w2t, b2c, low4, up4)
    return out.reshape(n, p)


def _im2col_features(x, taps):
    """Tap expansion for the tiny-Cin front convs only (Cin = 1 or 3)."""
    n, h, w, c = x.shape
    xp = jnp.pad(x, ((0, 0), (PAD, PAD), (PAD, PAD), (0, 0)))
    cols = [xp[:, dh:dh + h, dw:dw + w, :] for dh, dw in taps]
    return jnp.concatenate(cols, axis=-1).reshape(n, h * w, len(taps) * c)


def _pick_tile_h(h, w, c, target_bytes=4 << 20):
    """Largest row-tile whose bf16 halo tile fits ~4 MiB (safe even for v7x /
    v5e default scoped VMEM with double-buffered in+out blocks)."""
    valid = [th for th in range(1, h + 1) if h % th == 0 and (th * w) % 8 == 0]
    if not valid:
        return h
    fit = [th for th in valid
           if (th + 2 * PAD) * (w + 2 * PAD) * max(c, 1) * 2 <= target_bytes]
    return max(fit) if fit else min(valid)


# ----------------------------------------------------------------------------
# Parameters (deterministic synthetic init)
# ----------------------------------------------------------------------------
def _init_conv(key, k, cin, cout):
    wk, bk = jax.random.split(key)
    bound = 1.0 / float((k * k * cin) ** 0.5)
    w = jax.random.uniform(wk, (k, k, cin, cout), jnp.float32, -bound, bound)
    b = jax.random.uniform(bk, (cout,), jnp.float32, -bound, bound)
    return w, b


def init_pixelcnn_context(key, nec=128):
    ks = jax.random.split(key, 9)
    return {
        "conv_pre":  _init_conv(ks[0], K, 1, nec),             # mask 'A' (taps only)
        "conv_ctx":  _init_conv(ks[1], K, CTX_CHANNELS, nec),   # unmasked context conv
        "res1_c1":   _init_conv(ks[2], K, nec, nec),            # mask 'B'
        "res1_c2":   _init_conv(ks[3], K, nec, nec),
        "res2_c1":   _init_conv(ks[4], K, nec, nec),
        "res2_c2":   _init_conv(ks[5], K, nec, nec),
        "conv_post": _init_conv(ks[6], K, nec, nec),
        "conv1":     _init_conv(ks[7], 1, nec, nec),
        "conv2":     _init_conv(ks[8], 1, nec, NUM_PARAMS),
    }


def init_coding_hh_lossless(key, decomp_levels, nec=128):
    return [init_pixelcnn_context(k, nec=nec) for k in jax.random.split(key, decomp_levels)]


# ----------------------------------------------------------------------------
# Forward pass: PixelCNN_Context.forward_inf(HH, context, lower, upper) -> prob
# ----------------------------------------------------------------------------
def pixelcnn_context_forward_inf(p, HH, context, lower_bound, upper_bound, tile_h=None):
    x = jnp.transpose(HH, (0, 2, 3, 1)).astype(jnp.float32)          # (n, h, w, 1)
    ctx = jnp.transpose(context, (0, 2, 3, 1)).astype(jnp.float32)   # (n, h, w, 3)
    n, h, w, _ = x.shape
    nec = p["conv1"][0].shape[-1]
    if tile_h is None:
        tile_h = _pick_tile_h(h, w, nec)
    assert h % tile_h == 0 and (tile_h * w) % 8 == 0
    tile_p = tile_h * w
    taps_a = _mask_taps(K, "A")
    taps_b = _mask_taps(K, "B")

    # --- h0 = maskA_conv(x) + conv(ctx): one fused long-K row matmul (F = 12 + 75) ---
    feat = jnp.concatenate(
        [_im2col_features(x, taps_a), _im2col_features(ctx, _all_taps(K))], axis=-1)
    w_pre, b_pre = p["conv_pre"]
    w_ctx, b_ctx = p["conv_ctx"]
    w0 = jnp.concatenate(
        [jnp.concatenate([w_pre[dh, dw] for dh, dw in taps_a], axis=0),
         w_ctx.reshape(K * K * CTX_CHANNELS, nec)], axis=0)          # (87, nec)
    b0 = b_pre + b_ctx
    h0 = _row_matmul(feat, w0, b0, tile_p=tile_p).reshape(n, h, w, nec)

    # --- masked 'B' residual blocks (residual adds + ReLUs fused into epilogues) ---
    t = _masked_conv2d(h0, *p["res1_c1"], taps=taps_b, tile_h=tile_h, relu_out=True)
    h1 = _masked_conv2d(t, *p["res1_c2"], taps=taps_b, tile_h=tile_h, residuals=(h0,))
    t = _masked_conv2d(h1, *p["res2_c1"], taps=taps_b, tile_h=tile_h, relu_out=True)
    # relu(h0 + h2) with h2 = h1 + conv(t): both residuals + ReLU fused here
    hp = _masked_conv2d(t, *p["res2_c2"], taps=taps_b, tile_h=tile_h,
                        residuals=(h1, h0), relu_out=True)
    hq = _masked_conv2d(hp, *p["conv_post"], taps=taps_b, tile_h=tile_h, relu_out=True)

    # --- 1x1 conv, then conv2 fused with the logistic-mixture likelihood ---
    w1, b1 = p["conv1"]
    hr = _row_matmul(hq.reshape(n, h * w, nec), w1.reshape(nec, nec), b1,
                     tile_p=tile_p, relu_out=True)
    w2, b2 = p["conv2"]
    prob = _head_mixture(hr, w2, b2, lower_bound, upper_bound, tile_p=tile_p)
    return prob.reshape(n, 1, h, w)                                   # NCHW


@functools.partial(jax.jit, static_argnames=("layer", "tile_h"))
def coding_hh_lossless_forward(params_list, HH, context, lower_bound, upper_bound,
                               layer, tile_h=None):
    """CodingHH_lossless.forward: run the layer-th PixelCNN_Context.forward_inf."""
    return pixelcnn_context_forward_inf(params_list[layer], HH, context,
                                        lower_bound, upper_bound, tile_h=tile_h)


if __name__ == "__main__":
    key = jax.random.PRNGKey(0)
    pkey, dkey, ckey = jax.random.split(key, 3)

    decomp_levels = 2
    nec = 32                        # module default is 128; small for the example
    n, h, w = 2, 16, 16
    layer = 1

    params = init_coding_hh_lossless(pkey, decomp_levels, nec=nec)

    HH = jnp.round(jax.random.normal(dkey, (n, 1, h, w), jnp.float32) * 4.0)
    context = jax.random.normal(ckey, (n, CTX_CHANNELS, h, w), jnp.float32)
    lower_bound = HH - 0.5
    upper_bound = HH + 0.5

    prob = coding_hh_lossless_forward(params, HH, context, lower_bound, upper_bound,
                                      layer=layer, tile_h=8)
    prob = jax.block_until_ready(prob)

    assert prob.shape == (n, 1, h, w)
    assert bool(jnp.all(prob > 0.0)) and bool(jnp.all(prob <= 1.0 + 1e-6))
    assert bool(jnp.all(jnp.isfinite(prob)))
    print("KERNEL_OK")
</pallas_src>

<mosaic_0001>
module attributes {stable_mosaic.version = 11 : i64} {
  func.func @_row_matmul_kernel(%arg0: i32, %arg1: i32, %arg2: memref<1x128x87xbf16, #tpu.memory_space<vmem>>, %arg3: memref<87x32xbf16, #tpu.memory_space<vmem>>, %arg4: memref<1x32xf32, #tpu.memory_space<vmem>>, %arg5: memref<1x128x32xbf16, #tpu.memory_space<vmem>>) attributes {dimension_semantics = [#tpu.dimension_semantics<parallel>, #tpu.dimension_semantics<parallel>], iteration_bounds = array<i64: 2, 2>, scalar_prefetch = 0 : i64, scratch_operands = 0 : i64, tpu.core_type = #tpu.core_type<tc>, window_params = [{transform_indices = @transform_0, window_bounds = array<i64: 1, 128, 87>}, {pipeline_mode = #tpu.pipeline_mode<synchronous>, transform_indices = @transform_1, window_bounds = array<i64: 87, 32>}, {pipeline_mode = #tpu.pipeline_mode<synchronous>, transform_indices = @transform_2, window_bounds = array<i64: 1, 32>}, {transform_indices = @transform_3, window_bounds = array<i64: 1, 128, 32>}]} {
    %c0 = arith.constant 0 : index
    %c0_0 = arith.constant 0 : index
    %c0_1 = arith.constant 0 : index
    %0 = vector.load %arg2[%c0, %c0_0, %c0_1] : memref<1x128x87xbf16, #tpu.memory_space<vmem>>, vector<1x128x87xbf16>
    %1 = vector.shape_cast %0 : vector<1x128x87xbf16> to vector<128x87xbf16>
    %c0_2 = arith.constant 0 : index
    %c0_3 = arith.constant 0 : index
    %2 = vector.load %arg3[%c0_2, %c0_3] : memref<87x32xbf16, #tpu.memory_space<vmem>>, vector<87x32xbf16>
    %cst = arith.constant dense<0.000000e+00> : vector<128x32xf32>
    %3 = tpu.matmul %1, %2, %cst {dimension_numbers = #tpu.dot_dimension_numbers<[1], [0], [0], [1], [0, 0, 1, 1], [], []>} : vector<128x87xbf16>, vector<87x32xbf16>, vector<128x32xf32> -> vector<128x32xf32>
    %c0_4 = arith.constant 0 : index
    %c0_5 = arith.constant 0 : index
    %4 = vector.load %arg4[%c0_4, %c0_5] : memref<1x32xf32, #tpu.memory_space<vmem>>, vector<1x32xf32>
    %5 = vector.shape_cast %4 : vector<1x32xf32> to vector<32xf32>
    %6 = vector.shape_cast %5 : vector<32xf32> to vector<1x32xf32>
    %7 = vector.broadcast %6 : vector<1x32xf32> to vector<128x32xf32>
    %8 = arith.addf %3, %7 : vector<128x32xf32>
    %9 = arith.truncf %8 : vector<128x32xf32> to vector<128x32xbf16>
    %c0_6 = arith.constant 0 : index
    %c0_7 = arith.constant 0 : index
    %c0_8 = arith.constant 0 : index
    %10 = vector.load %arg5[%c0_6, %c0_7, %c0_8] : memref<1x128x32xbf16, #tpu.memory_space<vmem>>, vector<1x128x32xbf16>
    %11 = vector.shape_cast %10 : vector<1x128x32xbf16> to vector<128x32xbf16>
    %12 = vector.shape_cast %9 : vector<128x32xbf16> to vector<1x128x32xbf16>
    tpu.vector_store %arg5[%c0_6, %c0_7, %c0_8], %12 {strides = array<i32>} : memref<1x128x32xbf16, #tpu.memory_space<vmem>>, vector<1x128x32xbf16>,
    return
  }
  func.func @transform_0(%arg0: i32, %arg1: i32) -> (i32, i32, i32) {
    %c0_i32 = arith.constant 0 : i32
    %c0_i32_0 = arith.constant 0 : i32
    return %arg0, %arg1, %c0_i32 : i32, i32, i32
  }
  func.func @transform_1(%arg0: i32, %arg1: i32) -> (i32, i32) {
    %c0_i32 = arith.constant 0 : i32
    %c0_i32_0 = arith.constant 0 : i32
    %c0_i32_1 = arith.constant 0 : i32
    return %c0_i32, %c0_i32_0 : i32, i32
  }
  func.func @transform_2(%arg0: i32, %arg1: i32) -> (i32, i32) {
    %c0_i32 = arith.constant 0 : i32
    %c0_i32_0 = arith.constant 0 : i32
    %c0_i32_1 = arith.constant 0 : i32
    return %c0_i32, %c0_i32_0 : i32, i32
  }
  func.func @transform_3(%arg0: i32, %arg1: i32) -> (i32, i32, i32) {
    %c0_i32 = arith.constant 0 : i32
    %c0_i32_0 = arith.constant 0 : i32
    return %arg0, %arg1, %c0_i32 : i32, i32, i32
  }
}

module attributes {stable_mosaic.version = 11 : i64} {
  func.func @_masked_conv_kernel(%arg0: i32, %arg1: i32, %arg2: memref<1x1x12x20x32xbf16, #tpu.memory_space<vmem>>, %arg3: memref<13x32x32xbf16, #tpu.memory_space<vmem>>, %arg4: memref<1x32xf32, #tpu.memory_space<vmem>>, %arg5: memref<1x1x8x16x32xbf16, #tpu.memory_space<vmem>>, %arg6: memref<1x1x8x16x32xbf16, #tpu.memory_space<vmem>>, %arg7: memref<1x1x8x16x32xbf16, #tpu.memory_space<vmem>>) attributes {dimension_semantics = [#tpu.dimension_semantics<parallel>, #tpu.dimension_semantics<parallel>], iteration_bounds = array<i64: 2, 2>, scalar_prefetch = 0 : i64, scratch_operands = 0 : i64, tpu.core_type = #tpu.core_type<tc>, window_params = [{transform_indices = @transform_0, window_bounds = array<i64: 1, 1, 12, 20, 32>}, {pipeline_mode = #tpu.pipeline_mode<synchronous>, transform_indices = @transform_1, window_bounds = array<i64: 13, 32, 32>}, {pipeline_mode = #tpu.pipeline_mode<synchronous>, transform_indices = @transform_2, window_bounds = array<i64: 1, 32>}, {transform_indices = @transform_3, window_bounds = array<i64: 1, 1, 8, 16, 32>}, {transform_indices = @transform_4, window_bounds = array<i64: 1, 1, 8, 16, 32>}, {transform_indices = @transform_5, window_bounds = array<i64: 1, 1, 8, 16, 32>}]} {
    %cst = arith.constant 0.000000e+00 : f32
    %0 = vector.broadcast %cst : f32 to vector<128x32xf32>
    %c0 = arith.constant 0 : index
    %c0_0 = arith.constant 0 : index
    %c0_1 = arith.constant 0 : index
    %c0_2 = arith.constant 0 : index
    %c0_3 = arith.constant 0 : index
    %1 = vector.load %arg2[%c0, %c0_0, %c0_1, %c0_2, %c0_3] : memref<1x1x12x20x32xbf16, #tpu.memory_space<vmem>>, vector<1x1x8x16x32xbf16>
    %2 = vector.shape_cast %1 : vector<1x1x8x16x32xbf16> to vector<8x16x32xbf16>
    %3 = vector.shape_cast %2 : vector<8x16x32xbf16> to vector<128x32xbf16>
    %c0_4 = arith.constant 0 : index
    %c0_5 = arith.constant 0 : index
    %c0_6 = arith.constant 0 : index
    %4 = vector.load %arg3[%c0_4, %c0_5, %c0_6] : memref<13x32x32xbf16, #tpu.memory_space<vmem>>, vector<1x32x32xbf16>
    %5 = vector.shape_cast %4 : vector<1x32x32xbf16> to vector<32x32xbf16>
    %cst_7 = arith.constant dense<0.000000e+00> : vector<128x32xf32>
    %6 = tpu.matmul %3, %5, %cst_7 {dimension_numbers = #tpu.dot_dimension_numbers<[1], [0], [0], [1], [0, 0, 1, 1], [], []>} : vector<128x32xbf16>, vector<32x32xbf16>, vector<128x32xf32> -> vector<128x32xf32>
    %7 = arith.addf %0, %6 : vector<128x32xf32>
    %c0_8 = arith.constant 0 : index
    %c0_9 = arith.constant 0 : index
    %c0_10 = arith.constant 0 : index
    %c1 = arith.constant 1 : index
    %c0_11 = arith.constant 0 : index
    %8 = vector.load %arg2[%c0_8, %c0_9, %c0_10, %c1, %c0_11] : memref<1x1x12x20x32xbf16, #tpu.memory_space<vmem>>, vector<1x1x8x16x32xbf16>
    %9 = vector.shape_cast %8 : vector<1x1x8x16x32xbf16> to vector<8x16x32xbf16>
    %10 = vector.shape_cast %9 : vector<8x16x32xbf16> to vector<128x32xbf16>
    %c1_12 = arith.constant 1 : index
    %c0_13 = arith.constant 0 : index
    %c0_14 = arith.constant 0 : index
    %11 = vector.load %arg3[%c1_12, %c0_13, %c0_14] : memref<13x32x32xbf16, #tpu.memory_space<vmem>>, vector<1x32x32xbf16>
    %12 = vector.shape_cast %11 : vector<1x32x32xbf16> to vector<32x32xbf16>
    %cst_15 = arith.constant dense<0.000000e+00> : vector<128x32xf32>
    %13 = tpu.matmul %10, %12, %cst_15 {dimension_numbers = #tpu.dot_dimension_numbers<[1], [0], [0], [1], [0, 0, 1, 1], [], []>} : vector<128x32xbf16>, vector<32x32xbf16>, vector<128x32xf32> -> vector<128x32xf32>
    %14 = arith.addf %7, %13 : vector<128x32xf32>
    %c0_16 = arith.constant 0 : index
    %c0_17 = arith.constant 0 : index
    %c0_18 = arith.constant 0 : index
    %c2 = arith.constant 2 : index
    %c0_19 = arith.constant 0 : index
    %15 = vector.load %arg2[%c0_16, %c0_17, %c0_18, %c2, %c0_19] : memref<1x1x12x20x32xbf16, #tpu.memory_space<vmem>>, vector<1x1x8x16x32xbf16>
    %16 = vector.shape_cast %15 : vector<1x1x8x16x32xbf16> to vector<8x16x32xbf16>
    %17 = vector.shape_cast %16 : vector<8x16x32xbf16> to vector<128x32xbf16>
    %c2_20 = arith.constant 2 : index
    %c0_21 = arith.constant 0 : index
    %c0_22 = arith.constant 0 : index
    %18 = vector.load %arg3[%c2_20, %c0_21, %c0_22] : memref<13x32x32xbf16, #tpu.memory_space<vmem>>, vector<1x32x32xbf16>
    %19 = vector.shape_cast %18 : vector<1x32x32xbf16> to vector<32x32xbf16>
    %cst_23 = arith.constant dense<0.000000e+00> : vector<128x32xf32>
    %20 = tpu.matmul %17, %19, %cst_23 {dimension_numbers = #tpu.dot_dimension_numbers<[1], [0], [0], [1], [0, 0, 1, 1], [], []>} : vector<128x32xbf16>, vector<32x32xbf16>, vector<128x32xf32> -> vector<128x32xf32>
    %21 = arith.addf %14, %20 : vector<128x32xf32>
    %c0_24 = arith.constant 0 : index
    %c0_25 = arith.constant 0 : index
    %c0_26 = arith.constant 0 : index
    %c3 = arith.constant 3 : index
    %c0_27 = arith.constant 0 : index
    %22 = vector.load %arg2[%c0_24, %c0_25, %c0_26, %c3, %c0_27] : memref<1x1x12x20x32xbf16, #tpu.memory_space<vmem>>, vector<1x1x8x16x32xbf16>
    %23 = vector.shape_cast %22 : vector<1x1x8x16x32xbf16> to vector<8x16x32xbf16>
    %24 = vector.shape_cast %23 : vector<8x16x32xbf16> to vector<128x32xbf16>
    %c3_28 = arith.constant 3 : index
    %c0_29 = arith.constant 0 : index
    %c0_30 = arith.constant 0 : index
    %25 = vector.load %arg3[%c3_28, %c0_29, %c0_30] : memref<13x32x32xbf16, #tpu.memory_space<vmem>>, vector<1x32x32xbf16>
    %26 = vector.shape_cast %25 : vector<1x32x32xbf16> to vector<32x32xbf16>
    %cst_31 = arith.constant dense<0.000000e+00> : vector<128x32xf32>
    %27 = tpu.matmul %24, %26, %cst_31 {dimension_numbers = #tpu.dot_dimension_numbers<[1], [0], [0], [1], [0, 0, 1, 1], [], []>} : vector<128x32xbf16>, vector<32x32xbf16>, vector<128x32xf32> -> vector<128x32xf32>
    %28 = arith.addf %21, %27 : vector<128x32xf32>
    %c0_32 = arith.constant 0 : index
    %c0_33 = arith.constant 0 : index
    %c0_34 = arith.constant 0 : index
    %c4 = arith.constant 4 : index
    %c0_35 = arith.constant 0 : index
    %29 = vector.load %arg2[%c0_32, %c0_33, %c0_34, %c4, %c0_35] : memref<1x1x12x20x32xbf16, #tpu.memory_space<vmem>>, vector<1x1x8x16x32xbf16>
    %30 = vector.shape_cast %29 : vector<1x1x8x16x32xbf16> to vector<8x16x32xbf16>
    %31 = vector.shape_cast %30 : vector<8x16x32xbf16> to vector<128x32xbf16>
    %c4_36 = arith.constant 4 : index
    %c0_37 = arith.constant 0 : index
    %c0_38 = arith.constant 0 : index
    %32 = vector.load %arg3[%c4_36, %c0_37, %c0_38] : memref<13x32x32xbf16, #tpu.memory_space<vmem>>, vector<1x32x32xbf16>
    %33 = vector.shape_cast %32 : vector<1x32x32xbf16> to vector<32x32xbf16>
    %cst_39 = arith.constant dense<0.000000e+00> : vector<128x32xf32>
    %34 = tpu.matmul %31, %33, %cst_39 {dimension_numbers = #tpu.dot_dimension_numbers<[1], [0], [0], [1], [0, 0, 1, 1], [], []>} : vector<128x32xbf16>, vector<32x32xbf16>, vector<128x32xf32> -> vector<128x32xf32>
    %35 = arith.addf %28, %34 : vector<128x32xf32>
    %c0_40 = arith.constant 0 : index
    %c0_41 = arith.constant 0 : index
    %c1_42 = arith.constant 1 : index
    %c0_43 = arith.constant 0 : index
    %c0_44 = arith.constant 0 : index
    %36 = vector.load %arg2[%c0_40, %c0_41, %c1_42, %c0_43, %c0_44] : memref<1x1x12x20x32xbf16, #tpu.memory_space<vmem>>, vector<1x1x8x16x32xbf16>
    %37 = vector.shape_cast %36 : vector<1x1x8x16x32xbf16> to vector<8x16x32xbf16>
    %38 = vector.shape_cast %37 : vector<8x16x32xbf16> to vector<128x32xbf16>
    %c5 = arith.constant 5 : index
    %c0_45 = arith.constant 0 : index
    %c0_46 = arith.constant 0 : index
    %39 = vector.load %arg3[%c5, %c0_45, %c0_46] : memref<13x32x32xbf16, #tpu.memory_space<vmem>>, vector<1x32x32xbf16>
    %40 = vector.shape_cast %39 : vector<1x32x32xbf16> to vector<32x32xbf16>
    %cst_47 = arith.constant dense<0.000000e+00> : vector<128x32xf32>
    %41 = tpu.matmul %38, %40, %cst_47 {dimension_numbers = #tpu.dot_dimension_numbers<[1], [0], [0], [1], [0, 0, 1, 1], [], []>} : vector<128x32xbf16>, vector<32x32xbf16>, vector<128x32xf32> -> vector<128x32xf32>
    %42 = arith.addf %35, %41 : vector<128x32xf32>
    %c0_48 = arith.constant 0 : index
    %c0_49 = arith.constant 0 : index
    %c1_50 = arith.constant 1 : index
    %c1_51 = arith.constant 1 : index
    %c0_52 = arith.constant 0 : index
    %43 = vector.load %arg2[%c0_48, %c0_49, %c1_50, %c1_51, %c0_52] : memref<1x1x12x20x32xbf16, #tpu.memory_space<vmem>>, vector<1x1x8x16x32xbf16>
    %44 = vector.shape_cast %43 : vector<1x1x8x16x32xbf16> to vector<8x16x32xbf16>
    %45 = vector.shape_cast %44 : vector<8x16x32xbf16> to vector<128x32xbf16>
    %c6 = arith.constant 6 : index
    %c0_53 = arith.constant 0 : index
    %c0_54 = arith.constant 0 : index
    %46 = vector.load %arg3[%c6, %c0_53, %c0_54] : memref<13x32x32xbf16, #tpu.memory_space<vmem>>, vector<1x32x32xbf16>
    %47 = vector.shape_cast %46 : vector<1x32x32xbf16> to vector<32x32xbf16>
    %cst_55 = arith.constant dense<0.000000e+00> : vector<128x32xf32>
    %48 = tpu.matmul %45, %47, %cst_55 {dimension_numbers = #tpu.dot_dimension_numbers<[1], [0], [0], [1], [0, 0, 1, 1], [], []>} : vector<128x32xbf16>, vector<32x32xbf16>, vector<128x32xf32> -> vector<128x32xf32>
    %49 = arith.addf %42, %48 : vector<128x32xf32>
    %c0_56 = arith.constant 0 : index
    %c0_57 = arith.constant 0 : index
    %c1_58 = arith.constant 1 : index
    %c2_59 = arith.constant 2 : index
    %c0_60 = arith.constant 0 : index
    %50 = vector.load %arg2[%c0_56, %c0_57, %c1_58, %c2_59, %c0_60] : memref<1x1x12x20x32xbf16, #tpu.memory_space<vmem>>, vector<1x1x8x16x32xbf16>
    %51 = vector.shape_cast %50 : vector<1x1x8x16x32xbf16> to vector<8x16x32xbf16>
    %52 = vector.shape_cast %51 : vector<8x16x32xbf16> to vector<128x32xbf16>
    %c7 = arith.constant 7 : index
    %c0_61 = arith.constant 0 : index
    %c0_62 = arith.constant 0 : index
    %53 = vector.load %arg3[%c7, %c0_61, %c0_62] : memref<13x32x32xbf16, #tpu.memory_space<vmem>>, vector<1x32x32xbf16>
    %54 = vector.shape_cast %53 : vector<1x32x32xbf16> to vector<32x32xbf16>
    %cst_63 = arith.constant dense<0.000000e+00> : vector<128x32xf32>
    %55 = tpu.matmul %52, %54, %cst_63 {dimension_numbers = #tpu.dot_dimension_numbers<[1], [0], [0], [1], [0, 0, 1, 1], [], []>} : vector<128x32xbf16>, vector<32x32xbf16>, vector<128x32xf32> -> vector<128x32xf32>
    %56 = arith.addf %49, %55 : vector<128x32xf32>
    %c0_64 = arith.constant 0 : index
    %c0_65 = arith.constant 0 : index
    %c1_66 = arith.constant 1 : index
    %c3_67 = arith.constant 3 : index
    %c0_68 = arith.constant 0 : index
    %57 = vector.load %arg2[%c0_64, %c0_65, %c1_66, %c3_67, %c0_68] : memref<1x1x12x20x32xbf16, #tpu.memory_space<vmem>>, vector<1x1x8x16x32xbf16>
    %58 = vector.shape_cast %57 : vector<1x1x8x16x32xbf16> to vector<8x16x32xbf16>
    %59 = vector.shape_cast %58 : vector<8x16x32xbf16> to vector<128x32xbf16>
    %c8 = arith.constant 8 : index
    %c0_69 = arith.constant 0 : index
    %c0_70 = arith.constant 0 : index
    %60 = vector.load %arg3[%c8, %c0_69, %c0_70] : memref<13x32x32xbf16, #tpu.memory_space<vmem>>, vector<1x32x32xbf16>
    %61 = vector.shape_cast %60 : vector<1x32x32xbf16> to vector<32x32xbf16>
    %cst_71 = arith.constant dense<0.000000e+00> : vector<128x32xf32>
    %62 = tpu.matmul %59, %61, %cst_71 {dimension_numbers = #tpu.dot_dimension_numbers<[1], [0], [0], [1], [0, 0, 1, 1], [], []>} : vector<128x32xbf16>, vector<32x32xbf16>, vector<128x32xf32> -> vector<128x32xf32>
    %63 = arith.addf %56, %62 : vector<128x32xf32>
    %c0_72 = arith.constant 0 : index
    %c0_73 = arith.constant 0 : index
    %c1_74 = arith.constant 1 : index
    %c4_75 = arith.constant 4 : index
    %c0_76 = arith.constant 0 : index
    %64 = vector.load %arg2[%c0_72, %c0_73, %c1_74, %c4_75, %c0_76] : memref<1x1x12x20x32xbf16, #tpu.memory_space<vmem>>, vector<1x1x8x16x32xbf16>
    %65 = vector.shape_cast %64 : vector<1x1x8x16x32xbf16> to vector<8x16x32xbf16>
    %66 = vector.shape_cast %65 : vector<8x16x32xbf16> to vector<128x32xbf16>
    %c9 = arith.constant 9 : index
    %c0_77 = arith.constant 0 : index
    %c0_78 = arith.constant 0 : index
    %67 = vector.load %arg3[%c9, %c0_77, %c0_78] : memref<13x32x32xbf16, #tpu.memory_space<vmem>>, vector<1x32x32xbf16>
    %68 = vector.shape_cast %67 : vector<1x32x32xbf16> to vector<32x32xbf16>
    %cst_79 = arith.constant dense<0.000000e+00> : vector<128x32xf32>
    %69 = tpu.matmul %66, %68, %cst_79 {dimension_numbers = #tpu.dot_dimension_numbers<[1], [0], [0], [1], [0, 0, 1, 1], [], []>} : vector<128x32xbf16>, vector<32x32xbf16>, vector<128x32xf32> -> vector<128x32xf32>
    %70 = arith.addf %63, %69 : vector<128x32xf32>
    %c0_80 = arith.constant 0 : index
    %c0_81 = arith.constant 0 : index
    %c2_82 = arith.constant 2 : index
    %c0_83 = arith.constant 0 : index
    %c0_84 = arith.constant 0 : index
    %71 = vector.load %arg2[%c0_80, %c0_81, %c2_82, %c0_83, %c0_84] : memref<1x1x12x20x32xbf16, #tpu.memory_space<vmem>>, vector<1x1x8x16x32xbf16>
    %72 = vector.shape_cast %71 : vector<1x1x8x16x32xbf16> to vector<8x16x32xbf16>
    %73 = vector.shape_cast %72 : vector<8x16x32xbf16> to vector<128x32xbf16>
    %c10 = arith.constant 10 : index
    %c0_85 = arith.constant 0 : index
    %c0_86 = arith.constant 0 : index
    %74 = vector.load %arg3[%c10, %c0_85, %c0_86] : memref<13x32x32xbf16, #tpu.memory_space<vmem>>, vector<1x32x32xbf16>
    %75 = vector.shape_cast %74 : vector<1x32x32xbf16> to vector<32x32xbf16>
    %cst_87 = arith.constant dense<0.000000e+00> : vector<128x32xf32>
    %76 = tpu.matmul %73, %75, %cst_87 {dimension_numbers = #tpu.dot_dimension_numbers<[1], [0], [0], [1], [0, 0, 1, 1], [], []>} : vector<128x32xbf16>, vector<32x32xbf16>, vector<128x32xf32> -> vector<128x32xf32>
    %77 = arith.addf %70, %76 : vector<128x32xf32>
    %c0_88 = arith.constant 0 : index
    %c0_89 = arith.constant 0 : index
    %c2_90 = arith.constant 2 : index
    %c1_91 = arith.constant 1 : index
    %c0_92 = arith.constant 0 : index
    %78 = vector.load %arg2[%c0_88, %c0_89, %c2_90, %c1_91, %c0_92] : memref<1x1x12x20x32xbf16, #tpu.memory_space<vmem>>, vector<1x1x8x16x32xbf16>
    %79 = vector.shape_cast %78 : vector<1x1x8x16x32xbf16> to vector<8x16x32xbf16>
    %80 = vector.shape_cast %79 : vector<8x16x32xbf16> to vector<128x32xbf16>
    %c11 = arith.constant 11 : index
    %c0_93 = arith.constant 0 : index
    %c0_94 = arith.constant 0 : index
    %81 = vector.load %arg3[%c11, %c0_93, %c0_94] : memref<13x32x32xbf16, #tpu.memory_space<vmem>>, vector<1x32x32xbf16>
    %82 = vector.shape_cast %81 : vector<1x32x32xbf16> to vector<32x32xbf16>
    %cst_95 = arith.constant dense<0.000000e+00> : vector<128x32xf32>
    %83 = tpu.matmul %80, %82, %cst_95 {dimension_numbers = #tpu.dot_dimension_numbers<[1], [0], [0], [1], [0, 0, 1, 1], [], []>} : vector<128x32xbf16>, vector<32x32xbf16>, vector<128x32xf32> -> vector<128x32xf32>
    %84 = arith.addf %77, %83 : vector<128x32xf32>
    %c0_96 = arith.constant 0 : index
    %c0_97 = arith.constant 0 : index
    %c2_98 = arith.constant 2 : index
    %c2_99 = arith.constant 2 : index
    %c0_100 = arith.constant 0 : index
    %85 = vector.load %arg2[%c0_96, %c0_97, %c2_98, %c2_99, %c0_100] : memref<1x1x12x20x32xbf16, #tpu.memory_space<vmem>>, vector<1x1x8x16x32xbf16>
    %86 = vector.shape_cast %85 : vector<1x1x8x16x32xbf16> to vector<8x16x32xbf16>
    %87 = vector.shape_cast %86 : vector<8x16x32xbf16> to vector<128x32xbf16>
    %c12 = arith.constant 12 : index
    %c0_101 = arith.constant 0 : index
    %c0_102 = arith.constant 0 : index
    %88 = vector.load %arg3[%c12, %c0_101, %c0_102] : memref<13x32x32xbf16, #tpu.memory_space<vmem>>, vector<1x32x32xbf16>
    %89 = vector.shape_cast %88 : vector<1x32x32xbf16> to vector<32x32xbf16>
    %cst_103 = arith.constant dense<0.000000e+00> : vector<128x32xf32>
    %90 = tpu.matmul %87, %89, %cst_103 {dimension_numbers = #tpu.dot_dimension_numbers<[1], [0], [0], [1], [0, 0, 1, 1], [], []>} : vector<128x32xbf16>, vector<32x32xbf16>, vector<128x32xf32> -> vector<128x32xf32>
    %91 = arith.addf %84, %90 : vector<128x32xf32>
    %c0_104 = arith.constant 0 : index
    %c0_105 = arith.constant 0 : index
    %92 = vector.load %arg4[%c0_104, %c0_105] : memref<1x32xf32, #tpu.memory_space<vmem>>, vector<1x32xf32>
    %93 = vector.shape_cast %92 : vector<1x32xf32> to vector<32xf32>
    %94 = vector.shape_cast %93 : vector<32xf32> to vector<1x32xf32>
    %95 = vector.broadcast %94 : vector<1x32xf32> to vector<128x32xf32>
    %96 = arith.addf %91, %95 : vector<128x32xf32>
    %c0_106 = arith.constant 0 : index
    %c0_107 = arith.constant 0 : index
    %c0_108 = arith.constant 0 : index
    %c0_109 = arith.constant 0 : index
    %c0_110 = arith.constant 0 : index
    %97 = vector.load %arg5[%c0_106, %c0_107, %c0_108, %c0_109, %c0_110] : memref<1x1x8x16x32xbf16, #tpu.memory_space<vmem>>, vector<1x1x8x16x32xbf16>
    %98 = vector.shape_cast %97 : vector<1x1x8x16x32xbf16> to vector<8x16x32xbf16>
    %99 = vector.shape_cast %98 : vector<8x16x32xbf16> to vector<128x32xbf16>
    %100 = arith.extf %99 : vector<128x32xbf16> to vector<128x32xf32>
    %101 = arith.addf %96, %100 : vector<128x32xf32>
    %c0_111 = arith.constant 0 : index
    %c0_112 = arith.constant 0 : index
    %c0_113 = arith.constant 0 : index
    %c0_114 = arith.constant 0 : index
    %c0_115 = arith.constant 0 : index
    %102 = vector.load %arg6[%c0_111, %c0_112, %c0_113, %c0_114, %c0_115] : memref<1x1x8x16x32xbf16, #tpu.memory_space<vmem>>, vector<1x1x8x16x32xbf16>
    %103 = vector.shape_cast %102 : vector<1x1x8x16x32xbf16> to vector<8x16x32xbf16>
    %104 = vector.shape_cast %103 : vector<8x16x32xbf16> to vector<128x32xbf16>
    %105 = arith.extf %104 : vector<128x32xbf16> to vector<128x32xf32>
    %106 = arith.addf %101, %105 : vector<128x32xf32>
    %cst_116 = arith.constant 0.000000e+00 : f32
    %107 = vector.broadcast %cst_116 : f32 to vector<128x32xf32>
    %108 = arith.maximumf %106, %107 : vector<128x32xf32>
    %109 = vector.shape_cast %108 : vector<128x32xf32> to vector<8x16x32xf32>
    %110 = arith.truncf %109 : vector<8x16x32xf32> to vector<8x16x32xbf16>
    %c0_117 = arith.constant 0 : index
    %c0_118 = arith.constant 0 : index
    %c0_119 = arith.constant 0 : index
    %c0_120 = arith.constant 0 : index
    %c0_121 = arith.constant 0 : index
    %111 = vector.load %arg7[%c0_117, %c0_118, %c0_119, %c0_120, %c0_121] : memref<1x1x8x16x32xbf16, #tpu.memory_space<vmem>>, vector<1x1x8x16x32xbf16>
    %112 = vector.shape_cast %111 : vector<1x1x8x16x32xbf16> to vector<8x16x32xbf16>
    %113 = vector.shape_cast %110 : vector<8x16x32xbf16> to vector<1x1x8x16x32xbf16>
    tpu.vector_store %arg7[%c0_117, %c0_118, %c0_119, %c0_120, %c0_121], %113 {strides = array<i32>} : memref<1x1x8x16x32xbf16, #tpu.memory_space<vmem>>, vector<1x1x8x16x32xbf16>,
    return
  }
  func.func @transform_0(%arg0: i32, %arg1: i32) -> (i32, i32, i32, i32, i32) {
    %c0_i32 = arith.constant 0 : i32
    %c0_i32_0 = arith.constant 0 : i32
    %c0_i32_1 = arith.constant 0 : i32
    %c0_i32_2 = arith.constant 0 : i32
    return %arg0, %arg1, %c0_i32, %c0_i32_0, %c0_i32_1 : i32, i32, i32, i32, i32
  }
  func.func @transform_1(%arg0: i32, %arg1: i32) -> (i32, i32, i32) {
    %c0_i32 = arith.constant 0 : i32
    %c0_i32_0 = arith.constant 0 : i32
    %c0_i32_1 = arith.constant 0 : i32
    %c0_i32_2 = arith.constant 0 : i32
    return %c0_i32, %c0_i32_0, %c0_i32_1 : i32, i32, i32
  }
  func.func @transform_2(%arg0: i32, %arg1: i32) -> (i32, i32) {
    %c0_i32 = arith.constant 0 : i32
    %c0_i32_0 = arith.constant 0 : i32
    %c0_i32_1 = arith.constant 0 : i32
    return %c0_i32, %c0_i32_0 : i32, i32
  }
  func.func @transform_3(%arg0: i32, %arg1: i32) -> (i32, i32, i32, i32, i32) {
    %c0_i32 = arith.constant 0 : i32
    %c0_i32_0 = arith.constant 0 : i32
    %c0_i32_1 = arith.constant 0 : i32
    %c0_i32_2 = arith.constant 0 : i32
    return %arg0, %arg1, %c0_i32, %c0_i32_0, %c0_i32_1 : i32, i32, i32, i32, i32
  }
  func.func @transform_4(%arg0: i32, %arg1: i32) -> (i32, i32, i32, i32, i32) {
    %c0_i32 = arith.constant 0 : i32
    %c0_i32_0 = arith.constant 0 : i32
    %c0_i32_1 = arith.constant 0 : i32
    %c0_i32_2 = arith.constant 0 : i32
    return %arg0, %arg1, %c0_i32, %c0_i32_0, %c0_i32_1 : i32, i32, i32, i32, i32
  }
  func.func @transform_5(%arg0: i32, %arg1: i32) -> (i32, i32, i32, i32, i32) {
    %c0_i32 = arith.constant 0 : i32
    %c0_i32_0 = arith.constant 0 : i32
    %c0_i32_1 = arith.constant 0 : i32
    %c0_i32_2 = arith.constant 0 : i32
    return %arg0, %arg1, %c0_i32, %c0_i32_0, %c0_i32_1 : i32, i32, i32, i32, i32
  }
}

module attributes {stable_mosaic.version = 11 : i64} {
  func.func @_masked_conv_kernel(%arg0: i32, %arg1: i32, %arg2: memref<1x1x12x20x32xbf16, #tpu.memory_space<vmem>>, %arg3: memref<13x32x32xbf16, #tpu.memory_space<vmem>>, %arg4: memref<1x32xf32, #tpu.memory_space<vmem>>, %arg5: memref<1x1x8x16x32xbf16, #tpu.memory_space<vmem>>, %arg6: memref<1x1x8x16x32xbf16, #tpu.memory_space<vmem>>) attributes {dimension_semantics = [#tpu.dimension_semantics<parallel>, #tpu.dimension_semantics<parallel>], iteration_bounds = array<i64: 2, 2>, scalar_prefetch = 0 : i64, scratch_operands = 0 : i64, tpu.core_type = #tpu.core_type<tc>, window_params = [{transform_indices = @transform_0, window_bounds = array<i64: 1, 1, 12, 20, 32>}, {pipeline_mode = #tpu.pipeline_mode<synchronous>, transform_indices = @transform_1, window_bounds = array<i64: 13, 32, 32>}, {pipeline_mode = #tpu.pipeline_mode<synchronous>, transform_indices = @transform_2, window_bounds = array<i64: 1, 32>}, {transform_indices = @transform_3, window_bounds = array<i64: 1, 1, 8, 16, 32>}, {transform_indices = @transform_4, window_bounds = array<i64: 1, 1, 8, 16, 32>}]} {
    %cst = arith.constant 0.000000e+00 : f32
    %0 = vector.broadcast %cst : f32 to vector<128x32xf32>
    %c0 = arith.constant 0 : index
    %c0_0 = arith.constant 0 : index
    %c0_1 = arith.constant 0 : index
    %c0_2 = arith.constant 0 : index
    %c0_3 = arith.constant 0 : index
    %1 = vector.load %arg2[%c0, %c0_0, %c0_1, %c0_2, %c0_3] : memref<1x1x12x20x32xbf16, #tpu.memory_space<vmem>>, vector<1x1x8x16x32xbf16>
    %2 = vector.shape_cast %1 : vector<1x1x8x16x32xbf16> to vector<8x16x32xbf16>
    %3 = vector.shape_cast %2 : vector<8x16x32xbf16> to vector<128x32xbf16>
    %c0_4 = arith.constant 0 : index
    %c0_5 = arith.constant 0 : index
    %c0_6 = arith.constant 0 : index
    %4 = vector.load %arg3[%c0_4, %c0_5, %c0_6] : memref<13x32x32xbf16, #tpu.memory_space<vmem>>, vector<1x32x32xbf16>
    %5 = vector.shape_cast %4 : vector<1x32x32xbf16> to vector<32x32xbf16>
    %cst_7 = arith.constant dense<0.000000e+00> : vector<128x32xf32>
    %6 = tpu.matmul %3, %5, %cst_7 {dimension_numbers = #tpu.dot_dimension_numbers<[1], [0], [0], [1], [0, 0, 1, 1], [], []>} : vector<128x32xbf16>, vector<32x32xbf16>, vector<128x32xf32> -> vector<128x32xf32>
    %7 = arith.addf %0, %6 : vector<128x32xf32>
    %c0_8 = arith.constant 0 : index
    %c0_9 = arith.constant 0 : index
    %c0_10 = arith.constant 0 : index
    %c1 = arith.constant 1 : index
    %c0_11 = arith.constant 0 : index
    %8 = vector.load %arg2[%c0_8, %c0_9, %c0_10, %c1, %c0_11] : memref<1x1x12x20x32xbf16, #tpu.memory_space<vmem>>, vector<1x1x8x16x32xbf16>
    %9 = vector.shape_cast %8 : vector<1x1x8x16x32xbf16> to vector<8x16x32xbf16>
    %10 = vector.shape_cast %9 : vector<8x16x32xbf16> to vector<128x32xbf16>
    %c1_12 = arith.constant 1 : index
    %c0_13 = arith.constant 0 : index
    %c0_14 = arith.constant 0 : index
    %11 = vector.load %arg3[%c1_12, %c0_13, %c0_14] : memref<13x32x32xbf16, #tpu.memory_space<vmem>>, vector<1x32x32xbf16>
    %12 = vector.shape_cast %11 : vector<1x32x32xbf16> to vector<32x32xbf16>
    %cst_15 = arith.constant dense<0.000000e+00> : vector<128x32xf32>
    %13 = tpu.matmul %10, %12, %cst_15 {dimension_numbers = #tpu.dot_dimension_numbers<[1], [0], [0], [1], [0, 0, 1, 1], [], []>} : vector<128x32xbf16>, vector<32x32xbf16>, vector<128x32xf32> -> vector<128x32xf32>
    %14 = arith.addf %7, %13 : vector<128x32xf32>
    %c0_16 = arith.constant 0 : index
    %c0_17 = arith.constant 0 : index
    %c0_18 = arith.constant 0 : index
    %c2 = arith.constant 2 : index
    %c0_19 = arith.constant 0 : index
    %15 = vector.load %arg2[%c0_16, %c0_17, %c0_18, %c2, %c0_19] : memref<1x1x12x20x32xbf16, #tpu.memory_space<vmem>>, vector<1x1x8x16x32xbf16>
    %16 = vector.shape_cast %15 : vector<1x1x8x16x32xbf16> to vector<8x16x32xbf16>
    %17 = vector.shape_cast %16 : vector<8x16x32xbf16> to vector<128x32xbf16>
    %c2_20 = arith.constant 2 : index
    %c0_21 = arith.constant 0 : index
    %c0_22 = arith.constant 0 : index
    %18 = vector.load %arg3[%c2_20, %c0_21, %c0_22] : memref<13x32x32xbf16, #tpu.memory_space<vmem>>, vector<1x32x32xbf16>
    %19 = vector.shape_cast %18 : vector<1x32x32xbf16> to vector<32x32xbf16>
    %cst_23 = arith.constant dense<0.000000e+00> : vector<128x32xf32>
    %20 = tpu.matmul %17, %19, %cst_23 {dimension_numbers = #tpu.dot_dimension_numbers<[1], [0], [0], [1], [0, 0, 1, 1], [], []>} : vector<128x32xbf16>, vector<32x32xbf16>, vector<128x32xf32> -> vector<128x32xf32>
    %21 = arith.addf %14, %20 : vector<128x32xf32>
    %c0_24 = arith.constant 0 : index
    %c0_25 = arith.constant 0 : index
    %c0_26 = arith.constant 0 : index
    %c3 = arith.constant 3 : index
    %c0_27 = arith.constant 0 : index
    %22 = vector.load %arg2[%c0_24, %c0_25, %c0_26, %c3, %c0_27] : memref<1x1x12x20x32xbf16, #tpu.memory_space<vmem>>, vector<1x1x8x16x32xbf16>
    %23 = vector.shape_cast %22 : vector<1x1x8x16x32xbf16> to vector<8x16x32xbf16>
    %24 = vector.shape_cast %23 : vector<8x16x32xbf16> to vector<128x32xbf16>
    %c3_28 = arith.constant 3 : index
    %c0_29 = arith.constant 0 : index
    %c0_30 = arith.constant 0 : index
    %25 = vector.load %arg3[%c3_28, %c0_29, %c0_30] : memref<13x32x32xbf16, #tpu.memory_space<vmem>>, vector<1x32x32xbf16>
    %26 = vector.shape_cast %25 : vector<1x32x32xbf16> to vector<32x32xbf16>
    %cst_31 = arith.constant dense<0.000000e+00> : vector<128x32xf32>
    %27 = tpu.matmul %24, %26, %cst_31 {dimension_numbers = #tpu.dot_dimension_numbers<[1], [0], [0], [1], [0, 0, 1, 1], [], []>} : vector<128x32xbf16>, vector<32x32xbf16>, vector<128x32xf32> -> vector<128x32xf32>
    %28 = arith.addf %21, %27 : vector<128x32xf32>
    %c0_32 = arith.constant 0 : index
    %c0_33 = arith.constant 0 : index
    %c0_34 = arith.constant 0 : index
    %c4 = arith.constant 4 : index
    %c0_35 = arith.constant 0 : index
    %29 = vector.load %arg2[%c0_32, %c0_33, %c0_34, %c4, %c0_35] : memref<1x1x12x20x32xbf16, #tpu.memory_space<vmem>>, vector<1x1x8x16x32xbf16>
    %30 = vector.shape_cast %29 : vector<1x1x8x16x32xbf16> to vector<8x16x32xbf16>
    %31 = vector.shape_cast %30 : vector<8x16x32xbf16> to vector<128x32xbf16>
    %c4_36 = arith.constant 4 : index
    %c0_37 = arith.constant 0 : index
    %c0_38 = arith.constant 0 : index
    %32 = vector.load %arg3[%c4_36, %c0_37, %c0_38] : memref<13x32x32xbf16, #tpu.memory_space<vmem>>, vector<1x32x32xbf16>
    %33 = vector.shape_cast %32 : vector<1x32x32xbf16> to vector<32x32xbf16>
    %cst_39 = arith.constant dense<0.000000e+00> : vector<128x32xf32>
    %34 = tpu.matmul %31, %33, %cst_39 {dimension_numbers = #tpu.dot_dimension_numbers<[1], [0], [0], [1], [0, 0, 1, 1], [], []>} : vector<128x32xbf16>, vector<32x32xbf16>, vector<128x32xf32> -> vector<128x32xf32>
    %35 = arith.addf %28, %34 : vector<128x32xf32>
    %c0_40 = arith.constant 0 : index
    %c0_41 = arith.constant 0 : index
    %c1_42 = arith.constant 1 : index
    %c0_43 = arith.constant 0 : index
    %c0_44 = arith.constant 0 : index
    %36 = vector.load %arg2[%c0_40, %c0_41, %c1_42, %c0_43, %c0_44] : memref<1x1x12x20x32xbf16, #tpu.memory_space<vmem>>, vector<1x1x8x16x32xbf16>
    %37 = vector.shape_cast %36 : vector<1x1x8x16x32xbf16> to vector<8x16x32xbf16>
    %38 = vector.shape_cast %37 : vector<8x16x32xbf16> to vector<128x32xbf16>
    %c5 = arith.constant 5 : index
    %c0_45 = arith.constant 0 : index
    %c0_46 = arith.constant 0 : index
    %39 = vector.load %arg3[%c5, %c0_45, %c0_46] : memref<13x32x32xbf16, #tpu.memory_space<vmem>>, vector<1x32x32xbf16>
    %40 = vector.shape_cast %39 : vector<1x32x32xbf16> to vector<32x32xbf16>
    %cst_47 = arith.constant dense<0.000000e+00> : vector<128x32xf32>
    %41 = tpu.matmul %38, %40, %cst_47 {dimension_numbers = #tpu.dot_dimension_numbers<[1], [0], [0], [1], [0, 0, 1, 1], [], []>} : vector<128x32xbf16>, vector<32x32xbf16>, vector<128x32xf32> -> vector<128x32xf32>
    %42 = arith.addf %35, %41 : vector<128x32xf32>
    %c0_48 = arith.constant 0 : index
    %c0_49 = arith.constant 0 : index
    %c1_50 = arith.constant 1 : index
    %c1_51 = arith.constant 1 : index
    %c0_52 = arith.constant 0 : index
    %43 = vector.load %arg2[%c0_48, %c0_49, %c1_50, %c1_51, %c0_52] : memref<1x1x12x20x32xbf16, #tpu.memory_space<vmem>>, vector<1x1x8x16x32xbf16>
    %44 = vector.shape_cast %43 : vector<1x1x8x16x32xbf16> to vector<8x16x32xbf16>
    %45 = vector.shape_cast %44 : vector<8x16x32xbf16> to vector<128x32xbf16>
    %c6 = arith.constant 6 : index
    %c0_53 = arith.constant 0 : index
    %c0_54 = arith.constant 0 : index
    %46 = vector.load %arg3[%c6, %c0_53, %c0_54] : memref<13x32x32xbf16, #tpu.memory_space<vmem>>, vector<1x32x32xbf16>
    %47 = vector.shape_cast %46 : vector<1x32x32xbf16> to vector<32x32xbf16>
    %cst_55 = arith.constant dense<0.000000e+00> : vector<128x32xf32>
    %48 = tpu.matmul %45, %47, %cst_55 {dimension_numbers = #tpu.dot_dimension_numbers<[1], [0], [0], [1], [0, 0, 1, 1], [], []>} : vector<128x32xbf16>, vector<32x32xbf16>, vector<128x32xf32> -> vector<128x32xf32>
    %49 = arith.addf %42, %48 : vector<128x32xf32>
    %c0_56 = arith.constant 0 : index
    %c0_57 = arith.constant 0 : index
    %c1_58 = arith.constant 1 : index
    %c2_59 = arith.constant 2 : index
    %c0_60 = arith.constant 0 : index
    %50 = vector.load %arg2[%c0_56, %c0_57, %c1_58, %c2_59, %c0_60] : memref<1x1x12x20x32xbf16, #tpu.memory_space<vmem>>, vector<1x1x8x16x32xbf16>
    %51 = vector.shape_cast %50 : vector<1x1x8x16x32xbf16> to vector<8x16x32xbf16>
    %52 = vector.shape_cast %51 : vector<8x16x32xbf16> to vector<128x32xbf16>
    %c7 = arith.constant 7 : index
    %c0_61 = arith.constant 0 : index
    %c0_62 = arith.constant 0 : index
    %53 = vector.load %arg3[%c7, %c0_61, %c0_62] : memref<13x32x32xbf16, #tpu.memory_space<vmem>>, vector<1x32x32xbf16>
    %54 = vector.shape_cast %53 : vector<1x32x32xbf16> to vector<32x32xbf16>
    %cst_63 = arith.constant dense<0.000000e+00> : vector<128x32xf32>
    %55 = tpu.matmul %52, %54, %cst_63 {dimension_numbers = #tpu.dot_dimension_numbers<[1], [0], [0], [1], [0, 0, 1, 1], [], []>} : vector<128x32xbf16>, vector<32x32xbf16>, vector<128x32xf32> -> vector<128x32xf32>
    %56 = arith.addf %49, %55 : vector<128x32xf32>
    %c0_64 = arith.constant 0 : index
    %c0_65 = arith.constant 0 : index
    %c1_66 = arith.constant 1 : index
    %c3_67 = arith.constant 3 : index
    %c0_68 = arith.constant 0 : index
    %57 = vector.load %arg2[%c0_64, %c0_65, %c1_66, %c3_67, %c0_68] : memref<1x1x12x20x32xbf16, #tpu.memory_space<vmem>>, vector<1x1x8x16x32xbf16>
    %58 = vector.shape_cast %57 : vector<1x1x8x16x32xbf16> to vector<8x16x32xbf16>
    %59 = vector.shape_cast %58 : vector<8x16x32xbf16> to vector<128x32xbf16>
    %c8 = arith.constant 8 : index
    %c0_69 = arith.constant 0 : index
    %c0_70 = arith.constant 0 : index
    %60 = vector.load %arg3[%c8, %c0_69, %c0_70] : memref<13x32x32xbf16, #tpu.memory_space<vmem>>, vector<1x32x32xbf16>
    %61 = vector.shape_cast %60 : vector<1x32x32xbf16> to vector<32x32xbf16>
    %cst_71 = arith.constant dense<0.000000e+00> : vector<128x32xf32>
    %62 = tpu.matmul %59, %61, %cst_71 {dimension_numbers = #tpu.dot_dimension_numbers<[1], [0], [0], [1], [0, 0, 1, 1], [], []>} : vector<128x32xbf16>, vector<32x32xbf16>, vector<128x32xf32> -> vector<128x32xf32>
    %63 = arith.addf %56, %62 : vector<128x32xf32>
    %c0_72 = arith.constant 0 : index
    %c0_73 = arith.constant 0 : index
    %c1_74 = arith.constant 1 : index
    %c4_75 = arith.constant 4 : index
    %c0_76 = arith.constant 0 : index
    %64 = vector.load %arg2[%c0_72, %c0_73, %c1_74, %c4_75, %c0_76] : memref<1x1x12x20x32xbf16, #tpu.memory_space<vmem>>, vector<1x1x8x16x32xbf16>
    %65 = vector.shape_cast %64 : vector<1x1x8x16x32xbf16> to vector<8x16x32xbf16>
    %66 = vector.shape_cast %65 : vector<8x16x32xbf16> to vector<128x32xbf16>
    %c9 = arith.constant 9 : index
    %c0_77 = arith.constant 0 : index
    %c0_78 = arith.constant 0 : index
    %67 = vector.load %arg3[%c9, %c0_77, %c0_78] : memref<13x32x32xbf16, #tpu.memory_space<vmem>>, vector<1x32x32xbf16>
    %68 = vector.shape_cast %67 : vector<1x32x32xbf16> to vector<32x32xbf16>
    %cst_79 = arith.constant dense<0.000000e+00> : vector<128x32xf32>
    %69 = tpu.matmul %66, %68, %cst_79 {dimension_numbers = #tpu.dot_dimension_numbers<[1], [0], [0], [1], [0, 0, 1, 1], [], []>} : vector<128x32xbf16>, vector<32x32xbf16>, vector<128x32xf32> -> vector<128x32xf32>
    %70 = arith.addf %63, %69 : vector<128x32xf32>
    %c0_80 = arith.constant 0 : index
    %c0_81 = arith.constant 0 : index
    %c2_82 = arith.constant 2 : index
    %c0_83 = arith.constant 0 : index
    %c0_84 = arith.constant 0 : index
    %71 = vector.load %arg2[%c0_80, %c0_81, %c2_82, %c0_83, %c0_84] : memref<1x1x12x20x32xbf16, #tpu.memory_space<vmem>>, vector<1x1x8x16x32xbf16>
    %72 = vector.shape_cast %71 : vector<1x1x8x16x32xbf16> to vector<8x16x32xbf16>
    %73 = vector.shape_cast %72 : vector<8x16x32xbf16> to vector<128x32xbf16>
    %c10 = arith.constant 10 : index
    %c0_85 = arith.constant 0 : index
    %c0_86 = arith.constant 0 : index
    %74 = vector.load %arg3[%c10, %c0_85, %c0_86] : memref<13x32x32xbf16, #tpu.memory_space<vmem>>, vector<1x32x32xbf16>
    %75 = vector.shape_cast %74 : vector<1x32x32xbf16> to vector<32x32xbf16>
    %cst_87 = arith.constant dense<0.000000e+00> : vector<128x32xf32>
    %76 = tpu.matmul %73, %75, %cst_87 {dimension_numbers = #tpu.dot_dimension_numbers<[1], [0], [0], [1], [0, 0, 1, 1], [], []>} : vector<128x32xbf16>, vector<32x32xbf16>, vector<128x32xf32> -> vector<128x32xf32>
    %77 = arith.addf %70, %76 : vector<128x32xf32>
    %c0_88 = arith.constant 0 : index
    %c0_89 = arith.constant 0 : index
    %c2_90 = arith.constant 2 : index
    %c1_91 = arith.constant 1 : index
    %c0_92 = arith.constant 0 : index
    %78 = vector.load %arg2[%c0_88, %c0_89, %c2_90, %c1_91, %c0_92] : memref<1x1x12x20x32xbf16, #tpu.memory_space<vmem>>, vector<1x1x8x16x32xbf16>
    %79 = vector.shape_cast %78 : vector<1x1x8x16x32xbf16> to vector<8x16x32xbf16>
    %80 = vector.shape_cast %79 : vector<8x16x32xbf16> to vector<128x32xbf16>
    %c11 = arith.constant 11 : index
    %c0_93 = arith.constant 0 : index
    %c0_94 = arith.constant 0 : index
    %81 = vector.load %arg3[%c11, %c0_93, %c0_94] : memref<13x32x32xbf16, #tpu.memory_space<vmem>>, vector<1x32x32xbf16>
    %82 = vector.shape_cast %81 : vector<1x32x32xbf16> to vector<32x32xbf16>
    %cst_95 = arith.constant dense<0.000000e+00> : vector<128x32xf32>
    %83 = tpu.matmul %80, %82, %cst_95 {dimension_numbers = #tpu.dot_dimension_numbers<[1], [0], [0], [1], [0, 0, 1, 1], [], []>} : vector<128x32xbf16>, vector<32x32xbf16>, vector<128x32xf32> -> vector<128x32xf32>
    %84 = arith.addf %77, %83 : vector<128x32xf32>
    %c0_96 = arith.constant 0 : index
    %c0_97 = arith.constant 0 : index
    %c2_98 = arith.constant 2 : index
    %c2_99 = arith.constant 2 : index
    %c0_100 = arith.constant 0 : index
    %85 = vector.load %arg2[%c0_96, %c0_97, %c2_98, %c2_99, %c0_100] : memref<1x1x12x20x32xbf16, #tpu.memory_space<vmem>>, vector<1x1x8x16x32xbf16>
    %86 = vector.shape_cast %85 : vector<1x1x8x16x32xbf16> to vector<8x16x32xbf16>
    %87 = vector.shape_cast %86 : vector<8x16x32xbf16> to vector<128x32xbf16>
    %c12 = arith.constant 12 : index
    %c0_101 = arith.constant 0 : index
    %c0_102 = arith.constant 0 : index
    %88 = vector.load %arg3[%c12, %c0_101, %c0_102] : memref<13x32x32xbf16, #tpu.memory_space<vmem>>, vector<1x32x32xbf16>
    %89 = vector.shape_cast %88 : vector<1x32x32xbf16> to vector<32x32xbf16>
    %cst_103 = arith.constant dense<0.000000e+00> : vector<128x32xf32>
    %90 = tpu.matmul %87, %89, %cst_103 {dimension_numbers = #tpu.dot_dimension_numbers<[1], [0], [0], [1], [0, 0, 1, 1], [], []>} : vector<128x32xbf16>, vector<32x32xbf16>, vector<128x32xf32> -> vector<128x32xf32>
    %91 = arith.addf %84, %90 : vector<128x32xf32>
    %c0_104 = arith.constant 0 : index
    %c0_105 = arith.constant 0 : index
    %92 = vector.load %arg4[%c0_104, %c0_105] : memref<1x32xf32, #tpu.memory_space<vmem>>, vector<1x32xf32>
    %93 = vector.shape_cast %92 : vector<1x32xf32> to vector<32xf32>
    %94 = vector.shape_cast %93 : vector<32xf32> to vector<1x32xf32>
    %95 = vector.broadcast %94 : vector<1x32xf32> to vector<128x32xf32>
    %96 = arith.addf %91, %95 : vector<128x32xf32>
    %c0_106 = arith.constant 0 : index
    %c0_107 = arith.constant 0 : index
    %c0_108 = arith.constant 0 : index
    %c0_109 = arith.constant 0 : index
    %c0_110 = arith.constant 0 : index
    %97 = vector.load %arg5[%c0_106, %c0_107, %c0_108, %c0_109, %c0_110] : memref<1x1x8x16x32xbf16, #tpu.memory_space<vmem>>, vector<1x1x8x16x32xbf16>
    %98 = vector.shape_cast %97 : vector<1x1x8x16x32xbf16> to vector<8x16x32xbf16>
    %99 = vector.shape_cast %98 : vector<8x16x32xbf16> to vector<128x32xbf16>
    %100 = arith.extf %99 : vector<128x32xbf16> to vector<128x32xf32>
    %101 = arith.addf %96, %100 : vector<128x32xf32>
    %102 = vector.shape_cast %101 : vector<128x32xf32> to vector<8x16x32xf32>
    %103 = arith.truncf %102 : vector<8x16x32xf32> to vector<8x16x32xbf16>
    %c0_111 = arith.constant 0 : index
    %c0_112 = arith.constant 0 : index
    %c0_113 = arith.constant 0 : index
    %c0_114 = arith.constant 0 : index
    %c0_115 = arith.constant 0 : index
    %104 = vector.load %arg6[%c0_111, %c0_112, %c0_113, %c0_114, %c0_115] : memref<1x1x8x16x32xbf16, #tpu.memory_space<vmem>>, vector<1x1x8x16x32xbf16>
    %105 = vector.shape_cast %104 : vector<1x1x8x16x32xbf16> to vector<8x16x32xbf16>
    %106 = vector.shape_cast %103 : vector<8x16x32xbf16> to vector<1x1x8x16x32xbf16>
    tpu.vector_store %arg6[%c0_111, %c0_112, %c0_113, %c0_114, %c0_115], %106 {strides = array<i32>} : memref<1x1x8x16x32xbf16, #tpu.memory_space<vmem>>, vector<1x1x8x16x32xbf16>,
    return
  }
  func.func @transform_0(%arg0: i32, %arg1: i32) -> (i32, i32, i32, i32, i32) {
    %c0_i32 = arith.constant 0 : i32
    %c0_i32_0 = arith.constant 0 : i32
    %c0_i32_1 = arith.constant 0 : i32
    %c0_i32_2 = arith.constant 0 : i32
    return %arg0, %arg1, %c0_i32, %c0_i32_0, %c0_i32_1 : i32, i32, i32, i32, i32
  }
  func.func @transform_1(%arg0: i32, %arg1: i32) -> (i32, i32, i32) {
    %c0_i32 = arith.constant 0 : i32
    %c0_i32_0 = arith.constant 0 : i32
    %c0_i32_1 = arith.constant 0 : i32
    %c0_i32_2 = arith.constant 0 : i32
    return %c0_i32, %c0_i32_0, %c0_i32_1 : i32, i32, i32
  }
  func.func @transform_2(%arg0: i32, %arg1: i32) -> (i32, i32) {
    %c0_i32 = arith.constant 0 : i32
    %c0_i32_0 = arith.constant 0 : i32
    %c0_i32_1 = arith.constant 0 : i32
    return %c0_i32, %c0_i32_0 : i32, i32
  }
  func.func @transform_3(%arg0: i32, %arg1: i32) -> (i32, i32, i32, i32, i32) {
    %c0_i32 = arith.constant 0 : i32
    %c0_i32_0 = arith.constant 0 : i32
    %c0_i32_1 = arith.constant 0 : i32
    %c0_i32_2 = arith.constant 0 : i32
    return %arg0, %arg1, %c0_i32, %c0_i32_0, %c0_i32_1 : i32, i32, i32, i32, i32
  }
  func.func @transform_4(%arg0: i32, %arg1: i32) -> (i32, i32, i32, i32, i32) {
    %c0_i32 = arith.constant 0 : i32
    %c0_i32_0 = arith.constant 0 : i32
    %c0_i32_1 = arith.constant 0 : i32
    %c0_i32_2 = arith.constant 0 : i32
    return %arg0, %arg1, %c0_i32, %c0_i32_0, %c0_i32_1 : i32, i32, i32, i32, i32
  }
}

module attributes {stable_mosaic.version = 11 : i64} {
  func.func @_masked_conv_kernel(%arg0: i32, %arg1: i32, %arg2: memref<1x1x12x20x32xbf16, #tpu.memory_space<vmem>>, %arg3: memref<13x32x32xbf16, #tpu.memory_space<vmem>>, %arg4: memref<1x32xf32, #tpu.memory_space<vmem>>, %arg5: memref<1x1x8x16x32xbf16, #tpu.memory_space<vmem>>) attributes {dimension_semantics = [#tpu.dimension_semantics<parallel>, #tpu.dimension_semantics<parallel>], iteration_bounds = array<i64: 2, 2>, scalar_prefetch = 0 : i64, scratch_operands = 0 : i64, tpu.core_type = #tpu.core_type<tc>, window_params = [{transform_indices = @transform_0, window_bounds = array<i64: 1, 1, 12, 20, 32>}, {pipeline_mode = #tpu.pipeline_mode<synchronous>, transform_indices = @transform_1, window_bounds = array<i64: 13, 32, 32>}, {pipeline_mode = #tpu.pipeline_mode<synchronous>, transform_indices = @transform_2, window_bounds = array<i64: 1, 32>}, {transform_indices = @transform_3, window_bounds = array<i64: 1, 1, 8, 16, 32>}]} {
    %cst = arith.constant 0.000000e+00 : f32
    %0 = vector.broadcast %cst : f32 to vector<128x32xf32>
    %c0 = arith.constant 0 : index
    %c0_0 = arith.constant 0 : index
    %c0_1 = arith.constant 0 : index
    %c0_2 = arith.constant 0 : index
    %c0_3 = arith.constant 0 : index
    %1 = vector.load %arg2[%c0, %c0_0, %c0_1, %c0_2, %c0_3] : memref<1x1x12x20x32xbf16, #tpu.memory_space<vmem>>, vector<1x1x8x16x32xbf16>
    %2 = vector.shape_cast %1 : vector<1x1x8x16x32xbf16> to vector<8x16x32xbf16>
    %3 = vector.shape_cast %2 : vector<8x16x32xbf16> to vector<128x32xbf16>
    %c0_4 = arith.constant 0 : index
    %c0_5 = arith.constant 0 : index
    %c0_6 = arith.constant 0 : index
    %4 = vector.load %arg3[%c0_4, %c0_5, %c0_6] : memref<13x32x32xbf16, #tpu.memory_space<vmem>>, vector<1x32x32xbf16>
    %5 = vector.shape_cast %4 : vector<1x32x32xbf16> to vector<32x32xbf16>
    %cst_7 = arith.constant dense<0.000000e+00> : vector<128x32xf32>
    %6 = tpu.matmul %3, %5, %cst_7 {dimension_numbers = #tpu.dot_dimension_numbers<[1], [0], [0], [1], [0, 0, 1, 1], [], []>} : vector<128x32xbf16>, vector<32x32xbf16>, vector<128x32xf32> -> vector<128x32xf32>
    %7 = arith.addf %0, %6 : vector<128x32xf32>
    %c0_8 = arith.constant 0 : index
    %c0_9 = arith.constant 0 : index
    %c0_10 = arith.constant 0 : index
    %c1 = arith.constant 1 : index
    %c0_11 = arith.constant 0 : index
    %8 = vector.load %arg2[%c0_8, %c0_9, %c0_10, %c1, %c0_11] : memref<1x1x12x20x32xbf16, #tpu.memory_space<vmem>>, vector<1x1x8x16x32xbf16>
    %9 = vector.shape_cast %8 : vector<1x1x8x16x32xbf16> to vector<8x16x32xbf16>
    %10 = vector.shape_cast %9 : vector<8x16x32xbf16> to vector<128x32xbf16>
    %c1_12 = arith.constant 1 : index
    %c0_13 = arith.constant 0 : index
    %c0_14 = arith.constant 0 : index
    %11 = vector.load %arg3[%c1_12, %c0_13, %c0_14] : memref<13x32x32xbf16, #tpu.memory_space<vmem>>, vector<1x32x32xbf16>
    %12 = vector.shape_cast %11 : vector<1x32x32xbf16> to vector<32x32xbf16>
    %cst_15 = arith.constant dense<0.000000e+00> : vector<128x32xf32>
    %13 = tpu.matmul %10, %12, %cst_15 {dimension_numbers = #tpu.dot_dimension_numbers<[1], [0], [0], [1], [0, 0, 1, 1], [], []>} : vector<128x32xbf16>, vector<32x32xbf16>, vector<128x32xf32> -> vector<128x32xf32>
    %14 = arith.addf %7, %13 : vector<128x32xf32>
    %c0_16 = arith.constant 0 : index
    %c0_17 = arith.constant 0 : index
    %c0_18 = arith.constant 0 : index
    %c2 = arith.constant 2 : index
    %c0_19 = arith.constant 0 : index
    %15 = vector.load %arg2[%c0_16, %c0_17, %c0_18, %c2, %c0_19] : memref<1x1x12x20x32xbf16, #tpu.memory_space<vmem>>, vector<1x1x8x16x32xbf16>
    %16 = vector.shape_cast %15 : vector<1x1x8x16x32xbf16> to vector<8x16x32xbf16>
    %17 = vector.shape_cast %16 : vector<8x16x32xbf16> to vector<128x32xbf16>
    %c2_20 = arith.constant 2 : index
    %c0_21 = arith.constant 0 : index
    %c0_22 = arith.constant 0 : index
    %18 = vector.load %arg3[%c2_20, %c0_21, %c0_22] : memref<13x32x32xbf16, #tpu.memory_space<vmem>>, vector<1x32x32xbf16>
    %19 = vector.shape_cast %18 : vector<1x32x32xbf16> to vector<32x32xbf16>
    %cst_23 = arith.constant dense<0.000000e+00> : vector<128x32xf32>
    %20 = tpu.matmul %17, %19, %cst_23 {dimension_numbers = #tpu.dot_dimension_numbers<[1], [0], [0], [1], [0, 0, 1, 1], [], []>} : vector<128x32xbf16>, vector<32x32xbf16>, vector<128x32xf32> -> vector<128x32xf32>
    %21 = arith.addf %14, %20 : vector<128x32xf32>
    %c0_24 = arith.constant 0 : index
    %c0_25 = arith.constant 0 : index
    %c0_26 = arith.constant 0 : index
    %c3 = arith.constant 3 : index
    %c0_27 = arith.constant 0 : index
    %22 = vector.load %arg2[%c0_24, %c0_25, %c0_26, %c3, %c0_27] : memref<1x1x12x20x32xbf16, #tpu.memory_space<vmem>>, vector<1x1x8x16x32xbf16>
    %23 = vector.shape_cast %22 : vector<1x1x8x16x32xbf16> to vector<8x16x32xbf16>
    %24 = vector.shape_cast %23 : vector<8x16x32xbf16> to vector<128x32xbf16>
    %c3_28 = arith.constant 3 : index
    %c0_29 = arith.constant 0 : index
    %c0_30 = arith.constant 0 : index
    %25 = vector.load %arg3[%c3_28, %c0_29, %c0_30] : memref<13x32x32xbf16, #tpu.memory_space<vmem>>, vector<1x32x32xbf16>
    %26 = vector.shape_cast %25 : vector<1x32x32xbf16> to vector<32x32xbf16>
    %cst_31 = arith.constant dense<0.000000e+00> : vector<128x32xf32>
    %27 = tpu.matmul %24, %26, %cst_31 {dimension_numbers = #tpu.dot_dimension_numbers<[1], [0], [0], [1], [0, 0, 1, 1], [], []>} : vector<128x32xbf16>, vector<32x32xbf16>, vector<128x32xf32> -> vector<128x32xf32>
    %28 = arith.addf %21, %27 : vector<128x32xf32>
    %c0_32 = arith.constant 0 : index
    %c0_33 = arith.constant 0 : index
    %c0_34 = arith.constant 0 : index
    %c4 = arith.constant 4 : index
    %c0_35 = arith.constant 0 : index
    %29 = vector.load %arg2[%c0_32, %c0_33, %c0_34, %c4, %c0_35] : memref<1x1x12x20x32xbf16, #tpu.memory_space<vmem>>, vector<1x1x8x16x32xbf16>
    %30 = vector.shape_cast %29 : vector<1x1x8x16x32xbf16> to vector<8x16x32xbf16>
    %31 = vector.shape_cast %30 : vector<8x16x32xbf16> to vector<128x32xbf16>
    %c4_36 = arith.constant 4 : index
    %c0_37 = arith.constant 0 : index
    %c0_38 = arith.constant 0 : index
    %32 = vector.load %arg3[%c4_36, %c0_37, %c0_38] : memref<13x32x32xbf16, #tpu.memory_space<vmem>>, vector<1x32x32xbf16>
    %33 = vector.shape_cast %32 : vector<1x32x32xbf16> to vector<32x32xbf16>
    %cst_39 = arith.constant dense<0.000000e+00> : vector<128x32xf32>
    %34 = tpu.matmul %31, %33, %cst_39 {dimension_numbers = #tpu.dot_dimension_numbers<[1], [0], [0], [1], [0, 0, 1, 1], [], []>} : vector<128x32xbf16>, vector<32x32xbf16>, vector<128x32xf32> -> vector<128x32xf32>
    %35 = arith.addf %28, %34 : vector<128x32xf32>
    %c0_40 = arith.constant 0 : index
    %c0_41 = arith.constant 0 : index
    %c1_42 = arith.constant 1 : index
    %c0_43 = arith.constant 0 : index
    %c0_44 = arith.constant 0 : index
    %36 = vector.load %arg2[%c0_40, %c0_41, %c1_42, %c0_43, %c0_44] : memref<1x1x12x20x32xbf16, #tpu.memory_space<vmem>>, vector<1x1x8x16x32xbf16>
    %37 = vector.shape_cast %36 : vector<1x1x8x16x32xbf16> to vector<8x16x32xbf16>
    %38 = vector.shape_cast %37 : vector<8x16x32xbf16> to vector<128x32xbf16>
    %c5 = arith.constant 5 : index
    %c0_45 = arith.constant 0 : index
    %c0_46 = arith.constant 0 : index
    %39 = vector.load %arg3[%c5, %c0_45, %c0_46] : memref<13x32x32xbf16, #tpu.memory_space<vmem>>, vector<1x32x32xbf16>
    %40 = vector.shape_cast %39 : vector<1x32x32xbf16> to vector<32x32xbf16>
    %cst_47 = arith.constant dense<0.000000e+00> : vector<128x32xf32>
    %41 = tpu.matmul %38, %40, %cst_47 {dimension_numbers = #tpu.dot_dimension_numbers<[1], [0], [0], [1], [0, 0, 1, 1], [], []>} : vector<128x32xbf16>, vector<32x32xbf16>, vector<128x32xf32> -> vector<128x32xf32>
    %42 = arith.addf %35, %41 : vector<128x32xf32>
    %c0_48 = arith.constant 0 : index
    %c0_49 = arith.constant 0 : index
    %c1_50 = arith.constant 1 : index
    %c1_51 = arith.constant 1 : index
    %c0_52 = arith.constant 0 : index
    %43 = vector.load %arg2[%c0_48, %c0_49, %c1_50, %c1_51, %c0_52] : memref<1x1x12x20x32xbf16, #tpu.memory_space<vmem>>, vector<1x1x8x16x32xbf16>
    %44 = vector.shape_cast %43 : vector<1x1x8x16x32xbf16> to vector<8x16x32xbf16>
    %45 = vector.shape_cast %44 : vector<8x16x32xbf16> to vector<128x32xbf16>
    %c6 = arith.constant 6 : index
    %c0_53 = arith.constant 0 : index
    %c0_54 = arith.constant 0 : index
    %46 = vector.load %arg3[%c6, %c0_53, %c0_54] : memref<13x32x32xbf16, #tpu.memory_space<vmem>>, vector<1x32x32xbf16>
    %47 = vector.shape_cast %46 : vector<1x32x32xbf16> to vector<32x32xbf16>
    %cst_55 = arith.constant dense<0.000000e+00> : vector<128x32xf32>
    %48 = tpu.matmul %45, %47, %cst_55 {dimension_numbers = #tpu.dot_dimension_numbers<[1], [0], [0], [1], [0, 0, 1, 1], [], []>} : vector<128x32xbf16>, vector<32x32xbf16>, vector<128x32xf32> -> vector<128x32xf32>
    %49 = arith.addf %42, %48 : vector<128x32xf32>
    %c0_56 = arith.constant 0 : index
    %c0_57 = arith.constant 0 : index
    %c1_58 = arith.constant 1 : index
    %c2_59 = arith.constant 2 : index
    %c0_60 = arith.constant 0 : index
    %50 = vector.load %arg2[%c0_56, %c0_57, %c1_58, %c2_59, %c0_60] : memref<1x1x12x20x32xbf16, #tpu.memory_space<vmem>>, vector<1x1x8x16x32xbf16>
    %51 = vector.shape_cast %50 : vector<1x1x8x16x32xbf16> to vector<8x16x32xbf16>
    %52 = vector.shape_cast %51 : vector<8x16x32xbf16> to vector<128x32xbf16>
    %c7 = arith.constant 7 : index
    %c0_61 = arith.constant 0 : index
    %c0_62 = arith.constant 0 : index
    %53 = vector.load %arg3[%c7, %c0_61, %c0_62] : memref<13x32x32xbf16, #tpu.memory_space<vmem>>, vector<1x32x32xbf16>
    %54 = vector.shape_cast %53 : vector<1x32x32xbf16> to vector<32x32xbf16>
    %cst_63 = arith.constant dense<0.000000e+00> : vector<128x32xf32>
    %55 = tpu.matmul %52, %54, %cst_63 {dimension_numbers = #tpu.dot_dimension_numbers<[1], [0], [0], [1], [0, 0, 1, 1], [], []>} : vector<128x32xbf16>, vector<32x32xbf16>, vector<128x32xf32> -> vector<128x32xf32>
    %56 = arith.addf %49, %55 : vector<128x32xf32>
    %c0_64 = arith.constant 0 : index
    %c0_65 = arith.constant 0 : index
    %c1_66 = arith.constant 1 : index
    %c3_67 = arith.constant 3 : index
    %c0_68 = arith.constant 0 : index
    %57 = vector.load %arg2[%c0_64, %c0_65, %c1_66, %c3_67, %c0_68] : memref<1x1x12x20x32xbf16, #tpu.memory_space<vmem>>, vector<1x1x8x16x32xbf16>
    %58 = vector.shape_cast %57 : vector<1x1x8x16x32xbf16> to vector<8x16x32xbf16>
    %59 = vector.shape_cast %58 : vector<8x16x32xbf16> to vector<128x32xbf16>
    %c8 = arith.constant 8 : index
    %c0_69 = arith.constant 0 : index
    %c0_70 = arith.constant 0 : index
    %60 = vector.load %arg3[%c8, %c0_69, %c0_70] : memref<13x32x32xbf16, #tpu.memory_space<vmem>>, vector<1x32x32xbf16>
    %61 = vector.shape_cast %60 : vector<1x32x32xbf16> to vector<32x32xbf16>
    %cst_71 = arith.constant dense<0.000000e+00> : vector<128x32xf32>
    %62 = tpu.matmul %59, %61, %cst_71 {dimension_numbers = #tpu.dot_dimension_numbers<[1], [0], [0], [1], [0, 0, 1, 1], [], []>} : vector<128x32xbf16>, vector<32x32xbf16>, vector<128x32xf32> -> vector<128x32xf32>
    %63 = arith.addf %56, %62 : vector<128x32xf32>
    %c0_72 = arith.constant 0 : index
    %c0_73 = arith.constant 0 : index
    %c1_74 = arith.constant 1 : index
    %c4_75 = arith.constant 4 : index
    %c0_76 = arith.constant 0 : index
    %64 = vector.load %arg2[%c0_72, %c0_73, %c1_74, %c4_75, %c0_76] : memref<1x1x12x20x32xbf16, #tpu.memory_space<vmem>>, vector<1x1x8x16x32xbf16>
    %65 = vector.shape_cast %64 : vector<1x1x8x16x32xbf16> to vector<8x16x32xbf16>
    %66 = vector.shape_cast %65 : vector<8x16x32xbf16> to vector<128x32xbf16>
    %c9 = arith.constant 9 : index
    %c0_77 = arith.constant 0 : index
    %c0_78 = arith.constant 0 : index
    %67 = vector.load %arg3[%c9, %c0_77, %c0_78] : memref<13x32x32xbf16, #tpu.memory_space<vmem>>, vector<1x32x32xbf16>
    %68 = vector.shape_cast %67 : vector<1x32x32xbf16> to vector<32x32xbf16>
    %cst_79 = arith.constant dense<0.000000e+00> : vector<128x32xf32>
    %69 = tpu.matmul %66, %68, %cst_79 {dimension_numbers = #tpu.dot_dimension_numbers<[1], [0], [0], [1], [0, 0, 1, 1], [], []>} : vector<128x32xbf16>, vector<32x32xbf16>, vector<128x32xf32> -> vector<128x32xf32>
    %70 = arith.addf %63, %69 : vector<128x32xf32>
    %c0_80 = arith.constant 0 : index
    %c0_81 = arith.constant 0 : index
    %c2_82 = arith.constant 2 : index
    %c0_83 = arith.constant 0 : index
    %c0_84 = arith.constant 0 : index
    %71 = vector.load %arg2[%c0_80, %c0_81, %c2_82, %c0_83, %c0_84] : memref<1x1x12x20x32xbf16, #tpu.memory_space<vmem>>, vector<1x1x8x16x32xbf16>
    %72 = vector.shape_cast %71 : vector<1x1x8x16x32xbf16> to vector<8x16x32xbf16>
    %73 = vector.shape_cast %72 : vector<8x16x32xbf16> to vector<128x32xbf16>
    %c10 = arith.constant 10 : index
    %c0_85 = arith.constant 0 : index
    %c0_86 = arith.constant 0 : index
    %74 = vector.load %arg3[%c10, %c0_85, %c0_86] : memref<13x32x32xbf16, #tpu.memory_space<vmem>>, vector<1x32x32xbf16>
    %75 = vector.shape_cast %74 : vector<1x32x32xbf16> to vector<32x32xbf16>
    %cst_87 = arith.constant dense<0.000000e+00> : vector<128x32xf32>
    %76 = tpu.matmul %73, %75, %cst_87 {dimension_numbers = #tpu.dot_dimension_numbers<[1], [0], [0], [1], [0, 0, 1, 1], [], []>} : vector<128x32xbf16>, vector<32x32xbf16>, vector<128x32xf32> -> vector<128x32xf32>
    %77 = arith.addf %70, %76 : vector<128x32xf32>
    %c0_88 = arith.constant 0 : index
    %c0_89 = arith.constant 0 : index
    %c2_90 = arith.constant 2 : index
    %c1_91 = arith.constant 1 : index
    %c0_92 = arith.constant 0 : index
    %78 = vector.load %arg2[%c0_88, %c0_89, %c2_90, %c1_91, %c0_92] : memref<1x1x12x20x32xbf16, #tpu.memory_space<vmem>>, vector<1x1x8x16x32xbf16>
    %79 = vector.shape_cast %78 : vector<1x1x8x16x32xbf16> to vector<8x16x32xbf16>
    %80 = vector.shape_cast %79 : vector<8x16x32xbf16> to vector<128x32xbf16>
    %c11 = arith.constant 11 : index
    %c0_93 = arith.constant 0 : index
    %c0_94 = arith.constant 0 : index
    %81 = vector.load %arg3[%c11, %c0_93, %c0_94] : memref<13x32x32xbf16, #tpu.memory_space<vmem>>, vector<1x32x32xbf16>
    %82 = vector.shape_cast %81 : vector<1x32x32xbf16> to vector<32x32xbf16>
    %cst_95 = arith.constant dense<0.000000e+00> : vector<128x32xf32>
    %83 = tpu.matmul %80, %82, %cst_95 {dimension_numbers = #tpu.dot_dimension_numbers<[1], [0], [0], [1], [0, 0, 1, 1], [], []>} : vector<128x32xbf16>, vector<32x32xbf16>, vector<128x32xf32> -> vector<128x32xf32>
    %84 = arith.addf %77, %83 : vector<128x32xf32>
    %c0_96 = arith.constant 0 : index
    %c0_97 = arith.constant 0 : index
    %c2_98 = arith.constant 2 : index
    %c2_99 = arith.constant 2 : index
    %c0_100 = arith.constant 0 : index
    %85 = vector.load %arg2[%c0_96, %c0_97, %c2_98, %c2_99, %c0_100] : memref<1x1x12x20x32xbf16, #tpu.memory_space<vmem>>, vector<1x1x8x16x32xbf16>
    %86 = vector.shape_cast %85 : vector<1x1x8x16x32xbf16> to vector<8x16x32xbf16>
    %87 = vector.shape_cast %86 : vector<8x16x32xbf16> to vector<128x32xbf16>
    %c12 = arith.constant 12 : index
    %c0_101 = arith.constant 0 : index
    %c0_102 = arith.constant 0 : index
    %88 = vector.load %arg3[%c12, %c0_101, %c0_102] : memref<13x32x32xbf16, #tpu.memory_space<vmem>>, vector<1x32x32xbf16>
    %89 = vector.shape_cast %88 : vector<1x32x32xbf16> to vector<32x32xbf16>
    %cst_103 = arith.constant dense<0.000000e+00> : vector<128x32xf32>
    %90 = tpu.matmul %87, %89, %cst_103 {dimension_numbers = #tpu.dot_dimension_numbers<[1], [0], [0], [1], [0, 0, 1, 1], [], []>} : vector<128x32xbf16>, vector<32x32xbf16>, vector<128x32xf32> -> vector<128x32xf32>
    %91 = arith.addf %84, %90 : vector<128x32xf32>
    %c0_104 = arith.constant 0 : index
    %c0_105 = arith.constant 0 : index
    %92 = vector.load %arg4[%c0_104, %c0_105] : memref<1x32xf32, #tpu.memory_space<vmem>>, vector<1x32xf32>
    %93 = vector.shape_cast %92 : vector<1x32xf32> to vector<32xf32>
    %94 = vector.shape_cast %93 : vector<32xf32> to vector<1x32xf32>
    %95 = vector.broadcast %94 : vector<1x32xf32> to vector<128x32xf32>
    %96 = arith.addf %91, %95 : vector<128x32xf32>
    %cst_106 = arith.constant 0.000000e+00 : f32
    %97 = vector.broadcast %cst_106 : f32 to vector<128x32xf32>
    %98 = arith.maximumf %96, %97 : vector<128x32xf32>
    %99 = vector.shape_cast %98 : vector<128x32xf32> to vector<8x16x32xf32>
    %100 = arith.truncf %99 : vector<8x16x32xf32> to vector<8x16x32xbf16>
    %c0_107 = arith.constant 0 : index
    %c0_108 = arith.constant 0 : index
    %c0_109 = arith.constant 0 : index
    %c0_110 = arith.constant 0 : index
    %c0_111 = arith.constant 0 : index
    %101 = vector.load %arg5[%c0_107, %c0_108, %c0_109, %c0_110, %c0_111] : memref<1x1x8x16x32xbf16, #tpu.memory_space<vmem>>, vector<1x1x8x16x32xbf16>
    %102 = vector.shape_cast %101 : vector<1x1x8x16x32xbf16> to vector<8x16x32xbf16>
    %103 = vector.shape_cast %100 : vector<8x16x32xbf16> to vector<1x1x8x16x32xbf16>
    tpu.vector_store %arg5[%c0_107, %c0_108, %c0_109, %c0_110, %c0_111], %103 {strides = array<i32>} : memref<1x1x8x16x32xbf16, #tpu.memory_space<vmem>>, vector<1x1x8x16x32xbf16>,
    return
  }
  func.func @transform_0(%arg0: i32, %arg1: i32) -> (i32, i32, i32, i32, i32) {
    %c0_i32 = arith.constant 0 : i32
    %c0_i32_0 = arith.constant 0 : i32
    %c0_i32_1 = arith.constant 0 : i32
    %c0_i32_2 = arith.constant 0 : i32
    return %arg0, %arg1, %c0_i32, %c0_i32_0, %c0_i32_1 : i32, i32, i32, i32, i32
  }
  func.func @transform_1(%arg0: i32, %arg1: i32) -> (i32, i32, i32) {
    %c0_i32 = arith.constant 0 : i32
    %c0_i32_0 = arith.constant 0 : i32
    %c0_i32_1 = arith.constant 0 : i32
    %c0_i32_2 = arith.constant 0 : i32
    return %c0_i32, %c0_i32_0, %c0_i32_1 : i32, i32, i32
  }
  func.func @transform_2(%arg0: i32, %arg1: i32) -> (i32, i32) {
    %c0_i32 = arith.constant 0 : i32
    %c0_i32_0 = arith.constant 0 : i32
    %c0_i32_1 = arith.constant 0 : i32
    return %c0_i32, %c0_i32_0 : i32, i32
  }
  func.func @transform_3(%arg0: i32, %arg1: i32) -> (i32, i32, i32, i32, i32) {
    %c0_i32 = arith.constant 0 : i32
    %c0_i32_0 = arith.constant 0 : i32
    %c0_i32_1 = arith.constant 0 : i32
    %c0_i32_2 = arith.constant 0 : i32
    return %arg0, %arg1, %c0_i32, %c0_i32_0, %c0_i32_1 : i32, i32, i32, i32, i32
  }
}

module attributes {stable_mosaic.version = 11 : i64} {
  func.func @_row_matmul_kernel(%arg0: i32, %arg1: i32, %arg2: memref<1x128x32xbf16, #tpu.memory_space<vmem>>, %arg3: memref<32x32xbf16, #tpu.memory_space<vmem>>, %arg4: memref<1x32xf32, #tpu.memory_space<vmem>>, %arg5: memref<1x128x32xbf16, #tpu.memory_space<vmem>>) attributes {dimension_semantics = [#tpu.dimension_semantics<parallel>, #tpu.dimension_semantics<parallel>], iteration_bounds = array<i64: 2, 2>, scalar_prefetch = 0 : i64, scratch_operands = 0 : i64, tpu.core_type = #tpu.core_type<tc>, window_params = [{transform_indices = @transform_0, window_bounds = array<i64: 1, 128, 32>}, {pipeline_mode = #tpu.pipeline_mode<synchronous>, transform_indices = @transform_1, window_bounds = array<i64: 32, 32>}, {pipeline_mode = #tpu.pipeline_mode<synchronous>, transform_indices = @transform_2, window_bounds = array<i64: 1, 32>}, {transform_indices = @transform_3, window_bounds = array<i64: 1, 128, 32>}]} {
    %c0 = arith.constant 0 : index
    %c0_0 = arith.constant 0 : index
    %c0_1 = arith.constant 0 : index
    %0 = vector.load %arg2[%c0, %c0_0, %c0_1] : memref<1x128x32xbf16, #tpu.memory_space<vmem>>, vector<1x128x32xbf16>
    %1 = vector.shape_cast %0 : vector<1x128x32xbf16> to vector<128x32xbf16>
    %c0_2 = arith.constant 0 : index
    %c0_3 = arith.constant 0 : index
    %2 = vector.load %arg3[%c0_2, %c0_3] : memref<32x32xbf16, #tpu.memory_space<vmem>>, vector<32x32xbf16>
    %cst = arith.constant dense<0.000000e+00> : vector<128x32xf32>
    %3 = tpu.matmul %1, %2, %cst {dimension_numbers = #tpu.dot_dimension_numbers<[1], [0], [0], [1], [0, 0, 1, 1], [], []>} : vector<128x32xbf16>, vector<32x32xbf16>, vector<128x32xf32> -> vector<128x32xf32>
    %c0_4 = arith.constant 0 : index
    %c0_5 = arith.constant 0 : index
    %4 = vector.load %arg4[%c0_4, %c0_5] : memref<1x32xf32, #tpu.memory_space<vmem>>, vector<1x32xf32>
    %5 = vector.shape_cast %4 : vector<1x32xf32> to vector<32xf32>
    %6 = vector.shape_cast %5 : vector<32xf32> to vector<1x32xf32>
    %7 = vector.broadcast %6 : vector<1x32xf32> to vector<128x32xf32>
    %8 = arith.addf %3, %7 : vector<128x32xf32>
    %cst_6 = arith.constant 0.000000e+00 : f32
    %9 = vector.broadcast %cst_6 : f32 to vector<128x32xf32>
    %10 = arith.maximumf %8, %9 : vector<128x32xf32>
    %11 = arith.truncf %10 : vector<128x32xf32> to vector<128x32xbf16>
    %c0_7 = arith.constant 0 : index
    %c0_8 = arith.constant 0 : index
    %c0_9 = arith.constant 0 : index
    %12 = vector.load %arg5[%c0_7, %c0_8, %c0_9] : memref<1x128x32xbf16, #tpu.memory_space<vmem>>, vector<1x128x32xbf16>
    %13 = vector.shape_cast %12 : vector<1x128x32xbf16> to vector<128x32xbf16>
    %14 = vector.shape_cast %11 : vector<128x32xbf16> to vector<1x128x32xbf16>
    tpu.vector_store %arg5[%c0_7, %c0_8, %c0_9], %14 {strides = array<i32>} : memref<1x128x32xbf16, #tpu.memory_space<vmem>>, vector<1x128x32xbf16>,
    return
  }
  func.func @transform_0(%arg0: i32, %arg1: i32) -> (i32, i32, i32) {
    %c0_i32 = arith.constant 0 : i32
    %c0_i32_0 = arith.constant 0 : i32
    return %arg0, %arg1, %c0_i32 : i32, i32, i32
  }
  func.func @transform_1(%arg0: i32, %arg1: i32) -> (i32, i32) {
    %c0_i32 = arith.constant 0 : i32
    %c0_i32_0 = arith.constant 0 : i32
    %c0_i32_1 = arith.constant 0 : i32
    return %c0_i32, %c0_i32_0 : i32, i32
  }
  func.func @transform_2(%arg0: i32, %arg1: i32) -> (i32, i32) {
    %c0_i32 = arith.constant 0 : i32
    %c0_i32_0 = arith.constant 0 : i32
    %c0_i32_1 = arith.constant 0 : i32
    return %c0_i32, %c0_i32_0 : i32, i32
  }
  func.func @transform_3(%arg0: i32, %arg1: i32) -> (i32, i32, i32) {
    %c0_i32 = arith.constant 0 : i32
    %c0_i32_0 = arith.constant 0 : i32
    return %arg0, %arg1, %c0_i32 : i32, i32, i32
  }
}

module attributes {stable_mosaic.version = 11 : i64} {
  func.func @_head_mixture_kernel(%arg0: i32, %arg1: i32, %arg2: memref<1x128x32xbf16, #tpu.memory_space<vmem>>, %arg3: memref<9x32xbf16, #tpu.memory_space<vmem>>, %arg4: memref<9x1xf32, #tpu.memory_space<vmem>>, %arg5: memref<1x1x1x128xf32, #tpu.memory_space<vmem>>, %arg6: memref<1x1x1x128xf32, #tpu.memory_space<vmem>>, %arg7: memref<1x1x1x128xf32, #tpu.memory_space<vmem>>) attributes {dimension_semantics = [#tpu.dimension_semantics<parallel>, #tpu.dimension_semantics<parallel>], iteration_bounds = array<i64: 2, 2>, scalar_prefetch = 0 : i64, scratch_operands = 0 : i64, tpu.core_type = #tpu.core_type<tc>, window_params = [{transform_indices = @transform_0, window_bounds = array<i64: 1, 128, 32>}, {pipeline_mode = #tpu.pipeline_mode<synchronous>, transform_indices = @transform_1, window_bounds = array<i64: 9, 32>}, {pipeline_mode = #tpu.pipeline_mode<synchronous>, transform_indices = @transform_2, window_bounds = array<i64: 9, 1>}, {transform_indices = @transform_3, window_bounds = array<i64: 1, 1, 1, 128>}, {transform_indices = @transform_4, window_bounds = array<i64: 1, 1, 1, 128>}, {transform_indices = @transform_5, window_bounds = array<i64: 1, 1, 1, 128>}]} {
    %c0 = arith.constant 0 : index
    %c0_0 = arith.constant 0 : index
    %c0_1 = arith.constant 0 : index
    %0 = vector.load %arg2[%c0, %c0_0, %c0_1] : memref<1x128x32xbf16, #tpu.memory_space<vmem>>, vector<1x128x32xbf16>
    %1 = vector.shape_cast %0 : vector<1x128x32xbf16> to vector<128x32xbf16>
    %c0_2 = arith.constant 0 : index
    %c0_3 = arith.constant 0 : index
    %2 = vector.load %arg3[%c0_2, %c0_3] : memref<9x32xbf16, #tpu.memory_space<vmem>>, vector<9x32xbf16>
    %cst = arith.constant dense<0.000000e+00> : vector<9x128xf32>
    %3 = tpu.matmul %2, %1, %cst {dimension_numbers = #tpu.dot_dimension_numbers<[1], [1], [0], [0], [0, 0, 1, 0], [], []>} : vector<9x32xbf16>, vector<128x32xbf16>, vector<9x128xf32> -> vector<9x128xf32>
    %c0_4 = arith.constant 0 : index
    %c0_5 = arith.constant 0 : index
    %4 = vector.load %arg4[%c0_4, %c0_5] : memref<9x1xf32, #tpu.memory_space<vmem>>, vector<9x1xf32>
    %5 = vector.broadcast %4 : vector<9x1xf32> to vector<9x128xf32>
    %6 = arith.addf %3, %5 : vector<9x128xf32>
    %7 = vector.extract_strided_slice %6 {offsets = [0, 0], sizes = [3, 128], strides = [1, 1]} : vector<9x128xf32> to vector<3x128xf32>
    %8 = vector.extract_strided_slice %6 {offsets = [3, 0], sizes = [3, 128], strides = [1, 1]} : vector<9x128xf32> to vector<3x128xf32>
    %9 = vector.extract_strided_slice %6 {offsets = [6, 0], sizes = [3, 128], strides = [1, 1]} : vector<9x128xf32> to vector<3x128xf32>
    %cst_6 = arith.constant -7.000000e+00 : f32
    %cst_7 = arith.constant 7.000000e+00 : f32
    %10 = vector.broadcast %cst_6 : f32 to vector<3x128xf32>
    %11 = arith.maximumf %10, %9 : vector<3x128xf32>
    %12 = vector.broadcast %cst_7 : f32 to vector<3x128xf32>
    %13 = arith.minimumf %12, %11 : vector<3x128xf32>
    %cst_8 = arith.constant dense<0xFF800000> : vector<128xf32>
    %14 = vector.multi_reduction <maximumf>, %7, %cst_8 [0] : vector<3x128xf32> to vector<128xf32>
    %15 = vector.shape_cast %14 : vector<128xf32> to vector<1x128xf32>
    %16 = vector.broadcast %15 : vector<1x128xf32> to vector<3x128xf32>
    %17 = arith.subf %7, %16 : vector<3x128xf32>
    %18 = math.exp %17 : vector<3x128xf32>
    %cst_9 = arith.constant dense<0.000000e+00> : vector<128xf32>
    %19 = vector.multi_reduction <add>, %18, %cst_9 [0] : vector<3x128xf32> to vector<128xf32>
    %20 = vector.shape_cast %19 : vector<128xf32> to vector<1x128xf32>
    %21 = tpu.reciprocal %20 {approx = true} : vector<1x128xf32> -> vector<1x128xf32>
    %22 = vector.broadcast %21 : vector<1x128xf32> to vector<3x128xf32>
    %23 = arith.mulf %18, %22 : vector<3x128xf32>
    %cst_10 = arith.constant 0.000000e+00 : f32
    %24 = vector.broadcast %cst_10 : f32 to vector<3x128xf32>
    %25 = arith.subf %24, %13 : vector<3x128xf32>
    %26 = math.exp %25 : vector<3x128xf32>
    %c0_11 = arith.constant 0 : index
    %c0_12 = arith.constant 0 : index
    %c0_13 = arith.constant 0 : index
    %c0_14 = arith.constant 0 : index
    %27 = vector.load %arg5[%c0_11, %c0_12, %c0_13, %c0_14] : memref<1x1x1x128xf32, #tpu.memory_space<vmem>>, vector<1x1x1x128xf32>
    %28 = vector.shape_cast %27 : vector<1x1x1x128xf32> to vector<1x128xf32>
    %c0_15 = arith.constant 0 : index
    %c0_16 = arith.constant 0 : index
    %c0_17 = arith.constant 0 : index
    %c0_18 = arith.constant 0 : index
    %29 = vector.load %arg6[%c0_15, %c0_16, %c0_17, %c0_18] : memref<1x1x1x128xf32, #tpu.memory_space<vmem>>, vector<1x1x1x128xf32>
    %30 = vector.shape_cast %29 : vector<1x1x1x128xf32> to vector<1x128xf32>
    %31 = vector.broadcast %30 : vector<1x128xf32> to vector<3x128xf32>
    %32 = arith.subf %31, %8 : vector<3x128xf32>
    %cst_19 = arith.constant 0.000000e+00 : f32
    %33 = vector.broadcast %cst_19 : f32 to vector<3x128xf32>
    %34 = arith.subf %33, %32 : vector<3x128xf32>
    %35 = arith.mulf %34, %26 : vector<3x128xf32>
    %36 = math.exp %35 : vector<3x128xf32>
    %cst_20 = arith.constant 1.000000e+00 : f32
    %37 = vector.broadcast %cst_20 : f32 to vector<3x128xf32>
    %38 = arith.addf %37, %36 : vector<3x128xf32>
    %39 = tpu.reciprocal %38 {approx = true} : vector<3x128xf32> -> vector<3x128xf32>
    %40 = vector.broadcast %28 : vector<1x128xf32> to vector<3x128xf32>
    %41 = arith.subf %40, %8 : vector<3x128xf32>
    %cst_21 = arith.constant 0.000000e+00 : f32
    %42 = vector.broadcast %cst_21 : f32 to vector<3x128xf32>
    %43 = arith.subf %42, %41 : vector<3x128xf32>
    %44 = arith.mulf %43, %26 : vector<3x128xf32>
    %45 = math.exp %44 : vector<3x128xf32>
    %cst_22 = arith.constant 1.000000e+00 : f32
    %46 = vector.broadcast %cst_22 : f32 to vector<3x128xf32>
    %47 = arith.addf %46, %45 : vector<3x128xf32>
    %48 = tpu.reciprocal %47 {approx = true} : vector<3x128xf32> -> vector<3x128xf32>
    %49 = arith.subf %39, %48 : vector<3x128xf32>
    %50 = arith.mulf %23, %49 : vector<3x128xf32>
    %cst_23 = arith.constant dense<0.000000e+00> : vector<128xf32>
    %51 = vector.multi_reduction <add>, %50, %cst_23 [0] : vector<3x128xf32> to vector<128xf32>
    %52 = vector.shape_cast %51 : vector<128xf32> to vector<1x128xf32>
    %cst_24 = arith.constant 9.99999971E-10 : f32
    %cst_25 = arith.constant 1.000000e+00 : f32
    %53 = vector.broadcast %cst_24 : f32 to vector<1x128xf32>
    %54 = arith.maximumf %53, %52 : vector<1x128xf32>
    %55 = vector.broadcast %cst_25 : f32 to vector<1x128xf32>
    %56 = arith.minimumf %55, %54 : vector<1x128xf32>
    %c0_26 = arith.constant 0 : index
    %c0_27 = arith.constant 0 : index
    %c0_28 = arith.constant 0 : index
    %c0_29 = arith.constant 0 : index
    %57 = vector.load %arg7[%c0_26, %c0_27, %c0_28, %c0_29] : memref<1x1x1x128xf32, #tpu.memory_space<vmem>>, vector<1x1x1x128xf32>
    %58 = vector.shape_cast %57 : vector<1x1x1x128xf32> to vector<1x128xf32>
    %59 = vector.shape_cast %56 : vector<1x128xf32> to vector<1x1x1x128xf32>
    tpu.vector_store %arg7[%c0_26, %c0_27, %c0_28, %c0_29], %59 {strides = array<i32>} : memref<1x1x1x128xf32, #tpu.memory_space<vmem>>, vector<1x1x1x128xf32>,
    return
  }
  func.func @transform_0(%arg0: i32, %arg1: i32) -> (i32, i32, i32) {
    %c0_i32 = arith.constant 0 : i32
    %c0_i32_0 = arith.constant 0 : i32
    return %arg0, %arg1, %c0_i32 : i32, i32, i32
  }
  func.func @transform_1(%arg0: i32, %arg1: i32) -> (i32, i32) {
    %c0_i32 = arith.constant 0 : i32
    %c0_i32_0 = arith.constant 0 : i32
    %c0_i32_1 = arith.constant 0 : i32
    return %c0_i32, %c0_i32_0 : i32, i32
  }
  func.func @transform_2(%arg0: i32, %arg1: i32) -> (i32, i32) {
    %c0_i32 = arith.constant 0 : i32
    %c0_i32_0 = arith.constant 0 : i32
    %c0_i32_1 = arith.constant 0 : i32
    return %c0_i32, %c0_i32_0 : i32, i32
  }
  func.func @transform_3(%arg0: i32, %arg1: i32) -> (i32, i32, i32, i32) {
    %c0_i32 = arith.constant 0 : i32
    %c0_i32_0 = arith.constant 0 : i32
    %c0_i32_1 = arith.constant 0 : i32
    return %arg0, %arg1, %c0_i32, %c0_i32_0 : i32, i32, i32, i32
  }
  func.func @transform_4(%arg0: i32, %arg1: i32) -> (i32, i32, i32, i32) {
    %c0_i32 = arith.constant 0 : i32
    %c0_i32_0 = arith.constant 0 : i32
    %c0_i32_1 = arith.constant 0 : i32
    return %arg0, %arg1, %c0_i32, %c0_i32_0 : i32, i32, i32, i32
  }
  func.func @transform_5(%arg0: i32, %arg1: i32) -> (i32, i32, i32, i32) {
    %c0_i32 = arith.constant 0 : i32
    %c0_i32_0 = arith.constant 0 : i32
    %c0_i32_1 = arith.constant 0 : i32
    return %arg0, %arg1, %c0_i32, %c0_i32_0 : i32, i32, i32, i32
  }
}

</mosaic_0001>

<bundles_post_ra>
// kernel: coding_hh_lossless_forward.8
= control target key start
LH: loop header
LB: loop body
LE: loop exit
PB: predicated region body
PF: predicated region fallthrough
CT: control target
= control target key end

     0   :  { %s856_s12 = smov 0   ;;  %s858_s13 = smov 0   ;;  %s984_s0 = inlined_call_operand.vmem [shape: bf16[2,256,87], index: 0, kind: input, shape index: {}]   ;;  %s985_s1 = inlined_call_operand.vmem [shape: bf16[87,32], index: 1, kind: input, shape index: {}]   ;;  %s986_s2 = inlined_call_operand.vmem [shape: f32[1,32], index: 2, kind: input, shape index: {}]   ;;  %s987_s3 = inlined_call_operand.vmem [shape: bf16[2,256,32], index: 3, kind: output, shape index: {}]  }
   0x1   :  { %s860_s14 = smov 0   ;;  %s862_s15 = smov 0  }
   0x2   :  { %s864_s16 = smov 0  }
   0x3 LB: > { %s22_s17 = sadd.s32 1, %s825_s14  ;;  %s25_s18 = sadd.s32 1, %s829_s15  ;;  %s833_s16 = sphi %s864_s16, %s13_s16   ;;  %s829_s15 = sphi %s862_s15, %s991_s15   ;;  %s825_s14 = sphi %s860_s14, %s990_s14   ;;  %s821_s13 = sphi %s858_s13, %s989_s13   ;;  %s817_s12 = sphi %s856_s12, %s988_s12  }
   0x4   : > { %p23_p0 = scmp.ge.s32.totalorder %s22_s17, 2  ;;  %p622_p1 = scmp.ge.s32.totalorder %s833_s16, 1 }
   0x5   : > { %p158_p2 = scmp.lt.s32.totalorder %s833_s16, 5 }
   0x6   : > { %s993_s17 = smov (%p23_p0, %s22_s17), 0  ;;  %s995_s18 = smov (!%p23_p0, %s25_s18), %s829_s15 }
   0x7   : > { %p159_p3 = pnand %p622_p1, %p158_p2  ;;  %p27_p4 = scmp.ge.s32.totalorder %s995_s18, 2 }
   0x8   : > { %v781_v0 = vld [vmem:[%s985_s1] sm:$0xff] (!%p159_p3)   ;;  %v782_v1 = vld [vmem:[%s985_s1 + $0x8] sm:$0xff] (!%p159_p3)   ;;  %v783_v2 = vld [vmem:[%s985_s1 + $0x10] sm:$0xff] (!%p159_p3)   ;;  %s623_s25 = sshll.u32 (!%p159_p3), %s817_s12, 4  ;;  %p191_p5 = scmp.lt.s32.totalorder (!%p159_p3), %s821_s13, 1  ;;  %vm343_vm0 = vcmask (!%p159_p3), 1042432  }
   0x9   : > { %s997_s18 = smov (%p27_p4, %s995_s18), 0  ;;  %162 = sbr.rel (%p159_p3) target bundleno = 262 (0x106), region = 32 }
   0xa   : > { %700 = vmatprep.subr.bf16.mxu0 (!%p159_p3), %v781_v0  ;;  %728 = vmatprep.subr.bf16.mxu1 (!%p159_p3), %v781_v0  ;;  %p193_p6 = scmp.lt.s32.totalorder (!%p159_p3), %s623_s25, 31  ;;  %v784_v3 = vld [vmem:[%s985_s1 + $0x18] sm:$0xff] (!%p159_p3)   ;;  %vm344_vm1 = vcmask (!%p159_p3), 1043456   ;;  %v835_v4 = vmov (!%p159_p3), 65535   ;;  %v785_v6 = vld [vmem:[%s985_s1 + $0x20] sm:$0xff] (!%p159_p3)   ;;  %vm318_vm2 = vcmask (!%p159_p3), 711680  }
   0xb   : > { %701 = vmatpush3.bf16.msra.mxu0 (!%p159_p3), %v781_v0  ;;  %734 = vmatpush3.bf16.msra.mxu1 (!%p159_p3), %v781_v0  ;;  %v345_v5 = vsel (!%p159_p3), %vm343_vm0, 4294967295, %v835_v4  ;;  %v786_v7 = vld [vmem:[%s985_s1 + $0x28] ss:$0 sps:$4 sm:$0xff] (!%p159_p3)   ;;  %v629_v18 = vld [vmem:[%s986_s2] ss:$0 sm:$0xff] (!%p159_p3)  ;;  %vm511_vm3 = vcmask (!%p159_p3), 257024  }
   0xc   : > { %702 = vmatprep.subr.bf16.mxu0 (!%p159_p3), %v782_v1  ;;  %729 = vmatprep.subr.bf16.mxu1 (!%p159_p3), %v782_v1  ;;  %v346_v8 = vsel (!%p159_p3), %vm344_vm1, %v345_v5, 0 }
   0xd   : > { %v348_v11 = vand.u32 (!%p159_p3), %v786_v7, %v346_v8 }
   0xf   : > { %703 = vmatpush3.bf16.msra.mxu0 (!%p159_p3), %v782_v1  ;;  %735 = vmatpush3.bf16.msra.mxu1 (!%p159_p3), %v782_v1 }
  0x10   : > { %s999_s13 = smov (!%p191_p5, %s821_s13), 1  ;;  %704 = vmatprep.subr.bf16.mxu0 %v783_v2  ;;  %730 = vmatprep.subr.bf16.mxu1 %v783_v2  ;;  %s1001_s25 = smov (!%p193_p6, %s623_s25), 31 }
  0x11   : > { %s624_s28 = sshll.u32 %s999_s13, 5 }
  0x12   : > { %s905_s29 = sadd.s32 %s624_s28, %s1001_s25 }
  0x13   : > { %705 = vmatpush3.bf16.msra.mxu0 %v783_v2  ;;  %736 = vmatpush3.bf16.msra.mxu1 %v783_v2  ;;  %s625_s30 = sshll.u32 %s905_s29, 2 }
  0x14   : > { %706 = vmatprep.subr.bf16.mxu0 %v784_v3  ;;  %731 = vmatprep.subr.bf16.mxu1 %v784_v3  ;;  %s198_s10 = scalar_lea.vmem %s984_s0, %s625_s30  ;;  %s935_s20 = scalar_lea.vmem %s987_s3, %s625_s30 }
  0x15   : > { %v787_v9 = vld [vmem:[%s198_s10] sm:$0xff]   ;;  %v789_v12 = vld [vmem:[%s198_s10 + $0x8] sm:$0xff]   ;;  %v791_v14 = vld [vmem:[%s198_s10 + $0x10] sm:$0xff]  }
  0x16   : > { %v788_v10 = vld [vmem:[%s198_s10 + $0x20] sm:$0xff]   ;;  %712 = vmatprep.mubr.msk.bf16.mxu0 %vm318_vm2, %v787_v9  ;;  %v790_v13 = vld [vmem:[%s198_s10 + $0x28] sm:$0xff]   ;;  %v792_v15 = vld [vmem:[%s198_s10 + $0x30] sm:$0xff]  }
  0x17   : > { %707 = vmatpush3.bf16.msra.mxu0 %v784_v3  ;;  %737 = vmatpush3.bf16.msra.mxu1 %v784_v3  ;;  %v793_v16 = vld [vmem:[%s198_s10 + $0x18] sm:$0xff]  }
  0x18   : > { %708 = vmatprep.subr.bf16.mxu0 %v785_v6  ;;  %732 = vmatprep.subr.bf16.mxu1 %v785_v6  ;;  %v794_v17 = vld [vmem:[%s198_s10 + $0x38] sm:$0xff]  }
  0x19   : > { %720 = vmatprep.mubr.msk.bf16.mxu1 %vm318_vm2, %v788_v10 }
  0x1b   : > { %709 = vmatpush3.bf16.msra.mxu0 %v785_v6  ;;  %738 = vmatpush3.bf16.msra.mxu1 %v785_v6 }
  0x1c   : > { %710 = vmatprep.subr.bf16.mxu0 %v348_v11  ;;  %733 = vmatprep.subr.bf16.mxu1 %v348_v11 }
  0x1f   : > { %711 = vmatpush3.bf16.msra.mxu0 %v348_v11  ;;  %739 = vmatpush3.bf16.msra.mxu1 %v348_v11 }
  0x22   : > { %713 = vmatmul.mubr.msk.bf16.vlgmr.msra.gmra.mrb[0].mxu0 %vm318_vm2, %v789_v12  ;;  %721 = vmatmul.mubr.msk.bf16.vlgmr.msra.gmra.mrb[0].mxu1 %vm318_vm2, %v790_v13 }
  0x23   : > { %716 = vmatprep.mubr.msk.bf16.mxu0 %vm318_vm2, %v791_v14  ;;  %724 = vmatprep.mubr.msk.bf16.mxu1 %vm318_vm2, %v792_v15 }
  0x2a   : > { %717 = vmatmul.mubr.msk.bf16.gmra.mrb[4].mxu0 %vm318_vm2, %v793_v16  ;;  %725 = vmatmul.mubr.msk.bf16.gmra.mrb[4].mxu1 %vm318_vm2, %v794_v17 }
  0xf5   : > { %v714_v19 = vpop.f32.mrb[0].mxu0  ;;  %v722_v20 = vpop.f32.mrb[0].mxu1 }
  0xf6   : > { %v393_v21 = vadd.f32 %v714_v19, %v629_v18  ;;  %v425_v22 = vadd.f32 %v722_v20, %v629_v18  ;;  %v384_v23 = vpop.f32.mrb[1].mxu0  ;;  %v416_v24 = vpop.f32.mrb[1].mxu1 }
  0xf7   : > { %v385_v25 = vadd.f32 %v629_v18, %v384_v23  ;;  %v417_v26 = vadd.f32 %v629_v18, %v416_v24  ;;  %v715_v27 = vpop.f32.mrb[2].mxu0  ;;  %v723_v28 = vpop.f32.mrb[2].mxu1 }
  0xf8   : > { %v672_v29 = vpack.c.bf16 %v393_v21, %v393_v21  ;;  %v680_v30 = vpack.c.bf16 %v425_v22, %v425_v22  ;;  %v396_v31 = vadd.f32 %v715_v27, %v629_v18  ;;  %v428_v32 = vadd.f32 %v723_v28, %v629_v18  ;;  %v387_v33 = vpop.f32.mrb[3].mxu0  ;;  %v419_v34 = vpop.f32.mrb[3].mxu1 }
  0xf9   : > { %v670_v35 = vpack.c.bf16 %v385_v25, %v385_v25  ;;  %v678_v36 = vpack.c.bf16 %v417_v26, %v417_v26  ;;  %v388_v37 = vadd.f32 %v629_v18, %v387_v33  ;;  %v420_v38 = vadd.f32 %v629_v18, %v419_v34 }
  0xfa   : > { %514 = vst.msk [vmem:[%s935_s20 + $0x8] sm:$0xf] %vm511_vm3, %v672_v29  ;;  %522 = vst.msk [vmem:[%s935_s20 + $0x28] sm:$0xf] %vm511_vm3, %v680_v30  ;;  %v673_v39 = vpack.c.bf16 %v396_v31, %v396_v31  ;;  %v681_v40 = vpack.c.bf16 %v428_v32, %v428_v32 }
  0xfb   : > { %512 = vst.msk [vmem:[%s935_s20] sm:$0xf] %vm511_vm3, %v670_v35  ;;  %520 = vst.msk [vmem:[%s935_s20 + $0x20] sm:$0xf] %vm511_vm3, %v678_v36  ;;  %v671_v41 = vpack.c.bf16 %v388_v37, %v388_v37  ;;  %v679_v42 = vpack.c.bf16 %v420_v38, %v420_v38 }
  0xfc   : > { %515 = vst.msk [vmem:[%s935_s20 + $0xc] sm:$0xf] %vm511_vm3, %v673_v39  ;;  %523 = vst.msk [vmem:[%s935_s20 + $0x2c] sm:$0xf] %vm511_vm3, %v681_v40 }
  0xfd   : > { %513 = vst.msk [vmem:[%s935_s20 + $0x4] sm:$0xf] %vm511_vm3, %v671_v41  ;;  %521 = vst.msk [vmem:[%s935_s20 + $0x24] sm:$0xf] %vm511_vm3, %v679_v42  ;;  %v718_v43 = vpop.f32.mrb[4].mxu0  ;;  %v726_v44 = vpop.f32.mrb[4].mxu1 }
  0xfe   : > { %v409_v45 = vadd.f32 %v718_v43, %v629_v18  ;;  %v441_v46 = vadd.f32 %v726_v44, %v629_v18  ;;  %v400_v47 = vpop.f32.mrb[5].mxu0  ;;  %v432_v48 = vpop.f32.mrb[5].mxu1 }
  0xff   : > { %v401_v49 = vadd.f32 %v629_v18, %v400_v47  ;;  %v433_v50 = vadd.f32 %v629_v18, %v432_v48  ;;  %v719_v51 = vpop.f32.mrb[6].mxu0  ;;  %v727_v52 = vpop.f32.mrb[6].mxu1 }
 0x100   : > { %v676_v53 = vpack.c.bf16 %v409_v45, %v409_v45  ;;  %v684_v54 = vpack.c.bf16 %v441_v46, %v441_v46  ;;  %v412_v55 = vadd.f32 %v719_v51, %v629_v18  ;;  %v444_v56 = vadd.f32 %v727_v52, %v629_v18  ;;  %v403_v57 = vpop.f32.mrb[7].mxu0  ;;  %v435_v58 = vpop.f32.mrb[7].mxu1 }
 0x101   : > { %v674_v59 = vpack.c.bf16 %v401_v49, %v401_v49  ;;  %v682_v60 = vpack.c.bf16 %v433_v50, %v433_v50  ;;  %v404_v61 = vadd.f32 %v629_v18, %v403_v57  ;;  %v436_v62 = vadd.f32 %v629_v18, %v435_v58 }
 0x102   : > { %518 = vst.msk [vmem:[%s935_s20 + $0x18] sm:$0xf] %vm511_vm3, %v676_v53  ;;  %526 = vst.msk [vmem:[%s935_s20 + $0x38] sm:$0xf] %vm511_vm3, %v684_v54  ;;  %v677_v63 = vpack.c.bf16 %v412_v55, %v412_v55  ;;  %v685_v0 = vpack.c.bf16 %v444_v56, %v444_v56 }
 0x103   : > { %516 = vst.msk [vmem:[%s935_s20 + $0x10] sm:$0xf] %vm511_vm3, %v674_v59  ;;  %524 = vst.msk [vmem:[%s935_s20 + $0x30] sm:$0xf] %vm511_vm3, %v682_v60  ;;  %v675_v1 = vpack.c.bf16 %v404_v61, %v404_v61  ;;  %v683_v2 = vpack.c.bf16 %v436_v62, %v436_v62 }
 0x104   : > { %519 = vst.msk [vmem:[%s935_s20 + $0x1c] sm:$0xf] %vm511_vm3, %v677_v63  ;;  %527 = vst.msk [vmem:[%s935_s20 + $0x3c] sm:$0xf] %vm511_vm3, %v685_v0 }
 0x105   : > { %517 = vst.msk [vmem:[%s935_s20 + $0x14] sm:$0xf] %vm511_vm3, %v675_v1  ;;  %525 = vst.msk [vmem:[%s935_s20 + $0x34] sm:$0xf] %vm511_vm3, %v683_v2 }
 0x106 PF: > { %s13_s16 = sadd.s32 1, %s833_s16   ;;  %s988_s12 = smov %s825_s14 }
 0x107   : > { %p10_p7 = scmp.ge.s32.totalorder %s13_s16, 6   ;;  %s989_s13 = smov %s829_s15 }
 0x108   : > { %s990_s14 = smov %s993_s17  ;;  %s991_s15 = smov %s997_s18 }
 0x109   :  { %12 = sbr.rel (!%p10_p7) target bundleno = 3 (0x3), region = 62 }

// kernel: coding_hh_lossless_forward.14
= control target key start
LH: loop header
LB: loop body
LE: loop exit
PB: predicated region body
PF: predicated region fallthrough
CT: control target
= control target key end

     0   :  { %s807_s12 = smov 0   ;;  %s809_s13 = smov 0   ;;  %s934_s0 = inlined_call_operand.vmem [shape: bf16[2,256,32], index: 0, kind: input, shape index: {}]   ;;  %s935_s1 = inlined_call_operand.vmem [shape: bf16[32,32], index: 1, kind: input, shape index: {}]   ;;  %s936_s2 = inlined_call_operand.vmem [shape: f32[1,32], index: 2, kind: input, shape index: {}]   ;;  %s937_s3 = inlined_call_operand.vmem [shape: bf16[2,256,32], index: 3, kind: output, shape index: {}]  }
   0x1   :  { %s811_s14 = smov 0   ;;  %s813_s15 = smov 0  }
   0x2   :  { %s815_s16 = smov 0  }
   0x3 LB: > { %s22_s17 = sadd.s32 1, %s777_s14  ;;  %s25_s18 = sadd.s32 1, %s781_s15  ;;  %s785_s16 = sphi %s815_s16, %s13_s16   ;;  %s781_s15 = sphi %s813_s15, %s941_s15   ;;  %s777_s14 = sphi %s811_s14, %s940_s14   ;;  %s773_s13 = sphi %s809_s13, %s939_s13   ;;  %s769_s12 = sphi %s807_s12, %s938_s12  }
   0x4   : > { %p23_p0 = scmp.ge.s32.totalorder %s22_s17, 2  ;;  %p603_p1 = scmp.ge.s32.totalorder %s785_s16, 1 }
   0x5   : > { %p158_p2 = scmp.lt.s32.totalorder %s785_s16, 5 }
   0x6   : > { %s943_s17 = smov (%p23_p0, %s22_s17), 0  ;;  %s945_s18 = smov (!%p23_p0, %s25_s18), %s781_s15 }
   0x7   : > { %p159_p3 = pnand %p603_p1, %p158_p2  ;;  %p27_p4 = scmp.ge.s32.totalorder %s945_s18, 2 }
   0x8   : > { %v737_v0 = vld [vmem:[%s935_s1] sm:$0xff] (!%p159_p3)   ;;  %s604_s21 = sshll.u32 (!%p159_p3), %s769_s12, 4  ;;  %v738_v1 = vld [vmem:[%s935_s1 + $0x8] sm:$0xff] (!%p159_p3)   ;;  %p191_p5 = scmp.lt.s32.totalorder (!%p159_p3), %s773_s13, 1  ;;  %vm290_vm0 = vcmask (!%p159_p3), 261120   ;;  %vm492_vm1 = vcmask (!%p159_p3), 257024  }
   0x9   : > { %s947_s18 = smov (%p27_p4, %s945_s18), 0  ;;  %162 = sbr.rel (%p159_p3) target bundleno = 254 (0xfe), region = 32 }
   0xa   : > { %673 = vmatprep.subr.bf16.mxu0 (!%p159_p3), %v737_v0  ;;  %693 = vmatprep.subr.bf16.mxu1 (!%p159_p3), %v737_v0  ;;  %p193_p6 = scmp.lt.s32.totalorder (!%p159_p3), %s604_s21, 31  ;;  %v862_v10 = vld [vmem:[%s936_s2] ss:$0 sm:$0xff] (!%p159_p3) }
   0xb   : > { %674 = vmatpush3.bf16.msra.mxu0 (!%p159_p3), %v737_v0  ;;  %695 = vmatpush3.bf16.msra.mxu1 (!%p159_p3), %v737_v0 }
   0xc   : > { %675 = vmatprep.subr.bf16.mxu0 (!%p159_p3), %v738_v1  ;;  %694 = vmatprep.subr.bf16.mxu1 (!%p159_p3), %v738_v1 }
   0xf   : > { %676 = vmatpush3.bf16.msra.mxu0 (!%p159_p3), %v738_v1  ;;  %696 = vmatpush3.bf16.msra.mxu1 (!%p159_p3), %v738_v1 }
  0x10   : > { %s949_s13 = smov (!%p191_p5, %s773_s13), 1  ;;  %s951_s21 = smov (!%p193_p6, %s604_s21), 31 }
  0x11   : > { %s605_s24 = sshll.u32 %s949_s13, 5 }
  0x12   : > { %s843_s25 = sadd.s32 %s605_s24, %s951_s21 }
  0x13   : > { %s606_s26 = sshll.u32 %s843_s25, 2 }
  0x14   : > { %s198_s29 = scalar_lea.vmem %s934_s0, %s606_s26  ;;  %s874_s7 = scalar_lea.vmem %s937_s3, %s606_s26 }
  0x15   : > { %v739_v2 = vld [vmem:[%s198_s29] sm:$0xff]   ;;  %v741_v4 = vld [vmem:[%s198_s29 + $0x8] sm:$0xff]   ;;  %v743_v6 = vld [vmem:[%s198_s29 + $0x10] sm:$0xff]  }
  0x16   : > { %v740_v3 = vld [vmem:[%s198_s29 + $0x20] sm:$0xff]   ;;  %677 = vmatprep.mubr.msk.bf16.mxu0 %vm290_vm0, %v739_v2  ;;  %v742_v5 = vld [vmem:[%s198_s29 + $0x28] sm:$0xff]   ;;  %v744_v7 = vld [vmem:[%s198_s29 + $0x30] sm:$0xff]  }
  0x17   : > { %685 = vmatprep.mubr.msk.bf16.mxu1 %vm290_vm0, %v740_v3  ;;  %678 = vmatmul.mubr.msk.bf16.vlgmr.msra.gmra.mrb[0].mxu0 %vm290_vm0, %v741_v4  ;;  %v745_v8 = vld [vmem:[%s198_s29 + $0x18] sm:$0xff]  }
  0x18   : > { %686 = vmatmul.mubr.msk.bf16.vlgmr.msra.gmra.mrb[0].mxu1 %vm290_vm0, %v742_v5  ;;  %681 = vmatprep.mubr.msk.bf16.mxu0 %vm290_vm0, %v743_v6  ;;  %v746_v9 = vld [vmem:[%s198_s29 + $0x38] sm:$0xff]  }
  0x19   : > { %689 = vmatprep.mubr.msk.bf16.mxu1 %vm290_vm0, %v744_v7 }
  0x1f   : > { %682 = vmatmul.mubr.msk.bf16.gmra.mrb[4].mxu0 %vm290_vm0, %v745_v8 }
  0x20   : > { %690 = vmatmul.mubr.msk.bf16.gmra.mrb[4].mxu1 %vm290_vm0, %v746_v9 }
  0xea   : > { %v679_v11 = vpop.f32.mrb[0].mxu0 }
  0xeb   : > { %v358_v12 = vadd.f32 %v679_v11, %v862_v10  ;;  %v687_v13 = vpop.f32.mrb[0].mxu1  ;;  %v349_v14 = vpop.f32.mrb[1].mxu0 }
  0xec   : > { %v390_v15 = vadd.f32 %v687_v13, %v862_v10  ;;  %v350_v16 = vadd.f32 %v862_v10, %v349_v14  ;;  %v381_v17 = vpop.f32.mrb[1].mxu1  ;;  %v680_v18 = vpop.f32.mrb[2].mxu0 }
  0xed   : > { %v414_v19 = vmax.f32 %v358_v12, 0.0  ;;  %v382_v20 = vadd.f32 %v862_v10, %v381_v17  ;;  %v361_v21 = vadd.f32 %v680_v18, %v862_v10  ;;  %v688_v22 = vpop.f32.mrb[2].mxu1  ;;  %v352_v23 = vpop.f32.mrb[3].mxu0 }
  0xee   : > { %v422_v24 = vmax.f32 %v390_v15, 0.0  ;;  %v412_v25 = vmax.f32 %v350_v16, 0.0  ;;  %v393_v26 = vadd.f32 %v688_v22, %v862_v10  ;;  %v353_v27 = vadd.f32 %v862_v10, %v352_v23  ;;  %v384_v28 = vpop.f32.mrb[3].mxu1 }
  0xef   : > { %v649_v29 = vpack.c.bf16 %v414_v19, %v414_v19  ;;  %v420_v30 = vmax.f32 %v382_v20, 0.0  ;;  %v415_v31 = vmax.f32 %v361_v21, 0.0  ;;  %v385_v32 = vadd.f32 %v862_v10, %v384_v28 }
  0xf0   : > { %v657_v33 = vpack.c.bf16 %v422_v24, %v422_v24  ;;  %v647_v34 = vpack.c.bf16 %v412_v25, %v412_v25  ;;  %v423_v35 = vmax.f32 %v393_v26, 0.0  ;;  %v413_v36 = vmax.f32 %v353_v27, 0.0 }
  0xf1   : > { %495 = vst.msk [vmem:[%s874_s7 + $0x8] sm:$0xf] %vm492_vm1, %v649_v29  ;;  %v655_v37 = vpack.c.bf16 %v420_v30, %v420_v30  ;;  %v650_v38 = vpack.c.bf16 %v415_v31, %v415_v31  ;;  %v421_v39 = vmax.f32 %v385_v32, 0.0 }
  0xf2   : > { %503 = vst.msk [vmem:[%s874_s7 + $0x28] sm:$0xf] %vm492_vm1, %v657_v33  ;;  %493 = vst.msk [vmem:[%s874_s7] sm:$0xf] %vm492_vm1, %v647_v34  ;;  %v658_v40 = vpack.c.bf16 %v423_v35, %v423_v35  ;;  %v648_v41 = vpack.c.bf16 %v413_v36, %v413_v36  ;;  %v683_v42 = vpop.f32.mrb[4].mxu0 }
  0xf3   : > { %501 = vst.msk [vmem:[%s874_s7 + $0x20] sm:$0xf] %vm492_vm1, %v655_v37  ;;  %496 = vst.msk [vmem:[%s874_s7 + $0xc] sm:$0xf] %vm492_vm1, %v650_v38  ;;  %v656_v43 = vpack.c.bf16 %v421_v39, %v421_v39  ;;  %v374_v44 = vadd.f32 %v683_v42, %v862_v10  ;;  %v691_v45 = vpop.f32.mrb[4].mxu1  ;;  %v365_v46 = vpop.f32.mrb[5].mxu0 }
  0xf4   : > { %504 = vst.msk [vmem:[%s874_s7 + $0x2c] sm:$0xf] %vm492_vm1, %v658_v40  ;;  %494 = vst.msk [vmem:[%s874_s7 + $0x4] sm:$0xf] %vm492_vm1, %v648_v41  ;;  %v406_v47 = vadd.f32 %v691_v45, %v862_v10  ;;  %v366_v48 = vadd.f32 %v862_v10, %v365_v46  ;;  %v397_v49 = vpop.f32.mrb[5].mxu1  ;;  %v684_v50 = vpop.f32.mrb[6].mxu0 }
  0xf5   : > { %502 = vst.msk [vmem:[%s874_s7 + $0x24] sm:$0xf] %vm492_vm1, %v656_v43  ;;  %v418_v51 = vmax.f32 %v374_v44, 0.0  ;;  %v398_v52 = vadd.f32 %v862_v10, %v397_v49  ;;  %v377_v53 = vadd.f32 %v684_v50, %v862_v10  ;;  %v692_v54 = vpop.f32.mrb[6].mxu1  ;;  %v368_v55 = vpop.f32.mrb[7].mxu0 }
  0xf6   : > { %v426_v56 = vmax.f32 %v406_v47, 0.0  ;;  %v416_v57 = vmax.f32 %v366_v48, 0.0  ;;  %v409_v58 = vadd.f32 %v692_v54, %v862_v10  ;;  %v369_v59 = vadd.f32 %v862_v10, %v368_v55  ;;  %v400_v60 = vpop.f32.mrb[7].mxu1 }
  0xf7   : > { %v653_v61 = vpack.c.bf16 %v418_v51, %v418_v51  ;;  %v424_v62 = vmax.f32 %v398_v52, 0.0  ;;  %v419_v63 = vmax.f32 %v377_v53, 0.0  ;;  %v401_v0 = vadd.f32 %v862_v10, %v400_v60 }
  0xf8   : > { %v661_v1 = vpack.c.bf16 %v426_v56, %v426_v56  ;;  %v651_v2 = vpack.c.bf16 %v416_v57, %v416_v57  ;;  %v427_v3 = vmax.f32 %v409_v58, 0.0  ;;  %v417_v4 = vmax.f32 %v369_v59, 0.0 }
  0xf9   : > { %499 = vst.msk [vmem:[%s874_s7 + $0x18] sm:$0xf] %vm492_vm1, %v653_v61  ;;  %v659_v5 = vpack.c.bf16 %v424_v62, %v424_v62  ;;  %v654_v6 = vpack.c.bf16 %v419_v63, %v419_v63  ;;  %v425_v7 = vmax.f32 %v401_v0, 0.0 }
  0xfa   : > { %507 = vst.msk [vmem:[%s874_s7 + $0x38] sm:$0xf] %vm492_vm1, %v661_v1  ;;  %497 = vst.msk [vmem:[%s874_s7 + $0x10] sm:$0xf] %vm492_vm1, %v651_v2  ;;  %v662_v8 = vpack.c.bf16 %v427_v3, %v427_v3  ;;  %v652_v9 = vpack.c.bf16 %v417_v4, %v417_v4 }
  0xfb   : > { %505 = vst.msk [vmem:[%s874_s7 + $0x30] sm:$0xf] %vm492_vm1, %v659_v5  ;;  %500 = vst.msk [vmem:[%s874_s7 + $0x1c] sm:$0xf] %vm492_vm1, %v654_v6  ;;  %v660_v10 = vpack.c.bf16 %v425_v7, %v425_v7 }
  0xfc   : > { %508 = vst.msk [vmem:[%s874_s7 + $0x3c] sm:$0xf] %vm492_vm1, %v662_v8  ;;  %498 = vst.msk [vmem:[%s874_s7 + $0x14] sm:$0xf] %vm492_vm1, %v652_v9 }
  0xfd   : > { %506 = vst.msk [vmem:[%s874_s7 + $0x34] sm:$0xf] %vm492_vm1, %v660_v10 }
  0xfe PF: > { %s13_s16 = sadd.s32 1, %s785_s16   ;;  %s938_s12 = smov %s777_s14 }
  0xff   : > { %p10_p7 = scmp.ge.s32.totalorder %s13_s16, 6   ;;  %s939_s13 = smov %s781_s15 }
 0x100   : > { %s940_s14 = smov %s943_s17  ;;  %s941_s15 = smov %s947_s18 }
 0x101   :  { %12 = sbr.rel (!%p10_p7) target bundleno = 3 (0x3), region = 62 }

// kernel: coding_hh_lossless_forward.15
= control target key start
LH: loop header
LB: loop body
LE: loop exit
PB: predicated region body
PF: predicated region fallthrough
CT: control target
= control target key end

     0   :  { %s848_s18 = smov 0   ;;  %s850_s19 = smov 0   ;;  %s950_s0 = inlined_call_operand.vmem [shape: bf16[2,256,32], index: 0, kind: input, shape index: {}]   ;;  %s951_s1 = inlined_call_operand.vmem [shape: bf16[9,32], index: 1, kind: input, shape index: {}]   ;;  %s952_s2 = inlined_call_operand.vmem [shape: f32[9,1], index: 2, kind: input, shape index: {}]   ;;  %s953_s3 = inlined_call_operand.vmem [shape: f32[2,2,1,128], index: 3, kind: input, shape index: {}]   ;;  %s954_s4 = inlined_call_operand.vmem [shape: f32[2,2,1,128], index: 4, kind: input, shape index: {}]   ;;  %s955_s5 = inlined_call_operand.vmem [shape: f32[2,2,1,128], index: 5, kind: output, shape index: {}]  }
   0x1   :  { %s852_s20 = smov 0   ;;  %s854_s21 = smov 0  }
   0x2   :  { %s856_s22 = smov 0  }
   0x3 LB: > { %s24_s23 = sadd.s32 1, %s805_s20  ;;  %s27_s24 = sadd.s32 1, %s809_s21  ;;  %s813_s22 = sphi %s856_s22, %s15_s22   ;;  %s809_s21 = sphi %s854_s21, %s959_s21   ;;  %s805_s20 = sphi %s852_s20, %s958_s20   ;;  %s801_s19 = sphi %s850_s19, %s957_s19   ;;  %s797_s18 = sphi %s848_s18, %s956_s18  }
   0x4   : > { %p25_p0 = scmp.ge.s32.totalorder %s24_s23, 2  ;;  %p654_p1 = scmp.ge.s32.totalorder %s813_s22, 1 }
   0x5   : > { %p236_p2 = scmp.lt.s32.totalorder %s813_s22, 5 }
   0x6   : > { %s961_s23 = smov (%p25_p0, %s24_s23), 0  ;;  %s963_s24 = smov (!%p25_p0, %s27_s24), %s809_s21 }
   0x7   : > { %p237_p3 = pnand %p654_p1, %p236_p2  ;;  %p29_p4 = scmp.ge.s32.totalorder %s963_s24, 2 }
   0x8   : > { %s655_s25 = sshll.u32 (!%p237_p3), %s797_s18, 4  ;;  %p285_p5 = scmp.lt.s32.totalorder (!%p237_p3), %s801_s19, 1  ;;  %v815_v0 = vmov (!%p237_p3), 0.0   ;;  %vm816_vm0 = vmmov (!%p237_p3), 0   ;;  %v334_v1 = vld [vmem:[%s952_s2] sm:$0xff] (!%p237_p3)  ;;  %v817_v2 = vmov (!%p237_p3), 0  }
   0x9   : > { %s965_s24 = smov (%p29_p4, %s963_s24), 0  ;;  %240 = sbr.rel (%p237_p3) target bundleno = 377 (0x179), region = 40 }
   0xa   : > { %686 = vmatprep.subr.bf16.mxu0 (!%p237_p3), %v815_v0  ;;  %p287_p6 = scmp.lt.s32.totalorder (!%p237_p3), %s655_s25, 31  ;;  %702 = vmatprep.mubr.msk.bf16.mxu0 (!%p237_p3), %vm816_vm0, %v815_v0  ;;  %v335_v3 = vld [vmem:[%s952_s2 + $0x8] sm:$0x1] (!%p237_p3)  ;;  %vm391_vm1 = vcmask (!%p237_p3), 261120   ;;  %v758_v20 = vld [vmem:[%s951_s1] sm:$0x1f] (!%p237_p3)  }
   0xb   : > { %749 = vset.pattern.permute.xlu0 (!%p237_p3), %v817_v2  ;;  %p296_p7 = scmp.lt.s32.totalorder (!%p237_p3), %s797_s18, 1  ;;  %vm464_vm2 = vcmask (!%p237_p3), 1042432   ;;  %vm502_vm3 = vcmask (!%p237_p3), 1044480  }
   0xc   : > { %338 = vperm.xlu0 (!%p237_p3), %749, %v334_v1  }
  0x10   : > { %s967_s19 = smov (!%p285_p5, %s801_s19), 1  ;;  %s969_s25 = smov (!%p287_p6, %s655_s25), 31  ;;  %343 = vperm.xlu0 %749, %v335_v3  }
  0x11   : > { %s656_s28 = sshll.u32 %s967_s19, 5  ;;  %s971_s18 = smov (!%p296_p7, %s797_s18), 1 }
  0x12   : > { %s290_s6 = sadd.s32 %s656_s28, %s969_s25  ;;  %s658_s13 = sshll.u32 %s967_s19, 1 }
  0x13   : > { %s657_s7 = sshll.u32 %s290_s6, 2  ;;  %s918_s14 = sadd.s32 %s658_s13, %s971_s18 }
  0x14   : > { %s893_s10 = scalar_lea.vmem %s950_s0, %s657_s7  ;;  %s300_s17 = scalar_lea.vmem %s953_s3, %s918_s14 }
  0x15   : > { %v750_v4 = vld [vmem:[%s893_s10] sm:$0xff]   ;;  %v751_v6 = vld [vmem:[%s893_s10 + $0x8] sm:$0xff]   ;;  %v752_v8 = vld [vmem:[%s893_s10 + $0x10] sm:$0xff]   ;;  %s307_s27 = scalar_lea.vmem %s954_s4, %s918_s14  ;;  %s314_s28 = scalar_lea.vmem %s955_s5, %s918_s14 }
  0x16   : > { %v396_v5 = vsel %vm391_vm1, %v750_v4, 0  ;;  %v399_v7 = vsel %vm391_vm1, %v751_v6, 0  ;;  %v402_v9 = vsel %vm391_vm1, %v752_v8, 0  ;;  %v753_v10 = vld [vmem:[%s893_s10 + $0x18] sm:$0xff]   ;;  %v754_v12 = vld [vmem:[%s893_s10 + $0x20] sm:$0xff]   ;;  %v755_v14 = vld [vmem:[%s893_s10 + $0x28] sm:$0xff]  }
  0x17   : > { %687 = vmatpush3.bf16.xpose.msra.mxu0 %v396_v5  ;;  %v405_v11 = vsel %vm391_vm1, %v753_v10, 0  ;;  %v408_v13 = vsel %vm391_vm1, %v754_v12, 0  ;;  %v411_v15 = vsel %vm391_vm1, %v755_v14, 0  ;;  %v756_v16 = vld [vmem:[%s893_s10 + $0x30] sm:$0xff]   ;;  %v757_v18 = vld [vmem:[%s893_s10 + $0x38] sm:$0xff]  }
  0x18   : > { %688 = vmatprep.subr.bf16.mxu0 %v815_v0  ;;  %v414_v17 = vsel %vm391_vm1, %v756_v16, 0  ;;  %v417_v19 = vsel %vm391_vm1, %v757_v18, 0  ;;  %v674_v23 = vld [vmem:[%s300_s17] ss:$0 sm:$0xff] }
  0x19   : > { %v673_v24 = vld [vmem:[%s307_s27] ss:$0 sm:$0xff] }
  0x1f   : > { %689 = vmatpush3.bf16.xpose.msra.mxu0 %v399_v7 }
  0x20   : > { %690 = vmatprep.subr.bf16.mxu0 %v815_v0 }
  0x27   : > { %691 = vmatpush3.bf16.xpose.msra.mxu0 %v402_v9 }
  0x28   : > { %692 = vmatprep.subr.bf16.mxu0 %v815_v0 }
  0x2f   : > { %693 = vmatpush3.bf16.xpose.msra.mxu0 %v405_v11 }
  0x30   : > { %694 = vmatprep.subr.bf16.mxu0 %v815_v0 }
  0x37   : > { %695 = vmatpush3.bf16.xpose.msra.mxu0 %v408_v13 }
  0x38   : > { %696 = vmatprep.subr.bf16.mxu0 %v815_v0 }
  0x3f   : > { %697 = vmatpush3.bf16.xpose.msra.mxu0 %v411_v15 }
  0x40   : > { %698 = vmatprep.subr.bf16.mxu0 %v815_v0 }
  0x47   : > { %699 = vmatpush3.bf16.xpose.msra.mxu0 %v414_v17 }
  0x48   : > { %700 = vmatprep.subr.bf16.mxu0 %v815_v0 }
  0x4f   : > { %701 = vmatpush3.bf16.xpose.msra.mxu0 %v417_v19 }
  0x56   : > { %703 = vmatmul.mubr.msk.bf16.vlgmr.msra.gmra.mrb[0].mxu0 %vm391_vm1, %v758_v20 }
  0x8b   : > { %v339_v21 = vpop.permute.xlu0 %338 }
  0x8f   : > { %v344_v28 = vpop.permute.xlu0 %343 }
 0x129   : > { %v453_v22 = vpop.f32.mrb[0].mxu0 }
 0x12a   : > { %v454_v25 = vadd.f32 %v453_v22, %v339_v21  ;;  %v704_v26 = vpop.f32.mrb[1].mxu0 }
 0x12b   : > { %v456_v27 = vpop.f32.mrb[2].mxu0 }
 0x12c   : > { %v671_v29 = vclamps-f32 %v454_v25, 7.0  ;;  %v465_v30 = vsel %vm464_vm2, %v454_v25, -inf  ;;  %v498_v31 = vsub.f32 %v673_v24, %v454_v25  ;;  %v518_v32 = vsub.f32 %v674_v23, %v454_v25  ;;  %v705_v33 = vpop.f32.mrb[3].mxu0 }
 0x12d   : > { %v466_v34 = vrot.slane %v465_v30, 4  ;;  %v457_v35 = vadd.f32 %v456_v27, %v344_v28 }
 0x12e   : > { %v484_v36 = vsub.f32 0.0, %v671_v29  ;;  %v499_v52 = vsub.f32 0.0, %v498_v31  ;;  %v519_v53 = vsub.f32 0.0, %v518_v32 }
 0x12f   : > { %v467_v37 = vmax.f32 %v465_v30, %v466_v34  ;;  %v672_v38 = vclamps-f32 %v457_v35, 7.0 }
 0x130   : > { %v486_v39 = vmul.f32 1.442695, %v484_v36 }
 0x131   : > { %v468_v40 = vrot.slane %v467_v37, 2  ;;  %v485_v41 = vsub.f32 0.0, %v672_v38 }
 0x132   : > { %759 = vpow2.f32 %v486_v39 }
 0x133   : > { %v469_v42 = vmax.f32 %v467_v37, %v468_v40  ;;  %v488_v43 = vmul.f32 1.442695, %v485_v41 }
 0x135   : > { %v470_v44 = vrot.slane %v469_v42, 1  ;;  %761 = vpow2.f32 %v488_v43 }
 0x137   : > { %v471_v45 = vmax.f32 %v469_v42, %v470_v44 }
 0x139   : > { %v472_v46 = vsub.f32 %v454_v25, %v471_v45 }
 0x13b   : > { %v473_v47 = vmul.f32 1.442695, %v472_v46 }
 0x13c   : > { %v760_v48 = vpop.eup %759 }
 0x13d   : > { %763 = vpow2.f32 %v473_v47  ;;  %v503_v50 = vrot.slane %v760_v48, 3 }
 0x13f   : > { %v762_v49 = vpop.eup %761 }
 0x140   : > { %v504_v51 = vrot.slane %v762_v49, 3 }
 0x142   : > { %v505_v54 = vsel %vm502_vm3, %v503_v50, %v504_v51 }
 0x143   : > { %v507_v55 = vmul.f32 %v505_v54, %v499_v52  ;;  %v520_v56 = vmul.f32 %v519_v53, %v505_v54 }
 0x145   : > { %v508_v57 = vmul.f32 1.442695, %v507_v55  ;;  %v521_v58 = vmul.f32 1.442695, %v520_v56 }
 0x147   : > { %v764_v59 = vpop.eup %763  ;;  %765 = vpow2.f32 %v508_v57 }
 0x148   : > { %v475_v60 = vsel %vm464_vm2, %v764_v59, 0.0  ;;  %767 = vpow2.f32 %v521_v58 }
 0x149   : > { %v476_v61 = vrot.slane %v475_v60, 4 }
 0x14b   : > { %v477_v62 = vadd.f32 %v476_v61, %v475_v60 }
 0x14d   : > { %v478_v63 = vrot.slane %v477_v62, 2 }
 0x14f   : > { %v479_v0 = vadd.f32 %v478_v63, %v477_v62 }
 0x151   : > { %v766_v1 = vpop.eup %765  ;;  %v480_v2 = vrot.slane %v479_v0, 1 }
 0x152   : > { %v768_v3 = vpop.eup %767  ;;  %v510_v4 = vadd.f32 1.0, %v766_v1 }
 0x153   : > { %v481_v5 = vadd.f32 %v480_v2, %v479_v0  ;;  %v523_v6 = vadd.f32 1.0, %v768_v3 }
 0x154   : > { %769 = vrcp.f32 %v510_v4 }
 0x155   : > { %771 = vrcp.f32 %v481_v5 }
 0x156   : > { %773 = vrcp.f32 %v523_v6 }
 0x15e   : > { %v770_v7 = vpop.eup %769 }
 0x15f   : > { %v772_v8 = vpop.eup %771 }
 0x160   : > { %v774_v9 = vpop.eup %773  ;;  %v483_v10 = vmul.f32 %v772_v8, %v764_v59 }
 0x161   : > { %v525_v11 = vsub.f32 %v770_v7, %v774_v9 }
 0x163   : > { %v527_v12 = vrot.slane %v525_v11, 3 }
 0x165   : > { %v529_v13 = vmul.f32 %v527_v12, %v483_v10 }
 0x167   : > { %v530_v14 = vsel %vm464_vm2, %v529_v13, 0.0 }
 0x168   : > { %v531_v15 = vrot.slane %v530_v14, 4 }
 0x16a   : > { %v532_v16 = vadd.f32 %v531_v15, %v530_v14 }
 0x16c   : > { %v533_v17 = vrot.slane %v532_v16, 2 }
 0x16e   : > { %v534_v18 = vadd.f32 %v533_v17, %v532_v16 }
 0x170   : > { %v535_v19 = vrot.slane %v534_v18, 1 }
 0x172   : > { %v536_v20 = vadd.f32 %v535_v19, %v534_v18 }
 0x174   : > { %v537_v21 = vmax.f32 %v536_v20, 1e-09 }
 0x176   : > { %v538_v22 = vmin.f32 %v537_v21, 1.0 }
 0x178   : > { %539 = vst [vmem:[%s314_s28] sm:$0x1] %v538_v22 }
 0x179 PF: > { %s15_s22 = sadd.s32 1, %s813_s22   ;;  %s956_s18 = smov %s805_s20 }
 0x17a   : > { %p12_p8 = scmp.ge.s32.totalorder %s15_s22, 6   ;;  %s957_s19 = smov %s809_s21 }
 0x17b   : > { %s958_s20 = smov %s961_s23  ;;  %s959_s21 = smov %s965_s24 }
 0x17c   :  { %14 = sbr.rel (!%p12_p8) target bundleno = 3 (0x3), region = 76 }

// kernel: coding_hh_lossless_forward.10
= control target key start
LH: loop header
LB: loop body
LE: loop exit
PB: predicated region body
PF: predicated region fallthrough
CT: control target
= control target key end

     0   :  { %s5641_s15 = smov 0   ;;  %s5643_s16 = smov 0   ;;  %s7120_s0 = inlined_call_operand.vmem [shape: bf16[2,2,12,20,32], index: 0, kind: input, shape index: {}]   ;;  %s7121_s1 = inlined_call_operand.vmem [shape: bf16[13,32,32], index: 1, kind: input, shape index: {}]   ;;  %s7122_s2 = inlined_call_operand.vmem [shape: f32[1,32], index: 2, kind: input, shape index: {}]   ;;  %s7123_s3 = inlined_call_operand.vmem [shape: bf16[2,2,8,16,32], index: 3, kind: input, shape index: {}]   ;;  %s7124_s4 = inlined_call_operand.vmem [shape: bf16[2,2,8,16,32], index: 4, kind: output, shape index: {}]  }
   0x1   :  { %s5645_s17 = smov 0   ;;  %s5647_s18 = smov 0  }
   0x2   :  { %s5649_s19 = smov 0  }
   0x3 LB: > { %s23_s20 = sadd.s32 1, %s5606_s17  ;;  %s26_s21 = sadd.s32 1, %s5610_s18  ;;  %s5614_s19 = sphi %s5649_s19, %s14_s19   ;;  %s5610_s18 = sphi %s5647_s18, %s7194_s18   ;;  %s5606_s17 = sphi %s5645_s17, %s7193_s17   ;;  %s5602_s16 = sphi %s5643_s16, %s7192_s16   ;;  %s5598_s15 = sphi %s5641_s15, %s7191_s15  }
   0x4   : > { %p24_p0 = scmp.ge.s32.totalorder %s23_s20, 2  ;;  %p4365_p1 = scmp.ge.s32.totalorder %s5614_s19, 1 }
   0x5   : > { %p198_p2 = scmp.lt.s32.totalorder %s5614_s19, 5 }
   0x6   : > { %s7196_s20 = smov (%p24_p0, %s23_s20), 0  ;;  %s7198_s21 = smov (!%p24_p0, %s26_s21), %s5610_s18 }
   0x7   : > { %p199_p3 = pnand %p4365_p1, %p198_p2  ;;  %p28_p4 = scmp.ge.s32.totalorder %s7198_s21, 2 }
   0x9   : > { %s7200_s21 = smov (%p28_p4, %s7198_s21), 0  ;;  %202 = sbr.rel (%p199_p3) target bundleno = 511 (0x1ff), region = 36 }
  0x10   : > { %v5509_v0 = vld [vmem:[%s7121_s1 + $0x10] sm:$0xff]   ;;  %p241_p5 = scmp.lt.s32.totalorder %s5602_s16, 1  ;;  %v5510_v1 = vld [vmem:[%s7121_s1 + $0x60] sm:$0xff]   ;;  %p243_p6 = scmp.lt.s32.totalorder %s5598_s15, 1  ;;  %v5511_v2 = vld [vmem:[%s7121_s1 + $0x18] sm:$0xff]   ;;  %vm533_vm2 = vcmask 261120  }
  0x11   : > { %5011 = vmatprep.subr.bf16.mxu1 %v5509_v0  ;;  %5131 = vmatprep.subr.bf16.mxu0 %v5510_v1  ;;  %v5512_v3 = vld [vmem:[%s7121_s1 + $0x68] sm:$0xff]   ;;  %v5692_v4 = vld [vmem:[%s7121_s1] sm:$0xff]   ;;  %v5697_v5 = vld [vmem:[%s7121_s1 + $0x70] sm:$0xff]   ;;  %vm297_vm0 = vsmask.f32 3328  ;;  %v7149_v30 = vmov 0 }
  0x12   : > { %s7202_s16 = smov (!%p241_p5, %s5602_s16), 1  ;;  %5012 = vmatpush3.bf16.msra.mxu1 %v5509_v0  ;;  %s7204_s15 = smov (!%p243_p6, %s5598_s15), 1  ;;  %5132 = vmatpush3.bf16.msra.mxu0 %v5510_v1  ;;  %vm298_vm1 = vsmask.f32 7440  ;;  %vm852_vm4 = vcmask 1042432   ;;  %vm853_vm5 = vcmask 1046532  }
  0x13   : > { %5013 = vmatprep.subr.bf16.mxu1 %v5511_v2  ;;  %s5468_s30 = smul.u32 72, %s7202_s16  ;;  %5133 = vmatprep.subr.bf16.mxu0 %v5512_v3  ;;  %vm5735_vm3 = vmor %vm297_vm0, %vm298_vm1  ;;  %vm1097_vm7 = vsmask.f32 2304  ;;  %vm1098_vm8 = vsmask.f32 6416  ;;  %vm1486_vm10 = vcmask 1041408  }
  0x14   : > { %s5467_s5 = smul.u32 36, %s7204_s15  ;;  %v7150_v30 = vsel %vm5735_vm3, 4294967295, %v7149_v30  ;;  %vm5927_vm6 = vmor %vm852_vm4, %vm853_vm5  ;;  %vm1487_vm11 = vcmask 1045508   ;;  %vm4228_vm13 = vcmask 257024  }
  0x15   : > { %7151 = vst [vmem:[#allocation4_spill] sm:$0xff] %v7150_v30  ;;  %vm6147_vm9 = vmor %vm1097_vm7, %vm1098_vm8 }
  0x16   : > { %5014 = vmatpush3.bf16.msra.mxu1 %v5511_v2  ;;  %s247_s8 = sadd.s32 %s5468_s30, %s5467_s5  ;;  %5134 = vmatpush3.bf16.msra.mxu0 %v5512_v3  ;;  %vm6381_vm12 = vmor %vm1486_vm10, %vm1487_vm11  ;;  %s4368_s30 = sshll.u32 %s7202_s16, 5 }
  0x17   : > { %s4366_s11 = sshll.u32 %s247_s8, 2  ;;  %5031 = vmatprep.subr.bf16.mxu1 %v5692_v4  ;;  %5151 = vmatprep.subr.bf16.mxu0 %v5697_v5 }
  0x18   : > { %s5703_s14 = scalar_lea.vmem %s7120_s0, %s4366_s11 }
  0x19   : > { %v5707_v6 = vld [vmem:[%s5703_s14] sm:$0xf]  ;;  %v5710_v7 = vld [vmem:[%s5703_s14 + $0x4] sm:$0xf]  ;;  %v5713_v8 = vld [vmem:[%s5703_s14 + $0x8] sm:$0x1] }
  0x1a   : > { %v301_v9 = vshrl.u32 %v5707_v6, 16  ;;  %v304_v10 = vshll.u32 %v5707_v6, 16  ;;  %v310_v11 = vshll.u32 %v5710_v7, 16  ;;  %v314_v12 = vshrl.u32 %v5710_v7, 16  ;;  %v4533_v13 = vld [vmem:[%s5703_s14 + $0xc] sm:$0xf] }
  0x1b   : > { %v320_v14 = vshll.u32 %v5713_v8, 16  ;;  %v5723_v16 = vld [vmem:[%s5703_s14 + $0x10] sm:$0xf]  ;;  %v5726_v21 = vld [vmem:[%s5703_s14 + $0x14] sm:$0x1]  ;;  %v1959_v25 = vshrl.u32 %v4533_v13, 16 }
  0x1c   : > { %v303_v17 = vrot.slane %v301_v9, 4  ;;  %v306_v18 = vrot.slane %v304_v10, 5  ;;  %v312_v19 = vrot.slane %v310_v11, 5  ;;  %v316_v20 = vrot.slane %v314_v12, 4  ;;  %v5743_v35 = vld [vmem:[%s5703_s14 + $0xc] sm:$0xf] }
  0x1d   : > { %v322_v22 = vrot.slane %v320_v14, 5  ;;  %v5728_v23 = vrot.slane %v314_v12, 5  ;;  %v5730_v24 = vrot.slane %v310_v11, 6  ;;  %v1962_v28 = vshll.u32 %v4533_v13, 16  ;;  %v5746_v40 = vld [vmem:[%s5703_s14 + $0x10] sm:$0xf] }
  0x1e   : > { %v307_v26 = vor.u32 %v306_v18, %v303_v17  ;;  %v317_v27 = vor.u32 %v316_v20, %v312_v19  ;;  %v1968_v29 = vshll.u32 %v5723_v16, 16  ;;  %v1961_v31 = vrot.slane %v1959_v25, 4  ;;  %v5753_v45 = vld [vmem:[%s5703_s14 + $0x14] sm:$0x1]  ;;  %v4536_v58 = vld [vmem:[%s5703_s14 + $0x18] sm:$0xf] }
  0x1f   : > { %7147 = vst [vmem:[#allocation2_spill] sm:$0xff] %v5728_v23  ;;  %7148 = vst [vmem:[#allocation3_spill] sm:$0xff] %v5730_v24  ;;  %v1972_v32 = vshrl.u32 %v5723_v16, 16  ;;  %v1978_v33 = vshll.u32 %v5726_v21, 16  ;;  %v2365_v34 = vrot.slane %v5726_v21, 5  ;;  %v1964_v38 = vrot.slane %v1962_v28, 5 }
  0x20   : > { %v308_v36 = vrot.slane %v307_v26, 4  ;;  %v318_v37 = vrot.slane %v317_v27, 4  ;;  %v1970_v39 = vrot.slane %v1968_v29, 5  ;;  %v5750_v44 = vrot.slane %v1968_v29, 6  ;;  %v5768_v63 = vld [vmem:[%s5703_s14 + $0x1c] sm:$0xf] }
  0x21   : > { %v1974_v41 = vrot.slane %v1972_v32, 4  ;;  %v1980_v42 = vrot.slane %v1978_v33, 5  ;;  %v5748_v43 = vrot.slane %v1972_v32, 5  ;;  %v1965_v48 = vor.u32 %v1964_v38, %v1961_v31  ;;  %v5775_v12 = vld [vmem:[%s5703_s14 + $0x20] sm:$0x1] }
  0x22   : > { %v313_v46 = vsel %vm5735_vm3, %v308_v36, %v312_v19  ;;  %v323_v47 = vsel %vm5735_vm3, %v318_v37, %v322_v22  ;;  %v325_v49 = vshrl.u32 %v5743_v35, 16  ;;  %v328_v52 = vshll.u32 %v5743_v35, 16  ;;  %v5784_v32 = vld [vmem:[%s5703_s14 + $0x18] sm:$0xf]  ;;  %v5923_v36 = vld [vmem:[%s5703_s14 + $0x40] sm:$0xf] }
  0x23   : > { %v4377_v50 = vcombine.low %v313_v46, %v323_v47  ;;  %v1975_v51 = vor.u32 %v1974_v41, %v1970_v39  ;;  %v334_v53 = vshll.u32 %v5746_v40, 16  ;;  %v1966_v54 = vrot.slane %v1965_v48, 4  ;;  %v5796_v48 = vld [vmem:[%s5703_s14 + $0x20] sm:$0x1]  ;;  %v5946_v62 = vld [vmem:[%s5703_s14 + $0x18] sm:$0xe] }
  0x24   : > { %v327_v55 = vrot.slane %v325_v49, 4  ;;  %v338_v56 = vshrl.u32 %v5746_v40, 16  ;;  %v344_v57 = vshll.u32 %v5753_v45, 16  ;;  %v330_v60 = vrot.slane %v328_v52, 5  ;;  %v6082_v24 = vld [vmem:[%s5703_s14 + $0x64] sm:$0xf] }
  0x25   : > { %5015 = vmatprep.mubr.msk.bf16.mxu1 %vm533_vm2, %v4377_v50  ;;  %v1976_v59 = vrot.slane %v1975_v51, 4  ;;  %v336_v61 = vrot.slane %v334_v53, 5  ;;  %v1971_v0 = vsel %vm5735_vm3, %v1966_v54, %v1970_v39  ;;  %v1133_v11 = vrot.slane %v334_v53, 6  ;;  %v5791_v39 = vld [vmem:[%s5703_s14 + $0x1c] sm:$0xf]  ;;  %v5516_v53 = vld [vmem:[%s7121_s1 + $0x8] sm:$0xff]  }
  0x26   : > { %v340_v1 = vrot.slane %v338_v56, 4  ;;  %v346_v2 = vrot.slane %v344_v57, 5  ;;  %v1132_v3 = vrot.slane %v338_v56, 5  ;;  %v331_v10 = vor.u32 %v330_v60, %v327_v55 }
  0x27   : > { %v1981_v9 = vsel %vm5735_vm3, %v1976_v59, %v1980_v42  ;;  %v1983_v13 = vshrl.u32 %v4536_v58, 16  ;;  %v1986_v18 = vshll.u32 %v4536_v58, 16  ;;  %v1992_v19 = vshll.u32 %v5768_v63, 16  ;;  %v4539_v58 = vld [vmem:[%s5703_s14 + $0x24] sm:$0xf] }
  0x28   : > { %v4561_v14 = vcombine.low %v1971_v0, %v1981_v9  ;;  %v341_v17 = vor.u32 %v340_v1, %v336_v61  ;;  %v332_v20 = vrot.slane %v331_v10, 4  ;;  %v5778_v22 = vor.u32 %v1133_v11, %v1132_v3  ;;  %v5811_v1 = vld [vmem:[%s5703_s14 + $0x28] sm:$0xf]  ;;  %v5821_v11 = vld [vmem:[%s5703_s14 + $0x2c] sm:$0x1] }
  0x29   : > { %v1985_v25 = vrot.slane %v1983_v13, 4  ;;  %v1996_v26 = vshrl.u32 %v5768_v63, 16  ;;  %v1988_v28 = vrot.slane %v1986_v18, 5  ;;  %v1994_v29 = vrot.slane %v1992_v19, 5  ;;  %v5827_v18 = vld [vmem:[%s5703_s14 + $0x24] sm:$0xf] }
  0x2a   : > { %7152 = vst [vmem:[#allocation5_spill] sm:$0xff] %v5778_v22  ;;  %5135 = vmatprep.mubr.msk.bf16.mxu0 %vm533_vm2, %v4561_v14  ;;  %v342_v27 = vrot.slane %v341_v17, 4  ;;  %v2002_v31 = vshll.u32 %v5775_v12, 16  ;;  %v337_v33 = vsel %vm5735_vm3, %v332_v20, %v336_v61  ;;  %v2372_v38 = vrot.slane %v5775_v12, 5  ;;  %v6053_v14 = vld [vmem:[%s5703_s14 + $0x4c] sm:$0xf] }
  0x2b   : > { %v1998_v37 = vrot.slane %v1996_v26, 4  ;;  %v1989_v42 = vor.u32 %v1988_v28, %v1985_v25  ;;  %v2634_v47 = vrot.slane %v1996_v26, 5  ;;  %v2635_v51 = vrot.slane %v1992_v19, 6  ;;  %v5832_v19 = vld [vmem:[%s7121_s1 + $0x20] sm:$0xff]   ;;  %v5515_v28 = vld [vmem:[%s7121_s1 + $0x78] sm:$0xff]  }
  0x2c   : > { %v347_v41 = vsel %vm5735_vm3, %v342_v27, %v346_v2  ;;  %v2004_v46 = vrot.slane %v2002_v31, 5  ;;  %v349_v52 = vshrl.u32 %v5784_v32, 16  ;;  %v352_v55 = vshll.u32 %v5784_v32, 16 }
  0x2d   : > { %v4378_v49 = vcombine.low %v337_v33, %v347_v41  ;;  %v1999_v50 = vor.u32 %v1998_v37, %v1994_v29  ;;  %v1990_v54 = vrot.slane %v1989_v42, 4  ;;  %v7127_v56 = vshll.u32 %v5791_v39, 16  ;;  %v5841_v41 = vld [vmem:[%s5703_s14 + $0x28] sm:$0xf] }
  0x2e   : > { %v7130_v57 = vshrl.u32 %v5791_v39, 16  ;;  %v5807_v60 = vor.u32 %v2635_v51, %v2634_v47  ;;  %v351_v61 = vrot.slane %v349_v52, 4  ;;  %v368_v0 = vshll.u32 %v5796_v48, 16 }
  0x2f   : > { %5016 = vmatmul.mubr.msk.bf16.vlgmr.msra.gmra.mrb[0].mxu1 %vm533_vm2, %v4378_v49  ;;  %v2000_v59 = vrot.slane %v1999_v50, 4  ;;  %v1995_v2 = vsel %vm5735_vm3, %v1990_v54, %v1994_v29  ;;  %v354_v3 = vrot.slane %v352_v55, 5  ;;  %v360_v9 = vrot.slane %v7127_v56, 5  ;;  %v5845_v49 = vld [vmem:[%s5703_s14 + $0x2c] sm:$0x1] }
  0x30   : > { %5032 = vmatpush3.bf16.msra.mxu1 %v5692_v4  ;;  %v364_v10 = vrot.slane %v7130_v57, 4  ;;  %v370_v17 = vrot.slane %v368_v0, 5  ;;  %v2007_v4 = vshrl.u32 %v4539_v58, 16  ;;  %v2010_v27 = vshll.u32 %v4539_v58, 16  ;;  %v4542_v58 = vld [vmem:[%s5703_s14 + $0x30] sm:$0xf] }
  0x31   : > { %v2005_v13 = vsel %vm5735_vm3, %v2000_v59, %v2004_v46  ;;  %5033 = vmatprep.subr.bf16.mxu1 %v5516_v53  ;;  %v355_v25 = vor.u32 %v354_v3, %v351_v61  ;;  %v7139_v31 = vshll.u32 %v5811_v1, 16  ;;  %v7140_v33 = vshrl.u32 %v5811_v1, 16  ;;  %v5863_v0 = vld [vmem:[%s7121_s1 + $0x80] sm:$0xff]  }
  0x32   : > { %v4562_v20 = vcombine.low %v1995_v2, %v2005_v13  ;;  %v365_v26 = vor.u32 %v364_v10, %v360_v9  ;;  %v2009_v29 = vrot.slane %v2007_v4, 4  ;;  %v2026_v37 = vshll.u32 %v5821_v11, 16  ;;  %v5867_v4 = vld [vmem:[%s5703_s14 + $0x34] sm:$0xf] }
  0x33   : > { %v356_v42 = vrot.slane %v355_v25, 4  ;;  %v2012_v47 = vrot.slane %v2010_v27, 5  ;;  %v373_v50 = vshrl.u32 %v5827_v18, 16  ;;  %v2018_v51 = vrot.slane %v7139_v31, 5  ;;  %v5872_v25 = vld [vmem:[%s5703_s14 + $0x38] sm:$0x1] }
  0x34   : > { %5136 = vmatmul.mubr.msk.bf16.vlgmr.msra.gmra.mrb[0].mxu0 %vm533_vm2, %v4562_v20  ;;  %v366_v46 = vrot.slane %v365_v26, 4  ;;  %5034 = vmatpush3.bf16.msra.mxu1 %v5516_v53  ;;  %v2022_v52 = vrot.slane %v7140_v33, 4  ;;  %v2028_v54 = vrot.slane %v2026_v37, 5  ;;  %v376_v55 = vshll.u32 %v5827_v18, 16  ;;  %v4553_v33 = vld [vmem:[%s5703_s14 + $0x5c] sm:$0x1] }
  0x35   : > { %5152 = vmatpush3.bf16.msra.mxu0 %v5697_v5  ;;  %5051 = vmatprep.subr.bf16.mxu1 %v5832_v19  ;;  %v361_v59 = vsel %vm5735_vm3, %v356_v42, %v360_v9  ;;  %v2013_v53 = vor.u32 %v2012_v47, %v2009_v29  ;;  %v375_v61 = vrot.slane %v373_v50, 4  ;;  %v7125_v13 = vshll.u32 %v5841_v41, 16 }
  0x36   : > { %v371_v5 = vsel %vm5735_vm3, %v366_v46, %v370_v17  ;;  %5153 = vmatprep.subr.bf16.mxu0 %v5515_v28  ;;  %v2023_v3 = vor.u32 %v2022_v52, %v2018_v51  ;;  %v378_v10 = vrot.slane %v376_v55, 5  ;;  %v7126_v17 = vshrl.u32 %v5841_v41, 16  ;;  %v5878_v46 = vld [vmem:[%s5703_s14 + $0x30] sm:$0xf] }
  0x37   : > { %v4379_v2 = vcombine.low %v361_v59, %v371_v5  ;;  %v2014_v9 = vrot.slane %v2013_v53, 4  ;;  %v392_v20 = vshll.u32 %v5845_v49, 16  ;;  %v2031_v26 = vshrl.u32 %v4542_v58, 16 }
  0x38   : > { %v2024_v27 = vrot.slane %v2023_v3, 4  ;;  %v379_v29 = vor.u32 %v378_v10, %v375_v61  ;;  %v384_v37 = vrot.slane %v7125_v13, 5  ;;  %v2034_v42 = vshll.u32 %v4542_v58, 16  ;;  %v5891_v3 = vld [vmem:[%s5703_s14 + $0x34] sm:$0xf] }
  0x39   : > { %5019 = vmatprep.mubr.msk.bf16.mxu1 %vm533_vm2, %v4379_v2  ;;  %5154 = vmatpush3.bf16.msra.mxu0 %v5515_v28  ;;  %v2019_v47 = vsel %vm5735_vm3, %v2014_v9, %v2018_v51  ;;  %v388_v50 = vrot.slane %v7126_v17, 4  ;;  %v394_v52 = vrot.slane %v392_v20, 5  ;;  %v2033_v55 = vrot.slane %v2031_v26, 4  ;;  %v5898_v20 = vld [vmem:[%s5703_s14 + $0x38] sm:$0x1] }
  0x3a   : > { %5171 = vmatprep.subr.bf16.mxu0 %v5863_v0  ;;  %v2029_v59 = vsel %vm5735_vm3, %v2024_v27, %v2028_v54  ;;  %v380_v5 = vrot.slane %v379_v29, 4  ;;  %v2036_v58 = vrot.slane %v2034_v42, 5  ;;  %v7131_v28 = vshll.u32 %v5867_v4, 16 }
  0x3b   : > { %v4563_v53 = vcombine.low %v2019_v47, %v2029_v59  ;;  %v389_v61 = vor.u32 %v388_v50, %v384_v37  ;;  %v7136_v2 = vshrl.u32 %v5867_v4, 16  ;;  %v2050_v51 = vshll.u32 %v5872_v25, 16 }
  0x3c   : > { %v385_v10 = vsel %vm5735_vm3, %v380_v5, %v384_v37  ;;  %v2037_v9 = vor.u32 %v2036_v58, %v2033_v55  ;;  %v2042_v54 = vrot.slane %v7131_v28, 5  ;;  %v397_v26 = vshrl.u32 %v5878_v46, 16  ;;  %v5908_v5 = vld [vmem:[%s5703_s14 + $0xc] sm:$0xe] }
  0x3d   : > { %5139 = vmatprep.mubr.msk.bf16.mxu0 %vm533_vm2, %v4563_v53  ;;  %v390_v27 = vrot.slane %v389_v61, 4  ;;  %v2046_v29 = vrot.slane %v7136_v2, 4  ;;  %v2052_v42 = vrot.slane %v2050_v51, 5  ;;  %v400_v47 = vshll.u32 %v5878_v46, 16  ;;  %v5914_v51 = vld [vmem:[%s5703_s14 + $0x3c] sm:$0xf] }
  0x3e   : > { %v2038_v37 = vrot.slane %v2037_v9, 4  ;;  %v399_v50 = vrot.slane %v397_v26, 4  ;;  %v7128_v55 = vshll.u32 %v5891_v3, 16  ;;  %v7129_v59 = vshrl.u32 %v5891_v3, 16  ;;  %v6014_v2 = vld [vmem:[%s5703_s14 + $0x30] sm:$0xe] }
  0x3f   : > { %v395_v58 = vsel %vm5735_vm3, %v390_v27, %v394_v52  ;;  %v2047_v53 = vor.u32 %v2046_v29, %v2042_v54  ;;  %v402_v61 = vrot.slane %v400_v47, 5  ;;  %v416_v13 = vshll.u32 %v5898_v20, 16 }
  0x40   : > { %v4380_v17 = vcombine.low %v385_v10, %v395_v58  ;;  %v2043_v9 = vsel %vm5735_vm3, %v2038_v37, %v2042_v54  ;;  %v408_v26 = vrot.slane %v7128_v55, 5  ;;  %v412_v56 = vrot.slane %v7129_v59, 4  ;;  %v5935_v58 = vld [vmem:[%s5703_s14 + $0x44] sm:$0x1] }
  0x41   : > { %v2048_v52 = vrot.slane %v2047_v53, 4  ;;  %v403_v27 = vor.u32 %v402_v61, %v399_v50  ;;  %v418_v29 = vrot.slane %v416_v13, 5  ;;  %v4587_v10 = vrot.slane %v5908_v5, 9 }
  0x42   : > { %5020 = vmatmul.mubr.msk.bf16.gmra.mrb[4].mxu1 %vm533_vm2, %v4380_v17  ;;  %v413_v54 = vor.u32 %v412_v56, %v408_v26  ;;  %v2362_v37 = vrot.slane %v5723_v16, 5  ;;  %v421_v50 = vshrl.u32 %v5914_v51, 16  ;;  %v424_v13 = vshll.u32 %v5914_v51, 16 }
  0x43   : > { %v2053_v53 = vsel %vm5735_vm3, %v2048_v52, %v2052_v42  ;;  %v404_v61 = vrot.slane %v403_v27, 4  ;;  %v7132_v55 = vshll.u32 %v5923_v36, 16  ;;  %v7135_v59 = vshrl.u32 %v5923_v36, 16  ;;  %v5953_v27 = vld [vmem:[%s5703_s14 + $0x48] sm:$0xf] }
  0x44   : > { %v4564_v17 = vcombine.low %v2043_v9, %v2053_v53  ;;  %v414_v56 = vrot.slane %v413_v54, 4  ;;  %v2363_v16 = vsel %vm5927_vm6, %v4587_v10, %v2362_v37  ;;  %v2364_v57 = vrot.slane %v2362_v37, 4  ;;  %v5966_v37 = vld [vmem:[%s5703_s14 + $0x4c] sm:$0xf] }
  0x45   : > { %v409_v15 = vsel %vm5735_vm3, %v404_v61, %v408_v26  ;;  %v423_v28 = vrot.slane %v421_v50, 4  ;;  %v426_v42 = vrot.slane %v424_v13, 5  ;;  %v432_v52 = vrot.slane %v7132_v55, 5  ;;  %v5991_v55 = vld [vmem:[%s5703_s14 + $0x54] sm:$0xf] }
  0x46   : > { %5140 = vmatmul.mubr.msk.bf16.gmra.mrb[4].mxu0 %vm533_vm2, %v4564_v17  ;;  %v419_v9 = vsel %vm5735_vm3, %v414_v56, %v418_v29  ;;  %v2366_v10 = vsel %vm5927_vm6, %v2364_v57, %v2365_v34  ;;  %v436_v26 = vrot.slane %v7135_v59, 4  ;;  %v440_v54 = vshll.u32 %v5935_v58, 16  ;;  %v5970_v17 = vld [vmem:[%s5703_s14 + $0x50] sm:$0x1]  ;;  %v5975_v57 = vld [vmem:[%s5703_s14 + $0x24] sm:$0xe] }
  0x47   : > { %v4381_v50 = vcombine.low %v409_v15, %v419_v9  ;;  %v4599_v13 = vcombine.low %v2363_v16, %v2366_v10  ;;  %v427_v53 = vor.u32 %v426_v42, %v423_v28  ;;  %v4588_v61 = vrot.slane %v5946_v62, 9  ;;  %7155 = vst [vmem:[#allocation6_spill] sm:$0xff] %v5970_v17  ;;  %v6005_v59 = vld [vmem:[%s5703_s14 + $0x5c] sm:$0x1] }
  0x48   : > { %v437_v29 = vor.u32 %v436_v26, %v432_v52  ;;  %v442_v56 = vrot.slane %v440_v54, 5  ;;  %v2369_v21 = vrot.slane %v5768_v63, 5  ;;  %v445_v34 = vshrl.u32 %v5953_v27, 16  ;;  %7156 = vst [vmem:[#allocation7_spill] sm:$0xff] %v6005_v59 }
  0x49   : > { %5023 = vmatprep.mubr.msk.bf16.mxu1 %vm533_vm2, %v4381_v50  ;;  %5155 = vmatprep.mubr.msk.bf16.mxu0 %vm533_vm2, %v4599_v13  ;;  %v428_v15 = vrot.slane %v427_v53, 4  ;;  %v448_v28 = vshll.u32 %v5953_v27, 16  ;;  %v7133_v16 = vshll.u32 %v5966_v37, 16  ;;  %v7134_v42 = vshrl.u32 %v5966_v37, 16 }
  0x4a   : > { %v438_v9 = vrot.slane %v437_v29, 4  ;;  %v2370_v63 = vsel %vm5927_vm6, %v4588_v61, %v2369_v21  ;;  %v2371_v10 = vrot.slane %v2369_v21, 4  ;;  %v447_v26 = vrot.slane %v445_v34, 4  ;;  %v6002_v34 = vld [vmem:[%s5703_s14 + $0x58] sm:$0xf] }
  0x4b   : > { %v433_v54 = vsel %vm5735_vm3, %v428_v15, %v432_v52  ;;  %v450_v50 = vrot.slane %v448_v28, 5  ;;  %v456_v13 = vrot.slane %v7133_v16, 5  ;;  %v460_v53 = vrot.slane %v7134_v42, 4 }
  0x4c   : > { %v443_v29 = vsel %vm5735_vm3, %v438_v9, %v442_v56  ;;  %v2373_v61 = vsel %vm5927_vm6, %v2371_v10, %v2372_v38  ;;  %v464_v52 = vshll.u32 %v5970_v17, 16  ;;  %v4589_v21 = vrot.slane %v5975_v57, 9  ;;  %v5520_v56 = vld [vmem:[%s7121_s1 + $0x88] sm:$0xff]  }
  0x4d   : > { %v4382_v15 = vcombine.low %v433_v54, %v443_v29  ;;  %v4600_v28 = vcombine.low %v2370_v63, %v2373_v61  ;;  %v451_v16 = vor.u32 %v450_v50, %v447_v26  ;;  %v461_v42 = vor.u32 %v460_v53, %v456_v13 }
  0x4e   : > { %v466_v12 = vrot.slane %v464_v52, 5  ;;  %v2376_v9 = vrot.slane %v5811_v1, 5  ;;  %v2379_v38 = vrot.slane %v5821_v11, 5  ;;  %v469_v10 = vshrl.u32 %v5991_v55, 16  ;;  %v6027_v52 = vld [vmem:[%s7121_s1 + $0x90] sm:$0xff]  }
  0x4f   : > { %5024 = vmatmul.mubr.msk.bf16.gmra.mrb[8].mxu1 %vm533_vm2, %v4382_v15  ;;  %5156 = vmatmul.mubr.msk.bf16.vlgmr.msra.gmra.mrb[0].mxu0 %vm533_vm2, %v4600_v28  ;;  %v452_v63 = vrot.slane %v451_v16, 4  ;;  %v462_v26 = vrot.slane %v461_v42, 4  ;;  %v472_v54 = vshll.u32 %v5991_v55, 16  ;;  %v7137_v50 = vshll.u32 %v6002_v34, 16  ;;  %v6036_v15 = vld [vmem:[%s5703_s14 + $0x3c] sm:$0xe] }
  0x50   : > { %5172 = vmatpush3.bf16.msra.mxu0 %v5863_v0  ;;  %v2377_v11 = vsel %vm5927_vm6, %v4589_v21, %v2376_v9  ;;  %v2378_v53 = vrot.slane %v2376_v9, 4  ;;  %v471_v29 = vrot.slane %v469_v10, 4  ;;  %v7138_v61 = vshrl.u32 %v6002_v34, 16 }
  0x51   : > { %v457_v16 = vsel %vm5735_vm3, %v452_v63, %v456_v13  ;;  %v467_v0 = vsel %vm5735_vm3, %v462_v26, %v466_v12  ;;  %v474_v42 = vrot.slane %v472_v54, 5  ;;  %v480_v21 = vrot.slane %v7137_v50, 5  ;;  %5173 = vmatprep.subr.bf16.mxu0 %v5520_v56  ;;  %v6044_v12 = vld [vmem:[%s5703_s14 + $0x40] sm:$0xf] }
  0x52   : > { %v4383_v28 = vcombine.low %v457_v16, %v467_v0  ;;  %v2380_v9 = vsel %vm5927_vm6, %v2378_v53, %v2379_v38  ;;  %v484_v13 = vrot.slane %v7138_v61, 4  ;;  %v488_v10 = vshll.u32 %v6005_v59, 16  ;;  %v4547_v16 = vld [vmem:[%s5703_s14 + $0x44] sm:$0x1] }
  0x53   : > { %v4601_v63 = vcombine.low %v2377_v11, %v2380_v9  ;;  %v475_v26 = vor.u32 %v474_v42, %v471_v29  ;;  %v4590_v54 = vrot.slane %v6014_v2, 9  ;;  %v2383_v50 = vrot.slane %v5867_v4, 5  ;;  %v6056_v11 = vld [vmem:[%s5703_s14 + $0x50] sm:$0x1]  ;;  %v6059_v29 = vld [vmem:[%s5703_s14 + $0x48] sm:$0xe] }
  0x54   : > { %5027 = vmatprep.mubr.msk.bf16.mxu1 %vm533_vm2, %v4383_v28  ;;  %v485_v0 = vor.u32 %v484_v13, %v480_v21  ;;  %v490_v38 = vrot.slane %v488_v10, 5  ;;  %v2386_v53 = vrot.slane %v5872_v25, 5  ;;  %v4591_v61 = vrot.slane %v6036_v15, 9  ;;  %5174 = vmatpush3.bf16.msra.mxu0 %v5520_v56  ;;  %v6066_v13 = vld [vmem:[%s5703_s14 + $0x58] sm:$0xf] }
  0x55   : > { %5159 = vmatprep.mubr.msk.bf16.mxu0 %vm533_vm2, %v4601_v63  ;;  %v476_v42 = vrot.slane %v475_v26, 4  ;;  %v2384_v28 = vsel %vm5927_vm6, %v4590_v54, %v2383_v50  ;;  %v2385_v9 = vrot.slane %v2383_v50, 4  ;;  %v2390_v25 = vrot.slane %v6044_v12, 5  ;;  %5191 = vmatprep.subr.bf16.mxu0 %v6027_v52  ;;  %v6073_v63 = vld [vmem:[%s5703_s14 + $0x54] sm:$0xe] }
  0x56   : > { %v486_v10 = vrot.slane %v485_v0, 4  ;;  %v4395_v31 = vcombine.low %v5707_v6, %v5710_v7  ;;  %v2393_v56 = vrot.slane %v4547_v16, 5  ;;  %v4396_v0 = vcombine.low %v5743_v35, %v5746_v40 }
  0x57   : > { %v481_v26 = vsel %vm5735_vm3, %v476_v42, %v480_v21  ;;  %v2387_v50 = vsel %vm5927_vm6, %v2385_v9, %v2386_v53  ;;  %v2391_v54 = vsel %vm5927_vm6, %v4591_v61, %v2390_v25  ;;  %v2392_v22 = vrot.slane %v2390_v25, 4  ;;  %v6090_v21 = vld [vmem:[%s5703_s14 + $0x60] sm:$0xe] }
  0x58   : > { %v491_v6 = vsel %vm5735_vm3, %v486_v10, %v490_v38  ;;  %v4602_v16 = vcombine.low %v2384_v28, %v2387_v50  ;;  %v4592_v23 = vrot.slane %v6059_v29, 9  ;;  %v2397_v42 = vrot.slane %v6053_v14, 5  ;;  %v4556_v10 = vld [vmem:[%s5703_s14 + $0x68] sm:$0x1] }
  0x59   : > { %v4384_v53 = vcombine.low %v481_v26, %v491_v6  ;;  %v2394_v61 = vsel %vm5927_vm6, %v2392_v22, %v2393_v56  ;;  %v2400_v9 = vrot.slane %v6056_v11, 5  ;;  %v4397_v28 = vcombine.low %v5784_v32, %v5791_v39 }
  0x5a   : > { %5160 = vmatmul.mubr.msk.bf16.gmra.mrb[4].mxu0 %vm533_vm2, %v4602_v16  ;;  %v4603_v38 = vcombine.low %v2391_v54, %v2394_v61  ;;  %v4593_v35 = vrot.slane %v6073_v63, 9  ;;  %v2404_v25 = vrot.slane %v6066_v13, 5  ;;  %v2398_v22 = vsel %vm5927_vm6, %v4592_v23, %v2397_v42  ;;  %v6118_v61 = vld [vmem:[%s5703_s14 + $0x14] sm:$0x3] }
  0x5b   : > { %5028 = vmatmul.mubr.msk.bf16.gmra.mrb[12].mxu1 %vm533_vm2, %v4384_v53  ;;  %v2399_v56 = vrot.slane %v2397_v42, 4  ;;  %v2407_v26 = vrot.slane %v4553_v33, 5  ;;  %v4594_v6 = vrot.slane %v6090_v21, 9  ;;  %v2411_v16 = vrot.slane %v6082_v24, 5 }
  0x5c   : > { %5035 = vmatprep.mubr.msk.bf16.mxu1 %vm533_vm2, %v4395_v31  ;;  %5163 = vmatprep.mubr.msk.bf16.mxu0 %vm533_vm2, %v4603_v38  ;;  %v2405_v32 = vsel %vm5927_vm6, %v4593_v35, %v2404_v25  ;;  %v2406_v54 = vrot.slane %v2404_v25, 4  ;;  %v2414_v33 = vrot.slane %v4556_v10, 5  ;;  %v6125_v25 = vld [vmem:[%s5703_s14 + $0x20] sm:$0x3]  ;;  %v2606_v10 = vshll.u32 %v5908_v5, 16 }
  0x5d   : > { %v2401_v23 = vsel %vm5927_vm6, %v2399_v56, %v2400_v9  ;;  %v2412_v38 = vsel %vm5927_vm6, %v4594_v6, %v2411_v16  ;;  %v2413_v35 = vrot.slane %v2411_v16, 4  ;;  %v2603_v9 = vshrl.u32 %v5908_v5, 16 }
  0x5e   : > { %v4604_v31 = vcombine.low %v2398_v22, %v2401_v23  ;;  %v2408_v42 = vsel %vm5927_vm6, %v2406_v54, %v2407_v26  ;;  %v2613_v56 = vor.u32 %v5750_v44, %v5748_v43  ;;  %v2617_v23 = vshrl.u32 %v6118_v61, 16 }
  0x5f   : > { %v4605_v50 = vcombine.low %v2405_v32, %v2408_v42  ;;  %v2415_v22 = vsel %vm5927_vm6, %v2413_v35, %v2414_v33  ;;  %v2620_v26 = vshll.u32 %v6118_v61, 16  ;;  %v5525_v32 = vld [vmem:[%s7121_s1 + $0x28] sm:$0xff]   ;;  %v2605_v16 = vrot.slane %v2603_v9, 5 }
  0x60   : > { %v4606_v6 = vcombine.low %v2412_v38, %v2415_v22  ;;  %v2608_v5 = vrot.slane %v2606_v10, 6  ;;  %v2615_v42 = vrot.slane %v2613_v56, 4  ;;  %v2619_v43 = vrot.slane %v2617_v23, 5  ;;  %v6158_v23 = vld [vmem:[%s5703_s14 + $0x2c] sm:$0x3] }
  0x61   : > { %v2622_v44 = vrot.slane %v2620_v26, 6  ;;  %v2626_v33 = vshrl.u32 %v5946_v62, 16  ;;  %v2629_v35 = vshll.u32 %v5946_v62, 16  ;;  %v2643_v10 = vshll.u32 %v6125_v25, 16 }
  0x62   : > { %5164 = vmatmul.mubr.msk.bf16.gmra.mrb[8].mxu0 %vm533_vm2, %v4604_v31  ;;  %v2609_v9 = vor.u32 %v2608_v5, %v2605_v16  ;;  %v2640_v31 = vshrl.u32 %v6125_v25, 16  ;;  %v2649_v26 = vshrl.u32 %v5975_v57, 16  ;;  %v6164_v16 = vld [vmem:[%s7121_s1 + $0x30] sm:$0xff]   ;;  %v2663_v17 = vshrl.u32 %v6158_v23, 16 }
  0x63   : > { %5036 = vmatmul.mubr.msk.bf16.vlgmr.msra.gmra.mrb[0].mxu1 %vm533_vm2, %v4396_v0  ;;  %5167 = vmatprep.mubr.msk.bf16.mxu0 %vm533_vm2, %v4605_v50  ;;  %v2623_v62 = vor.u32 %v2622_v44, %v2619_v43  ;;  %v2628_v0 = vrot.slane %v2626_v33, 5  ;;  %v2631_v50 = vrot.slane %v2629_v35, 6  ;;  %v2645_v22 = vrot.slane %v2643_v10, 6 }
  0x64   : > { %5052 = vmatpush3.bf16.msra.mxu1 %v5832_v19  ;;  %5039 = vmatprep.mubr.msk.bf16.mxu1 %vm533_vm2, %v4397_v28  ;;  %v2610_v5 = vrot.slane %v2609_v9, 4  ;;  %v2642_v54 = vrot.slane %v2640_v31, 5  ;;  %v2652_v19 = vshll.u32 %v5975_v57, 16  ;;  %v2651_v44 = vrot.slane %v2649_v26, 5 }
  0x65   : > { %5053 = vmatprep.subr.bf16.mxu1 %v5525_v32  ;;  %v2624_v28 = vsel %vm6147_vm9, %v2615_v42, %v2623_v62  ;;  %v2632_v43 = vor.u32 %v2631_v50, %v2628_v0  ;;  %v7159_v33 = vshrl.u32 %v5811_v1, 16  ;;  %v7160_v9 = vshll.u32 %v5811_v1, 16  ;;  %v6178_v62 = vld [vmem:[%s5703_s14 + $0x38] sm:$0x3] }
  0x66   : > { %v2614_v53 = vsel %vm6147_vm9, %v2610_v5, %v2613_v56  ;;  %v2646_v30 = vor.u32 %v2645_v22, %v2642_v54  ;;  %v2654_v59 = vrot.slane %v2652_v19, 6  ;;  %v2666_v42 = vshll.u32 %v6158_v23, 16  ;;  %v6187_v22 = vld [vmem:[%s5703_s14] sm:$0xe] }
  0x67   : > { %v2657_v35 = vrot.slane %v7159_v33, 5  ;;  %v2658_v31 = vrot.slane %v7160_v9, 6  ;;  %v4629_v10 = vcombine.low %v2614_v53, %v2624_v28  ;;  %v2633_v57 = vrot.slane %v2632_v43, 4 }
  0x68   : > { %5054 = vmatpush3.bf16.msra.mxu1 %v5525_v32  ;;  %v7161_v0 = vrot.slane %v5807_v60, 4  ;;  %v2655_v56 = vor.u32 %v2654_v59, %v2651_v44  ;;  %v4402_v1 = vcombine.low %v5991_v55, %v6002_v34  ;;  %v2665_v32 = vrot.slane %v2663_v17, 5 }
  0x69   : > { %v2659_v54 = vor.u32 %v2658_v31, %v2657_v35  ;;  %5071 = vmatprep.subr.bf16.mxu1 %v6164_v16  ;;  %v2637_v53 = vsel %vm6147_vm9, %v2633_v57, %v5807_v60  ;;  %v2668_v26 = vrot.slane %v2666_v42, 6  ;;  %v2672_v5 = vshrl.u32 %v6014_v2, 16 }
  0x6a   : > { %v2647_v50 = vsel %vm6147_vm9, %v7161_v0, %v2646_v30  ;;  %5168 = vmatmul.mubr.msk.bf16.gmra.mrb[12].mxu0 %vm533_vm2, %v4606_v6  ;;  %v7162_v30 = vcombine.low %v5827_v18, %v5841_v41  ;;  %v2656_v19 = vrot.slane %v2655_v56, 4  ;;  %v2675_v6 = vshll.u32 %v6014_v2, 16 }
  0x6b   : > { %5175 = vmatprep.mubr.msk.bf16.mxu0 %vm533_vm2, %v4629_v10  ;;  %v4630_v59 = vcombine.low %v2637_v53, %v2647_v50  ;;  %v2661_v28 = vrot.slane %v2659_v54, 4  ;;  %v7163_v43 = vcombine.low %v5878_v46, %v5891_v3  ;;  %v2669_v60 = vor.u32 %v2668_v26, %v2665_v32  ;;  %v6218_v32 = vld [vmem:[%s5703_s14 + $0x44] sm:$0x3] }
  0x6c   : > { %5040 = vmatmul.mubr.msk.bf16.gmra.mrb[4].mxu1 %vm533_vm2, %v7162_v30  ;;  %v2674_v17 = vrot.slane %v2672_v5, 5  ;;  %v7164_v44 = vshrl.u32 %v5867_v4, 16  ;;  %v7165_v33 = vshll.u32 %v5867_v4, 16  ;;  %v2660_v9 = vsel %vm6147_vm9, %v2656_v19, %v2659_v54 }
  0x6d   : > { %5043 = vmatprep.mubr.msk.bf16.mxu1 %vm533_vm2, %v7163_v43  ;;  %v2677_v31 = vrot.slane %v2675_v6, 6  ;;  %v2686_v2 = vshrl.u32 %v6178_v62, 16  ;;  %v2689_v10 = vshll.u32 %v6178_v62, 16  ;;  %v2670_v46 = vsel %vm6147_vm9, %v2661_v28, %v2669_v60  ;;  %v5531_v43 = vld [vmem:[%s7121_s1 + $0x98] sm:$0xff]   ;;  %v6231_v60 = vld [vmem:[%s5703_s14 + $0xc] sm:$0xe] }
  0x6e   : > { %v2680_v18 = vrot.slane %v7164_v44, 5  ;;  %v2681_v35 = vrot.slane %v7165_v33, 6  ;;  %v4413_v42 = vrot.slane %v6187_v22, 9  ;;  %v857_v0 = vrot.slane %v5710_v7, 5 }
  0x6f   : > { %v4631_v50 = vcombine.low %v2660_v9, %v2670_v46  ;;  %v2678_v4 = vor.u32 %v2677_v31, %v2674_v17  ;;  %v2688_v56 = vrot.slane %v2686_v2, 5  ;;  %v2691_v53 = vrot.slane %v2689_v10, 6 }
  0x70   : > { %v2682_v57 = vor.u32 %v2681_v35, %v2680_v18  ;;  %v6222_v26 = vsel %vm5927_vm6, %v4413_v42, %v857_v0  ;;  %v859_v5 = vrot.slane %v857_v0, 4  ;;  %v2064_v30 = vshll.u32 %v6044_v12, 16 }
  0x71   : > { %v2679_v19 = vrot.slane %v2678_v4, 4  ;;  %v2692_v28 = vor.u32 %v2691_v53, %v2688_v56  ;;  %v2068_v6 = vshrl.u32 %v6044_v12, 16  ;;  %v2695_v7 = vshrl.u32 %v6036_v15, 16 }
  0x72   : > { %v2684_v54 = vrot.slane %v2682_v57, 4  ;;  %5176 = vmatmul.mubr.msk.bf16.vlgmr.msra.gmra.mrb[0].mxu0 %vm533_vm2, %v4630_v59  ;;  %v7166_v17 = vrot.slane %v5713_v8, 5  ;;  %v2698_v18 = vshll.u32 %v6036_v15, 16  ;;  %v2704_v33 = vrot.slane %v2064_v30, 6 }
  0x73   : > { %v2709_v35 = vshrl.u32 %v6218_v32, 16  ;;  %v7167_v9 = vcombine.low %v5914_v51, %v5923_v36  ;;  %5192 = vmatpush3.bf16.msra.mxu0 %v6027_v52  ;;  %v2683_v8 = vsel %vm6147_vm9, %v2679_v19, %v2682_v57  ;;  %v2697_v31 = vrot.slane %v2695_v7, 5  ;;  %5179 = vmatprep.mubr.msk.bf16.mxu0 %vm533_vm2, %v4631_v50  ;;  %v6262_v57 = vld [vmem:[%s7121_s1 + $0xa0] sm:$0xff]   ;;  %v6275_v7 = vld [vmem:[%s5703_s14 + $0x50] sm:$0x3] }
  0x74   : > { %v861_v44 = vsel %vm5927_vm6, %v859_v5, %v7166_v17  ;;  %v2693_v59 = vsel %vm6147_vm9, %v2684_v54, %v2692_v28  ;;  %v7168_v2 = vcombine.low %v5953_v27, %v5966_v37  ;;  %v2700_v10 = vrot.slane %v2698_v18, 6  ;;  %5193 = vmatprep.subr.bf16.mxu0 %v5531_v43 }
  0x75   : > { %5044 = vmatmul.mubr.msk.bf16.gmra.mrb[8].mxu1 %vm533_vm2, %v7167_v9  ;;  %v4425_v15 = vcombine.low %v6222_v26, %v861_v44  ;;  %v4632_v51 = vcombine.low %v2683_v8, %v2693_v59  ;;  %v2703_v52 = vrot.slane %v2068_v6, 5  ;;  %v2711_v46 = vrot.slane %v2709_v35, 5 }
  0x76   : > { %5047 = vmatprep.mubr.msk.bf16.mxu1 %vm533_vm2, %v7168_v2  ;;  %v2712_v42 = vshll.u32 %v6218_v32, 16  ;;  %v4414_v27 = vrot.slane %v6231_v60, 9  ;;  %v864_v0 = vrot.slane %v5746_v40, 5  ;;  %v2088_v50 = vshll.u32 %v6053_v14, 16 }
  0x77   : > { %v2701_v4 = vor.u32 %v2700_v10, %v2697_v31  ;;  %v2705_v56 = vor.u32 %v2704_v33, %v2703_v52  ;;  %v2092_v53 = vshrl.u32 %v6053_v14, 16  ;;  %v2718_v54 = vshrl.u32 %v6059_v29, 16  ;;  %5194 = vmatpush3.bf16.msra.mxu0 %v5531_v43  ;;  %v6286_v31 = vld [vmem:[%s5703_s14 + $0x18] sm:$0xe] }
  0x78   : > { %v2714_v26 = vrot.slane %v2712_v42, 6  ;;  %v865_v5 = vsel %vm5927_vm6, %v4414_v27, %v864_v0  ;;  %v866_v19 = vrot.slane %v864_v0, 4  ;;  %v6272_v28 = vrot.slane %v2088_v50, 5  ;;  %5211 = vmatprep.subr.bf16.mxu0 %v6262_v57 }
  0x79   : > { %v2702_v40 = vrot.slane %v2701_v4, 4  ;;  %v2707_v17 = vrot.slane %v2705_v56, 4  ;;  %v6277_v44 = vrot.slane %v2092_v53, 4  ;;  %v2720_v18 = vrot.slane %v2718_v54, 5 }
  0x7a   : > { %v2715_v33 = vor.u32 %v2714_v26, %v2711_v46  ;;  %v7169_v35 = vrot.slane %v5753_v45, 5  ;;  %v2721_v8 = vshll.u32 %v6059_v29, 16  ;;  %v2726_v59 = vrot.slane %v2092_v53, 5  ;;  %5180 = vmatmul.mubr.msk.bf16.gmra.mrb[4].mxu0 %vm533_vm2, %v4632_v51 }
  0x7b   : > { %v2098_v43 = vshll.u32 %v6056_v11, 16  ;;  %v2706_v2 = vsel %vm6147_vm9, %v2702_v40, %v2705_v56  ;;  %v2095_v10 = vor.u32 %v6277_v44, %v6272_v28  ;;  %v2727_v52 = vrot.slane %v2088_v50, 6  ;;  %v4772_v11 = vld [vmem:[%s5703_s14 + $0x3c] sm:$0xe] }
  0x7c   : > { %v868_v9 = vsel %vm5927_vm6, %v866_v19, %v7169_v35  ;;  %v2716_v45 = vsel %vm6147_vm9, %v2707_v17, %v2715_v33  ;;  %v2723_v29 = vrot.slane %v2721_v8, 6  ;;  %v2732_v46 = vshrl.u32 %v6275_v7, 16  ;;  %v6310_v19 = vld [vmem:[%s5703_s14 + $0x5c] sm:$0x3]  ;;  %v6321_v8 = vld [vmem:[%s5703_s14 + $0x24] sm:$0xe] }
  0x7d   : > { %5048 = vmatmul.mubr.msk.bf16.gmra.mrb[12].mxu1 %vm533_vm2, %v4402_v1  ;;  %v2735_v51 = vshll.u32 %v6275_v7, 16  ;;  %v4633_v42 = vcombine.low %v2706_v2, %v2716_v45  ;;  %v4426_v27 = vcombine.low %v865_v5, %v868_v9  ;;  %v2728_v0 = vor.u32 %v2727_v52, %v2726_v59  ;;  %v5532_v45 = vld [vmem:[%s7121_s1 + $0x38] sm:$0xff]  }
  0x7e   : > { %5055 = vmatprep.mubr.msk.bf16.mxu1 %vm533_vm2, %v4425_v15  ;;  %v4415_v50 = vrot.slane %v6286_v31, 9  ;;  %v2724_v4 = vor.u32 %v2723_v29, %v2720_v18  ;;  %v2734_v55 = vrot.slane %v2732_v46, 5  ;;  %v871_v1 = vrot.slane %v5791_v39, 5 }
  0x7f   : > { %v2737_v56 = vrot.slane %v2735_v51, 6  ;;  %5183 = vmatprep.mubr.msk.bf16.mxu0 %vm533_vm2, %v4633_v42  ;;  %v2730_v53 = vrot.slane %v2728_v0, 4  ;;  %v874_v54 = vrot.slane %v5796_v48, 5  ;;  %v2112_v26 = vshll.u32 %v6066_v13, 16 }
  0x80   : > { %v2116_v15 = vshrl.u32 %v6066_v13, 16  ;;  %v2725_v5 = vrot.slane %v2724_v4, 4  ;;  %v872_v17 = vsel %vm5927_vm6, %v4415_v50, %v871_v1  ;;  %v873_v18 = vrot.slane %v871_v1, 4 }
  0x81   : > { %v2738_v40 = vor.u32 %v2737_v56, %v2734_v55  ;;  %v2741_v33 = vshrl.u32 %v6073_v63, 16  ;;  %v2744_v35 = vshll.u32 %v6073_v63, 16  ;;  %v2750_v48 = vrot.slane %v2112_v26, 6 }
  0x82   : > { %v2749_v9 = vrot.slane %v2116_v15, 5  ;;  %v2729_v59 = vsel %vm6147_vm9, %v2725_v5, %v2728_v0  ;;  %v875_v52 = vsel %vm5927_vm6, %v873_v18, %v874_v54  ;;  %v2755_v63 = vshrl.u32 %v6310_v19, 16  ;;  %v6342_v5 = vld [vmem:[%s5703_s14 + $0x68] sm:$0x3] }
  0x83   : > { %v2739_v2 = vsel %vm6147_vm9, %v2730_v53, %v2738_v40  ;;  %v4427_v46 = vcombine.low %v872_v17, %v875_v52  ;;  %v2743_v51 = vrot.slane %v2741_v33, 5  ;;  %v2746_v42 = vrot.slane %v2744_v35, 6  ;;  %v6353_v33 = vld [vmem:[%s5703_s14 + $0x30] sm:$0xe] }
  0x84   : > { %v4634_v29 = vcombine.low %v2729_v59, %v2739_v2  ;;  %v2751_v0 = vor.u32 %v2750_v48, %v2749_v9  ;;  %v2757_v50 = vrot.slane %v2755_v63, 5  ;;  %v2758_v4 = vshll.u32 %v6310_v19, 16 }
  0x85   : > { %5056 = vmatmul.mubr.msk.bf16.vlgmr.msra.gmra.mrb[0].mxu1 %vm533_vm2, %v4426_v27  ;;  %v4416_v55 = vrot.slane %v6321_v8, 9  ;;  %v2747_v56 = vor.u32 %v2746_v42, %v2743_v51  ;;  %v878_v1 = vrot.slane %v5841_v41, 5  ;;  %v881_v53 = vrot.slane %v5845_v49, 5  ;;  %v6347_v27 = vld [vmem:[%s7121_s1 + $0x40] sm:$0xff]  }
  0x86   : > { %5072 = vmatpush3.bf16.msra.mxu1 %v6164_v16  ;;  %5184 = vmatmul.mubr.msk.bf16.gmra.mrb[8].mxu0 %vm533_vm2, %v4634_v29  ;;  %v2136_v54 = vshll.u32 %v6082_v24, 16  ;;  %v2753_v40 = vrot.slane %v2751_v0, 4  ;;  %v2760_v16 = vrot.slane %v2758_v4, 6  ;;  %v2140_v17 = vshrl.u32 %v6082_v24, 16 }
  0x87   : > { %5059 = vmatprep.mubr.msk.bf16.mxu1 %vm533_vm2, %v4427_v46  ;;  %v2764_v18 = vshrl.u32 %v6090_v21, 16  ;;  %5073 = vmatprep.subr.bf16.mxu1 %v5532_v45  ;;  %v2748_v49 = vrot.slane %v2747_v56, 4  ;;  %v879_v35 = vsel %vm5927_vm6, %v4416_v55, %v878_v1  ;;  %v880_v9 = vrot.slane %v878_v1, 4  ;;  %v4647_v56 = vld [vmem:[%s5703_s14 + $0xc] sm:$0xc] }
  0x88   : > { %v2767_v48 = vshll.u32 %v6090_v21, 16  ;;  %v2761_v59 = vor.u32 %v2760_v16, %v2757_v50  ;;  %v2772_v52 = vrot.slane %v2140_v17, 5  ;;  %v2773_v63 = vrot.slane %v2136_v54, 6  ;;  %v6372_v1 = vld [vmem:[%s5703_s14 + $0x3c] sm:$0xe] }
  0x89   : > { %v2766_v2 = vrot.slane %v2764_v18, 5  ;;  %v2752_v29 = vsel %vm6147_vm9, %v2748_v49, %v2751_v0  ;;  %v882_v46 = vsel %vm5927_vm6, %v880_v9, %v881_v53  ;;  %v2778_v42 = vshrl.u32 %v6342_v5, 16 }
  0x8a   : > { %v2769_v51 = vrot.slane %v2767_v48, 6  ;;  %5074 = vmatpush3.bf16.msra.mxu1 %v5532_v45  ;;  %v2762_v21 = vsel %vm6147_vm9, %v2753_v40, %v2761_v59  ;;  %v4428_v50 = vcombine.low %v879_v35, %v882_v46  ;;  %v2774_v4 = vor.u32 %v2773_v63, %v2772_v52 }
  0x8b   : > { %v2781_v55 = vshll.u32 %v6342_v5, 16  ;;  %5091 = vmatprep.subr.bf16.mxu1 %v6347_v27  ;;  %v4635_v0 = vcombine.low %v2752_v29, %v2762_v21  ;;  %v2780_v16 = vrot.slane %v2778_v42, 5  ;;  %v4417_v18 = vrot.slane %v6353_v33, 9  ;;  %v4648_v29 = vld [vmem:[%s5703_s14 + $0x18] sm:$0xc] }
  0x8c   : > { %v2770_v53 = vor.u32 %v2769_v51, %v2766_v2  ;;  %v2776_v45 = vrot.slane %v2774_v4, 4  ;;  %v885_v49 = vrot.slane %v5891_v3, 5  ;;  %v888_v35 = vrot.slane %v5898_v20, 5  ;;  %v5559_v2 = vld [vmem:[%s5703_s14 + $0x10] sm:$0xf] }
  0x8d   : > { %5060 = vmatmul.mubr.msk.bf16.gmra.mrb[4].mxu1 %vm533_vm2, %v4428_v50  ;;  %v2783_v40 = vrot.slane %v2781_v55, 6  ;;  %5187 = vmatprep.mubr.msk.bf16.mxu0 %vm533_vm2, %v4635_v0  ;;  %v4655_v59 = vrot.slane %v4647_v56, 10  ;;  %v2990_v52 = vrot.slane %v5559_v2, 6  ;;  %v2993_v63 = vrot.slane %v6118_v61, 6  ;;  %v6411_v2 = vld [vmem:[%s5703_s14 + $0x54] sm:$0xe] }
  0x8e   : > { %v2771_v48 = vrot.slane %v2770_v53, 4  ;;  %v886_v20 = vsel %vm5927_vm6, %v4417_v18, %v885_v49  ;;  %v887_v51 = vrot.slane %v885_v49, 4  ;;  %v4418_v42 = vrot.slane %v6372_v1, 9  ;;  %v6403_v18 = vld [vmem:[%s5703_s14 + $0x48] sm:$0xe] }
  0x8f   : > { %v2784_v46 = vor.u32 %v2783_v40, %v2780_v16  ;;  %v2991_v50 = vsel %vm6381_vm12, %v4655_v59, %v2990_v52  ;;  %v2992_v55 = vrot.slane %v2990_v52, 4  ;;  %v892_v56 = vrot.slane %v5923_v36, 5  ;;  %v4649_v40 = vld [vmem:[%s5703_s14 + $0x24] sm:$0xc] }
  0x90   : > { %v2775_v21 = vsel %vm6147_vm9, %v2771_v48, %v2774_v4  ;;  %v889_v0 = vsel %vm5927_vm6, %v887_v51, %v888_v35  ;;  %v895_v53 = vrot.slane %v5935_v58, 5  ;;  %v4656_v16 = vrot.slane %v4648_v29, 10  ;;  %v5560_v35 = vld [vmem:[%s5703_s14 + $0x1c] sm:$0xf] }
  0x91   : > { %v2785_v61 = vsel %vm6147_vm9, %v2776_v45, %v2784_v46  ;;  %v4429_v49 = vcombine.low %v886_v20, %v889_v0  ;;  %v2994_v48 = vsel %vm6381_vm12, %v2992_v55, %v2993_v63  ;;  %v893_v59 = vsel %vm5927_vm6, %v4418_v42, %v892_v56  ;;  %v7172_v20 = vld [vmem:[#allocation6_spill] sm:$0xff]  ;;  %v5561_v55 = vld [vmem:[%s5703_s14 + $0x28] sm:$0xf] }
  0x92   : > { %v4636_v4 = vcombine.low %v2775_v21, %v2785_v61  ;;  %v4667_v45 = vcombine.low %v2991_v50, %v2994_v48  ;;  %v894_v52 = vrot.slane %v892_v56, 4  ;;  %v2997_v46 = vrot.slane %v5560_v35, 6 }
  0x93   : > { %v3000_v58 = vrot.slane %v6125_v25, 6  ;;  %5063 = vmatprep.mubr.msk.bf16.mxu1 %vm533_vm2, %v4429_v49  ;;  %v4419_v29 = vrot.slane %v6403_v18, 9  ;;  %v899_v63 = vrot.slane %v5966_v37, 5  ;;  %v902_v51 = vrot.slane %v7172_v20, 5  ;;  %v5562_v20 = vld [vmem:[%s5703_s14 + $0x34] sm:$0xf] }
  0x94   : > { %5188 = vmatmul.mubr.msk.bf16.gmra.mrb[12].mxu0 %vm533_vm2, %v4636_v4  ;;  %v4657_v42 = vrot.slane %v4649_v40, 10  ;;  %v896_v21 = vsel %vm5927_vm6, %v894_v52, %v895_v53  ;;  %v2998_v25 = vsel %vm6381_vm12, %v4656_v16, %v2997_v46  ;;  %v2999_v50 = vrot.slane %v2997_v46, 4  ;;  %v4650_v40 = vld [vmem:[%s5703_s14 + $0x30] sm:$0xc] }
  0x95   : > { %5195 = vmatprep.mubr.msk.bf16.mxu0 %vm533_vm2, %v4667_v45  ;;  %v3004_v56 = vrot.slane %v5561_v55, 6  ;;  %v4430_v61 = vcombine.low %v893_v59, %v896_v21  ;;  %v900_v0 = vsel %vm5927_vm6, %v4419_v29, %v899_v63  ;;  %v901_v4 = vrot.slane %v899_v63, 4  ;;  %v6444_v21 = vld [vmem:[%s5703_s14 + $0x8] sm:$0x3] }
  0x96   : > { %v3007_v49 = vrot.slane %v6158_v23, 6  ;;  %v3001_v48 = vsel %vm6381_vm12, %v2999_v50, %v3000_v58  ;;  %v4420_v45 = vrot.slane %v6411_v2, 9  ;;  %v906_v35 = vrot.slane %v6002_v34, 5  ;;  %v7173_v23 = vld [vmem:[#allocation7_spill] sm:$0xff] }
  0x97   : > { %v3005_v53 = vsel %vm6381_vm12, %v4657_v42, %v3004_v56  ;;  %v3006_v16 = vrot.slane %v3004_v56, 4  ;;  %5064 = vmatmul.mubr.msk.bf16.gmra.mrb[8].mxu1 %vm533_vm2, %v4430_v61  ;;  %v4668_v59 = vcombine.low %v2998_v25, %v3001_v48  ;;  %v903_v52 = vsel %vm5927_vm6, %v901_v4, %v902_v51  ;;  %v5535_v56 = vld [vmem:[%s7121_s1 + $0xa8] sm:$0xff]  }
  0x98   : > { %v909_v46 = vrot.slane %v7173_v23, 5  ;;  %v4431_v29 = vcombine.low %v900_v0, %v903_v52  ;;  %v4658_v63 = vrot.slane %v4650_v40, 10  ;;  %v3011_v42 = vrot.slane %v5562_v20, 6  ;;  %v7174_v40 = vld [vmem:[#allocation2_spill] sm:$0xff]  ;;  %v7175_v48 = vld [vmem:[#allocation3_spill] sm:$0xff] }
  0x99   : > { %v3008_v58 = vsel %vm6381_vm12, %v3006_v16, %v3007_v49  ;;  %v907_v25 = vsel %vm5927_vm6, %v4420_v45, %v906_v35  ;;  %v908_v55 = vrot.slane %v906_v35, 4  ;;  %v3014_v51 = vrot.slane %v6178_v62, 6  ;;  %v4651_v52 = vld [vmem:[%s5703_s14 + $0x3c] sm:$0xc] }
  0x9a   : > { %v4669_v50 = vcombine.low %v3005_v53, %v3008_v58  ;;  %5067 = vmatprep.mubr.msk.bf16.mxu1 %vm533_vm2, %v4431_v29  ;;  %v3012_v61 = vsel %vm6381_vm12, %v4658_v63, %v3011_v42  ;;  %v3013_v0 = vrot.slane %v3011_v42, 4  ;;  %v1101_v4 = vshrl.u32 %v6187_v22, 16  ;;  %v6470_v29 = vld [vmem:[%s5703_s14 + $0x14] sm:$0x3] }
  0x9b   : > { %v1104_v49 = vshll.u32 %v6187_v22, 16  ;;  %v910_v62 = vsel %vm5927_vm6, %v908_v55, %v909_v46  ;;  %v1111_v53 = vor.u32 %v7175_v48, %v7174_v40  ;;  %v1115_v16 = vshrl.u32 %v6444_v21, 16 }
  0x9c   : > { %5196 = vmatmul.mubr.msk.bf16.vlgmr.msra.gmra.mrb[0].mxu0 %vm533_vm2, %v4668_v59  ;;  %v1118_v45 = vshll.u32 %v6444_v21, 16  ;;  %v4432_v35 = vcombine.low %v907_v25, %v910_v62  ;;  %v3015_v22 = vsel %vm6381_vm12, %v3013_v0, %v3014_v51  ;;  %v1103_v59 = vrot.slane %v1101_v4, 5 }
  0x9d   : > { %5212 = vmatpush3.bf16.msra.mxu0 %v6262_v57  ;;  %5199 = vmatprep.mubr.msk.bf16.mxu0 %vm533_vm2, %v4669_v50  ;;  %v1106_v23 = vrot.slane %v1104_v49, 6  ;;  %v4670_v46 = vcombine.low %v3012_v61, %v3015_v22  ;;  %v1113_v58 = vrot.slane %v1111_v53, 4  ;;  %v1117_v63 = vrot.slane %v1115_v16, 5  ;;  %v6475_v57 = vld [vmem:[%s7121_s1 + $0xb0] sm:$0xff]   ;;  %v4652_v49 = vld [vmem:[%s5703_s14 + $0x48] sm:$0xc] }
  0x9e   : > { %v1120_v20 = vrot.slane %v1118_v45, 6  ;;  %5213 = vmatprep.subr.bf16.mxu0 %v5535_v56  ;;  %v4659_v50 = vrot.slane %v4651_v52, 10  ;;  %v3018_v25 = vrot.slane %v6044_v12, 6  ;;  %v3021_v55 = vrot.slane %v6218_v32, 6 }
  0x9f   : > { %v1107_v42 = vor.u32 %v1106_v23, %v1103_v59  ;;  %5068 = vmatmul.mubr.msk.bf16.gmra.mrb[12].mxu1 %vm533_vm2, %v4432_v35  ;;  %v1124_v61 = vshrl.u32 %v6231_v60, 16  ;;  %v1127_v0 = vshll.u32 %v6231_v60, 16  ;;  %v1138_v4 = vshrl.u32 %v6470_v29, 16 }
  0xa0   : > { %v1121_v51 = vor.u32 %v1120_v20, %v1117_v63  ;;  %v3019_v40 = vsel %vm6381_vm12, %v4659_v50, %v3018_v25  ;;  %v3020_v48 = vrot.slane %v3018_v25, 4  ;;  %v1141_v16 = vshll.u32 %v6470_v29, 16  ;;  %v6498_v25 = vld [vmem:[%s5703_s14 + $0x20] sm:$0x3] }
  0xa1   : > { %v1108_v62 = vrot.slane %v1107_v42, 4  ;;  %5214 = vmatpush3.bf16.msra.mxu0 %v5535_v56  ;;  %v1126_v45 = vrot.slane %v1124_v61, 5  ;;  %v1129_v52 = vrot.slane %v1127_v0, 6  ;;  %v1140_v35 = vrot.slane %v1138_v4, 5  ;;  %v7177_v4 = vld [vmem:[#allocation5_spill] sm:$0xff] }
  0xa2   : > { %v1122_v32 = vsel %vm6147_vm9, %v1113_v58, %v1121_v51  ;;  %5231 = vmatprep.subr.bf16.mxu0 %v6475_v57  ;;  %v3022_v22 = vsel %vm6381_vm12, %v3020_v48, %v3021_v55  ;;  %v1143_v59 = vrot.slane %v1141_v16, 6  ;;  %v4660_v23 = vrot.slane %v4652_v49, 10  ;;  %v4653_v16 = vld [vmem:[%s5703_s14 + $0x54] sm:$0xc] }
  0xa3   : > { %v1112_v60 = vsel %vm6147_vm9, %v1108_v62, %v1111_v53  ;;  %v4671_v63 = vcombine.low %v3019_v40, %v3022_v22  ;;  %v1130_v20 = vor.u32 %v1129_v52, %v1126_v45  ;;  %v3025_v58 = vrot.slane %v6053_v14, 6 }
  0xa4   : > { %5200 = vmatmul.mubr.msk.bf16.gmra.mrb[4].mxu0 %vm533_vm2, %v4670_v46  ;;  %v4447_v56 = vcombine.low %v1112_v60, %v1122_v32  ;;  %v1144_v42 = vor.u32 %v1143_v59, %v1140_v35  ;;  %v3028_v50 = vrot.slane %v6275_v7, 6  ;;  %v1147_v53 = vshrl.u32 %v6286_v31, 16 }
  0xa5   : > { %v1150_v51 = vshll.u32 %v6286_v31, 16  ;;  %5203 = vmatprep.mubr.msk.bf16.mxu0 %vm533_vm2, %v4671_v63  ;;  %v1131_v46 = vrot.slane %v1130_v20, 4  ;;  %v3026_v55 = vsel %vm6381_vm12, %v4660_v23, %v3025_v58  ;;  %v3027_v61 = vrot.slane %v3025_v58, 4 }
  0xa6   : > { %5075 = vmatprep.mubr.msk.bf16.mxu1 %vm533_vm2, %v4447_v56  ;;  %v7176_v14 = vshrl.u32 %v5791_v39, 16  ;;  %v7178_v7 = vrot.slane %v7177_v4, 4  ;;  %v1149_v62 = vrot.slane %v1147_v53, 5  ;;  %v7179_v31 = vshll.u32 %v5791_v39, 16  ;;  %v5536_v39 = vld [vmem:[%s7121_s1 + $0x48] sm:$0xff]  }
  0xa7   : > { %v1152_v40 = vrot.slane %v1150_v51, 6  ;;  %v1135_v32 = vsel %vm6147_vm9, %v1131_v46, %v7177_v4  ;;  %v3029_v45 = vsel %vm6381_vm12, %v3027_v61, %v3028_v50  ;;  %v1161_v52 = vshrl.u32 %v6498_v25, 16  ;;  %v6529_v51 = vld [vmem:[%s5703_s14 + $0x2c] sm:$0x3] }
  0xa8   : > { %v1155_v0 = vrot.slane %v7176_v14, 5  ;;  %v1145_v49 = vsel %vm6147_vm9, %v7178_v7, %v1144_v42  ;;  %v1156_v48 = vrot.slane %v7179_v31, 6  ;;  %v1164_v35 = vshll.u32 %v6498_v25, 16 }
  0xa9   : > { %v4448_v60 = vcombine.low %v1135_v32, %v1145_v49  ;;  %v4672_v22 = vcombine.low %v3026_v55, %v3029_v45  ;;  %v1153_v59 = vor.u32 %v1152_v40, %v1149_v62  ;;  %v1163_v56 = vrot.slane %v1161_v52, 5  ;;  %v6552_v32 = vld [vmem:[%s7121_s1 + $0x50] sm:$0xff]  }
  0xaa   : > { %v1157_v23 = vor.u32 %v1156_v48, %v1155_v0  ;;  %v1166_v63 = vrot.slane %v1164_v35, 6  ;;  %v4661_v20 = vrot.slane %v4653_v16, 10  ;;  %v3032_v58 = vrot.slane %v6066_v13, 6 }
  0xab   : > { %5076 = vmatmul.mubr.msk.bf16.vlgmr.msra.gmra.mrb[0].mxu1 %vm533_vm2, %v4448_v60  ;;  %v1154_v42 = vrot.slane %v1153_v59, 4  ;;  %v3035_v53 = vrot.slane %v6310_v19, 6  ;;  %v1170_v46 = vshrl.u32 %v6321_v8, 16  ;;  %v1173_v0 = vshll.u32 %v6321_v8, 16 }
  0xac   : > { %v1159_v50 = vrot.slane %v1157_v23, 4  ;;  %5092 = vmatpush3.bf16.msra.mxu1 %v6347_v27  ;;  %5204 = vmatmul.mubr.msk.bf16.gmra.mrb[8].mxu0 %vm533_vm2, %v4672_v22  ;;  %v1167_v55 = vor.u32 %v1166_v63, %v1163_v56  ;;  %v3033_v61 = vsel %vm6381_vm12, %v4661_v20, %v3032_v58  ;;  %v3034_v14 = vrot.slane %v3032_v58, 4  ;;  %v4654_v27 = vld [vmem:[%s5703_s14 + $0x60] sm:$0xc]  ;;  %v6560_v58 = vld [vmem:[%s5703_s14 + $0x38] sm:$0x3] }
  0xad   : > { %v1158_v4 = vsel %vm6147_vm9, %v1154_v42, %v1157_v23  ;;  %v1172_v7 = vrot.slane %v1170_v46, 5  ;;  %v7180_v19 = vshrl.u32 %v5841_v41, 16  ;;  %v7181_v62 = vshll.u32 %v5841_v41, 16  ;;  %5093 = vmatprep.subr.bf16.mxu1 %v5536_v39 }
  0xae   : > { %v1168_v31 = vsel %vm6147_vm9, %v1159_v50, %v1167_v55  ;;  %v3036_v48 = vsel %vm6381_vm12, %v3034_v14, %v3035_v53  ;;  %v1175_v16 = vrot.slane %v1173_v0, 6  ;;  %v1184_v8 = vshrl.u32 %v6529_v51, 16 }
  0xaf   : > { %v1178_v49 = vrot.slane %v7180_v19, 5  ;;  %v1179_v40 = vrot.slane %v7181_v62, 6  ;;  %v4449_v45 = vcombine.low %v1158_v4, %v1168_v31  ;;  %v4673_v41 = vcombine.low %v3033_v61, %v3036_v48 }
  0xb0   : > { %v1187_v35 = vshll.u32 %v6529_v51, 16  ;;  %v1176_v60 = vor.u32 %v1175_v16, %v1172_v7  ;;  %v1186_v22 = vrot.slane %v1184_v8, 5  ;;  %v4662_v59 = vrot.slane %v4654_v27, 10  ;;  %5094 = vmatpush3.bf16.msra.mxu1 %v5536_v39  ;;  %v6581_v16 = vld [vmem:[%s5703_s14 + $0x44] sm:$0x3] }
  0xb1   : > { %v1180_v52 = vor.u32 %v1179_v40, %v1178_v49  ;;  %v3039_v23 = vrot.slane %v6082_v24, 6  ;;  %5079 = vmatprep.mubr.msk.bf16.mxu1 %vm533_vm2, %v4449_v45  ;;  %5207 = vmatprep.mubr.msk.bf16.mxu0 %vm533_vm2, %v4673_v41  ;;  %v3042_v20 = vrot.slane %v6342_v5, 6  ;;  %v1193_v42 = vshrl.u32 %v6353_v33, 16  ;;  %v4776_v24 = vld [vmem:[%s5703_s14 + $0x6c] sm:$0xe] }
  0xb2   : > { %v1189_v63 = vrot.slane %v1187_v35, 6  ;;  %v1177_v50 = vrot.slane %v1176_v60, 4  ;;  %v1196_v39 = vshll.u32 %v6353_v33, 16  ;;  %5111 = vmatprep.subr.bf16.mxu1 %v6552_v32  ;;  %v7182_v14 = vshrl.u32 %v5891_v3, 16  ;;  %v5537_v33 = vld [vmem:[%s5703_s14 + $0x18] sm:$0xff]  }
  0xb3   : > { %v1182_v56 = vrot.slane %v1180_v52, 4  ;;  %v3040_v53 = vsel %vm6381_vm12, %v4662_v59, %v3039_v23  ;;  %v3041_v46 = vrot.slane %v3039_v23, 4  ;;  %v1195_v61 = vrot.slane %v1193_v42, 5 }
  0xb4   : > { %v1190_v55 = vor.u32 %v1189_v63, %v1186_v22  ;;  %v1201_v5 = vrot.slane %v7182_v14, 5  ;;  %v7183_v0 = vshll.u32 %v5891_v3, 16  ;;  %v1181_v7 = vsel %vm6147_vm9, %v1177_v50, %v1180_v52  ;;  %v6598_v14 = vld [vmem:[%s5703_s14 + $0x50] sm:$0x3] }
  0xb5   : > { %v3043_v19 = vsel %vm6381_vm12, %v3041_v46, %v3042_v20  ;;  %v1198_v49 = vrot.slane %v1196_v39, 6  ;;  %v1207_v62 = vshrl.u32 %v6560_v58, 16  ;;  %v1210_v48 = vshll.u32 %v6560_v58, 16 }
  0xb6   : > { %v1202_v4 = vrot.slane %v7183_v0, 6  ;;  %v1191_v40 = vsel %vm6147_vm9, %v1182_v56, %v1190_v55  ;;  %v4674_v27 = vcombine.low %v3040_v53, %v3043_v19  ;;  %v1216_v41 = vshrl.u32 %v6372_v1, 16 }
  0xb7   : > { %v4450_v3 = vcombine.low %v1181_v7, %v1191_v40  ;;  %v1199_v8 = vor.u32 %v1198_v49, %v1195_v61  ;;  %v1209_v45 = vrot.slane %v1207_v62, 5  ;;  %v1212_v35 = vrot.slane %v1210_v48, 6  ;;  %v5539_v7 = vld [vmem:[%s5703_s14 + $0x24] sm:$0xff]  }
  0xb8   : > { %v1203_v31 = vor.u32 %v1202_v4, %v1201_v5  ;;  %5208 = vmatmul.mubr.msk.bf16.gmra.mrb[12].mxu0 %vm533_vm2, %v4674_v27  ;;  %v1219_v60 = vshll.u32 %v6372_v1, 16  ;;  %v7184_v22 = vshrl.u32 %v5923_v36, 16  ;;  %v1218_v56 = vrot.slane %v1216_v41, 5  ;;  %v5544_v41 = vld [vmem:[%s7121_s1 + $0xb8] sm:$0xff]  }
  0xb9   : > { %5080 = vmatmul.mubr.msk.bf16.gmra.mrb[4].mxu1 %vm533_vm2, %v4450_v3  ;;  %v1200_v23 = vrot.slane %v1199_v8, 4  ;;  %5215 = vmatprep.mubr.msk.bf16.mxu0 %vm533_vm2, %v5537_v33  ;;  %v7185_v63 = vshll.u32 %v5923_v36, 16  ;;  %v1230_v42 = vshrl.u32 %v6581_v16, 16  ;;  %v1213_v50 = vor.u32 %v1212_v35, %v1209_v45 }
  0xba   : > { %v1205_v52 = vrot.slane %v1203_v31, 4  ;;  %v1224_v59 = vrot.slane %v7184_v22, 5  ;;  %v1221_v53 = vrot.slane %v1219_v60, 6  ;;  %v1233_v46 = vshll.u32 %v6581_v16, 16 }
  0xbb   : > { %v1225_v20 = vrot.slane %v7185_v63, 6  ;;  %v1239_v1 = vshrl.u32 %v6403_v18, 16  ;;  %v1204_v39 = vsel %vm6147_vm9, %v1200_v23, %v1203_v31  ;;  %v1232_v61 = vrot.slane %v1230_v42, 5  ;;  %v5540_v31 = vld [vmem:[%s5703_s14 + $0x30] sm:$0xff]   ;;  %v6623_v63 = vld [vmem:[%s5703_s14 + $0x5c] sm:$0x3] }
  0xbc   : > { %v1242_v5 = vshll.u32 %v6403_v18, 16  ;;  %v1214_v36 = vsel %vm6147_vm9, %v1205_v52, %v1213_v50  ;;  %v1222_v0 = vor.u32 %v1221_v53, %v1218_v56  ;;  %v1235_v4 = vrot.slane %v1233_v46, 6  ;;  %v1462_v53 = vld [vmem:[%s5703_s14] sm:$0xc] }
  0xbd   : > { %v1226_v55 = vor.u32 %v1225_v20, %v1224_v59  ;;  %v1241_v19 = vrot.slane %v1239_v1, 5  ;;  %v4451_v49 = vcombine.low %v1204_v39, %v1214_v36  ;;  %v7186_v40 = vshrl.u32 %v5966_v37, 16 }
  0xbe   : > { %v1244_v33 = vrot.slane %v1242_v5, 6  ;;  %v1223_v48 = vrot.slane %v1222_v0, 4  ;;  %v1236_v3 = vor.u32 %v1235_v4, %v1232_v61  ;;  %v7187_v8 = vshll.u32 %v5966_v37, 16 }
  0xbf   : > { %v1228_v62 = vrot.slane %v1226_v55, 4  ;;  %v1247_v27 = vrot.slane %v7186_v40, 5  ;;  %v1253_v45 = vshrl.u32 %v6598_v14, 16  ;;  %5083 = vmatprep.mubr.msk.bf16.mxu1 %vm533_vm2, %v4451_v49  ;;  %v1256_v35 = vshll.u32 %v6598_v14, 16  ;;  %v5541_v49 = vld [vmem:[%s5703_s14 + $0x3c] sm:$0xff]  }
  0xc0   : > { %v1248_v18 = vrot.slane %v7187_v8, 6  ;;  %v1245_v52 = vor.u32 %v1244_v33, %v1241_v19  ;;  %v1262_v60 = vshrl.u32 %v6411_v2, 16  ;;  %v1265_v22 = vshll.u32 %v6411_v2, 16  ;;  %5216 = vmatmul.mubr.msk.bf16.vlgmr.msra.gmra.mrb[0].mxu0 %vm533_vm2, %v5539_v7  ;;  %v5563_v33 = vld [vmem:[%s5703_s14 + $0x4] sm:$0xf] }
  0xc1   : > { %v1227_v37 = vsel %vm6147_vm9, %v1223_v48, %v1226_v55  ;;  %v1237_v59 = vsel %vm6147_vm9, %v1228_v62, %v1236_v3  ;;  %v1255_v56 = vrot.slane %v1253_v45, 5  ;;  %5232 = vmatpush3.bf16.msra.mxu0 %v6475_v57  ;;  %v1258_v50 = vrot.slane %v1256_v35, 6  ;;  %5219 = vmatprep.mubr.msk.bf16.mxu0 %vm533_vm2, %v5540_v31  ;;  %v6635_v57 = vld [vmem:[%s7121_s1 + $0xc0] sm:$0xff]   ;;  %v1464_v45 = vld [vmem:[%s5703_s14 + $0x18] sm:$0xc] }
  0xc2   : > { %v1249_v23 = vor.u32 %v1248_v18, %v1247_v27  ;;  %v4452_v20 = vcombine.low %v1227_v37, %v1237_v59  ;;  %v1246_v42 = vrot.slane %v1245_v52, 4  ;;  %v1264_v2 = vrot.slane %v1262_v60, 5  ;;  %5233 = vmatprep.subr.bf16.mxu0 %v5544_v41  ;;  %v1463_v27 = vld [vmem:[%s5703_s14 + $0xc] sm:$0xc] }
  0xc3   : > { %v1267_v1 = vrot.slane %v1265_v22, 6  ;;  %v7188_v39 = vshrl.u32 %v6002_v34, 16  ;;  %v7189_v61 = vshll.u32 %v6002_v34, 16  ;;  %v1259_v0 = vor.u32 %v1258_v50, %v1255_v56  ;;  %v5543_v18 = vld [vmem:[%s5703_s14 + $0x48] sm:$0xff]   ;;  %v5564_v56 = vld [vmem:[%s5703_s14 + $0x10] sm:$0xf] }
  0xc4   : > { %v1251_v46 = vrot.slane %v1249_v23, 4  ;;  %5084 = vmatmul.mubr.msk.bf16.gmra.mrb[8].mxu1 %vm533_vm2, %v4452_v20  ;;  %v1250_v36 = vsel %vm6147_vm9, %v1246_v42, %v1249_v23  ;;  %v1276_v4 = vshrl.u32 %v6623_v63, 16  ;;  %v1279_v7 = vshll.u32 %v6623_v63, 16  ;;  %v5565_v50 = vld [vmem:[%s5703_s14 + $0x1c] sm:$0xf] }
  0xc5   : > { %v1270_v55 = vrot.slane %v7188_v39, 5  ;;  %v1271_v5 = vrot.slane %v7189_v61, 6  ;;  %v1268_v34 = vor.u32 %v1267_v1, %v1264_v2  ;;  %v4465_v62 = vrot.slane %v1462_v53, 10  ;;  %5234 = vmatpush3.bf16.msra.mxu0 %v5544_v41  ;;  %v1465_v53 = vld [vmem:[%s5703_s14 + $0x24] sm:$0xc] }
  0xc6   : > { %v1491_v40 = vrot.slane %v5563_v33, 6  ;;  %v1260_v31 = vsel %vm6147_vm9, %v1251_v46, %v1259_v0  ;;  %v1278_v48 = vrot.slane %v1276_v4, 5  ;;  %v1281_v3 = vrot.slane %v1279_v7, 6  ;;  %5251 = vmatprep.subr.bf16.mxu0 %v6635_v57  ;;  %v5545_v33 = vld [vmem:[%s5703_s14 + $0x54] sm:$0xff]  }
  0xc7   : > { %v1272_v19 = vor.u32 %v1271_v5, %v1270_v55  ;;  %v1494_v8 = vrot.slane %v6444_v21, 6  ;;  %v4453_v52 = vcombine.low %v1250_v36, %v1260_v31  ;;  %v1269_v35 = vrot.slane %v1268_v34, 4  ;;  %v5566_v34 = vld [vmem:[%s5703_s14 + $0x28] sm:$0xf]  ;;  %v5567_v31 = vld [vmem:[%s5703_s14 + $0x34] sm:$0xf] }
  0xc8   : > { %v1492_v22 = vsel %vm6381_vm12, %v4465_v62, %v1491_v40  ;;  %v1282_v37 = vor.u32 %v1281_v3, %v1278_v48  ;;  %v1493_v59 = vrot.slane %v1491_v40, 4  ;;  %v4466_v23 = vrot.slane %v1463_v27, 10  ;;  %5220 = vmatmul.mubr.msk.bf16.gmra.mrb[4].mxu0 %vm533_vm2, %v5541_v49  ;;  %v4723_v49 = vld [vmem:[%s5703_s14 + $0x18] sm:$0xf]  ;;  %v6683_v3 = vld [vmem:[%s5703_s14 + $0x1c] sm:$0xf] }
  0xc9   : > { %v1274_v60 = vrot.slane %v1272_v19, 4  ;;  %v1498_v20 = vrot.slane %v5564_v56, 6  ;;  %5087 = vmatprep.mubr.msk.bf16.mxu1 %vm533_vm2, %v4453_v52  ;;  %v1273_v21 = vsel %vm6147_vm9, %v1269_v35, %v1272_v19  ;;  %v1501_v41 = vrot.slane %v6470_v29, 6  ;;  %5223 = vmatprep.mubr.msk.bf16.mxu0 %vm533_vm2, %v5543_v18  ;;  %v1466_v29 = vld [vmem:[%s5703_s14 + $0x30] sm:$0xc] }
  0xca   : > { %v4467_v42 = vrot.slane %v1464_v45, 10  ;;  %v1505_v2 = vrot.slane %v5565_v50, 6  ;;  %v1495_v1 = vsel %vm6381_vm12, %v1493_v59, %v1494_v8  ;;  %v1508_v4 = vrot.slane %v6498_v25, 6  ;;  %v5546_v8 = vld [vmem:[%s5703_s14 + $0x60] sm:$0xff]  }
  0xcb   : > { %v1283_v46 = vsel %vm6147_vm9, %v1274_v60, %v1282_v37  ;;  %v1499_v39 = vsel %vm6381_vm12, %v4466_v23, %v1498_v20  ;;  %v1500_v55 = vrot.slane %v1498_v20, 4  ;;  %v4477_v5 = vcombine.low %v1492_v22, %v1495_v1  ;;  %v1467_v20 = vld [vmem:[%s5703_s14 + $0x3c] sm:$0xc] }
  0xcc   : > { %v4454_v61 = vcombine.low %v1273_v21, %v1283_v46  ;;  %v6671_v38 = vsel %vm6381_vm12, %v4467_v42, %v1505_v2  ;;  %v1507_v36 = vrot.slane %v1505_v2, 4  ;;  %v4468_v7 = vrot.slane %v1465_v53, 10  ;;  %v4726_v2 = vld [vmem:[%s5703_s14 + $0x24] sm:$0xf] }
  0xcd   : > { %v1502_v0 = vsel %vm6381_vm12, %v1500_v55, %v1501_v41  ;;  %v1512_v19 = vrot.slane %v5566_v34, 6  ;;  %v1515_v40 = vrot.slane %v6529_v51, 6  ;;  %v4469_v27 = vrot.slane %v1466_v29, 10  ;;  %v6695_v51 = vld [vmem:[%s5703_s14 + $0x20] sm:$0x1]  ;;  %v5548_v29 = vld [vmem:[%s7121_s1 + $0x58] sm:$0xff]  }
  0xce   : > { %5088 = vmatmul.mubr.msk.bf16.gmra.mrb[12].mxu1 %vm533_vm2, %v4454_v61  ;;  %v4478_v62 = vcombine.low %v1499_v39, %v1502_v0  ;;  %v1519_v48 = vrot.slane %v5567_v31, 6  ;;  %v1509_v25 = vsel %vm6381_vm12, %v1507_v36, %v1508_v4  ;;  %v1522_v52 = vrot.slane %v6560_v58, 6  ;;  %v6722_v55 = vld [vmem:[%s5703_s14 + $0x28] sm:$0xf]  ;;  %v6730_v34 = vld [vmem:[%s5703_s14 + $0x2c] sm:$0x1] }
  0xcf   : > { %5095 = vmatprep.mubr.msk.bf16.mxu1 %vm533_vm2, %v4477_v5  ;;  %v6691_v18 = vsel %vm6381_vm12, %v4468_v7, %v1512_v19  ;;  %v1514_v45 = vrot.slane %v1512_v19, 4  ;;  %v4479_v35 = vcombine.low %v6671_v38, %v1509_v25  ;;  %v3458_v37 = vshrl.u32 %v4723_v49, 16  ;;  %v5568_v38 = vld [vmem:[%s5703_s14 + $0x40] sm:$0xf] }
  0xd0   : > { %v6700_v60 = vsel %vm6381_vm12, %v4469_v27, %v1519_v48  ;;  %v1521_v22 = vrot.slane %v1519_v48, 4  ;;  %v3461_v23 = vshll.u32 %v4723_v49, 16  ;;  %v3467_v56 = vshll.u32 %v6683_v3, 16  ;;  %5224 = vmatmul.mubr.msk.bf16.gmra.mrb[8].mxu0 %vm533_vm2, %v5545_v33  ;;  %v5547_v33 = vld [vmem:[%s5703_s14 + $0x6c] sm:$0xff]  }
  0xd1   : > { %v6704_v59 = vsel %vm6381_vm12, %v1514_v45, %v1515_v40  ;;  %v3471_v58 = vshrl.u32 %v6683_v3, 16  ;;  %v3460_v42 = vrot.slane %v3458_v37, 4  ;;  %v3477_v50 = vshll.u32 %v6695_v51, 16  ;;  %5227 = vmatprep.mubr.msk.bf16.mxu0 %vm533_vm2, %v5546_v8  ;;  %v1468_v45 = vld [vmem:[%s5703_s14 + $0x48] sm:$0xc] }
  0xd2   : > { %v4480_v21 = vcombine.low %v6691_v18, %v6704_v59  ;;  %v6714_v41 = vsel %vm6381_vm12, %v1521_v22, %v1522_v52  ;;  %v3463_v46 = vrot.slane %v3461_v23, 5  ;;  %v3469_v1 = vrot.slane %v3467_v56, 5  ;;  %v4729_v56 = vld [vmem:[%s5703_s14 + $0x30] sm:$0xf] }
  0xd3   : > { %v4481_v53 = vcombine.low %v6700_v60, %v6714_v41  ;;  %v3473_v39 = vrot.slane %v3471_v58, 4  ;;  %v3479_v61 = vrot.slane %v3477_v50, 5  ;;  %v4470_v5 = vrot.slane %v1467_v20, 10  ;;  %v6756_v50 = vld [vmem:[%s5703_s14 + $0x34] sm:$0xf]  ;;  %v5551_v60 = vld [vmem:[%s7121_s1 + $0xc8] sm:$0xff]  }
  0xd4   : > { %v1526_v36 = vrot.slane %v5568_v38, 6  ;;  %v1529_v0 = vrot.slane %v6581_v16, 6  ;;  %v3464_v4 = vor.u32 %v3463_v46, %v3460_v42  ;;  %v3482_v19 = vshrl.u32 %v4726_v2, 16 }
  0xd5   : > { %v3474_v7 = vor.u32 %v3473_v39, %v3469_v1  ;;  %v3485_v49 = vshll.u32 %v4726_v2, 16  ;;  %v3491_v31 = vshll.u32 %v6722_v55, 16  ;;  %v3495_v16 = vshrl.u32 %v6722_v55, 16 }
  0xd6   : > { %5096 = vmatmul.mubr.msk.bf16.vlgmr.msra.gmra.mrb[0].mxu1 %vm533_vm2, %v4478_v62  ;;  %v6736_v40 = vsel %vm6381_vm12, %v4470_v5, %v1526_v36  ;;  %v1528_v27 = vrot.slane %v1526_v36, 4  ;;  %v3465_v48 = vrot.slane %v3464_v4, 4  ;;  %v3484_v8 = vrot.slane %v3482_v19, 4  ;;  %v5569_v36 = vld [vmem:[%s5703_s14 + $0x4c] sm:$0xf] }
  0xd7   : > { %5112 = vmatpush3.bf16.msra.mxu1 %v6552_v32  ;;  %5099 = vmatprep.mubr.msk.bf16.mxu1 %vm533_vm2, %v4479_v35  ;;  %v3475_v25 = vrot.slane %v3474_v7, 4  ;;  %v3487_v62 = vrot.slane %v3485_v49, 5  ;;  %v3493_v22 = vrot.slane %v3491_v31, 5  ;;  %v3497_v37 = vrot.slane %v3495_v16, 4 }
  0xd8   : > { %5113 = vmatprep.subr.bf16.mxu1 %v5548_v29  ;;  %v6745_v52 = vsel %vm6381_vm12, %v1528_v27, %v1529_v0  ;;  %v3501_v23 = vshll.u32 %v6730_v34, 16  ;;  %v3470_v35 = vsel %vm5735_vm3, %v3465_v48, %v3469_v1  ;;  %5228 = vmatmul.mubr.msk.bf16.gmra.mrb[12].mxu0 %vm533_vm2, %v5547_v33  ;;  %v4471_v5 = vrot.slane %v1468_v45, 10  ;;  %v1469_v27 = vld [vmem:[%s5703_s14 + $0x54] sm:$0xc] }
  0xd9   : > { %v3480_v58 = vsel %vm5735_vm3, %v3475_v25, %v3479_v61  ;;  %v4482_v20 = vcombine.low %v6736_v40, %v6745_v52  ;;  %v3488_v42 = vor.u32 %v3487_v62, %v3484_v8  ;;  %v3498_v46 = vor.u32 %v3497_v37, %v3493_v22  ;;  %v6762_v61 = vld [vmem:[%s5703_s14 + $0x38] sm:$0x1] }
  0xda   : > { %v4751_v2 = vcombine.low %v3470_v35, %v3480_v58  ;;  %v3503_v39 = vrot.slane %v3501_v23, 5  ;;  %v1533_v1 = vrot.slane %v5569_v36, 6  ;;  %v1536_v0 = vrot.slane %v6598_v14, 6  ;;  %v5571_v58 = vld [vmem:[%s5703_s14 + $0x58] sm:$0xf] }
  0xdb   : > { %5114 = vmatpush3.bf16.msra.mxu1 %v5548_v29  ;;  %v3489_v38 = vrot.slane %v3488_v42, 4  ;;  %v3506_v4 = vshrl.u32 %v4729_v56, 16  ;;  %v3499_v7 = vrot.slane %v3498_v46, 4  ;;  %v3509_v19 = vshll.u32 %v4729_v56, 16  ;;  %v6771_v29 = vld [vmem:[%s7121_s1 + $0x60] sm:$0xff]  }
  0xdc   : > { %5235 = vmatprep.mubr.msk.bf16.mxu0 %vm533_vm2, %v4751_v2  ;;  %v3515_v49 = vshll.u32 %v6756_v50, 16  ;;  %v3519_v33 = vshrl.u32 %v6756_v50, 16  ;;  %5271 = vmatprep.subr.bf16.mxu1 %v6771_v29  ;;  %v1534_v31 = vsel %vm6381_vm12, %v4471_v5, %v1533_v1  ;;  %v1535_v16 = vrot.slane %v1533_v1, 4  ;;  %v6794_v2 = vld [vmem:[%s5703_s14 + $0x40] sm:$0xf] }
  0xdd   : > { %v3494_v14 = vsel %vm5735_vm3, %v3489_v38, %v3493_v22  ;;  %v3508_v48 = vrot.slane %v3506_v4, 4  ;;  %v3504_v25 = vsel %vm5735_vm3, %v3499_v7, %v3503_v39  ;;  %v3511_v8 = vrot.slane %v3509_v19, 5  ;;  %v4732_v22 = vld [vmem:[%s5703_s14 + $0x3c] sm:$0xf]  ;;  %v6801_v46 = vld [vmem:[%s5703_s14 + $0x44] sm:$0x1] }
  0xde   : > { %5100 = vmatmul.mubr.msk.bf16.gmra.mrb[4].mxu1 %vm533_vm2, %v4480_v21  ;;  %v3517_v62 = vrot.slane %v3515_v49, 5  ;;  %v3521_v45 = vrot.slane %v3519_v33, 4  ;;  %v4752_v37 = vcombine.low %v3494_v14, %v3504_v25  ;;  %v1537_v18 = vsel %vm6381_vm12, %v1535_v16, %v1536_v0  ;;  %v4735_v49 = vld [vmem:[%s5703_s14 + $0x48] sm:$0xf]  ;;  %v6823_v16 = vld [vmem:[%s5703_s14 + $0x50] sm:$0x1] }
  0xdf   : > { %5103 = vmatprep.mubr.msk.bf16.mxu1 %vm533_vm2, %v4481_v53  ;;  %v3525_v59 = vshll.u32 %v6762_v61, 16  ;;  %v4472_v21 = vrot.slane %v1469_v27, 10  ;;  %v4483_v23 = vcombine.low %v1534_v31, %v1537_v18  ;;  %v3512_v56 = vor.u32 %v3511_v8, %v3508_v48  ;;  %v6837_v40 = vld [vmem:[%s5703_s14 + $0x58] sm:$0xf] }
  0xe0   : > { %v3522_v35 = vor.u32 %v3521_v45, %v3517_v62  ;;  %v1540_v42 = vrot.slane %v5571_v58, 6  ;;  %v1543_v53 = vrot.slane %v6623_v63, 6  ;;  %v3530_v39 = vshrl.u32 %v4732_v22, 16  ;;  %5236 = vmatmul.mubr.msk.bf16.vlgmr.msra.gmra.mrb[0].mxu0 %vm533_vm2, %v4752_v37 }
  0xe1   : > { %v3527_v41 = vrot.slane %v3525_v59, 5  ;;  %v3533_v5 = vshll.u32 %v4732_v22, 16  ;;  %v3513_v38 = vrot.slane %v3512_v56, 4  ;;  %5252 = vmatpush3.bf16.msra.mxu0 %v6635_v57  ;;  %v3539_v7 = vshll.u32 %v6794_v2, 16  ;;  %v6820_v57 = vld [vmem:[%s5703_s14 + $0x4c] sm:$0xf] }
  0xe2   : > { %v3523_v36 = vrot.slane %v3522_v35, 4  ;;  %v6806_v1 = vsel %vm6381_vm12, %v4472_v21, %v1540_v42  ;;  %v1542_v0 = vrot.slane %v1540_v42, 4  ;;  %v3532_v4 = vrot.slane %v3530_v39, 4  ;;  %5253 = vmatprep.subr.bf16.mxu0 %v5551_v60  ;;  %v6840_v42 = vld [vmem:[%s5703_s14 + $0x5c] sm:$0x1] }
  0xe3   : > { %v3535_v63 = vrot.slane %v3533_v5, 5  ;;  %v3543_v19 = vshrl.u32 %v6794_v2, 16  ;;  %v3518_v33 = vsel %vm5735_vm3, %v3513_v38, %v3517_v62  ;;  %v3549_v31 = vshll.u32 %v6801_v46, 16  ;;  %v4738_v62 = vld [vmem:[%s5703_s14 + $0x54] sm:$0xf] }
  0xe4   : > { %v3528_v27 = vsel %vm5735_vm3, %v3523_v36, %v3527_v41  ;;  %v1544_v14 = vsel %vm6381_vm12, %v1542_v0, %v1543_v53  ;;  %v3541_v45 = vrot.slane %v3539_v7, 5  ;;  %v3554_v37 = vshrl.u32 %v4735_v49, 16  ;;  %v4741_v38 = vld [vmem:[%s5703_s14 + $0x60] sm:$0xf] }
  0xe5   : > { %v4753_v48 = vcombine.low %v3518_v33, %v3528_v27  ;;  %v4484_v25 = vcombine.low %v6806_v1, %v1544_v14  ;;  %v3536_v8 = vor.u32 %v3535_v63, %v3532_v4  ;;  %v3545_v9 = vrot.slane %v3543_v19, 4  ;;  %5254 = vmatpush3.bf16.msra.mxu0 %v5551_v60  ;;  %v5550_v63 = vld [vmem:[%s5703_s14 + $0xc] sm:$0xff]  }
  0xe6   : > { %5104 = vmatmul.mubr.msk.bf16.gmra.mrb[8].mxu1 %vm533_vm2, %v4482_v20  ;;  %v3551_v22 = vrot.slane %v3549_v31, 5  ;;  %v3557_v18 = vshll.u32 %v4735_v49, 16  ;;  %v3563_v21 = vshll.u32 %v6820_v57, 16  ;;  %v3567_v56 = vshrl.u32 %v6820_v57, 16  ;;  %v6852_v31 = vld [vmem:[%s5703_s14 + $0x64] sm:$0xf] }
  0xe7   : > { %5107 = vmatprep.mubr.msk.bf16.mxu1 %vm533_vm2, %v4483_v23  ;;  %5239 = vmatprep.mubr.msk.bf16.mxu0 %vm533_vm2, %v4753_v48  ;;  %v3537_v59 = vrot.slane %v3536_v8, 4  ;;  %v3573_v35 = vshll.u32 %v6823_v16, 16  ;;  %v3546_v52 = vor.u32 %v3545_v9, %v3541_v45  ;;  %v3556_v20 = vrot.slane %v3554_v37, 4  ;;  %v6855_v37 = vld [vmem:[%s5703_s14 + $0x68] sm:$0x1] }
  0xe8   : > { %v3559_v58 = vrot.slane %v3557_v18, 5  ;;  %v3578_v41 = vshrl.u32 %v4738_v62, 16  ;;  %v3565_v53 = vrot.slane %v3563_v21, 5  ;;  %v3569_v39 = vrot.slane %v3567_v56, 4  ;;  %v4744_v56 = vld [vmem:[%s5703_s14 + $0x6c] sm:$0xf] }
  0xe9   : > { %v3542_v23 = vsel %vm5735_vm3, %v3537_v59, %v3541_v45  ;;  %v3575_v5 = vrot.slane %v3573_v35, 5  ;;  %v3547_v36 = vrot.slane %v3546_v52, 4  ;;  %v3581_v4 = vshll.u32 %v4738_v62, 16 }
  0xea   : > { %v3560_v1 = vor.u32 %v3559_v58, %v3556_v20  ;;  %v3580_v0 = vrot.slane %v3578_v41, 4  ;;  %v3570_v7 = vor.u32 %v3569_v39, %v3565_v53  ;;  %v3587_v19 = vshll.u32 %v6837_v40, 16  ;;  %v6869_v39 = vld [vmem:[%s5703_s14 + $0x70] sm:$0xf] }
  0xeb   : > { %v3591_v49 = vshrl.u32 %v6837_v40, 16  ;;  %v3597_v60 = vshll.u32 %v6840_v42, 16  ;;  %v3552_v33 = vsel %vm5735_vm3, %v3547_v36, %v3551_v22  ;;  %v3583_v14 = vrot.slane %v3581_v4, 5  ;;  %v6872_v4 = vld [vmem:[%s5703_s14 + $0x74] sm:$0x1] }
  0xec   : > { %v3561_v27 = vrot.slane %v3560_v1, 4  ;;  %v3602_v48 = vshrl.u32 %v4741_v38, 16  ;;  %v4754_v8 = vcombine.low %v3542_v23, %v3552_v33  ;;  %v3571_v45 = vrot.slane %v3570_v7, 4 }
  0xed   : > { %v3589_v62 = vrot.slane %v3587_v19, 5  ;;  %v3593_v9 = vrot.slane %v3591_v49, 4  ;;  %v3584_v59 = vor.u32 %v3583_v14, %v3580_v0  ;;  %v3599_v21 = vrot.slane %v3597_v60, 5  ;;  %v4769_v60 = vld [vmem:[%s5703_s14 + $0x18] sm:$0xe] }
  0xee   : > { %5108 = vmatmul.mubr.msk.bf16.gmra.mrb[12].mxu1 %vm533_vm2, %v4484_v25  ;;  %v3566_v18 = vsel %vm5735_vm3, %v3561_v27, %v3565_v53  ;;  %v3604_v22 = vrot.slane %v3602_v48, 4  ;;  %5240 = vmatmul.mubr.msk.bf16.gmra.mrb[4].mxu0 %vm533_vm2, %v4754_v8  ;;  %v3576_v35 = vsel %vm5735_vm3, %v3571_v45, %v3575_v5  ;;  %v3605_v20 = vshll.u32 %v4741_v38, 16  ;;  %v5552_v38 = vld [vmem:[%s5703_s14 + $0x18] sm:$0xff]   ;;  %v5553_v45 = vld [vmem:[%s5703_s14 + $0x24] sm:$0xff]  }
  0xef   : > { %5115 = vmatprep.mubr.msk.bf16.mxu1 %vm533_vm2, %v5550_v63  ;;  %v3594_v52 = vor.u32 %v3593_v9, %v3589_v62  ;;  %v3611_v25 = vshll.u32 %v6852_v31, 16  ;;  %v4755_v58 = vcombine.low %v3566_v18, %v3576_v35  ;;  %v3585_v41 = vrot.slane %v3584_v59, 4  ;;  %v4770_v35 = vld [vmem:[%s5703_s14 + $0x24] sm:$0xe] }
  0xf0   : > { %v3615_v23 = vshrl.u32 %v6852_v31, 16  ;;  %v3621_v53 = vshll.u32 %v6855_v37, 16  ;;  %v3607_v1 = vrot.slane %v3605_v20, 5  ;;  %v3626_v5 = vshrl.u32 %v4744_v56, 16 }
  0xf1   : > { %v3595_v36 = vrot.slane %v3594_v52, 4  ;;  %v3613_v0 = vrot.slane %v3611_v25, 5  ;;  %5243 = vmatprep.mubr.msk.bf16.mxu0 %vm533_vm2, %v4755_v58  ;;  %v3590_v63 = vsel %vm5735_vm3, %v3585_v41, %v3589_v62  ;;  %v3629_v49 = vshll.u32 %v4744_v56, 16 }
  0xf2   : > { %v3617_v7 = vrot.slane %v3615_v23, 4  ;;  %v3623_v19 = vrot.slane %v3621_v53, 5  ;;  %v3608_v27 = vor.u32 %v3607_v1, %v3604_v22  ;;  %v3628_v14 = vrot.slane %v3626_v5, 4 }
  0xf3   : > { %v3600_v33 = vsel %vm5735_vm3, %v3595_v36, %v3599_v21  ;;  %v3635_v48 = vshll.u32 %v6869_v39, 16  ;;  %v3631_v18 = vrot.slane %v3629_v49, 5  ;;  %v3639_v59 = vshrl.u32 %v6869_v39, 16 }
  0xf4   : > { %v4756_v8 = vcombine.low %v3590_v63, %v3600_v33  ;;  %v3618_v9 = vor.u32 %v3617_v7, %v3613_v0  ;;  %v3609_v52 = vrot.slane %v3608_v27, 4  ;;  %v3645_v20 = vshll.u32 %v6872_v4, 16 }
  0xf5   : > { %v3637_v62 = vrot.slane %v3635_v48, 5  ;;  %v4777_v56 = vrot.slane %v4769_v60, 9  ;;  %v3632_v21 = vor.u32 %v3631_v18, %v3628_v14  ;;  %v3641_v22 = vrot.slane %v3639_v59, 4  ;;  %v5554_v60 = vld [vmem:[%s5703_s14 + $0x30] sm:$0xff]   ;;  %v5555_v14 = vld [vmem:[%s5703_s14 + $0x3c] sm:$0xff]  }
  0xf6   : > { %5116 = vmatmul.mubr.msk.bf16.vlgmr.msra.gmra.mrb[0].mxu1 %vm533_vm2, %v5552_v38  ;;  %v3619_v25 = vrot.slane %v3618_v9, 4  ;;  %v3861_v58 = vrot.slane %v6683_v3, 5  ;;  %5244 = vmatmul.mubr.msk.bf16.gmra.mrb[8].mxu0 %vm533_vm2, %v4756_v8  ;;  %v3614_v41 = vsel %vm5735_vm3, %v3609_v52, %v3613_v0  ;;  %v3647_v23 = vrot.slane %v3645_v20, 5  ;;  %v4771_v38 = vld [vmem:[%s5703_s14 + $0x30] sm:$0xe] }
  0xf7   : > { %5273 = vmatpush3.bf16.msra.mxu1 %v6771_v29  ;;  %v3864_v53 = vrot.slane %v6695_v51, 5  ;;  %v4778_v36 = vrot.slane %v4770_v35, 9  ;;  %5119 = vmatprep.mubr.msk.bf16.mxu1 %vm533_vm2, %v5553_v45  ;;  %v3633_v5 = vrot.slane %v3632_v21, 4  ;;  %v3642_v3 = vor.u32 %v3641_v22, %v3637_v62  ;;  %v5572_v29 = vld [vmem:[%s7121_s1 + $0x68] sm:$0xff]  }
  0xf8   : > { %v3624_v1 = vsel %vm5735_vm3, %v3619_v25, %v3623_v19  ;;  %5272 = vmatprep.subr.bf16.mxu1 %v5572_v29  ;;  %v3862_v0 = vsel %vm5927_vm6, %v4777_v56, %v3861_v58  ;;  %v3863_v63 = vrot.slane %v3861_v58, 4  ;;  %v3868_v7 = vrot.slane %v6722_v55, 5  ;;  %v4773_v21 = vld [vmem:[%s5703_s14 + $0x48] sm:$0xe] }
  0xf9   : > { %v4757_v51 = vcombine.low %v3614_v41, %v3624_v1  ;;  %v3871_v49 = vrot.slane %v6730_v34, 5  ;;  %v6906_v19 = vrot.slane %v2098_v43, 5  ;;  %v3638_v33 = vsel %vm5735_vm3, %v3633_v5, %v3637_v62  ;;  %v4545_v43 = vld [vmem:[%s5703_s14 + $0x3c] sm:$0xf] }
  0xfa   : > { %v3643_v27 = vrot.slane %v3642_v3, 4  ;;  %v3875_v48 = vrot.slane %v6756_v50, 5  ;;  %v3865_v8 = vsel %vm5927_vm6, %v3863_v63, %v3864_v53  ;;  %v3870_v55 = vrot.slane %v3868_v7, 4 }
  0xfb   : > { %5247 = vmatprep.mubr.msk.bf16.mxu0 %vm533_vm2, %v4757_v51  ;;  %5274 = vmatpush3.bf16.msra.mxu1 %v5572_v29  ;;  %v4779_v34 = vrot.slane %v4771_v38, 9  ;;  %v4789_v9 = vcombine.low %v3862_v0, %v3865_v8  ;;  %v3869_v18 = vsel %vm5927_vm6, %v4778_v36, %v3868_v7  ;;  %v3878_v50 = vrot.slane %v6762_v61, 5  ;;  %v4548_v36 = vld [vmem:[%s5703_s14 + $0x48] sm:$0xf]  ;;  %v5557_v51 = vld [vmem:[%s5703_s14 + $0x54] sm:$0xff]  }
  0xfc   : > { %v3648_v45 = vsel %vm5735_vm3, %v3643_v27, %v3647_v23  ;;  %v3872_v35 = vsel %vm5927_vm6, %v3870_v55, %v3871_v49  ;;  %v3877_v52 = vrot.slane %v3875_v48, 4  ;;  %v3882_v62 = vrot.slane %v6794_v2, 5  ;;  %v5573_v23 = vld [vmem:[%s5703_s14 + $0x44] sm:$0x1]  ;;  %v5556_v0 = vld [vmem:[%s5703_s14 + $0x48] sm:$0xff]  }
  0xfd   : > { %v4758_v59 = vcombine.low %v3638_v33, %v3648_v45  ;;  %v6929_v20 = vrot.slane %v2095_v10, 4  ;;  %v4780_v56 = vrot.slane %v4772_v11, 9  ;;  %v3885_v25 = vrot.slane %v6801_v46, 5  ;;  %v4551_v8 = vld [vmem:[%s5703_s14 + $0x54] sm:$0xf] }
  0xfe   : > { %5120 = vmatmul.mubr.msk.bf16.gmra.mrb[4].mxu1 %vm533_vm2, %v5554_v60  ;;  %v2055_v61 = vshrl.u32 %v4545_v43, 16  ;;  %v4790_v2 = vcombine.low %v3869_v18, %v3872_v35  ;;  %v3876_v44 = vsel %vm5927_vm6, %v4779_v34, %v3875_v48  ;;  %v3884_v10 = vrot.slane %v3882_v62, 4  ;;  %v4774_v48 = vld [vmem:[%s5703_s14 + $0x54] sm:$0xe] }
  0xff   : > { %5248 = vmatmul.mubr.msk.bf16.gmra.mrb[12].mxu0 %vm533_vm2, %v4758_v59  ;;  %5123 = vmatprep.mubr.msk.bf16.mxu1 %vm533_vm2, %v5555_v14  ;;  %v2058_v22 = vshll.u32 %v4545_v43, 16  ;;  %v2066_v46 = vrot.slane %v2064_v30, 5  ;;  %v2070_v41 = vrot.slane %v2068_v6, 4  ;;  %v2074_v53 = vshll.u32 %v5573_v23, 16 }
 0x100   : > { %5255 = vmatprep.mubr.msk.bf16.mxu0 %vm533_vm2, %v4789_v9  ;;  %v2057_v58 = vrot.slane %v2055_v61, 4  ;;  %v3879_v1 = vsel %vm5927_vm6, %v3877_v52, %v3878_v50  ;;  %v4781_v3 = vrot.slane %v4773_v21, 9  ;;  %v3889_v29 = vrot.slane %v6820_v57, 5  ;;  %v5574_v21 = vld [vmem:[%s5703_s14 + $0x5c] sm:$0x1] }
 0x101   : > { %v2060_v5 = vrot.slane %v2058_v22, 5  ;;  %v6951_v38 = vsel %vm5927_vm6, %v4780_v56, %v3882_v62  ;;  %v6955_v12 = vsel %vm5927_vm6, %v3884_v10, %v3885_v25  ;;  %v2071_v30 = vor.u32 %v2070_v41, %v2066_v46  ;;  %v5558_v10 = vld [vmem:[%s5703_s14 + $0x60] sm:$0xff]  }
 0x102   : > { %v3892_v6 = vrot.slane %v6823_v16, 5  ;;  %v2076_v7 = vrot.slane %v2074_v53, 5  ;;  %v3891_v49 = vrot.slane %v3889_v29, 4  ;;  %v2079_v60 = vshrl.u32 %v4548_v36, 16 }
 0x103   : > { %v2061_v63 = vor.u32 %v2060_v5, %v2057_v58  ;;  %v4791_v33 = vcombine.low %v3876_v44, %v3879_v1  ;;  %v2072_v57 = vrot.slane %v2071_v30, 4  ;;  %v2082_v27 = vshll.u32 %v4548_v36, 16  ;;  %v4554_v44 = vld [vmem:[%s5703_s14 + $0x60] sm:$0xf] }
 0x104   : > { %v2101_v14 = vsel %vm5735_vm3, %v6929_v20, %v6906_v19  ;;  %v3890_v34 = vsel %vm5927_vm6, %v4781_v3, %v3889_v29  ;;  %v3893_v16 = vsel %vm5927_vm6, %v3891_v49, %v3892_v6  ;;  %v2081_v11 = vrot.slane %v2079_v60, 4  ;;  %v4775_v20 = vld [vmem:[%s5703_s14 + $0x60] sm:$0xe] }
 0x105   : > { %v2062_v55 = vrot.slane %v2061_v63, 4  ;;  %v4792_v43 = vcombine.low %v6951_v38, %v6955_v12  ;;  %v2084_v45 = vrot.slane %v2082_v27, 5  ;;  %v3896_v9 = vrot.slane %v6837_v40, 5 }
 0x106   : > { %5124 = vmatmul.mubr.msk.bf16.gmra.mrb[8].mxu1 %vm533_vm2, %v5556_v0  ;;  %v2077_v18 = vsel %vm5735_vm3, %v2072_v57, %v2076_v7  ;;  %v4782_v50 = vrot.slane %v4774_v48, 9  ;;  %v2103_v59 = vshrl.u32 %v4551_v8, 16  ;;  %v4793_v35 = vcombine.low %v3890_v34, %v3893_v16 }
 0x107   : > { %5256 = vmatmul.mubr.msk.bf16.vlgmr.msra.gmra.mrb[0].mxu0 %vm533_vm2, %v4790_v2  ;;  %5127 = vmatprep.mubr.msk.bf16.mxu1 %vm533_vm2, %v5557_v51  ;;  %v2067_v19 = vsel %vm5735_vm3, %v2062_v55, %v2066_v46  ;;  %v2085_v52 = vor.u32 %v2084_v45, %v2081_v11  ;;  %v2106_v40 = vshll.u32 %v4551_v8, 16  ;;  %v2114_v62 = vrot.slane %v2112_v26, 5  ;;  %v5575_v51 = vld [vmem:[%s5703_s14 + $0x68] sm:$0x1]  ;;  %s4367_s14 = sshll.u32 %s7204_s15, 4 }
 0x108   : > { %5259 = vmatprep.mubr.msk.bf16.mxu0 %vm533_vm2, %v4791_v33  ;;  %v3899_v56 = vrot.slane %v6840_v42, 5  ;;  %v2105_v25 = vrot.slane %v2103_v59, 4  ;;  %v2118_v61 = vrot.slane %v2116_v15, 4  ;;  %v2122_v2 = vshll.u32 %v5574_v21, 16  ;;  %s256_s5 = sadd.s32 %s4368_s30, %s4367_s14 }
 0x109   : > { %v4565_v22 = vcombine.low %v2067_v19, %v2077_v18  ;;  %v2086_v58 = vrot.slane %v2085_v52, 4  ;;  %v3898_v46 = vrot.slane %v3896_v9, 4  ;;  %v2108_v41 = vrot.slane %v2106_v40, 5  ;;  %s4369_s6 = sshll.u32 %s256_s5, 2 }
 0x10a   : > { %v2119_v23 = vor.u32 %v2118_v61, %v2114_v62  ;;  %v2124_v53 = vrot.slane %v2122_v2, 5  ;;  %v4783_v36 = vrot.slane %v4775_v20, 9  ;;  %v3903_v26 = vrot.slane %v6852_v31, 5  ;;  %s7037_s9 = scalar_lea.vmem %s7123_s3, %s4369_s6  ;;  %v7044_v61 = vld [vmem:[%s7122_s2] ss:$0 sm:$0xff]  ;;  %s7052_s12 = scalar_lea.vmem %s7124_s4, %s4369_s6 }
 0x10b   : > { %v2091_v42 = vsel %vm5735_vm3, %v2086_v58, %v6272_v28  ;;  %v2109_v1 = vor.u32 %v2108_v41, %v2105_v25  ;;  %v2127_v13 = vshrl.u32 %v4554_v44, 16  ;;  %v2130_v15 = vshll.u32 %v4554_v44, 16  ;;  %v4874_v47 = vld [vmem:[%s7037_s9 + $0x8] sm:$0xff]  }
 0x10c   : > { %v4566_v5 = vcombine.low %v2091_v42, %v2101_v14  ;;  %v2120_v3 = vrot.slane %v2119_v23, 4  ;;  %v3905_v29 = vrot.slane %v3903_v26, 4  ;;  %v3906_v0 = vrot.slane %v6855_v37, 5 }
 0x10d   : > { %v2110_v38 = vrot.slane %v2109_v1, 4  ;;  %v2129_v12 = vrot.slane %v2127_v13, 4  ;;  %v2132_v30 = vrot.slane %v2130_v15, 5  ;;  %v2138_v31 = vrot.slane %v2136_v54, 5 }
 0x10e   : > { %5128 = vmatmul.mubr.msk.bf16.gmra.mrb[12].mxu1 %vm533_vm2, %v5558_v10  ;;  %v3897_v28 = vsel %vm5927_vm6, %v4782_v50, %v3896_v9  ;;  %v3900_v6 = vsel %vm5927_vm6, %v3898_v46, %v3899_v56  ;;  %v2142_v37 = vrot.slane %v2140_v17, 4  ;;  %v2146_v63 = vshll.u32 %v5575_v51, 16  ;;  %v4843_v56 = vld [vmem:[%s7037_s9] sm:$0xff]  }
 0x10f   : > { %5260 = vmatmul.mubr.msk.bf16.gmra.mrb[4].mxu0 %vm533_vm2, %v4792_v43  ;;  %5143 = vmatprep.mubr.msk.bf16.mxu1 %vm533_vm2, %v4565_v22  ;;  %v2115_v54 = vsel %vm5735_vm3, %v2110_v38, %v2114_v62  ;;  %v2125_v7 = vsel %vm5735_vm3, %v2120_v3, %v2124_v53  ;;  %v2133_v49 = vor.u32 %v2132_v30, %v2129_v12  ;;  %v3910_v17 = vrot.slane %v6869_v39, 5  ;;  %v4876_v3 = vld [vmem:[%s7037_s9 + $0x18] sm:$0xff]   ;;  %v4875_v38 = vld [vmem:[%s7037_s9 + $0x10] sm:$0xff]  }
 0x110   : > { %5263 = vmatprep.mubr.msk.bf16.mxu0 %vm533_vm2, %v4793_v35  ;;  %v3904_v60 = vsel %vm5927_vm6, %v4783_v36, %v3903_v26  ;;  %v3907_v33 = vsel %vm5927_vm6, %v3905_v29, %v3906_v0  ;;  %v2143_v57 = vor.u32 %v2142_v37, %v2138_v31  ;;  %v4794_v27 = vcombine.low %v3897_v28, %v3900_v6 }
 0x111   : > { %v4567_v14 = vcombine.low %v2115_v54, %v2125_v7  ;;  %v2134_v48 = vrot.slane %v2133_v49, 4  ;;  %v2148_v55 = vrot.slane %v2146_v63, 5  ;;  %v4795_v34 = vcombine.low %v3904_v60, %v3907_v33 }
 0x112   : > { %v2144_v8 = vrot.slane %v2143_v57, 4  ;;  %v4784_v16 = vrot.slane %v4776_v24, 9  ;;  %v3912_v11 = vrot.slane %v3910_v17, 4  ;;  %v3913_v43 = vrot.slane %v6872_v4, 5 }
 0x113   : > { %v2139_v39 = vsel %vm5735_vm3, %v2134_v48, %v2138_v31  ;;  %v4848_v2 = vunpack.c.l.bf16 %v4874_v47  ;;  %v4844_v22 = vunpack.c.l.bf16 %v4843_v56  ;;  %v4849_v23 = vunpack.c.h.bf16 %v4874_v47 }
 0x114   : > { %v2149_v45 = vsel %vm5735_vm3, %v2144_v8, %v2148_v55  ;;  %v3911_v9 = vsel %vm5927_vm6, %v4784_v16, %v3910_v17  ;;  %v3914_v4 = vsel %vm5927_vm6, %v3912_v11, %v3913_v43  ;;  %v4845_v42 = vunpack.c.h.bf16 %v4843_v56  ;;  %v4878_v16 = vld [vmem:[%s7037_s9 + $0x28] sm:$0xff]  }
 0x115   : > { %v4568_v19 = vcombine.low %v2139_v39, %v2149_v45  ;;  %v4796_v18 = vcombine.low %v3911_v9, %v3914_v4  ;;  %v4856_v37 = vunpack.c.l.bf16 %v4876_v3  ;;  %v4852_v7 = vunpack.c.l.bf16 %v4875_v38  ;;  %v4877_v45 = vld [vmem:[%s7037_s9 + $0x20] sm:$0xff]  }
 0x116   : > { %5144 = vmatmul.mubr.msk.bf16.vlgmr.msra.gmra.mrb[8].mxu1 %vm533_vm2, %v4566_v5  ;;  %v4857_v57 = vunpack.c.h.bf16 %v4876_v3 }
 0x117   : > { %5264 = vmatmul.mubr.msk.bf16.gmra.mrb[8].mxu0 %vm533_vm2, %v4794_v27  ;;  %5147 = vmatprep.mubr.msk.bf16.mxu1 %vm533_vm2, %v4567_v14  ;;  %v4853_v14 = vunpack.c.h.bf16 %v4875_v38 }
 0x118   : > { %5267 = vmatprep.mubr.msk.bf16.mxu0 %vm533_vm2, %v4795_v34 }
 0x11e   : > { %5148 = vmatmul.mubr.msk.bf16.gmra.mrb[12].mxu1 %vm533_vm2, %v4568_v19 }
 0x11f   : > { %5268 = vmatmul.mubr.msk.bf16.gmra.mrb[12].mxu0 %vm533_vm2, %v4796_v18 }
 0x1c9   : > { %v5117_v50 = vpop.f32.mrb[0].mxu1 }
 0x1ca   : > { %v1855_v59 = vpop.f32.mrb[1].mxu1 }
 0x1cb   : > { %v5118_v35 = vpop.f32.mrb[2].mxu1 }
 0x1cc   : > { %v1858_v52 = vpop.f32.mrb[3].mxu1 }
 0x1d1   : > { %v5121_v32 = vpop.f32.mrb[4].mxu1 }
 0x1d2   : > { %v1871_v40 = vpop.f32.mrb[5].mxu1 }
 0x1d3   : > { %v5122_v62 = vpop.f32.mrb[6].mxu1 }
 0x1d4   : > { %v1874_v20 = vpop.f32.mrb[7].mxu1 }
 0x1da   : > { %v5257_v25 = vpop.f32.mrb[0].mxu0 }
 0x1db   : > { %v5275_v21 = vadd.f32 %v5257_v25, %v5117_v50  ;;  %v4014_v44 = vpop.f32.mrb[1].mxu0 }
 0x1dc   : > { %v5276_v10 = vadd.f32 %v4014_v44, %v1855_v59  ;;  %v5258_v58 = vpop.f32.mrb[2].mxu0 }
 0x1dd   : > { %v4102_v46 = vadd.f32 %v5275_v21, %v7044_v61  ;;  %v5277_v41 = vadd.f32 %v5258_v58, %v5118_v35  ;;  %v4017_v53 = vpop.f32.mrb[3].mxu0  ;;  %v4864_v35 = vunpack.c.l.bf16 %v4878_v16  ;;  %v4861_v58 = vunpack.c.h.bf16 %v4877_v45 }
 0x1de   : > { %v4100_v36 = vadd.f32 %v5276_v10, %v7044_v61  ;;  %v5278_v26 = vadd.f32 %v4017_v53, %v1858_v52 }
 0x1df   : > { %v4150_v1 = vadd.f32 %v4848_v2, %v4102_v46  ;;  %v4103_v13 = vadd.f32 %v5277_v41, %v7044_v61  ;;  %v4865_v2 = vunpack.c.h.bf16 %v4878_v16 }
 0x1e0   : > { %v4148_v15 = vadd.f32 %v4844_v22, %v4100_v36  ;;  %v4101_v5 = vadd.f32 %v5278_v26, %v7044_v61  ;;  %v4880_v36 = vld [vmem:[%s7037_s9 + $0x38] sm:$0xff]  }
 0x1e1   : > { %v4828_v29 = vpack.c.bf16 %v4150_v1, %v4150_v1  ;;  %v4151_v0 = vadd.f32 %v4849_v23, %v4103_v13  ;;  %v4879_v13 = vld [vmem:[%s7037_s9 + $0x30] sm:$0xff]  }
 0x1e2   : > { %v4826_v12 = vpack.c.bf16 %v4148_v15, %v4148_v15  ;;  %v4149_v30 = vadd.f32 %v4845_v42, %v4101_v5  ;;  %v5261_v31 = vpop.f32.mrb[4].mxu0 }
 0x1e3   : > { %4231 = vst.msk [vmem:[%s7052_s12 + $0x8] sm:$0xf] %vm4228_vm13, %v4828_v29  ;;  %v4829_v28 = vpack.c.bf16 %v4151_v0, %v4151_v0  ;;  %v5279_v6 = vadd.f32 %v5261_v31, %v5121_v32  ;;  %v4030_v51 = vpop.f32.mrb[5].mxu0 }
 0x1e4   : > { %4229 = vst.msk [vmem:[%s7052_s12] sm:$0xf] %vm4228_vm13, %v4826_v12  ;;  %v4827_v63 = vpack.c.bf16 %v4149_v30, %v4149_v30  ;;  %v5280_v54 = vadd.f32 %v4030_v51, %v1871_v40  ;;  %v5262_v49 = vpop.f32.mrb[6].mxu0  ;;  %v4872_v12 = vunpack.c.l.bf16 %v4880_v36 }
 0x1e5   : > { %4232 = vst.msk [vmem:[%s7052_s12 + $0xc] sm:$0xf] %vm4228_vm13, %v4829_v28  ;;  %v4106_v60 = vadd.f32 %v5279_v6, %v7044_v61  ;;  %v5281_v33 = vadd.f32 %v5262_v49, %v5122_v62  ;;  %v4033_v24 = vpop.f32.mrb[7].mxu0  ;;  %v4873_v49 = vunpack.c.h.bf16 %v4880_v36 }
 0x1e6   : > { %4230 = vst.msk [vmem:[%s7052_s12 + $0x4] sm:$0xf] %vm4228_vm13, %v4827_v63  ;;  %v4104_v17 = vadd.f32 %v5280_v54, %v7044_v61  ;;  %v5282_v27 = vadd.f32 %v4033_v24, %v1874_v20  ;;  %v4860_v20 = vunpack.c.l.bf16 %v4877_v45  ;;  %v4869_v24 = vunpack.c.h.bf16 %v4879_v13 }
 0x1e7   : > { %v4154_v48 = vadd.f32 %v4856_v37, %v4106_v60  ;;  %v4107_v8 = vadd.f32 %v5281_v33, %v7044_v61  ;;  %v4868_v37 = vunpack.c.l.bf16 %v4879_v13 }
 0x1e8   : > { %v4152_v55 = vadd.f32 %v4852_v7, %v4104_v17  ;;  %v4105_v34 = vadd.f32 %v5282_v27, %v7044_v61 }
 0x1e9   : > { %v4832_v11 = vpack.c.bf16 %v4154_v48, %v4154_v48  ;;  %v4155_v43 = vadd.f32 %v4857_v57, %v4107_v8  ;;  %v5145_v39 = vpop.f32.mrb[8].mxu1 }
 0x1ea   : > { %v4830_v9 = vpack.c.bf16 %v4152_v55, %v4152_v55  ;;  %v4153_v4 = vadd.f32 %v4853_v14, %v4105_v34  ;;  %v5265_v19 = vpop.f32.mrb[8].mxu0  ;;  %v2281_v18 = vpop.f32.mrb[9].mxu1 }
 0x1eb   : > { %4235 = vst.msk [vmem:[%s7052_s12 + $0x18] sm:$0xf] %vm4228_vm13, %v4832_v11  ;;  %v4833_v50 = vpack.c.bf16 %v4155_v43, %v4155_v43  ;;  %v5283_v59 = vadd.f32 %v5265_v19, %v5145_v39  ;;  %v4046_v52 = vpop.f32.mrb[9].mxu0  ;;  %v5146_v32 = vpop.f32.mrb[10].mxu1 }
 0x1ec   : > { %4233 = vst.msk [vmem:[%s7052_s12 + $0x10] sm:$0xf] %vm4228_vm13, %v4830_v9  ;;  %v4831_v40 = vpack.c.bf16 %v4153_v4, %v4153_v4  ;;  %v5284_v62 = vadd.f32 %v4046_v52, %v2281_v18  ;;  %v5266_v47 = vpop.f32.mrb[10].mxu0  ;;  %v2284_v56 = vpop.f32.mrb[11].mxu1 }
 0x1ed   : > { %4236 = vst.msk [vmem:[%s7052_s12 + $0x1c] sm:$0xf] %vm4228_vm13, %v4833_v50  ;;  %v4110_v25 = vadd.f32 %v5283_v59, %v7044_v61  ;;  %v5285_v21 = vadd.f32 %v5266_v47, %v5146_v32  ;;  %v4049_v44 = vpop.f32.mrb[11].mxu0 }
 0x1ee   : > { %4234 = vst.msk [vmem:[%s7052_s12 + $0x14] sm:$0xf] %vm4228_vm13, %v4831_v40  ;;  %v4108_v10 = vadd.f32 %v5284_v62, %v7044_v61  ;;  %v5286_v22 = vadd.f32 %v4049_v44, %v2284_v56 }
 0x1ef   : > { %v4158_v46 = vadd.f32 %v4864_v35, %v4110_v25  ;;  %v4111_v41 = vadd.f32 %v5285_v21, %v7044_v61 }
 0x1f0   : > { %v4156_v23 = vadd.f32 %v4860_v20, %v4108_v10  ;;  %v4109_v53 = vadd.f32 %v5286_v22, %v7044_v61 }
 0x1f1   : > { %v4836_v26 = vpack.c.bf16 %v4158_v46, %v4158_v46  ;;  %v4159_v42 = vadd.f32 %v4865_v2, %v4111_v41  ;;  %v5149_v1 = vpop.f32.mrb[12].mxu1 }
 0x1f2   : > { %v4834_v15 = vpack.c.bf16 %v4156_v23, %v4156_v23  ;;  %v4157_v5 = vadd.f32 %v4861_v58, %v4109_v53  ;;  %v5269_v3 = vpop.f32.mrb[12].mxu0  ;;  %v2297_v29 = vpop.f32.mrb[13].mxu1 }
 0x1f3   : > { %4239 = vst.msk [vmem:[%s7052_s12 + $0x28] sm:$0xf] %vm4228_vm13, %v4836_v26  ;;  %v4837_v0 = vpack.c.bf16 %v4159_v42, %v4159_v42  ;;  %v5287_v38 = vadd.f32 %v5269_v3, %v5149_v1  ;;  %v4062_v30 = vpop.f32.mrb[13].mxu0  ;;  %v5150_v31 = vpop.f32.mrb[14].mxu1 }
 0x1f4   : > { %4237 = vst.msk [vmem:[%s7052_s12 + $0x20] sm:$0xf] %vm4228_vm13, %v4834_v15  ;;  %v4835_v28 = vpack.c.bf16 %v4157_v5, %v4157_v5  ;;  %v5288_v6 = vadd.f32 %v4062_v30, %v2297_v29  ;;  %v5270_v51 = vpop.f32.mrb[14].mxu0  ;;  %v2300_v63 = vpop.f32.mrb[15].mxu1 }
 0x1f5   : > { %4240 = vst.msk [vmem:[%s7052_s12 + $0x2c] sm:$0xf] %vm4228_vm13, %v4837_v0  ;;  %v4114_v54 = vadd.f32 %v5287_v38, %v7044_v61  ;;  %v5289_v7 = vadd.f32 %v5270_v51, %v5150_v31  ;;  %v4065_v60 = vpop.f32.mrb[15].mxu0 }
 0x1f6   : > { %4238 = vst.msk [vmem:[%s7052_s12 + $0x24] sm:$0xf] %vm4228_vm13, %v4835_v28  ;;  %v4112_v33 = vadd.f32 %v5288_v6, %v7044_v61  ;;  %v5290_v57 = vadd.f32 %v4065_v60, %v2300_v63 }
 0x1f7   : > { %v4162_v17 = vadd.f32 %v4872_v12, %v4114_v54  ;;  %v4115_v27 = vadd.f32 %v5289_v7, %v7044_v61 }
 0x1f8   : > { %v4160_v14 = vadd.f32 %v4868_v37, %v4112_v33  ;;  %v4113_v48 = vadd.f32 %v5290_v57, %v7044_v61 }
 0x1f9   : > { %v4840_v8 = vpack.c.bf16 %v4162_v17, %v4162_v17  ;;  %v4163_v55 = vadd.f32 %v4873_v49, %v4115_v27 }
 0x1fa   : > { %v4838_v34 = vpack.c.bf16 %v4160_v14, %v4160_v14  ;;  %v4161_v16 = vadd.f32 %v4869_v24, %v4113_v48 }
 0x1fb   : > { %4243 = vst.msk [vmem:[%s7052_s12 + $0x38] sm:$0xf] %vm4228_vm13, %v4840_v8  ;;  %v4841_v11 = vpack.c.bf16 %v4163_v55, %v4163_v55 }
 0x1fc   : > { %4241 = vst.msk [vmem:[%s7052_s12 + $0x30] sm:$0xf] %vm4228_vm13, %v4838_v34  ;;  %v4839_v43 = vpack.c.bf16 %v4161_v16, %v4161_v16 }
 0x1fd   : > { %4244 = vst.msk [vmem:[%s7052_s12 + $0x3c] sm:$0xf] %vm4228_vm13, %v4841_v11 }
 0x1fe   : > { %4242 = vst.msk [vmem:[%s7052_s12 + $0x34] sm:$0xf] %vm4228_vm13, %v4839_v43 }
 0x1ff PF: > { %s14_s19 = sadd.s32 1, %s5614_s19   ;;  %s7191_s15 = smov %s5606_s17 }
 0x200   : > { %p11_p7 = scmp.ge.s32.totalorder %s14_s19, 6   ;;  %s7192_s16 = smov %s5610_s18 }
 0x201   : > { %s7193_s17 = smov %s7196_s20  ;;  %s7194_s18 = smov %s7200_s21 }
 0x202   :  { %13 = sbr.rel (!%p11_p7) target bundleno = 3 (0x3), region = 83 }

// kernel: coding_hh_lossless_forward.12
= control target key start
LH: loop header
LB: loop body
LE: loop exit
PB: predicated region body
PF: predicated region fallthrough
CT: control target
= control target key end

     0   :  { %s5834_s18 = smov 0   ;;  %s5836_s19 = smov 0   ;;  %s7362_s0 = inlined_call_operand.vmem [shape: bf16[2,2,12,20,32], index: 0, kind: input, shape index: {}]   ;;  %s7363_s1 = inlined_call_operand.vmem [shape: bf16[13,32,32], index: 1, kind: input, shape index: {}]   ;;  %s7364_s2 = inlined_call_operand.vmem [shape: f32[1,32], index: 2, kind: input, shape index: {}]   ;;  %s7365_s3 = inlined_call_operand.vmem [shape: bf16[2,2,8,16,32], index: 3, kind: input, shape index: {}]   ;;  %s7366_s4 = inlined_call_operand.vmem [shape: bf16[2,2,8,16,32], index: 4, kind: input, shape index: {}]   ;;  %s7367_s5 = inlined_call_operand.vmem [shape: bf16[2,2,8,16,32], index: 5, kind: output, shape index: {}]  }
   0x1   :  { %s5838_s20 = smov 0   ;;  %s5840_s21 = smov 0  }
   0x2   :  { %s5842_s22 = smov 0  }
   0x3 LB: > { %s24_s23 = sadd.s32 1, %s5794_s20  ;;  %s27_s24 = sadd.s32 1, %s5798_s21  ;;  %s5802_s22 = sphi %s5842_s22, %s15_s22   ;;  %s5798_s21 = sphi %s5840_s21, %s7437_s21   ;;  %s5794_s20 = sphi %s5838_s20, %s7436_s20   ;;  %s5790_s19 = sphi %s5836_s19, %s7435_s19   ;;  %s5786_s18 = sphi %s5834_s18, %s7434_s18  }
   0x4   : > { %p25_p0 = scmp.ge.s32.totalorder %s24_s23, 2  ;;  %p4511_p1 = scmp.ge.s32.totalorder %s5802_s22, 1 }
   0x5   : > { %p239_p2 = scmp.lt.s32.totalorder %s5802_s22, 5 }
   0x6   : > { %s7439_s23 = smov (%p25_p0, %s24_s23), 0  ;;  %s7441_s24 = smov (!%p25_p0, %s27_s24), %s5798_s21 }
   0x7   : > { %p240_p3 = pnand %p4511_p1, %p239_p2  ;;  %p29_p4 = scmp.ge.s32.totalorder %s7441_s24, 2 }
   0x9   : > { %s7443_s24 = smov (%p29_p4, %s7441_s24), 0  ;;  %243 = sbr.rel (%p240_p3) target bundleno = 515 (0x203), region = 40 }
  0x10   : > { %v5697_v0 = vld [vmem:[%s7363_s1 + $0x10] sm:$0xff]   ;;  %p293_p5 = scmp.lt.s32.totalorder %s5790_s19, 1  ;;  %v5698_v1 = vld [vmem:[%s7363_s1 + $0x60] sm:$0xff]   ;;  %p295_p6 = scmp.lt.s32.totalorder %s5786_s18, 1  ;;  %v5699_v2 = vld [vmem:[%s7363_s1 + $0x18] sm:$0xff]   ;;  %vm594_vm2 = vcmask 261120  }
  0x11   : > { %5199 = vmatprep.subr.bf16.mxu1 %v5697_v0  ;;  %5319 = vmatprep.subr.bf16.mxu0 %v5698_v1  ;;  %v5700_v3 = vld [vmem:[%s7363_s1 + $0x68] sm:$0xff]   ;;  %v5885_v4 = vld [vmem:[%s7363_s1] sm:$0xff]   ;;  %v5890_v5 = vld [vmem:[%s7363_s1 + $0x70] sm:$0xff]   ;;  %vm358_vm0 = vsmask.f32 3328  ;;  %v7392_v30 = vmov 0 }
  0x12   : > { %s7445_s19 = smov (!%p293_p5, %s5790_s19), 1  ;;  %5200 = vmatpush3.bf16.msra.mxu1 %v5697_v0  ;;  %s7447_s18 = smov (!%p295_p6, %s5786_s18), 1  ;;  %5320 = vmatpush3.bf16.msra.mxu0 %v5698_v1  ;;  %vm359_vm1 = vsmask.f32 7440  ;;  %vm913_vm4 = vcmask 1042432   ;;  %vm914_vm5 = vcmask 1046532  }
  0x13   : > { %5201 = vmatprep.subr.bf16.mxu1 %v5699_v2  ;;  %s5656_s8 = smul.u32 72, %s7445_s19  ;;  %5321 = vmatprep.subr.bf16.mxu0 %v5700_v3  ;;  %vm5928_vm3 = vmor %vm358_vm0, %vm359_vm1  ;;  %vm1158_vm7 = vsmask.f32 2304  ;;  %vm1159_vm8 = vsmask.f32 6416  ;;  %vm1547_vm10 = vcmask 1041408  }
  0x14   : > { %s5655_s9 = smul.u32 36, %s7447_s18  ;;  %v7393_v30 = vsel %vm5928_vm3, 4294967295, %v7392_v30  ;;  %vm6120_vm6 = vmor %vm913_vm4, %vm914_vm5  ;;  %vm1548_vm11 = vcmask 1045508   ;;  %s4514_s11 = sshll.u32 %s7445_s19, 5  ;;  %vm4353_vm13 = vcmask 257024  }
  0x15   : > { %7394 = vst [vmem:[#allocation4_spill] sm:$0xff] %v7393_v30  ;;  %vm6340_vm9 = vmor %vm1158_vm7, %vm1159_vm8 }
  0x16   : > { %5202 = vmatpush3.bf16.msra.mxu1 %v5699_v2  ;;  %s299_s12 = sadd.s32 %s5656_s8, %s5655_s9  ;;  %5322 = vmatpush3.bf16.msra.mxu0 %v5700_v3  ;;  %vm6574_vm12 = vmor %vm1547_vm10, %vm1548_vm11 }
  0x17   : > { %s4512_s15 = sshll.u32 %s299_s12, 2  ;;  %5219 = vmatprep.subr.bf16.mxu1 %v5885_v4  ;;  %5339 = vmatprep.subr.bf16.mxu0 %v5890_v5 }
  0x18   : > { %s5896_s25 = scalar_lea.vmem %s7362_s0, %s4512_s15 }
  0x19   : > { %v5900_v6 = vld [vmem:[%s5896_s25] sm:$0xf]  ;;  %v5903_v7 = vld [vmem:[%s5896_s25 + $0x4] sm:$0xf]  ;;  %v5906_v8 = vld [vmem:[%s5896_s25 + $0x8] sm:$0x1] }
  0x1a   : > { %v362_v9 = vshrl.u32 %v5900_v6, 16  ;;  %v365_v10 = vshll.u32 %v5900_v6, 16  ;;  %v371_v11 = vshll.u32 %v5903_v7, 16  ;;  %v375_v12 = vshrl.u32 %v5903_v7, 16  ;;  %v4682_v13 = vld [vmem:[%s5896_s25 + $0xc] sm:$0xf] }
  0x1b   : > { %v381_v14 = vshll.u32 %v5906_v8, 16  ;;  %v5916_v16 = vld [vmem:[%s5896_s25 + $0x10] sm:$0xf]  ;;  %v5919_v21 = vld [vmem:[%s5896_s25 + $0x14] sm:$0x1]  ;;  %v2020_v25 = vshrl.u32 %v4682_v13, 16 }
  0x1c   : > { %v364_v17 = vrot.slane %v362_v9, 4  ;;  %v367_v18 = vrot.slane %v365_v10, 5  ;;  %v373_v19 = vrot.slane %v371_v11, 5  ;;  %v377_v20 = vrot.slane %v375_v12, 4  ;;  %v5936_v35 = vld [vmem:[%s5896_s25 + $0xc] sm:$0xf] }
  0x1d   : > { %v383_v22 = vrot.slane %v381_v14, 5  ;;  %v5921_v23 = vrot.slane %v375_v12, 5  ;;  %v5923_v24 = vrot.slane %v371_v11, 6  ;;  %v2023_v28 = vshll.u32 %v4682_v13, 16  ;;  %v5939_v40 = vld [vmem:[%s5896_s25 + $0x10] sm:$0xf] }
  0x1e   : > { %v368_v26 = vor.u32 %v367_v18, %v364_v17  ;;  %v378_v27 = vor.u32 %v377_v20, %v373_v19  ;;  %v2029_v29 = vshll.u32 %v5916_v16, 16  ;;  %v2022_v31 = vrot.slane %v2020_v25, 4  ;;  %v5946_v45 = vld [vmem:[%s5896_s25 + $0x14] sm:$0x1]  ;;  %v4685_v58 = vld [vmem:[%s5896_s25 + $0x18] sm:$0xf] }
  0x1f   : > { %7390 = vst [vmem:[#allocation2_spill] sm:$0xff] %v5921_v23  ;;  %7391 = vst [vmem:[#allocation3_spill] sm:$0xff] %v5923_v24  ;;  %v2033_v32 = vshrl.u32 %v5916_v16, 16  ;;  %v2039_v33 = vshll.u32 %v5919_v21, 16  ;;  %v2426_v34 = vrot.slane %v5919_v21, 5  ;;  %v2025_v38 = vrot.slane %v2023_v28, 5 }
  0x20   : > { %v369_v36 = vrot.slane %v368_v26, 4  ;;  %v379_v37 = vrot.slane %v378_v27, 4  ;;  %v2031_v39 = vrot.slane %v2029_v29, 5  ;;  %v5943_v44 = vrot.slane %v2029_v29, 6  ;;  %v5961_v63 = vld [vmem:[%s5896_s25 + $0x1c] sm:$0xf] }
  0x21   : > { %v2035_v41 = vrot.slane %v2033_v32, 4  ;;  %v2041_v42 = vrot.slane %v2039_v33, 5  ;;  %v5941_v43 = vrot.slane %v2033_v32, 5  ;;  %v2026_v48 = vor.u32 %v2025_v38, %v2022_v31  ;;  %v5968_v12 = vld [vmem:[%s5896_s25 + $0x20] sm:$0x1] }
  0x22   : > { %v374_v46 = vsel %vm5928_vm3, %v369_v36, %v373_v19  ;;  %v384_v47 = vsel %vm5928_vm3, %v379_v37, %v383_v22  ;;  %v386_v49 = vshrl.u32 %v5936_v35, 16  ;;  %v389_v52 = vshll.u32 %v5936_v35, 16  ;;  %v5977_v32 = vld [vmem:[%s5896_s25 + $0x18] sm:$0xf]  ;;  %v6116_v36 = vld [vmem:[%s5896_s25 + $0x40] sm:$0xf] }
  0x23   : > { %v4526_v50 = vcombine.low %v374_v46, %v384_v47  ;;  %v2036_v51 = vor.u32 %v2035_v41, %v2031_v39  ;;  %v395_v53 = vshll.u32 %v5939_v40, 16  ;;  %v2027_v54 = vrot.slane %v2026_v48, 4  ;;  %v5989_v48 = vld [vmem:[%s5896_s25 + $0x20] sm:$0x1]  ;;  %v6139_v62 = vld [vmem:[%s5896_s25 + $0x18] sm:$0xe] }
  0x24   : > { %v388_v55 = vrot.slane %v386_v49, 4  ;;  %v399_v56 = vshrl.u32 %v5939_v40, 16  ;;  %v405_v57 = vshll.u32 %v5946_v45, 16  ;;  %v391_v60 = vrot.slane %v389_v52, 5  ;;  %v6275_v24 = vld [vmem:[%s5896_s25 + $0x64] sm:$0xf] }
  0x25   : > { %5203 = vmatprep.mubr.msk.bf16.mxu1 %vm594_vm2, %v4526_v50  ;;  %v2037_v59 = vrot.slane %v2036_v51, 4  ;;  %v397_v61 = vrot.slane %v395_v53, 5  ;;  %v2032_v0 = vsel %vm5928_vm3, %v2027_v54, %v2031_v39  ;;  %v1194_v11 = vrot.slane %v395_v53, 6  ;;  %v5984_v39 = vld [vmem:[%s5896_s25 + $0x1c] sm:$0xf]  ;;  %v5704_v53 = vld [vmem:[%s7363_s1 + $0x8] sm:$0xff]  }
  0x26   : > { %v401_v1 = vrot.slane %v399_v56, 4  ;;  %v407_v2 = vrot.slane %v405_v57, 5  ;;  %v1193_v3 = vrot.slane %v399_v56, 5  ;;  %v392_v10 = vor.u32 %v391_v60, %v388_v55 }
  0x27   : > { %v2042_v9 = vsel %vm5928_vm3, %v2037_v59, %v2041_v42  ;;  %v2044_v13 = vshrl.u32 %v4685_v58, 16  ;;  %v2047_v18 = vshll.u32 %v4685_v58, 16  ;;  %v2053_v19 = vshll.u32 %v5961_v63, 16  ;;  %v4688_v58 = vld [vmem:[%s5896_s25 + $0x24] sm:$0xf] }
  0x28   : > { %v4710_v14 = vcombine.low %v2032_v0, %v2042_v9  ;;  %v402_v17 = vor.u32 %v401_v1, %v397_v61  ;;  %v393_v20 = vrot.slane %v392_v10, 4  ;;  %v5971_v22 = vor.u32 %v1194_v11, %v1193_v3  ;;  %v6004_v1 = vld [vmem:[%s5896_s25 + $0x28] sm:$0xf]  ;;  %v6014_v11 = vld [vmem:[%s5896_s25 + $0x2c] sm:$0x1] }
  0x29   : > { %v2046_v25 = vrot.slane %v2044_v13, 4  ;;  %v2057_v26 = vshrl.u32 %v5961_v63, 16  ;;  %v2049_v28 = vrot.slane %v2047_v18, 5  ;;  %v2055_v29 = vrot.slane %v2053_v19, 5  ;;  %v6020_v18 = vld [vmem:[%s5896_s25 + $0x24] sm:$0xf] }
  0x2a   : > { %7395 = vst [vmem:[#allocation5_spill] sm:$0xff] %v5971_v22  ;;  %5323 = vmatprep.mubr.msk.bf16.mxu0 %vm594_vm2, %v4710_v14  ;;  %v403_v27 = vrot.slane %v402_v17, 4  ;;  %v2063_v31 = vshll.u32 %v5968_v12, 16  ;;  %v398_v33 = vsel %vm5928_vm3, %v393_v20, %v397_v61  ;;  %v2433_v38 = vrot.slane %v5968_v12, 5  ;;  %v6246_v14 = vld [vmem:[%s5896_s25 + $0x4c] sm:$0xf] }
  0x2b   : > { %v2059_v37 = vrot.slane %v2057_v26, 4  ;;  %v2050_v42 = vor.u32 %v2049_v28, %v2046_v25  ;;  %v2695_v47 = vrot.slane %v2057_v26, 5  ;;  %v2696_v51 = vrot.slane %v2053_v19, 6  ;;  %v6025_v19 = vld [vmem:[%s7363_s1 + $0x20] sm:$0xff]   ;;  %v5703_v28 = vld [vmem:[%s7363_s1 + $0x78] sm:$0xff]  }
  0x2c   : > { %v408_v41 = vsel %vm5928_vm3, %v403_v27, %v407_v2  ;;  %v2065_v46 = vrot.slane %v2063_v31, 5  ;;  %v410_v52 = vshrl.u32 %v5977_v32, 16  ;;  %v413_v55 = vshll.u32 %v5977_v32, 16 }
  0x2d   : > { %v4527_v49 = vcombine.low %v398_v33, %v408_v41  ;;  %v2060_v50 = vor.u32 %v2059_v37, %v2055_v29  ;;  %v2051_v54 = vrot.slane %v2050_v42, 4  ;;  %v7370_v56 = vshll.u32 %v5984_v39, 16  ;;  %v6034_v41 = vld [vmem:[%s5896_s25 + $0x28] sm:$0xf] }
  0x2e   : > { %v7373_v57 = vshrl.u32 %v5984_v39, 16  ;;  %v6000_v60 = vor.u32 %v2696_v51, %v2695_v47  ;;  %v412_v61 = vrot.slane %v410_v52, 4  ;;  %v429_v0 = vshll.u32 %v5989_v48, 16 }
  0x2f   : > { %5204 = vmatmul.mubr.msk.bf16.vlgmr.msra.gmra.mrb[0].mxu1 %vm594_vm2, %v4527_v49  ;;  %v2061_v59 = vrot.slane %v2060_v50, 4  ;;  %v2056_v2 = vsel %vm5928_vm3, %v2051_v54, %v2055_v29  ;;  %v415_v3 = vrot.slane %v413_v55, 5  ;;  %v421_v9 = vrot.slane %v7370_v56, 5  ;;  %v6038_v49 = vld [vmem:[%s5896_s25 + $0x2c] sm:$0x1] }
  0x30   : > { %5220 = vmatpush3.bf16.msra.mxu1 %v5885_v4  ;;  %v425_v10 = vrot.slane %v7373_v57, 4  ;;  %v431_v17 = vrot.slane %v429_v0, 5  ;;  %v2068_v4 = vshrl.u32 %v4688_v58, 16  ;;  %v2071_v27 = vshll.u32 %v4688_v58, 16  ;;  %v4691_v58 = vld [vmem:[%s5896_s25 + $0x30] sm:$0xf] }
  0x31   : > { %v2066_v13 = vsel %vm5928_vm3, %v2061_v59, %v2065_v46  ;;  %5221 = vmatprep.subr.bf16.mxu1 %v5704_v53  ;;  %v416_v25 = vor.u32 %v415_v3, %v412_v61  ;;  %v7382_v31 = vshll.u32 %v6004_v1, 16  ;;  %v7383_v33 = vshrl.u32 %v6004_v1, 16  ;;  %v6056_v0 = vld [vmem:[%s7363_s1 + $0x80] sm:$0xff]  }
  0x32   : > { %v4711_v20 = vcombine.low %v2056_v2, %v2066_v13  ;;  %v426_v26 = vor.u32 %v425_v10, %v421_v9  ;;  %v2070_v29 = vrot.slane %v2068_v4, 4  ;;  %v2087_v37 = vshll.u32 %v6014_v11, 16  ;;  %v6060_v4 = vld [vmem:[%s5896_s25 + $0x34] sm:$0xf] }
  0x33   : > { %v417_v42 = vrot.slane %v416_v25, 4  ;;  %v2073_v47 = vrot.slane %v2071_v27, 5  ;;  %v434_v50 = vshrl.u32 %v6020_v18, 16  ;;  %v2079_v51 = vrot.slane %v7382_v31, 5  ;;  %v6065_v25 = vld [vmem:[%s5896_s25 + $0x38] sm:$0x1] }
  0x34   : > { %5324 = vmatmul.mubr.msk.bf16.vlgmr.msra.gmra.mrb[0].mxu0 %vm594_vm2, %v4711_v20  ;;  %v427_v46 = vrot.slane %v426_v26, 4  ;;  %5222 = vmatpush3.bf16.msra.mxu1 %v5704_v53  ;;  %v2083_v52 = vrot.slane %v7383_v33, 4  ;;  %v2089_v54 = vrot.slane %v2087_v37, 5  ;;  %v437_v55 = vshll.u32 %v6020_v18, 16  ;;  %v4702_v33 = vld [vmem:[%s5896_s25 + $0x5c] sm:$0x1] }
  0x35   : > { %5340 = vmatpush3.bf16.msra.mxu0 %v5890_v5  ;;  %5239 = vmatprep.subr.bf16.mxu1 %v6025_v19  ;;  %v422_v59 = vsel %vm5928_vm3, %v417_v42, %v421_v9  ;;  %v2074_v53 = vor.u32 %v2073_v47, %v2070_v29  ;;  %v436_v61 = vrot.slane %v434_v50, 4  ;;  %v7368_v13 = vshll.u32 %v6034_v41, 16 }
  0x36   : > { %v432_v5 = vsel %vm5928_vm3, %v427_v46, %v431_v17  ;;  %5341 = vmatprep.subr.bf16.mxu0 %v5703_v28  ;;  %v2084_v3 = vor.u32 %v2083_v52, %v2079_v51  ;;  %v439_v10 = vrot.slane %v437_v55, 5  ;;  %v7369_v17 = vshrl.u32 %v6034_v41, 16  ;;  %v6071_v46 = vld [vmem:[%s5896_s25 + $0x30] sm:$0xf] }
  0x37   : > { %v4528_v2 = vcombine.low %v422_v59, %v432_v5  ;;  %v2075_v9 = vrot.slane %v2074_v53, 4  ;;  %v453_v20 = vshll.u32 %v6038_v49, 16  ;;  %v2092_v26 = vshrl.u32 %v4691_v58, 16 }
  0x38   : > { %v2085_v27 = vrot.slane %v2084_v3, 4  ;;  %v440_v29 = vor.u32 %v439_v10, %v436_v61  ;;  %v445_v37 = vrot.slane %v7368_v13, 5  ;;  %v2095_v42 = vshll.u32 %v4691_v58, 16  ;;  %v6084_v3 = vld [vmem:[%s5896_s25 + $0x34] sm:$0xf] }
  0x39   : > { %5207 = vmatprep.mubr.msk.bf16.mxu1 %vm594_vm2, %v4528_v2  ;;  %5342 = vmatpush3.bf16.msra.mxu0 %v5703_v28  ;;  %v2080_v47 = vsel %vm5928_vm3, %v2075_v9, %v2079_v51  ;;  %v449_v50 = vrot.slane %v7369_v17, 4  ;;  %v455_v52 = vrot.slane %v453_v20, 5  ;;  %v2094_v55 = vrot.slane %v2092_v26, 4  ;;  %v6091_v20 = vld [vmem:[%s5896_s25 + $0x38] sm:$0x1] }
  0x3a   : > { %5359 = vmatprep.subr.bf16.mxu0 %v6056_v0  ;;  %v2090_v59 = vsel %vm5928_vm3, %v2085_v27, %v2089_v54  ;;  %v441_v5 = vrot.slane %v440_v29, 4  ;;  %v2097_v58 = vrot.slane %v2095_v42, 5  ;;  %v7374_v28 = vshll.u32 %v6060_v4, 16 }
  0x3b   : > { %v4712_v53 = vcombine.low %v2080_v47, %v2090_v59  ;;  %v450_v61 = vor.u32 %v449_v50, %v445_v37  ;;  %v7379_v2 = vshrl.u32 %v6060_v4, 16  ;;  %v2111_v51 = vshll.u32 %v6065_v25, 16 }
  0x3c   : > { %v446_v10 = vsel %vm5928_vm3, %v441_v5, %v445_v37  ;;  %v2098_v9 = vor.u32 %v2097_v58, %v2094_v55  ;;  %v2103_v54 = vrot.slane %v7374_v28, 5  ;;  %v458_v26 = vshrl.u32 %v6071_v46, 16  ;;  %v6101_v5 = vld [vmem:[%s5896_s25 + $0xc] sm:$0xe] }
  0x3d   : > { %5327 = vmatprep.mubr.msk.bf16.mxu0 %vm594_vm2, %v4712_v53  ;;  %v451_v27 = vrot.slane %v450_v61, 4  ;;  %v2107_v29 = vrot.slane %v7379_v2, 4  ;;  %v2113_v42 = vrot.slane %v2111_v51, 5  ;;  %v461_v47 = vshll.u32 %v6071_v46, 16  ;;  %v6107_v51 = vld [vmem:[%s5896_s25 + $0x3c] sm:$0xf] }
  0x3e   : > { %v2099_v37 = vrot.slane %v2098_v9, 4  ;;  %v460_v50 = vrot.slane %v458_v26, 4  ;;  %v7371_v55 = vshll.u32 %v6084_v3, 16  ;;  %v7372_v59 = vshrl.u32 %v6084_v3, 16  ;;  %v6207_v2 = vld [vmem:[%s5896_s25 + $0x30] sm:$0xe] }
  0x3f   : > { %v456_v58 = vsel %vm5928_vm3, %v451_v27, %v455_v52  ;;  %v2108_v53 = vor.u32 %v2107_v29, %v2103_v54  ;;  %v463_v61 = vrot.slane %v461_v47, 5  ;;  %v477_v13 = vshll.u32 %v6091_v20, 16 }
  0x40   : > { %v4529_v17 = vcombine.low %v446_v10, %v456_v58  ;;  %v2104_v9 = vsel %vm5928_vm3, %v2099_v37, %v2103_v54  ;;  %v469_v26 = vrot.slane %v7371_v55, 5  ;;  %v473_v56 = vrot.slane %v7372_v59, 4  ;;  %v6128_v58 = vld [vmem:[%s5896_s25 + $0x44] sm:$0x1] }
  0x41   : > { %v2109_v52 = vrot.slane %v2108_v53, 4  ;;  %v464_v27 = vor.u32 %v463_v61, %v460_v50  ;;  %v479_v29 = vrot.slane %v477_v13, 5  ;;  %v4736_v10 = vrot.slane %v6101_v5, 9 }
  0x42   : > { %5208 = vmatmul.mubr.msk.bf16.gmra.mrb[4].mxu1 %vm594_vm2, %v4529_v17  ;;  %v474_v54 = vor.u32 %v473_v56, %v469_v26  ;;  %v2423_v37 = vrot.slane %v5916_v16, 5  ;;  %v482_v50 = vshrl.u32 %v6107_v51, 16  ;;  %v485_v13 = vshll.u32 %v6107_v51, 16 }
  0x43   : > { %v2114_v53 = vsel %vm5928_vm3, %v2109_v52, %v2113_v42  ;;  %v465_v61 = vrot.slane %v464_v27, 4  ;;  %v7375_v55 = vshll.u32 %v6116_v36, 16  ;;  %v7378_v59 = vshrl.u32 %v6116_v36, 16  ;;  %v6146_v27 = vld [vmem:[%s5896_s25 + $0x48] sm:$0xf] }
  0x44   : > { %v4713_v17 = vcombine.low %v2104_v9, %v2114_v53  ;;  %v475_v56 = vrot.slane %v474_v54, 4  ;;  %v2424_v16 = vsel %vm6120_vm6, %v4736_v10, %v2423_v37  ;;  %v2425_v57 = vrot.slane %v2423_v37, 4  ;;  %v6159_v37 = vld [vmem:[%s5896_s25 + $0x4c] sm:$0xf] }
  0x45   : > { %v470_v15 = vsel %vm5928_vm3, %v465_v61, %v469_v26  ;;  %v484_v28 = vrot.slane %v482_v50, 4  ;;  %v487_v42 = vrot.slane %v485_v13, 5  ;;  %v493_v52 = vrot.slane %v7375_v55, 5  ;;  %v6184_v55 = vld [vmem:[%s5896_s25 + $0x54] sm:$0xf] }
  0x46   : > { %5328 = vmatmul.mubr.msk.bf16.gmra.mrb[4].mxu0 %vm594_vm2, %v4713_v17  ;;  %v480_v9 = vsel %vm5928_vm3, %v475_v56, %v479_v29  ;;  %v2427_v10 = vsel %vm6120_vm6, %v2425_v57, %v2426_v34  ;;  %v497_v26 = vrot.slane %v7378_v59, 4  ;;  %v501_v54 = vshll.u32 %v6128_v58, 16  ;;  %v6163_v17 = vld [vmem:[%s5896_s25 + $0x50] sm:$0x1]  ;;  %v6168_v57 = vld [vmem:[%s5896_s25 + $0x24] sm:$0xe] }
  0x47   : > { %v4530_v50 = vcombine.low %v470_v15, %v480_v9  ;;  %v4748_v13 = vcombine.low %v2424_v16, %v2427_v10  ;;  %v488_v53 = vor.u32 %v487_v42, %v484_v28  ;;  %v4737_v61 = vrot.slane %v6139_v62, 9  ;;  %7398 = vst [vmem:[#allocation6_spill] sm:$0xff] %v6163_v17  ;;  %v6198_v59 = vld [vmem:[%s5896_s25 + $0x5c] sm:$0x1] }
  0x48   : > { %v498_v29 = vor.u32 %v497_v26, %v493_v52  ;;  %v503_v56 = vrot.slane %v501_v54, 5  ;;  %v2430_v21 = vrot.slane %v5961_v63, 5  ;;  %v506_v34 = vshrl.u32 %v6146_v27, 16  ;;  %7399 = vst [vmem:[#allocation7_spill] sm:$0xff] %v6198_v59 }
  0x49   : > { %5211 = vmatprep.mubr.msk.bf16.mxu1 %vm594_vm2, %v4530_v50  ;;  %5343 = vmatprep.mubr.msk.bf16.mxu0 %vm594_vm2, %v4748_v13  ;;  %v489_v15 = vrot.slane %v488_v53, 4  ;;  %v509_v28 = vshll.u32 %v6146_v27, 16  ;;  %v7376_v16 = vshll.u32 %v6159_v37, 16  ;;  %v7377_v42 = vshrl.u32 %v6159_v37, 16 }
  0x4a   : > { %v499_v9 = vrot.slane %v498_v29, 4  ;;  %v2431_v63 = vsel %vm6120_vm6, %v4737_v61, %v2430_v21  ;;  %v2432_v10 = vrot.slane %v2430_v21, 4  ;;  %v508_v26 = vrot.slane %v506_v34, 4  ;;  %v6195_v34 = vld [vmem:[%s5896_s25 + $0x58] sm:$0xf] }
  0x4b   : > { %v494_v54 = vsel %vm5928_vm3, %v489_v15, %v493_v52  ;;  %v511_v50 = vrot.slane %v509_v28, 5  ;;  %v517_v13 = vrot.slane %v7376_v16, 5  ;;  %v521_v53 = vrot.slane %v7377_v42, 4 }
  0x4c   : > { %v504_v29 = vsel %vm5928_vm3, %v499_v9, %v503_v56  ;;  %v2434_v61 = vsel %vm6120_vm6, %v2432_v10, %v2433_v38  ;;  %v525_v52 = vshll.u32 %v6163_v17, 16  ;;  %v4738_v21 = vrot.slane %v6168_v57, 9  ;;  %v5708_v56 = vld [vmem:[%s7363_s1 + $0x88] sm:$0xff]  }
  0x4d   : > { %v4531_v15 = vcombine.low %v494_v54, %v504_v29  ;;  %v4749_v28 = vcombine.low %v2431_v63, %v2434_v61  ;;  %v512_v16 = vor.u32 %v511_v50, %v508_v26  ;;  %v522_v42 = vor.u32 %v521_v53, %v517_v13 }
  0x4e   : > { %v527_v12 = vrot.slane %v525_v52, 5  ;;  %v2437_v9 = vrot.slane %v6004_v1, 5  ;;  %v2440_v38 = vrot.slane %v6014_v11, 5  ;;  %v530_v10 = vshrl.u32 %v6184_v55, 16  ;;  %v6220_v52 = vld [vmem:[%s7363_s1 + $0x90] sm:$0xff]  }
  0x4f   : > { %5212 = vmatmul.mubr.msk.bf16.gmra.mrb[8].mxu1 %vm594_vm2, %v4531_v15  ;;  %5344 = vmatmul.mubr.msk.bf16.vlgmr.msra.gmra.mrb[0].mxu0 %vm594_vm2, %v4749_v28  ;;  %v513_v63 = vrot.slane %v512_v16, 4  ;;  %v523_v26 = vrot.slane %v522_v42, 4  ;;  %v533_v54 = vshll.u32 %v6184_v55, 16  ;;  %v7380_v50 = vshll.u32 %v6195_v34, 16  ;;  %v6229_v15 = vld [vmem:[%s5896_s25 + $0x3c] sm:$0xe] }
  0x50   : > { %5360 = vmatpush3.bf16.msra.mxu0 %v6056_v0  ;;  %v2438_v11 = vsel %vm6120_vm6, %v4738_v21, %v2437_v9  ;;  %v2439_v53 = vrot.slane %v2437_v9, 4  ;;  %v532_v29 = vrot.slane %v530_v10, 4  ;;  %v7381_v61 = vshrl.u32 %v6195_v34, 16 }
  0x51   : > { %v518_v16 = vsel %vm5928_vm3, %v513_v63, %v517_v13  ;;  %v528_v0 = vsel %vm5928_vm3, %v523_v26, %v527_v12  ;;  %v535_v42 = vrot.slane %v533_v54, 5  ;;  %v541_v21 = vrot.slane %v7380_v50, 5  ;;  %5361 = vmatprep.subr.bf16.mxu0 %v5708_v56  ;;  %v6237_v12 = vld [vmem:[%s5896_s25 + $0x40] sm:$0xf] }
  0x52   : > { %v4532_v28 = vcombine.low %v518_v16, %v528_v0  ;;  %v2441_v9 = vsel %vm6120_vm6, %v2439_v53, %v2440_v38  ;;  %v545_v13 = vrot.slane %v7381_v61, 4  ;;  %v549_v10 = vshll.u32 %v6198_v59, 16  ;;  %v4696_v16 = vld [vmem:[%s5896_s25 + $0x44] sm:$0x1] }
  0x53   : > { %v4750_v63 = vcombine.low %v2438_v11, %v2441_v9  ;;  %v536_v26 = vor.u32 %v535_v42, %v532_v29  ;;  %v4739_v54 = vrot.slane %v6207_v2, 9  ;;  %v2444_v50 = vrot.slane %v6060_v4, 5  ;;  %v6249_v11 = vld [vmem:[%s5896_s25 + $0x50] sm:$0x1]  ;;  %v6252_v29 = vld [vmem:[%s5896_s25 + $0x48] sm:$0xe] }
  0x54   : > { %5215 = vmatprep.mubr.msk.bf16.mxu1 %vm594_vm2, %v4532_v28  ;;  %v546_v0 = vor.u32 %v545_v13, %v541_v21  ;;  %v551_v38 = vrot.slane %v549_v10, 5  ;;  %v2447_v53 = vrot.slane %v6065_v25, 5  ;;  %v4740_v61 = vrot.slane %v6229_v15, 9  ;;  %5362 = vmatpush3.bf16.msra.mxu0 %v5708_v56  ;;  %v6259_v13 = vld [vmem:[%s5896_s25 + $0x58] sm:$0xf] }
  0x55   : > { %5347 = vmatprep.mubr.msk.bf16.mxu0 %vm594_vm2, %v4750_v63  ;;  %v537_v42 = vrot.slane %v536_v26, 4  ;;  %v2445_v28 = vsel %vm6120_vm6, %v4739_v54, %v2444_v50  ;;  %v2446_v9 = vrot.slane %v2444_v50, 4  ;;  %v2451_v25 = vrot.slane %v6237_v12, 5  ;;  %5379 = vmatprep.subr.bf16.mxu0 %v6220_v52  ;;  %v6266_v63 = vld [vmem:[%s5896_s25 + $0x54] sm:$0xe] }
  0x56   : > { %v547_v10 = vrot.slane %v546_v0, 4  ;;  %v4544_v31 = vcombine.low %v5900_v6, %v5903_v7  ;;  %v2454_v56 = vrot.slane %v4696_v16, 5  ;;  %v4545_v0 = vcombine.low %v5936_v35, %v5939_v40 }
  0x57   : > { %v542_v26 = vsel %vm5928_vm3, %v537_v42, %v541_v21  ;;  %v2448_v50 = vsel %vm6120_vm6, %v2446_v9, %v2447_v53  ;;  %v2452_v54 = vsel %vm6120_vm6, %v4740_v61, %v2451_v25  ;;  %v2453_v22 = vrot.slane %v2451_v25, 4  ;;  %v6283_v21 = vld [vmem:[%s5896_s25 + $0x60] sm:$0xe] }
  0x58   : > { %v552_v6 = vsel %vm5928_vm3, %v547_v10, %v551_v38  ;;  %v4751_v16 = vcombine.low %v2445_v28, %v2448_v50  ;;  %v4741_v23 = vrot.slane %v6252_v29, 9  ;;  %v2458_v42 = vrot.slane %v6246_v14, 5  ;;  %v4705_v10 = vld [vmem:[%s5896_s25 + $0x68] sm:$0x1] }
  0x59   : > { %v4533_v53 = vcombine.low %v542_v26, %v552_v6  ;;  %v2455_v61 = vsel %vm6120_vm6, %v2453_v22, %v2454_v56  ;;  %v2461_v9 = vrot.slane %v6249_v11, 5  ;;  %v4546_v28 = vcombine.low %v5977_v32, %v5984_v39 }
  0x5a   : > { %5348 = vmatmul.mubr.msk.bf16.gmra.mrb[4].mxu0 %vm594_vm2, %v4751_v16  ;;  %v4752_v38 = vcombine.low %v2452_v54, %v2455_v61  ;;  %v4742_v35 = vrot.slane %v6266_v63, 9  ;;  %v2465_v25 = vrot.slane %v6259_v13, 5  ;;  %v2459_v22 = vsel %vm6120_vm6, %v4741_v23, %v2458_v42  ;;  %v6311_v61 = vld [vmem:[%s5896_s25 + $0x14] sm:$0x3] }
  0x5b   : > { %5216 = vmatmul.mubr.msk.bf16.gmra.mrb[12].mxu1 %vm594_vm2, %v4533_v53  ;;  %v2460_v56 = vrot.slane %v2458_v42, 4  ;;  %v2468_v26 = vrot.slane %v4702_v33, 5  ;;  %v4743_v6 = vrot.slane %v6283_v21, 9  ;;  %v2472_v16 = vrot.slane %v6275_v24, 5 }
  0x5c   : > { %5223 = vmatprep.mubr.msk.bf16.mxu1 %vm594_vm2, %v4544_v31  ;;  %5351 = vmatprep.mubr.msk.bf16.mxu0 %vm594_vm2, %v4752_v38  ;;  %v2466_v32 = vsel %vm6120_vm6, %v4742_v35, %v2465_v25  ;;  %v2467_v54 = vrot.slane %v2465_v25, 4  ;;  %v2475_v33 = vrot.slane %v4705_v10, 5  ;;  %v6318_v25 = vld [vmem:[%s5896_s25 + $0x20] sm:$0x3]  ;;  %v2667_v10 = vshll.u32 %v6101_v5, 16 }
  0x5d   : > { %v2462_v23 = vsel %vm6120_vm6, %v2460_v56, %v2461_v9  ;;  %v2473_v38 = vsel %vm6120_vm6, %v4743_v6, %v2472_v16  ;;  %v2474_v35 = vrot.slane %v2472_v16, 4  ;;  %v2664_v9 = vshrl.u32 %v6101_v5, 16 }
  0x5e   : > { %v4753_v31 = vcombine.low %v2459_v22, %v2462_v23  ;;  %v2469_v42 = vsel %vm6120_vm6, %v2467_v54, %v2468_v26  ;;  %v2674_v56 = vor.u32 %v5943_v44, %v5941_v43  ;;  %v2678_v23 = vshrl.u32 %v6311_v61, 16 }
  0x5f   : > { %v4754_v50 = vcombine.low %v2466_v32, %v2469_v42  ;;  %v2476_v22 = vsel %vm6120_vm6, %v2474_v35, %v2475_v33  ;;  %v2681_v26 = vshll.u32 %v6311_v61, 16  ;;  %v5713_v32 = vld [vmem:[%s7363_s1 + $0x28] sm:$0xff]   ;;  %v2666_v16 = vrot.slane %v2664_v9, 5 }
  0x60   : > { %v4755_v6 = vcombine.low %v2473_v38, %v2476_v22  ;;  %v2669_v5 = vrot.slane %v2667_v10, 6  ;;  %v2676_v42 = vrot.slane %v2674_v56, 4  ;;  %v2680_v43 = vrot.slane %v2678_v23, 5  ;;  %v6351_v23 = vld [vmem:[%s5896_s25 + $0x2c] sm:$0x3] }
  0x61   : > { %v2683_v44 = vrot.slane %v2681_v26, 6  ;;  %v2687_v33 = vshrl.u32 %v6139_v62, 16  ;;  %v2690_v35 = vshll.u32 %v6139_v62, 16  ;;  %v2704_v10 = vshll.u32 %v6318_v25, 16 }
  0x62   : > { %5352 = vmatmul.mubr.msk.bf16.gmra.mrb[8].mxu0 %vm594_vm2, %v4753_v31  ;;  %v2670_v9 = vor.u32 %v2669_v5, %v2666_v16  ;;  %v2701_v31 = vshrl.u32 %v6318_v25, 16  ;;  %v2710_v26 = vshrl.u32 %v6168_v57, 16  ;;  %v6357_v16 = vld [vmem:[%s7363_s1 + $0x30] sm:$0xff]   ;;  %v2724_v17 = vshrl.u32 %v6351_v23, 16 }
  0x63   : > { %5224 = vmatmul.mubr.msk.bf16.vlgmr.msra.gmra.mrb[0].mxu1 %vm594_vm2, %v4545_v0  ;;  %5355 = vmatprep.mubr.msk.bf16.mxu0 %vm594_vm2, %v4754_v50  ;;  %v2684_v62 = vor.u32 %v2683_v44, %v2680_v43  ;;  %v2689_v0 = vrot.slane %v2687_v33, 5  ;;  %v2692_v50 = vrot.slane %v2690_v35, 6  ;;  %v2706_v22 = vrot.slane %v2704_v10, 6 }
  0x64   : > { %5240 = vmatpush3.bf16.msra.mxu1 %v6025_v19  ;;  %5227 = vmatprep.mubr.msk.bf16.mxu1 %vm594_vm2, %v4546_v28  ;;  %v2671_v5 = vrot.slane %v2670_v9, 4  ;;  %v2703_v54 = vrot.slane %v2701_v31, 5  ;;  %v2713_v19 = vshll.u32 %v6168_v57, 16  ;;  %v2712_v44 = vrot.slane %v2710_v26, 5 }
  0x65   : > { %5241 = vmatprep.subr.bf16.mxu1 %v5713_v32  ;;  %v2685_v28 = vsel %vm6340_vm9, %v2676_v42, %v2684_v62  ;;  %v2693_v43 = vor.u32 %v2692_v50, %v2689_v0  ;;  %v7402_v33 = vshrl.u32 %v6004_v1, 16  ;;  %v7403_v9 = vshll.u32 %v6004_v1, 16  ;;  %v6371_v62 = vld [vmem:[%s5896_s25 + $0x38] sm:$0x3] }
  0x66   : > { %v2675_v53 = vsel %vm6340_vm9, %v2671_v5, %v2674_v56  ;;  %v2707_v30 = vor.u32 %v2706_v22, %v2703_v54  ;;  %v2715_v59 = vrot.slane %v2713_v19, 6  ;;  %v2727_v42 = vshll.u32 %v6351_v23, 16  ;;  %v6380_v22 = vld [vmem:[%s5896_s25] sm:$0xe] }
  0x67   : > { %v2718_v35 = vrot.slane %v7402_v33, 5  ;;  %v2719_v31 = vrot.slane %v7403_v9, 6  ;;  %v4778_v10 = vcombine.low %v2675_v53, %v2685_v28  ;;  %v2694_v57 = vrot.slane %v2693_v43, 4 }
  0x68   : > { %5242 = vmatpush3.bf16.msra.mxu1 %v5713_v32  ;;  %v7404_v0 = vrot.slane %v6000_v60, 4  ;;  %v2716_v56 = vor.u32 %v2715_v59, %v2712_v44  ;;  %v4551_v1 = vcombine.low %v6184_v55, %v6195_v34  ;;  %v2726_v32 = vrot.slane %v2724_v17, 5 }
  0x69   : > { %v2720_v54 = vor.u32 %v2719_v31, %v2718_v35  ;;  %5259 = vmatprep.subr.bf16.mxu1 %v6357_v16  ;;  %v2698_v53 = vsel %vm6340_vm9, %v2694_v57, %v6000_v60  ;;  %v2729_v26 = vrot.slane %v2727_v42, 6  ;;  %v2733_v5 = vshrl.u32 %v6207_v2, 16 }
  0x6a   : > { %v2708_v50 = vsel %vm6340_vm9, %v7404_v0, %v2707_v30  ;;  %5356 = vmatmul.mubr.msk.bf16.gmra.mrb[12].mxu0 %vm594_vm2, %v4755_v6  ;;  %v7405_v30 = vcombine.low %v6020_v18, %v6034_v41  ;;  %v2717_v19 = vrot.slane %v2716_v56, 4  ;;  %v2736_v6 = vshll.u32 %v6207_v2, 16 }
  0x6b   : > { %5363 = vmatprep.mubr.msk.bf16.mxu0 %vm594_vm2, %v4778_v10  ;;  %v4779_v59 = vcombine.low %v2698_v53, %v2708_v50  ;;  %v2722_v28 = vrot.slane %v2720_v54, 4  ;;  %v7406_v43 = vcombine.low %v6071_v46, %v6084_v3  ;;  %v2730_v60 = vor.u32 %v2729_v26, %v2726_v32  ;;  %v6411_v32 = vld [vmem:[%s5896_s25 + $0x44] sm:$0x3] }
  0x6c   : > { %5228 = vmatmul.mubr.msk.bf16.gmra.mrb[4].mxu1 %vm594_vm2, %v7405_v30  ;;  %v2735_v17 = vrot.slane %v2733_v5, 5  ;;  %v7407_v44 = vshrl.u32 %v6060_v4, 16  ;;  %v7408_v33 = vshll.u32 %v6060_v4, 16  ;;  %v2721_v9 = vsel %vm6340_vm9, %v2717_v19, %v2720_v54 }
  0x6d   : > { %5231 = vmatprep.mubr.msk.bf16.mxu1 %vm594_vm2, %v7406_v43  ;;  %v2738_v31 = vrot.slane %v2736_v6, 6  ;;  %v2747_v2 = vshrl.u32 %v6371_v62, 16  ;;  %v2750_v10 = vshll.u32 %v6371_v62, 16  ;;  %v2731_v46 = vsel %vm6340_vm9, %v2722_v28, %v2730_v60  ;;  %v5719_v43 = vld [vmem:[%s7363_s1 + $0x98] sm:$0xff]   ;;  %v6424_v60 = vld [vmem:[%s5896_s25 + $0xc] sm:$0xe] }
  0x6e   : > { %v2741_v18 = vrot.slane %v7407_v44, 5  ;;  %v2742_v35 = vrot.slane %v7408_v33, 6  ;;  %v4562_v42 = vrot.slane %v6380_v22, 9  ;;  %v918_v0 = vrot.slane %v5903_v7, 5 }
  0x6f   : > { %v4780_v50 = vcombine.low %v2721_v9, %v2731_v46  ;;  %v2739_v4 = vor.u32 %v2738_v31, %v2735_v17  ;;  %v2749_v56 = vrot.slane %v2747_v2, 5  ;;  %v2752_v53 = vrot.slane %v2750_v10, 6 }
  0x70   : > { %v2743_v57 = vor.u32 %v2742_v35, %v2741_v18  ;;  %v6415_v26 = vsel %vm6120_vm6, %v4562_v42, %v918_v0  ;;  %v920_v5 = vrot.slane %v918_v0, 4  ;;  %v2125_v30 = vshll.u32 %v6237_v12, 16 }
  0x71   : > { %v2740_v19 = vrot.slane %v2739_v4, 4  ;;  %v2753_v28 = vor.u32 %v2752_v53, %v2749_v56  ;;  %v2129_v6 = vshrl.u32 %v6237_v12, 16  ;;  %v2756_v7 = vshrl.u32 %v6229_v15, 16 }
  0x72   : > { %v2745_v54 = vrot.slane %v2743_v57, 4  ;;  %5364 = vmatmul.mubr.msk.bf16.vlgmr.msra.gmra.mrb[0].mxu0 %vm594_vm2, %v4779_v59  ;;  %v7409_v17 = vrot.slane %v5906_v8, 5  ;;  %v2759_v18 = vshll.u32 %v6229_v15, 16  ;;  %v2765_v33 = vrot.slane %v2125_v30, 6 }
  0x73   : > { %v2770_v35 = vshrl.u32 %v6411_v32, 16  ;;  %v7410_v9 = vcombine.low %v6107_v51, %v6116_v36  ;;  %5380 = vmatpush3.bf16.msra.mxu0 %v6220_v52  ;;  %v2744_v8 = vsel %vm6340_vm9, %v2740_v19, %v2743_v57  ;;  %v2758_v31 = vrot.slane %v2756_v7, 5  ;;  %5367 = vmatprep.mubr.msk.bf16.mxu0 %vm594_vm2, %v4780_v50  ;;  %v6455_v57 = vld [vmem:[%s7363_s1 + $0xa0] sm:$0xff]   ;;  %v6468_v7 = vld [vmem:[%s5896_s25 + $0x50] sm:$0x3] }
  0x74   : > { %v922_v44 = vsel %vm6120_vm6, %v920_v5, %v7409_v17  ;;  %v2754_v59 = vsel %vm6340_vm9, %v2745_v54, %v2753_v28  ;;  %v7411_v2 = vcombine.low %v6146_v27, %v6159_v37  ;;  %v2761_v10 = vrot.slane %v2759_v18, 6  ;;  %5381 = vmatprep.subr.bf16.mxu0 %v5719_v43 }
  0x75   : > { %5232 = vmatmul.mubr.msk.bf16.gmra.mrb[8].mxu1 %vm594_vm2, %v7410_v9  ;;  %v4574_v15 = vcombine.low %v6415_v26, %v922_v44  ;;  %v4781_v51 = vcombine.low %v2744_v8, %v2754_v59  ;;  %v2764_v52 = vrot.slane %v2129_v6, 5  ;;  %v2772_v46 = vrot.slane %v2770_v35, 5 }
  0x76   : > { %5235 = vmatprep.mubr.msk.bf16.mxu1 %vm594_vm2, %v7411_v2  ;;  %v2773_v42 = vshll.u32 %v6411_v32, 16  ;;  %v4563_v27 = vrot.slane %v6424_v60, 9  ;;  %v925_v0 = vrot.slane %v5939_v40, 5  ;;  %v2149_v50 = vshll.u32 %v6246_v14, 16 }
  0x77   : > { %v2762_v4 = vor.u32 %v2761_v10, %v2758_v31  ;;  %v2766_v56 = vor.u32 %v2765_v33, %v2764_v52  ;;  %v2153_v53 = vshrl.u32 %v6246_v14, 16  ;;  %v2779_v54 = vshrl.u32 %v6252_v29, 16  ;;  %5382 = vmatpush3.bf16.msra.mxu0 %v5719_v43  ;;  %v6479_v31 = vld [vmem:[%s5896_s25 + $0x18] sm:$0xe] }
  0x78   : > { %v2775_v26 = vrot.slane %v2773_v42, 6  ;;  %v926_v5 = vsel %vm6120_vm6, %v4563_v27, %v925_v0  ;;  %v927_v19 = vrot.slane %v925_v0, 4  ;;  %v6465_v28 = vrot.slane %v2149_v50, 5  ;;  %5399 = vmatprep.subr.bf16.mxu0 %v6455_v57 }
  0x79   : > { %v2763_v40 = vrot.slane %v2762_v4, 4  ;;  %v2768_v17 = vrot.slane %v2766_v56, 4  ;;  %v6470_v44 = vrot.slane %v2153_v53, 4  ;;  %v2781_v18 = vrot.slane %v2779_v54, 5 }
  0x7a   : > { %v2776_v33 = vor.u32 %v2775_v26, %v2772_v46  ;;  %v7412_v35 = vrot.slane %v5946_v45, 5  ;;  %v2782_v8 = vshll.u32 %v6252_v29, 16  ;;  %v2787_v59 = vrot.slane %v2153_v53, 5  ;;  %5368 = vmatmul.mubr.msk.bf16.gmra.mrb[4].mxu0 %vm594_vm2, %v4781_v51 }
  0x7b   : > { %v2159_v43 = vshll.u32 %v6249_v11, 16  ;;  %v2767_v2 = vsel %vm6340_vm9, %v2763_v40, %v2766_v56  ;;  %v2156_v10 = vor.u32 %v6470_v44, %v6465_v28  ;;  %v2788_v52 = vrot.slane %v2149_v50, 6  ;;  %v4921_v11 = vld [vmem:[%s5896_s25 + $0x3c] sm:$0xe] }
  0x7c   : > { %v929_v9 = vsel %vm6120_vm6, %v927_v19, %v7412_v35  ;;  %v2777_v45 = vsel %vm6340_vm9, %v2768_v17, %v2776_v33  ;;  %v2784_v29 = vrot.slane %v2782_v8, 6  ;;  %v2793_v46 = vshrl.u32 %v6468_v7, 16  ;;  %v6503_v19 = vld [vmem:[%s5896_s25 + $0x5c] sm:$0x3]  ;;  %v6514_v8 = vld [vmem:[%s5896_s25 + $0x24] sm:$0xe] }
  0x7d   : > { %5236 = vmatmul.mubr.msk.bf16.gmra.mrb[12].mxu1 %vm594_vm2, %v4551_v1  ;;  %v2796_v51 = vshll.u32 %v6468_v7, 16  ;;  %v4782_v42 = vcombine.low %v2767_v2, %v2777_v45  ;;  %v4575_v27 = vcombine.low %v926_v5, %v929_v9  ;;  %v2789_v0 = vor.u32 %v2788_v52, %v2787_v59  ;;  %v5720_v45 = vld [vmem:[%s7363_s1 + $0x38] sm:$0xff]  }
  0x7e   : > { %5243 = vmatprep.mubr.msk.bf16.mxu1 %vm594_vm2, %v4574_v15  ;;  %v4564_v50 = vrot.slane %v6479_v31, 9  ;;  %v2785_v4 = vor.u32 %v2784_v29, %v2781_v18  ;;  %v2795_v55 = vrot.slane %v2793_v46, 5  ;;  %v932_v1 = vrot.slane %v5984_v39, 5 }
  0x7f   : > { %v2798_v56 = vrot.slane %v2796_v51, 6  ;;  %5371 = vmatprep.mubr.msk.bf16.mxu0 %vm594_vm2, %v4782_v42  ;;  %v2791_v53 = vrot.slane %v2789_v0, 4  ;;  %v935_v54 = vrot.slane %v5989_v48, 5  ;;  %v2173_v26 = vshll.u32 %v6259_v13, 16 }
  0x80   : > { %v2177_v15 = vshrl.u32 %v6259_v13, 16  ;;  %v2786_v5 = vrot.slane %v2785_v4, 4  ;;  %v933_v17 = vsel %vm6120_vm6, %v4564_v50, %v932_v1  ;;  %v934_v18 = vrot.slane %v932_v1, 4 }
  0x81   : > { %v2799_v40 = vor.u32 %v2798_v56, %v2795_v55  ;;  %v2802_v33 = vshrl.u32 %v6266_v63, 16  ;;  %v2805_v35 = vshll.u32 %v6266_v63, 16  ;;  %v2811_v48 = vrot.slane %v2173_v26, 6 }
  0x82   : > { %v2810_v9 = vrot.slane %v2177_v15, 5  ;;  %v2790_v59 = vsel %vm6340_vm9, %v2786_v5, %v2789_v0  ;;  %v936_v52 = vsel %vm6120_vm6, %v934_v18, %v935_v54  ;;  %v2816_v63 = vshrl.u32 %v6503_v19, 16  ;;  %v6535_v5 = vld [vmem:[%s5896_s25 + $0x68] sm:$0x3] }
  0x83   : > { %v2800_v2 = vsel %vm6340_vm9, %v2791_v53, %v2799_v40  ;;  %v4576_v46 = vcombine.low %v933_v17, %v936_v52  ;;  %v2804_v51 = vrot.slane %v2802_v33, 5  ;;  %v2807_v42 = vrot.slane %v2805_v35, 6  ;;  %v6546_v33 = vld [vmem:[%s5896_s25 + $0x30] sm:$0xe] }
  0x84   : > { %v4783_v29 = vcombine.low %v2790_v59, %v2800_v2  ;;  %v2812_v0 = vor.u32 %v2811_v48, %v2810_v9  ;;  %v2818_v50 = vrot.slane %v2816_v63, 5  ;;  %v2819_v4 = vshll.u32 %v6503_v19, 16 }
  0x85   : > { %5244 = vmatmul.mubr.msk.bf16.vlgmr.msra.gmra.mrb[0].mxu1 %vm594_vm2, %v4575_v27  ;;  %v4565_v55 = vrot.slane %v6514_v8, 9  ;;  %v2808_v56 = vor.u32 %v2807_v42, %v2804_v51  ;;  %v939_v1 = vrot.slane %v6034_v41, 5  ;;  %v942_v53 = vrot.slane %v6038_v49, 5  ;;  %v6540_v27 = vld [vmem:[%s7363_s1 + $0x40] sm:$0xff]  }
  0x86   : > { %5260 = vmatpush3.bf16.msra.mxu1 %v6357_v16  ;;  %5372 = vmatmul.mubr.msk.bf16.gmra.mrb[8].mxu0 %vm594_vm2, %v4783_v29  ;;  %v2197_v54 = vshll.u32 %v6275_v24, 16  ;;  %v2814_v40 = vrot.slane %v2812_v0, 4  ;;  %v2821_v16 = vrot.slane %v2819_v4, 6  ;;  %v2201_v17 = vshrl.u32 %v6275_v24, 16 }
  0x87   : > { %5247 = vmatprep.mubr.msk.bf16.mxu1 %vm594_vm2, %v4576_v46  ;;  %v2825_v18 = vshrl.u32 %v6283_v21, 16  ;;  %5261 = vmatprep.subr.bf16.mxu1 %v5720_v45  ;;  %v2809_v49 = vrot.slane %v2808_v56, 4  ;;  %v940_v35 = vsel %vm6120_vm6, %v4565_v55, %v939_v1  ;;  %v941_v9 = vrot.slane %v939_v1, 4  ;;  %v4796_v56 = vld [vmem:[%s5896_s25 + $0xc] sm:$0xc] }
  0x88   : > { %v2828_v48 = vshll.u32 %v6283_v21, 16  ;;  %v2822_v59 = vor.u32 %v2821_v16, %v2818_v50  ;;  %v2833_v52 = vrot.slane %v2201_v17, 5  ;;  %v2834_v63 = vrot.slane %v2197_v54, 6  ;;  %v6565_v1 = vld [vmem:[%s5896_s25 + $0x3c] sm:$0xe] }
  0x89   : > { %v2827_v2 = vrot.slane %v2825_v18, 5  ;;  %v2813_v29 = vsel %vm6340_vm9, %v2809_v49, %v2812_v0  ;;  %v943_v46 = vsel %vm6120_vm6, %v941_v9, %v942_v53  ;;  %v2839_v42 = vshrl.u32 %v6535_v5, 16 }
  0x8a   : > { %v2830_v51 = vrot.slane %v2828_v48, 6  ;;  %5262 = vmatpush3.bf16.msra.mxu1 %v5720_v45  ;;  %v2823_v21 = vsel %vm6340_vm9, %v2814_v40, %v2822_v59  ;;  %v4577_v50 = vcombine.low %v940_v35, %v943_v46  ;;  %v2835_v4 = vor.u32 %v2834_v63, %v2833_v52 }
  0x8b   : > { %v2842_v55 = vshll.u32 %v6535_v5, 16  ;;  %5279 = vmatprep.subr.bf16.mxu1 %v6540_v27  ;;  %v4784_v0 = vcombine.low %v2813_v29, %v2823_v21  ;;  %v2841_v16 = vrot.slane %v2839_v42, 5  ;;  %v4566_v18 = vrot.slane %v6546_v33, 9  ;;  %v4797_v29 = vld [vmem:[%s5896_s25 + $0x18] sm:$0xc] }
  0x8c   : > { %v2831_v53 = vor.u32 %v2830_v51, %v2827_v2  ;;  %v2837_v45 = vrot.slane %v2835_v4, 4  ;;  %v946_v49 = vrot.slane %v6084_v3, 5  ;;  %v949_v35 = vrot.slane %v6091_v20, 5  ;;  %v5747_v2 = vld [vmem:[%s5896_s25 + $0x10] sm:$0xf] }
  0x8d   : > { %5248 = vmatmul.mubr.msk.bf16.gmra.mrb[4].mxu1 %vm594_vm2, %v4577_v50  ;;  %v2844_v40 = vrot.slane %v2842_v55, 6  ;;  %5375 = vmatprep.mubr.msk.bf16.mxu0 %vm594_vm2, %v4784_v0  ;;  %v4804_v59 = vrot.slane %v4796_v56, 10  ;;  %v3051_v52 = vrot.slane %v5747_v2, 6  ;;  %v3054_v63 = vrot.slane %v6311_v61, 6  ;;  %v6604_v2 = vld [vmem:[%s5896_s25 + $0x54] sm:$0xe] }
  0x8e   : > { %v2832_v48 = vrot.slane %v2831_v53, 4  ;;  %v947_v20 = vsel %vm6120_vm6, %v4566_v18, %v946_v49  ;;  %v948_v51 = vrot.slane %v946_v49, 4  ;;  %v4567_v42 = vrot.slane %v6565_v1, 9  ;;  %v6596_v18 = vld [vmem:[%s5896_s25 + $0x48] sm:$0xe] }
  0x8f   : > { %v2845_v46 = vor.u32 %v2844_v40, %v2841_v16  ;;  %v3052_v50 = vsel %vm6574_vm12, %v4804_v59, %v3051_v52  ;;  %v3053_v55 = vrot.slane %v3051_v52, 4  ;;  %v953_v56 = vrot.slane %v6116_v36, 5  ;;  %v4798_v40 = vld [vmem:[%s5896_s25 + $0x24] sm:$0xc] }
  0x90   : > { %v2836_v21 = vsel %vm6340_vm9, %v2832_v48, %v2835_v4  ;;  %v950_v0 = vsel %vm6120_vm6, %v948_v51, %v949_v35  ;;  %v956_v53 = vrot.slane %v6128_v58, 5  ;;  %v4805_v16 = vrot.slane %v4797_v29, 10  ;;  %v5748_v35 = vld [vmem:[%s5896_s25 + $0x1c] sm:$0xf] }
  0x91   : > { %v2846_v61 = vsel %vm6340_vm9, %v2837_v45, %v2845_v46  ;;  %v4578_v49 = vcombine.low %v947_v20, %v950_v0  ;;  %v3055_v48 = vsel %vm6574_vm12, %v3053_v55, %v3054_v63  ;;  %v954_v59 = vsel %vm6120_vm6, %v4567_v42, %v953_v56  ;;  %v7415_v20 = vld [vmem:[#allocation6_spill] sm:$0xff]  ;;  %v5749_v55 = vld [vmem:[%s5896_s25 + $0x28] sm:$0xf] }
  0x92   : > { %v4785_v4 = vcombine.low %v2836_v21, %v2846_v61  ;;  %v4816_v45 = vcombine.low %v3052_v50, %v3055_v48  ;;  %v955_v52 = vrot.slane %v953_v56, 4  ;;  %v3058_v46 = vrot.slane %v5748_v35, 6 }
  0x93   : > { %v3061_v58 = vrot.slane %v6318_v25, 6  ;;  %5251 = vmatprep.mubr.msk.bf16.mxu1 %vm594_vm2, %v4578_v49  ;;  %v4568_v29 = vrot.slane %v6596_v18, 9  ;;  %v960_v63 = vrot.slane %v6159_v37, 5  ;;  %v963_v51 = vrot.slane %v7415_v20, 5  ;;  %v5750_v20 = vld [vmem:[%s5896_s25 + $0x34] sm:$0xf] }
  0x94   : > { %5376 = vmatmul.mubr.msk.bf16.gmra.mrb[12].mxu0 %vm594_vm2, %v4785_v4  ;;  %v4806_v42 = vrot.slane %v4798_v40, 10  ;;  %v957_v21 = vsel %vm6120_vm6, %v955_v52, %v956_v53  ;;  %v3059_v25 = vsel %vm6574_vm12, %v4805_v16, %v3058_v46  ;;  %v3060_v50 = vrot.slane %v3058_v46, 4  ;;  %v4799_v40 = vld [vmem:[%s5896_s25 + $0x30] sm:$0xc] }
  0x95   : > { %5383 = vmatprep.mubr.msk.bf16.mxu0 %vm594_vm2, %v4816_v45  ;;  %v3065_v56 = vrot.slane %v5749_v55, 6  ;;  %v4579_v61 = vcombine.low %v954_v59, %v957_v21  ;;  %v961_v0 = vsel %vm6120_vm6, %v4568_v29, %v960_v63  ;;  %v962_v4 = vrot.slane %v960_v63, 4  ;;  %v6637_v21 = vld [vmem:[%s5896_s25 + $0x8] sm:$0x3] }
  0x96   : > { %v3068_v49 = vrot.slane %v6351_v23, 6  ;;  %v3062_v48 = vsel %vm6574_vm12, %v3060_v50, %v3061_v58  ;;  %v4569_v45 = vrot.slane %v6604_v2, 9  ;;  %v967_v35 = vrot.slane %v6195_v34, 5  ;;  %v7416_v23 = vld [vmem:[#allocation7_spill] sm:$0xff] }
  0x97   : > { %v3066_v53 = vsel %vm6574_vm12, %v4806_v42, %v3065_v56  ;;  %v3067_v16 = vrot.slane %v3065_v56, 4  ;;  %5252 = vmatmul.mubr.msk.bf16.gmra.mrb[8].mxu1 %vm594_vm2, %v4579_v61  ;;  %v4817_v59 = vcombine.low %v3059_v25, %v3062_v48  ;;  %v964_v52 = vsel %vm6120_vm6, %v962_v4, %v963_v51  ;;  %v5723_v56 = vld [vmem:[%s7363_s1 + $0xa8] sm:$0xff]  }
  0x98   : > { %v970_v46 = vrot.slane %v7416_v23, 5  ;;  %v4580_v29 = vcombine.low %v961_v0, %v964_v52  ;;  %v4807_v63 = vrot.slane %v4799_v40, 10  ;;  %v3072_v42 = vrot.slane %v5750_v20, 6  ;;  %v7417_v40 = vld [vmem:[#allocation2_spill] sm:$0xff]  ;;  %v7418_v48 = vld [vmem:[#allocation3_spill] sm:$0xff] }
  0x99   : > { %v3069_v58 = vsel %vm6574_vm12, %v3067_v16, %v3068_v49  ;;  %v968_v25 = vsel %vm6120_vm6, %v4569_v45, %v967_v35  ;;  %v969_v55 = vrot.slane %v967_v35, 4  ;;  %v3075_v51 = vrot.slane %v6371_v62, 6  ;;  %v4800_v52 = vld [vmem:[%s5896_s25 + $0x3c] sm:$0xc] }
  0x9a   : > { %v4818_v50 = vcombine.low %v3066_v53, %v3069_v58  ;;  %5255 = vmatprep.mubr.msk.bf16.mxu1 %vm594_vm2, %v4580_v29  ;;  %v3073_v61 = vsel %vm6574_vm12, %v4807_v63, %v3072_v42  ;;  %v3074_v0 = vrot.slane %v3072_v42, 4  ;;  %v1162_v4 = vshrl.u32 %v6380_v22, 16  ;;  %v6663_v29 = vld [vmem:[%s5896_s25 + $0x14] sm:$0x3] }
  0x9b   : > { %v1165_v49 = vshll.u32 %v6380_v22, 16  ;;  %v971_v62 = vsel %vm6120_vm6, %v969_v55, %v970_v46  ;;  %v1172_v53 = vor.u32 %v7418_v48, %v7417_v40  ;;  %v1176_v16 = vshrl.u32 %v6637_v21, 16 }
  0x9c   : > { %5384 = vmatmul.mubr.msk.bf16.vlgmr.msra.gmra.mrb[0].mxu0 %vm594_vm2, %v4817_v59  ;;  %v1179_v45 = vshll.u32 %v6637_v21, 16  ;;  %v4581_v35 = vcombine.low %v968_v25, %v971_v62  ;;  %v3076_v22 = vsel %vm6574_vm12, %v3074_v0, %v3075_v51  ;;  %v1164_v59 = vrot.slane %v1162_v4, 5 }
  0x9d   : > { %5400 = vmatpush3.bf16.msra.mxu0 %v6455_v57  ;;  %5387 = vmatprep.mubr.msk.bf16.mxu0 %vm594_vm2, %v4818_v50  ;;  %v1167_v23 = vrot.slane %v1165_v49, 6  ;;  %v4819_v46 = vcombine.low %v3073_v61, %v3076_v22  ;;  %v1174_v58 = vrot.slane %v1172_v53, 4  ;;  %v1178_v63 = vrot.slane %v1176_v16, 5  ;;  %v6668_v57 = vld [vmem:[%s7363_s1 + $0xb0] sm:$0xff]   ;;  %v4801_v49 = vld [vmem:[%s5896_s25 + $0x48] sm:$0xc] }
  0x9e   : > { %v1181_v20 = vrot.slane %v1179_v45, 6  ;;  %5401 = vmatprep.subr.bf16.mxu0 %v5723_v56  ;;  %v4808_v50 = vrot.slane %v4800_v52, 10  ;;  %v3079_v25 = vrot.slane %v6237_v12, 6  ;;  %v3082_v55 = vrot.slane %v6411_v32, 6 }
  0x9f   : > { %v1168_v42 = vor.u32 %v1167_v23, %v1164_v59  ;;  %5256 = vmatmul.mubr.msk.bf16.gmra.mrb[12].mxu1 %vm594_vm2, %v4581_v35  ;;  %v1185_v61 = vshrl.u32 %v6424_v60, 16  ;;  %v1188_v0 = vshll.u32 %v6424_v60, 16  ;;  %v1199_v4 = vshrl.u32 %v6663_v29, 16 }
  0xa0   : > { %v1182_v51 = vor.u32 %v1181_v20, %v1178_v63  ;;  %v3080_v40 = vsel %vm6574_vm12, %v4808_v50, %v3079_v25  ;;  %v3081_v48 = vrot.slane %v3079_v25, 4  ;;  %v1202_v16 = vshll.u32 %v6663_v29, 16  ;;  %v6691_v25 = vld [vmem:[%s5896_s25 + $0x20] sm:$0x3] }
  0xa1   : > { %v1169_v62 = vrot.slane %v1168_v42, 4  ;;  %5402 = vmatpush3.bf16.msra.mxu0 %v5723_v56  ;;  %v1187_v45 = vrot.slane %v1185_v61, 5  ;;  %v1190_v52 = vrot.slane %v1188_v0, 6  ;;  %v1201_v35 = vrot.slane %v1199_v4, 5  ;;  %v7420_v4 = vld [vmem:[#allocation5_spill] sm:$0xff] }
  0xa2   : > { %v1183_v32 = vsel %vm6340_vm9, %v1174_v58, %v1182_v51  ;;  %5419 = vmatprep.subr.bf16.mxu0 %v6668_v57  ;;  %v3083_v22 = vsel %vm6574_vm12, %v3081_v48, %v3082_v55  ;;  %v1204_v59 = vrot.slane %v1202_v16, 6  ;;  %v4809_v23 = vrot.slane %v4801_v49, 10  ;;  %v4802_v16 = vld [vmem:[%s5896_s25 + $0x54] sm:$0xc] }
  0xa3   : > { %v1173_v60 = vsel %vm6340_vm9, %v1169_v62, %v1172_v53  ;;  %v4820_v63 = vcombine.low %v3080_v40, %v3083_v22  ;;  %v1191_v20 = vor.u32 %v1190_v52, %v1187_v45  ;;  %v3086_v58 = vrot.slane %v6246_v14, 6 }
  0xa4   : > { %5388 = vmatmul.mubr.msk.bf16.gmra.mrb[4].mxu0 %vm594_vm2, %v4819_v46  ;;  %v4596_v56 = vcombine.low %v1173_v60, %v1183_v32  ;;  %v1205_v42 = vor.u32 %v1204_v59, %v1201_v35  ;;  %v3089_v50 = vrot.slane %v6468_v7, 6  ;;  %v1208_v53 = vshrl.u32 %v6479_v31, 16 }
  0xa5   : > { %v1211_v51 = vshll.u32 %v6479_v31, 16  ;;  %5391 = vmatprep.mubr.msk.bf16.mxu0 %vm594_vm2, %v4820_v63  ;;  %v1192_v46 = vrot.slane %v1191_v20, 4  ;;  %v3087_v55 = vsel %vm6574_vm12, %v4809_v23, %v3086_v58  ;;  %v3088_v61 = vrot.slane %v3086_v58, 4 }
  0xa6   : > { %5263 = vmatprep.mubr.msk.bf16.mxu1 %vm594_vm2, %v4596_v56  ;;  %v7419_v14 = vshrl.u32 %v5984_v39, 16  ;;  %v7421_v7 = vrot.slane %v7420_v4, 4  ;;  %v1210_v62 = vrot.slane %v1208_v53, 5  ;;  %v7422_v31 = vshll.u32 %v5984_v39, 16  ;;  %v5724_v39 = vld [vmem:[%s7363_s1 + $0x48] sm:$0xff]  }
  0xa7   : > { %v1213_v40 = vrot.slane %v1211_v51, 6  ;;  %v1196_v32 = vsel %vm6340_vm9, %v1192_v46, %v7420_v4  ;;  %v3090_v45 = vsel %vm6574_vm12, %v3088_v61, %v3089_v50  ;;  %v1222_v52 = vshrl.u32 %v6691_v25, 16  ;;  %v6722_v51 = vld [vmem:[%s5896_s25 + $0x2c] sm:$0x3] }
  0xa8   : > { %v1216_v0 = vrot.slane %v7419_v14, 5  ;;  %v1206_v49 = vsel %vm6340_vm9, %v7421_v7, %v1205_v42  ;;  %v1217_v48 = vrot.slane %v7422_v31, 6  ;;  %v1225_v35 = vshll.u32 %v6691_v25, 16 }
  0xa9   : > { %v4597_v60 = vcombine.low %v1196_v32, %v1206_v49  ;;  %v4821_v22 = vcombine.low %v3087_v55, %v3090_v45  ;;  %v1214_v59 = vor.u32 %v1213_v40, %v1210_v62  ;;  %v1224_v56 = vrot.slane %v1222_v52, 5  ;;  %v6745_v32 = vld [vmem:[%s7363_s1 + $0x50] sm:$0xff]  }
  0xaa   : > { %v1218_v23 = vor.u32 %v1217_v48, %v1216_v0  ;;  %v1227_v63 = vrot.slane %v1225_v35, 6  ;;  %v4810_v20 = vrot.slane %v4802_v16, 10  ;;  %v3093_v58 = vrot.slane %v6259_v13, 6 }
  0xab   : > { %5264 = vmatmul.mubr.msk.bf16.vlgmr.msra.gmra.mrb[0].mxu1 %vm594_vm2, %v4597_v60  ;;  %v1215_v42 = vrot.slane %v1214_v59, 4  ;;  %v3096_v53 = vrot.slane %v6503_v19, 6  ;;  %v1231_v46 = vshrl.u32 %v6514_v8, 16  ;;  %v1234_v0 = vshll.u32 %v6514_v8, 16 }
  0xac   : > { %v1220_v50 = vrot.slane %v1218_v23, 4  ;;  %5280 = vmatpush3.bf16.msra.mxu1 %v6540_v27  ;;  %5392 = vmatmul.mubr.msk.bf16.gmra.mrb[8].mxu0 %vm594_vm2, %v4821_v22  ;;  %v1228_v55 = vor.u32 %v1227_v63, %v1224_v56  ;;  %v3094_v61 = vsel %vm6574_vm12, %v4810_v20, %v3093_v58  ;;  %v3095_v14 = vrot.slane %v3093_v58, 4  ;;  %v4803_v27 = vld [vmem:[%s5896_s25 + $0x60] sm:$0xc]  ;;  %v6753_v58 = vld [vmem:[%s5896_s25 + $0x38] sm:$0x3] }
  0xad   : > { %v1219_v4 = vsel %vm6340_vm9, %v1215_v42, %v1218_v23  ;;  %v1233_v7 = vrot.slane %v1231_v46, 5  ;;  %v7423_v19 = vshrl.u32 %v6034_v41, 16  ;;  %v7424_v62 = vshll.u32 %v6034_v41, 16  ;;  %5281 = vmatprep.subr.bf16.mxu1 %v5724_v39 }
  0xae   : > { %v1229_v31 = vsel %vm6340_vm9, %v1220_v50, %v1228_v55  ;;  %v3097_v48 = vsel %vm6574_vm12, %v3095_v14, %v3096_v53  ;;  %v1236_v16 = vrot.slane %v1234_v0, 6  ;;  %v1245_v8 = vshrl.u32 %v6722_v51, 16 }
  0xaf   : > { %v1239_v49 = vrot.slane %v7423_v19, 5  ;;  %v1240_v40 = vrot.slane %v7424_v62, 6  ;;  %v4598_v45 = vcombine.low %v1219_v4, %v1229_v31  ;;  %v4822_v41 = vcombine.low %v3094_v61, %v3097_v48 }
  0xb0   : > { %v1248_v35 = vshll.u32 %v6722_v51, 16  ;;  %v1237_v60 = vor.u32 %v1236_v16, %v1233_v7  ;;  %v1247_v22 = vrot.slane %v1245_v8, 5  ;;  %v4811_v59 = vrot.slane %v4803_v27, 10  ;;  %5282 = vmatpush3.bf16.msra.mxu1 %v5724_v39  ;;  %v6774_v16 = vld [vmem:[%s5896_s25 + $0x44] sm:$0x3] }
  0xb1   : > { %v1241_v52 = vor.u32 %v1240_v40, %v1239_v49  ;;  %v3100_v23 = vrot.slane %v6275_v24, 6  ;;  %5267 = vmatprep.mubr.msk.bf16.mxu1 %vm594_vm2, %v4598_v45  ;;  %5395 = vmatprep.mubr.msk.bf16.mxu0 %vm594_vm2, %v4822_v41  ;;  %v3103_v20 = vrot.slane %v6535_v5, 6  ;;  %v1254_v42 = vshrl.u32 %v6546_v33, 16  ;;  %v4925_v24 = vld [vmem:[%s5896_s25 + $0x6c] sm:$0xe] }
  0xb2   : > { %v1250_v63 = vrot.slane %v1248_v35, 6  ;;  %v1238_v50 = vrot.slane %v1237_v60, 4  ;;  %v1257_v39 = vshll.u32 %v6546_v33, 16  ;;  %5299 = vmatprep.subr.bf16.mxu1 %v6745_v32  ;;  %v7425_v14 = vshrl.u32 %v6084_v3, 16  ;;  %v5725_v33 = vld [vmem:[%s5896_s25 + $0x18] sm:$0xff]  }
  0xb3   : > { %v1243_v56 = vrot.slane %v1241_v52, 4  ;;  %v3101_v53 = vsel %vm6574_vm12, %v4811_v59, %v3100_v23  ;;  %v3102_v46 = vrot.slane %v3100_v23, 4  ;;  %v1256_v61 = vrot.slane %v1254_v42, 5 }
  0xb4   : > { %v1251_v55 = vor.u32 %v1250_v63, %v1247_v22  ;;  %v1262_v5 = vrot.slane %v7425_v14, 5  ;;  %v7426_v0 = vshll.u32 %v6084_v3, 16  ;;  %v1242_v7 = vsel %vm6340_vm9, %v1238_v50, %v1241_v52  ;;  %v6791_v14 = vld [vmem:[%s5896_s25 + $0x50] sm:$0x3] }
  0xb5   : > { %v3104_v19 = vsel %vm6574_vm12, %v3102_v46, %v3103_v20  ;;  %v1259_v49 = vrot.slane %v1257_v39, 6  ;;  %v1268_v62 = vshrl.u32 %v6753_v58, 16  ;;  %v1271_v48 = vshll.u32 %v6753_v58, 16 }
  0xb6   : > { %v1263_v4 = vrot.slane %v7426_v0, 6  ;;  %v1252_v40 = vsel %vm6340_vm9, %v1243_v56, %v1251_v55  ;;  %v4823_v27 = vcombine.low %v3101_v53, %v3104_v19  ;;  %v1277_v41 = vshrl.u32 %v6565_v1, 16 }
  0xb7   : > { %v4599_v3 = vcombine.low %v1242_v7, %v1252_v40  ;;  %v1260_v8 = vor.u32 %v1259_v49, %v1256_v61  ;;  %v1270_v45 = vrot.slane %v1268_v62, 5  ;;  %v1273_v35 = vrot.slane %v1271_v48, 6  ;;  %v5727_v7 = vld [vmem:[%s5896_s25 + $0x24] sm:$0xff]  }
  0xb8   : > { %v1264_v31 = vor.u32 %v1263_v4, %v1262_v5  ;;  %5396 = vmatmul.mubr.msk.bf16.gmra.mrb[12].mxu0 %vm594_vm2, %v4823_v27  ;;  %v1280_v60 = vshll.u32 %v6565_v1, 16  ;;  %v7427_v22 = vshrl.u32 %v6116_v36, 16  ;;  %v1279_v56 = vrot.slane %v1277_v41, 5  ;;  %v5732_v41 = vld [vmem:[%s7363_s1 + $0xb8] sm:$0xff]  }
  0xb9   : > { %5268 = vmatmul.mubr.msk.bf16.gmra.mrb[4].mxu1 %vm594_vm2, %v4599_v3  ;;  %v1261_v23 = vrot.slane %v1260_v8, 4  ;;  %5403 = vmatprep.mubr.msk.bf16.mxu0 %vm594_vm2, %v5725_v33  ;;  %v7428_v63 = vshll.u32 %v6116_v36, 16  ;;  %v1291_v42 = vshrl.u32 %v6774_v16, 16  ;;  %v1274_v50 = vor.u32 %v1273_v35, %v1270_v45 }
  0xba   : > { %v1266_v52 = vrot.slane %v1264_v31, 4  ;;  %v1285_v59 = vrot.slane %v7427_v22, 5  ;;  %v1282_v53 = vrot.slane %v1280_v60, 6  ;;  %v1294_v46 = vshll.u32 %v6774_v16, 16 }
  0xbb   : > { %v1286_v20 = vrot.slane %v7428_v63, 6  ;;  %v1300_v1 = vshrl.u32 %v6596_v18, 16  ;;  %v1265_v39 = vsel %vm6340_vm9, %v1261_v23, %v1264_v31  ;;  %v1293_v61 = vrot.slane %v1291_v42, 5  ;;  %v5728_v31 = vld [vmem:[%s5896_s25 + $0x30] sm:$0xff]   ;;  %v6816_v63 = vld [vmem:[%s5896_s25 + $0x5c] sm:$0x3] }
  0xbc   : > { %v1303_v5 = vshll.u32 %v6596_v18, 16  ;;  %v1275_v36 = vsel %vm6340_vm9, %v1266_v52, %v1274_v50  ;;  %v1283_v0 = vor.u32 %v1282_v53, %v1279_v56  ;;  %v1296_v4 = vrot.slane %v1294_v46, 6  ;;  %v1523_v53 = vld [vmem:[%s5896_s25] sm:$0xc] }
  0xbd   : > { %v1287_v55 = vor.u32 %v1286_v20, %v1285_v59  ;;  %v1302_v19 = vrot.slane %v1300_v1, 5  ;;  %v4600_v49 = vcombine.low %v1265_v39, %v1275_v36  ;;  %v7429_v40 = vshrl.u32 %v6159_v37, 16 }
  0xbe   : > { %v1305_v33 = vrot.slane %v1303_v5, 6  ;;  %v1284_v48 = vrot.slane %v1283_v0, 4  ;;  %v1297_v3 = vor.u32 %v1296_v4, %v1293_v61  ;;  %v7430_v8 = vshll.u32 %v6159_v37, 16 }
  0xbf   : > { %v1289_v62 = vrot.slane %v1287_v55, 4  ;;  %v1308_v27 = vrot.slane %v7429_v40, 5  ;;  %v1314_v45 = vshrl.u32 %v6791_v14, 16  ;;  %5271 = vmatprep.mubr.msk.bf16.mxu1 %vm594_vm2, %v4600_v49  ;;  %v1317_v35 = vshll.u32 %v6791_v14, 16  ;;  %v5729_v49 = vld [vmem:[%s5896_s25 + $0x3c] sm:$0xff]  }
  0xc0   : > { %v1309_v18 = vrot.slane %v7430_v8, 6  ;;  %v1306_v52 = vor.u32 %v1305_v33, %v1302_v19  ;;  %v1323_v60 = vshrl.u32 %v6604_v2, 16  ;;  %v1326_v22 = vshll.u32 %v6604_v2, 16  ;;  %5404 = vmatmul.mubr.msk.bf16.vlgmr.msra.gmra.mrb[0].mxu0 %vm594_vm2, %v5727_v7  ;;  %v5751_v33 = vld [vmem:[%s5896_s25 + $0x4] sm:$0xf] }
  0xc1   : > { %v1288_v37 = vsel %vm6340_vm9, %v1284_v48, %v1287_v55  ;;  %v1298_v59 = vsel %vm6340_vm9, %v1289_v62, %v1297_v3  ;;  %v1316_v56 = vrot.slane %v1314_v45, 5  ;;  %5420 = vmatpush3.bf16.msra.mxu0 %v6668_v57  ;;  %v1319_v50 = vrot.slane %v1317_v35, 6  ;;  %5407 = vmatprep.mubr.msk.bf16.mxu0 %vm594_vm2, %v5728_v31  ;;  %v6828_v57 = vld [vmem:[%s7363_s1 + $0xc0] sm:$0xff]   ;;  %v1525_v45 = vld [vmem:[%s5896_s25 + $0x18] sm:$0xc] }
  0xc2   : > { %v1310_v23 = vor.u32 %v1309_v18, %v1308_v27  ;;  %v4601_v20 = vcombine.low %v1288_v37, %v1298_v59  ;;  %v1307_v42 = vrot.slane %v1306_v52, 4  ;;  %v1325_v2 = vrot.slane %v1323_v60, 5  ;;  %5421 = vmatprep.subr.bf16.mxu0 %v5732_v41  ;;  %v1524_v27 = vld [vmem:[%s5896_s25 + $0xc] sm:$0xc] }
  0xc3   : > { %v1328_v1 = vrot.slane %v1326_v22, 6  ;;  %v7431_v39 = vshrl.u32 %v6195_v34, 16  ;;  %v7432_v61 = vshll.u32 %v6195_v34, 16  ;;  %v1320_v0 = vor.u32 %v1319_v50, %v1316_v56  ;;  %v5731_v18 = vld [vmem:[%s5896_s25 + $0x48] sm:$0xff]   ;;  %v5752_v56 = vld [vmem:[%s5896_s25 + $0x10] sm:$0xf] }
  0xc4   : > { %v1312_v46 = vrot.slane %v1310_v23, 4  ;;  %5272 = vmatmul.mubr.msk.bf16.gmra.mrb[8].mxu1 %vm594_vm2, %v4601_v20  ;;  %v1311_v36 = vsel %vm6340_vm9, %v1307_v42, %v1310_v23  ;;  %v1337_v4 = vshrl.u32 %v6816_v63, 16  ;;  %v1340_v7 = vshll.u32 %v6816_v63, 16  ;;  %v5753_v50 = vld [vmem:[%s5896_s25 + $0x1c] sm:$0xf] }
  0xc5   : > { %v1331_v55 = vrot.slane %v7431_v39, 5  ;;  %v1332_v5 = vrot.slane %v7432_v61, 6  ;;  %v1329_v34 = vor.u32 %v1328_v1, %v1325_v2  ;;  %v4614_v62 = vrot.slane %v1523_v53, 10  ;;  %5422 = vmatpush3.bf16.msra.mxu0 %v5732_v41  ;;  %v1526_v53 = vld [vmem:[%s5896_s25 + $0x24] sm:$0xc] }
  0xc6   : > { %v1552_v40 = vrot.slane %v5751_v33, 6  ;;  %v1321_v31 = vsel %vm6340_vm9, %v1312_v46, %v1320_v0  ;;  %v1339_v48 = vrot.slane %v1337_v4, 5  ;;  %v1342_v3 = vrot.slane %v1340_v7, 6  ;;  %5439 = vmatprep.subr.bf16.mxu0 %v6828_v57  ;;  %v5733_v33 = vld [vmem:[%s5896_s25 + $0x54] sm:$0xff]  }
  0xc7   : > { %v1333_v19 = vor.u32 %v1332_v5, %v1331_v55  ;;  %v1555_v8 = vrot.slane %v6637_v21, 6  ;;  %v4602_v52 = vcombine.low %v1311_v36, %v1321_v31  ;;  %v1330_v35 = vrot.slane %v1329_v34, 4  ;;  %v5754_v34 = vld [vmem:[%s5896_s25 + $0x28] sm:$0xf]  ;;  %v5755_v31 = vld [vmem:[%s5896_s25 + $0x34] sm:$0xf] }
  0xc8   : > { %v1553_v22 = vsel %vm6574_vm12, %v4614_v62, %v1552_v40  ;;  %v1343_v37 = vor.u32 %v1342_v3, %v1339_v48  ;;  %v1554_v59 = vrot.slane %v1552_v40, 4  ;;  %v4615_v23 = vrot.slane %v1524_v27, 10  ;;  %5408 = vmatmul.mubr.msk.bf16.gmra.mrb[4].mxu0 %vm594_vm2, %v5729_v49  ;;  %v4872_v49 = vld [vmem:[%s5896_s25 + $0x18] sm:$0xf]  ;;  %v6876_v3 = vld [vmem:[%s5896_s25 + $0x1c] sm:$0xf] }
  0xc9   : > { %v1335_v60 = vrot.slane %v1333_v19, 4  ;;  %v1559_v20 = vrot.slane %v5752_v56, 6  ;;  %5275 = vmatprep.mubr.msk.bf16.mxu1 %vm594_vm2, %v4602_v52  ;;  %v1334_v21 = vsel %vm6340_vm9, %v1330_v35, %v1333_v19  ;;  %v1562_v41 = vrot.slane %v6663_v29, 6  ;;  %5411 = vmatprep.mubr.msk.bf16.mxu0 %vm594_vm2, %v5731_v18  ;;  %v1527_v29 = vld [vmem:[%s5896_s25 + $0x30] sm:$0xc] }
  0xca   : > { %v4616_v42 = vrot.slane %v1525_v45, 10  ;;  %v1566_v2 = vrot.slane %v5753_v50, 6  ;;  %v1556_v1 = vsel %vm6574_vm12, %v1554_v59, %v1555_v8  ;;  %v1569_v4 = vrot.slane %v6691_v25, 6  ;;  %v5734_v8 = vld [vmem:[%s5896_s25 + $0x60] sm:$0xff]  }
  0xcb   : > { %v1344_v46 = vsel %vm6340_vm9, %v1335_v60, %v1343_v37  ;;  %v1560_v39 = vsel %vm6574_vm12, %v4615_v23, %v1559_v20  ;;  %v1561_v55 = vrot.slane %v1559_v20, 4  ;;  %v4626_v5 = vcombine.low %v1553_v22, %v1556_v1  ;;  %v1528_v20 = vld [vmem:[%s5896_s25 + $0x3c] sm:$0xc] }
  0xcc   : > { %v4603_v61 = vcombine.low %v1334_v21, %v1344_v46  ;;  %v6864_v38 = vsel %vm6574_vm12, %v4616_v42, %v1566_v2  ;;  %v1568_v36 = vrot.slane %v1566_v2, 4  ;;  %v4617_v7 = vrot.slane %v1526_v53, 10  ;;  %v4875_v2 = vld [vmem:[%s5896_s25 + $0x24] sm:$0xf] }
  0xcd   : > { %v1563_v0 = vsel %vm6574_vm12, %v1561_v55, %v1562_v41  ;;  %v1573_v19 = vrot.slane %v5754_v34, 6  ;;  %v1576_v40 = vrot.slane %v6722_v51, 6  ;;  %v4618_v27 = vrot.slane %v1527_v29, 10  ;;  %v6888_v51 = vld [vmem:[%s5896_s25 + $0x20] sm:$0x1]  ;;  %v5736_v29 = vld [vmem:[%s7363_s1 + $0x58] sm:$0xff]  }
  0xce   : > { %5276 = vmatmul.mubr.msk.bf16.gmra.mrb[12].mxu1 %vm594_vm2, %v4603_v61  ;;  %v4627_v62 = vcombine.low %v1560_v39, %v1563_v0  ;;  %v1580_v48 = vrot.slane %v5755_v31, 6  ;;  %v1570_v25 = vsel %vm6574_vm12, %v1568_v36, %v1569_v4  ;;  %v1583_v52 = vrot.slane %v6753_v58, 6  ;;  %v6915_v55 = vld [vmem:[%s5896_s25 + $0x28] sm:$0xf]  ;;  %v6923_v34 = vld [vmem:[%s5896_s25 + $0x2c] sm:$0x1] }
  0xcf   : > { %5283 = vmatprep.mubr.msk.bf16.mxu1 %vm594_vm2, %v4626_v5  ;;  %v6884_v18 = vsel %vm6574_vm12, %v4617_v7, %v1573_v19  ;;  %v1575_v45 = vrot.slane %v1573_v19, 4  ;;  %v4628_v35 = vcombine.low %v6864_v38, %v1570_v25  ;;  %v3519_v37 = vshrl.u32 %v4872_v49, 16  ;;  %v5756_v38 = vld [vmem:[%s5896_s25 + $0x40] sm:$0xf] }
  0xd0   : > { %v6893_v60 = vsel %vm6574_vm12, %v4618_v27, %v1580_v48  ;;  %v1582_v22 = vrot.slane %v1580_v48, 4  ;;  %v3522_v23 = vshll.u32 %v4872_v49, 16  ;;  %v3528_v56 = vshll.u32 %v6876_v3, 16  ;;  %5412 = vmatmul.mubr.msk.bf16.gmra.mrb[8].mxu0 %vm594_vm2, %v5733_v33  ;;  %v5735_v33 = vld [vmem:[%s5896_s25 + $0x6c] sm:$0xff]  }
  0xd1   : > { %v6897_v59 = vsel %vm6574_vm12, %v1575_v45, %v1576_v40  ;;  %v3532_v58 = vshrl.u32 %v6876_v3, 16  ;;  %v3521_v42 = vrot.slane %v3519_v37, 4  ;;  %v3538_v50 = vshll.u32 %v6888_v51, 16  ;;  %5415 = vmatprep.mubr.msk.bf16.mxu0 %vm594_vm2, %v5734_v8  ;;  %v1529_v45 = vld [vmem:[%s5896_s25 + $0x48] sm:$0xc] }
  0xd2   : > { %v4629_v21 = vcombine.low %v6884_v18, %v6897_v59  ;;  %v6907_v41 = vsel %vm6574_vm12, %v1582_v22, %v1583_v52  ;;  %v3524_v46 = vrot.slane %v3522_v23, 5  ;;  %v3530_v1 = vrot.slane %v3528_v56, 5  ;;  %v4878_v56 = vld [vmem:[%s5896_s25 + $0x30] sm:$0xf] }
  0xd3   : > { %v4630_v53 = vcombine.low %v6893_v60, %v6907_v41  ;;  %v3534_v39 = vrot.slane %v3532_v58, 4  ;;  %v3540_v61 = vrot.slane %v3538_v50, 5  ;;  %v4619_v5 = vrot.slane %v1528_v20, 10  ;;  %v6949_v50 = vld [vmem:[%s5896_s25 + $0x34] sm:$0xf]  ;;  %v5739_v60 = vld [vmem:[%s7363_s1 + $0xc8] sm:$0xff]  }
  0xd4   : > { %v1587_v36 = vrot.slane %v5756_v38, 6  ;;  %v1590_v0 = vrot.slane %v6774_v16, 6  ;;  %v3525_v4 = vor.u32 %v3524_v46, %v3521_v42  ;;  %v3543_v19 = vshrl.u32 %v4875_v2, 16 }
  0xd5   : > { %v3535_v7 = vor.u32 %v3534_v39, %v3530_v1  ;;  %v3546_v49 = vshll.u32 %v4875_v2, 16  ;;  %v3552_v31 = vshll.u32 %v6915_v55, 16  ;;  %v3556_v16 = vshrl.u32 %v6915_v55, 16 }
  0xd6   : > { %5284 = vmatmul.mubr.msk.bf16.vlgmr.msra.gmra.mrb[0].mxu1 %vm594_vm2, %v4627_v62  ;;  %v6929_v40 = vsel %vm6574_vm12, %v4619_v5, %v1587_v36  ;;  %v1589_v27 = vrot.slane %v1587_v36, 4  ;;  %v3526_v48 = vrot.slane %v3525_v4, 4  ;;  %v3545_v8 = vrot.slane %v3543_v19, 4  ;;  %v5757_v36 = vld [vmem:[%s5896_s25 + $0x4c] sm:$0xf] }
  0xd7   : > { %5300 = vmatpush3.bf16.msra.mxu1 %v6745_v32  ;;  %5287 = vmatprep.mubr.msk.bf16.mxu1 %vm594_vm2, %v4628_v35  ;;  %v3536_v25 = vrot.slane %v3535_v7, 4  ;;  %v3548_v62 = vrot.slane %v3546_v49, 5  ;;  %v3554_v22 = vrot.slane %v3552_v31, 5  ;;  %v3558_v37 = vrot.slane %v3556_v16, 4 }
  0xd8   : > { %5301 = vmatprep.subr.bf16.mxu1 %v5736_v29  ;;  %v6938_v52 = vsel %vm6574_vm12, %v1589_v27, %v1590_v0  ;;  %v3562_v23 = vshll.u32 %v6923_v34, 16  ;;  %v3531_v35 = vsel %vm5928_vm3, %v3526_v48, %v3530_v1  ;;  %5416 = vmatmul.mubr.msk.bf16.gmra.mrb[12].mxu0 %vm594_vm2, %v5735_v33  ;;  %v4620_v5 = vrot.slane %v1529_v45, 10  ;;  %v1530_v27 = vld [vmem:[%s5896_s25 + $0x54] sm:$0xc] }
  0xd9   : > { %v3541_v58 = vsel %vm5928_vm3, %v3536_v25, %v3540_v61  ;;  %v4631_v20 = vcombine.low %v6929_v40, %v6938_v52  ;;  %v3549_v42 = vor.u32 %v3548_v62, %v3545_v8  ;;  %v3559_v46 = vor.u32 %v3558_v37, %v3554_v22  ;;  %v6955_v61 = vld [vmem:[%s5896_s25 + $0x38] sm:$0x1] }
  0xda   : > { %v4900_v2 = vcombine.low %v3531_v35, %v3541_v58  ;;  %v3564_v39 = vrot.slane %v3562_v23, 5  ;;  %v1594_v1 = vrot.slane %v5757_v36, 6  ;;  %v1597_v0 = vrot.slane %v6791_v14, 6  ;;  %v5759_v58 = vld [vmem:[%s5896_s25 + $0x58] sm:$0xf] }
  0xdb   : > { %5302 = vmatpush3.bf16.msra.mxu1 %v5736_v29  ;;  %v3550_v38 = vrot.slane %v3549_v42, 4  ;;  %v3567_v4 = vshrl.u32 %v4878_v56, 16  ;;  %v3560_v7 = vrot.slane %v3559_v46, 4  ;;  %v3570_v19 = vshll.u32 %v4878_v56, 16  ;;  %v6964_v29 = vld [vmem:[%s7363_s1 + $0x60] sm:$0xff]  }
  0xdc   : > { %5423 = vmatprep.mubr.msk.bf16.mxu0 %vm594_vm2, %v4900_v2  ;;  %v3576_v49 = vshll.u32 %v6949_v50, 16  ;;  %v3580_v33 = vshrl.u32 %v6949_v50, 16  ;;  %5459 = vmatprep.subr.bf16.mxu1 %v6964_v29  ;;  %v1595_v31 = vsel %vm6574_vm12, %v4620_v5, %v1594_v1  ;;  %v1596_v16 = vrot.slane %v1594_v1, 4  ;;  %v6987_v2 = vld [vmem:[%s5896_s25 + $0x40] sm:$0xf] }
  0xdd   : > { %v3555_v14 = vsel %vm5928_vm3, %v3550_v38, %v3554_v22  ;;  %v3569_v48 = vrot.slane %v3567_v4, 4  ;;  %v3565_v25 = vsel %vm5928_vm3, %v3560_v7, %v3564_v39  ;;  %v3572_v8 = vrot.slane %v3570_v19, 5  ;;  %v4881_v22 = vld [vmem:[%s5896_s25 + $0x3c] sm:$0xf]  ;;  %v6994_v46 = vld [vmem:[%s5896_s25 + $0x44] sm:$0x1] }
  0xde   : > { %5288 = vmatmul.mubr.msk.bf16.gmra.mrb[4].mxu1 %vm594_vm2, %v4629_v21  ;;  %v3578_v62 = vrot.slane %v3576_v49, 5  ;;  %v3582_v45 = vrot.slane %v3580_v33, 4  ;;  %v4901_v37 = vcombine.low %v3555_v14, %v3565_v25  ;;  %v1598_v18 = vsel %vm6574_vm12, %v1596_v16, %v1597_v0  ;;  %v4884_v49 = vld [vmem:[%s5896_s25 + $0x48] sm:$0xf]  ;;  %v7016_v16 = vld [vmem:[%s5896_s25 + $0x50] sm:$0x1] }
  0xdf   : > { %5291 = vmatprep.mubr.msk.bf16.mxu1 %vm594_vm2, %v4630_v53  ;;  %v3586_v59 = vshll.u32 %v6955_v61, 16  ;;  %v4621_v21 = vrot.slane %v1530_v27, 10  ;;  %v4632_v23 = vcombine.low %v1595_v31, %v1598_v18  ;;  %v3573_v56 = vor.u32 %v3572_v8, %v3569_v48  ;;  %v7030_v40 = vld [vmem:[%s5896_s25 + $0x58] sm:$0xf] }
  0xe0   : > { %v3583_v35 = vor.u32 %v3582_v45, %v3578_v62  ;;  %v1601_v42 = vrot.slane %v5759_v58, 6  ;;  %v1604_v53 = vrot.slane %v6816_v63, 6  ;;  %v3591_v39 = vshrl.u32 %v4881_v22, 16  ;;  %5424 = vmatmul.mubr.msk.bf16.vlgmr.msra.gmra.mrb[0].mxu0 %vm594_vm2, %v4901_v37 }
  0xe1   : > { %v3588_v41 = vrot.slane %v3586_v59, 5  ;;  %v3594_v5 = vshll.u32 %v4881_v22, 16  ;;  %v3574_v38 = vrot.slane %v3573_v56, 4  ;;  %5440 = vmatpush3.bf16.msra.mxu0 %v6828_v57  ;;  %v3600_v7 = vshll.u32 %v6987_v2, 16  ;;  %v7013_v57 = vld [vmem:[%s5896_s25 + $0x4c] sm:$0xf] }
  0xe2   : > { %v3584_v36 = vrot.slane %v3583_v35, 4  ;;  %v6999_v1 = vsel %vm6574_vm12, %v4621_v21, %v1601_v42  ;;  %v1603_v0 = vrot.slane %v1601_v42, 4  ;;  %v3593_v4 = vrot.slane %v3591_v39, 4  ;;  %5441 = vmatprep.subr.bf16.mxu0 %v5739_v60  ;;  %v7033_v42 = vld [vmem:[%s5896_s25 + $0x5c] sm:$0x1] }
  0xe3   : > { %v3596_v63 = vrot.slane %v3594_v5, 5  ;;  %v3604_v19 = vshrl.u32 %v6987_v2, 16  ;;  %v3579_v33 = vsel %vm5928_vm3, %v3574_v38, %v3578_v62  ;;  %v3610_v31 = vshll.u32 %v6994_v46, 16  ;;  %v4887_v62 = vld [vmem:[%s5896_s25 + $0x54] sm:$0xf] }
  0xe4   : > { %v3589_v27 = vsel %vm5928_vm3, %v3584_v36, %v3588_v41  ;;  %v1605_v14 = vsel %vm6574_vm12, %v1603_v0, %v1604_v53  ;;  %v3602_v45 = vrot.slane %v3600_v7, 5  ;;  %v3615_v37 = vshrl.u32 %v4884_v49, 16  ;;  %v4890_v38 = vld [vmem:[%s5896_s25 + $0x60] sm:$0xf] }
  0xe5   : > { %v4902_v48 = vcombine.low %v3579_v33, %v3589_v27  ;;  %v4633_v25 = vcombine.low %v6999_v1, %v1605_v14  ;;  %v3597_v8 = vor.u32 %v3596_v63, %v3593_v4  ;;  %v3606_v9 = vrot.slane %v3604_v19, 4  ;;  %5442 = vmatpush3.bf16.msra.mxu0 %v5739_v60  ;;  %v5738_v63 = vld [vmem:[%s5896_s25 + $0xc] sm:$0xff]  }
  0xe6   : > { %5292 = vmatmul.mubr.msk.bf16.gmra.mrb[8].mxu1 %vm594_vm2, %v4631_v20  ;;  %v3612_v22 = vrot.slane %v3610_v31, 5  ;;  %v3618_v18 = vshll.u32 %v4884_v49, 16  ;;  %v3624_v21 = vshll.u32 %v7013_v57, 16  ;;  %v3628_v56 = vshrl.u32 %v7013_v57, 16  ;;  %v7045_v31 = vld [vmem:[%s5896_s25 + $0x64] sm:$0xf] }
  0xe7   : > { %5295 = vmatprep.mubr.msk.bf16.mxu1 %vm594_vm2, %v4632_v23  ;;  %5427 = vmatprep.mubr.msk.bf16.mxu0 %vm594_vm2, %v4902_v48  ;;  %v3598_v59 = vrot.slane %v3597_v8, 4  ;;  %v3634_v35 = vshll.u32 %v7016_v16, 16  ;;  %v3607_v52 = vor.u32 %v3606_v9, %v3602_v45  ;;  %v3617_v20 = vrot.slane %v3615_v37, 4  ;;  %v7048_v37 = vld [vmem:[%s5896_s25 + $0x68] sm:$0x1] }
  0xe8   : > { %v3620_v58 = vrot.slane %v3618_v18, 5  ;;  %v3639_v41 = vshrl.u32 %v4887_v62, 16  ;;  %v3626_v53 = vrot.slane %v3624_v21, 5  ;;  %v3630_v39 = vrot.slane %v3628_v56, 4  ;;  %v4893_v56 = vld [vmem:[%s5896_s25 + $0x6c] sm:$0xf] }
  0xe9   : > { %v3603_v23 = vsel %vm5928_vm3, %v3598_v59, %v3602_v45  ;;  %v3636_v5 = vrot.slane %v3634_v35, 5  ;;  %v3608_v36 = vrot.slane %v3607_v52, 4  ;;  %v3642_v4 = vshll.u32 %v4887_v62, 16 }
  0xea   : > { %v3621_v1 = vor.u32 %v3620_v58, %v3617_v20  ;;  %v3641_v0 = vrot.slane %v3639_v41, 4  ;;  %v3631_v7 = vor.u32 %v3630_v39, %v3626_v53  ;;  %v3648_v19 = vshll.u32 %v7030_v40, 16  ;;  %v7062_v39 = vld [vmem:[%s5896_s25 + $0x70] sm:$0xf] }
  0xeb   : > { %v3652_v49 = vshrl.u32 %v7030_v40, 16  ;;  %v3658_v60 = vshll.u32 %v7033_v42, 16  ;;  %v3613_v33 = vsel %vm5928_vm3, %v3608_v36, %v3612_v22  ;;  %v3644_v14 = vrot.slane %v3642_v4, 5  ;;  %v7065_v4 = vld [vmem:[%s5896_s25 + $0x74] sm:$0x1] }
  0xec   : > { %v3622_v27 = vrot.slane %v3621_v1, 4  ;;  %v3663_v48 = vshrl.u32 %v4890_v38, 16  ;;  %v4903_v8 = vcombine.low %v3603_v23, %v3613_v33  ;;  %v3632_v45 = vrot.slane %v3631_v7, 4 }
  0xed   : > { %v3650_v62 = vrot.slane %v3648_v19, 5  ;;  %v3654_v9 = vrot.slane %v3652_v49, 4  ;;  %v3645_v59 = vor.u32 %v3644_v14, %v3641_v0  ;;  %v3660_v21 = vrot.slane %v3658_v60, 5  ;;  %v4918_v60 = vld [vmem:[%s5896_s25 + $0x18] sm:$0xe] }
  0xee   : > { %5296 = vmatmul.mubr.msk.bf16.gmra.mrb[12].mxu1 %vm594_vm2, %v4633_v25  ;;  %v3627_v18 = vsel %vm5928_vm3, %v3622_v27, %v3626_v53  ;;  %v3665_v22 = vrot.slane %v3663_v48, 4  ;;  %5428 = vmatmul.mubr.msk.bf16.gmra.mrb[4].mxu0 %vm594_vm2, %v4903_v8  ;;  %v3637_v35 = vsel %vm5928_vm3, %v3632_v45, %v3636_v5  ;;  %v3666_v20 = vshll.u32 %v4890_v38, 16  ;;  %v5740_v38 = vld [vmem:[%s5896_s25 + $0x18] sm:$0xff]   ;;  %v5741_v45 = vld [vmem:[%s5896_s25 + $0x24] sm:$0xff]  }
  0xef   : > { %5303 = vmatprep.mubr.msk.bf16.mxu1 %vm594_vm2, %v5738_v63  ;;  %v3655_v52 = vor.u32 %v3654_v9, %v3650_v62  ;;  %v3672_v25 = vshll.u32 %v7045_v31, 16  ;;  %v4904_v58 = vcombine.low %v3627_v18, %v3637_v35  ;;  %v3646_v41 = vrot.slane %v3645_v59, 4  ;;  %v4919_v35 = vld [vmem:[%s5896_s25 + $0x24] sm:$0xe] }
  0xf0   : > { %v3676_v23 = vshrl.u32 %v7045_v31, 16  ;;  %v3682_v53 = vshll.u32 %v7048_v37, 16  ;;  %v3668_v1 = vrot.slane %v3666_v20, 5  ;;  %v3687_v5 = vshrl.u32 %v4893_v56, 16 }
  0xf1   : > { %v3656_v36 = vrot.slane %v3655_v52, 4  ;;  %v3674_v0 = vrot.slane %v3672_v25, 5  ;;  %5431 = vmatprep.mubr.msk.bf16.mxu0 %vm594_vm2, %v4904_v58  ;;  %v3651_v63 = vsel %vm5928_vm3, %v3646_v41, %v3650_v62  ;;  %v3690_v49 = vshll.u32 %v4893_v56, 16 }
  0xf2   : > { %v3678_v7 = vrot.slane %v3676_v23, 4  ;;  %v3684_v19 = vrot.slane %v3682_v53, 5  ;;  %v3669_v27 = vor.u32 %v3668_v1, %v3665_v22  ;;  %v3689_v14 = vrot.slane %v3687_v5, 4 }
  0xf3   : > { %v3661_v33 = vsel %vm5928_vm3, %v3656_v36, %v3660_v21  ;;  %v3696_v48 = vshll.u32 %v7062_v39, 16  ;;  %v3692_v18 = vrot.slane %v3690_v49, 5  ;;  %v3700_v59 = vshrl.u32 %v7062_v39, 16 }
  0xf4   : > { %v4905_v8 = vcombine.low %v3651_v63, %v3661_v33  ;;  %v3679_v9 = vor.u32 %v3678_v7, %v3674_v0  ;;  %v3670_v52 = vrot.slane %v3669_v27, 4  ;;  %v3706_v20 = vshll.u32 %v7065_v4, 16 }
  0xf5   : > { %v3698_v62 = vrot.slane %v3696_v48, 5  ;;  %v4926_v56 = vrot.slane %v4918_v60, 9  ;;  %v3693_v21 = vor.u32 %v3692_v18, %v3689_v14  ;;  %v3702_v22 = vrot.slane %v3700_v59, 4  ;;  %v5742_v60 = vld [vmem:[%s5896_s25 + $0x30] sm:$0xff]   ;;  %v5743_v14 = vld [vmem:[%s5896_s25 + $0x3c] sm:$0xff]  }
  0xf6   : > { %5304 = vmatmul.mubr.msk.bf16.vlgmr.msra.gmra.mrb[0].mxu1 %vm594_vm2, %v5740_v38  ;;  %v3680_v25 = vrot.slane %v3679_v9, 4  ;;  %v3922_v58 = vrot.slane %v6876_v3, 5  ;;  %5432 = vmatmul.mubr.msk.bf16.gmra.mrb[8].mxu0 %vm594_vm2, %v4905_v8  ;;  %v3675_v41 = vsel %vm5928_vm3, %v3670_v52, %v3674_v0  ;;  %v3708_v23 = vrot.slane %v3706_v20, 5  ;;  %v4920_v38 = vld [vmem:[%s5896_s25 + $0x30] sm:$0xe] }
  0xf7   : > { %5461 = vmatpush3.bf16.msra.mxu1 %v6964_v29  ;;  %v3925_v53 = vrot.slane %v6888_v51, 5  ;;  %v4927_v36 = vrot.slane %v4919_v35, 9  ;;  %5307 = vmatprep.mubr.msk.bf16.mxu1 %vm594_vm2, %v5741_v45  ;;  %v3694_v5 = vrot.slane %v3693_v21, 4  ;;  %v3703_v3 = vor.u32 %v3702_v22, %v3698_v62  ;;  %v5760_v29 = vld [vmem:[%s7363_s1 + $0x68] sm:$0xff]  }
  0xf8   : > { %v3685_v1 = vsel %vm5928_vm3, %v3680_v25, %v3684_v19  ;;  %5460 = vmatprep.subr.bf16.mxu1 %v5760_v29  ;;  %v3923_v0 = vsel %vm6120_vm6, %v4926_v56, %v3922_v58  ;;  %v3924_v63 = vrot.slane %v3922_v58, 4  ;;  %v3929_v7 = vrot.slane %v6915_v55, 5  ;;  %v4922_v21 = vld [vmem:[%s5896_s25 + $0x48] sm:$0xe] }
  0xf9   : > { %v4906_v51 = vcombine.low %v3675_v41, %v3685_v1  ;;  %v3932_v49 = vrot.slane %v6923_v34, 5  ;;  %v7099_v19 = vrot.slane %v2159_v43, 5  ;;  %v3699_v33 = vsel %vm5928_vm3, %v3694_v5, %v3698_v62  ;;  %v4694_v43 = vld [vmem:[%s5896_s25 + $0x3c] sm:$0xf] }
  0xfa   : > { %v3704_v27 = vrot.slane %v3703_v3, 4  ;;  %v3936_v48 = vrot.slane %v6949_v50, 5  ;;  %v3926_v8 = vsel %vm6120_vm6, %v3924_v63, %v3925_v53  ;;  %v3931_v55 = vrot.slane %v3929_v7, 4 }
  0xfb   : > { %5435 = vmatprep.mubr.msk.bf16.mxu0 %vm594_vm2, %v4906_v51  ;;  %5462 = vmatpush3.bf16.msra.mxu1 %v5760_v29  ;;  %v4928_v34 = vrot.slane %v4920_v38, 9  ;;  %v4938_v9 = vcombine.low %v3923_v0, %v3926_v8  ;;  %v3930_v18 = vsel %vm6120_vm6, %v4927_v36, %v3929_v7  ;;  %v3939_v50 = vrot.slane %v6955_v61, 5  ;;  %v4697_v36 = vld [vmem:[%s5896_s25 + $0x48] sm:$0xf]  ;;  %v5745_v51 = vld [vmem:[%s5896_s25 + $0x54] sm:$0xff]  }
  0xfc   : > { %v3709_v45 = vsel %vm5928_vm3, %v3704_v27, %v3708_v23  ;;  %v3933_v35 = vsel %vm6120_vm6, %v3931_v55, %v3932_v49  ;;  %v3938_v52 = vrot.slane %v3936_v48, 4  ;;  %v3943_v62 = vrot.slane %v6987_v2, 5  ;;  %v5761_v23 = vld [vmem:[%s5896_s25 + $0x44] sm:$0x1]  ;;  %v5744_v0 = vld [vmem:[%s5896_s25 + $0x48] sm:$0xff]  }
  0xfd   : > { %v4907_v59 = vcombine.low %v3699_v33, %v3709_v45  ;;  %v7122_v20 = vrot.slane %v2156_v10, 4  ;;  %v4929_v56 = vrot.slane %v4921_v11, 9  ;;  %v3946_v25 = vrot.slane %v6994_v46, 5  ;;  %v4700_v8 = vld [vmem:[%s5896_s25 + $0x54] sm:$0xf] }
  0xfe   : > { %5308 = vmatmul.mubr.msk.bf16.gmra.mrb[4].mxu1 %vm594_vm2, %v5742_v60  ;;  %v2116_v61 = vshrl.u32 %v4694_v43, 16  ;;  %v4939_v2 = vcombine.low %v3930_v18, %v3933_v35  ;;  %v3937_v44 = vsel %vm6120_vm6, %v4928_v34, %v3936_v48  ;;  %v3945_v10 = vrot.slane %v3943_v62, 4  ;;  %v4923_v48 = vld [vmem:[%s5896_s25 + $0x54] sm:$0xe] }
  0xff   : > { %5436 = vmatmul.mubr.msk.bf16.gmra.mrb[12].mxu0 %vm594_vm2, %v4907_v59  ;;  %5311 = vmatprep.mubr.msk.bf16.mxu1 %vm594_vm2, %v5743_v14  ;;  %v2119_v22 = vshll.u32 %v4694_v43, 16  ;;  %v2127_v46 = vrot.slane %v2125_v30, 5  ;;  %v2131_v41 = vrot.slane %v2129_v6, 4  ;;  %v2135_v53 = vshll.u32 %v5761_v23, 16 }
 0x100   : > { %5443 = vmatprep.mubr.msk.bf16.mxu0 %vm594_vm2, %v4938_v9  ;;  %v2118_v58 = vrot.slane %v2116_v61, 4  ;;  %v3940_v1 = vsel %vm6120_vm6, %v3938_v52, %v3939_v50  ;;  %v4930_v3 = vrot.slane %v4922_v21, 9  ;;  %v3950_v29 = vrot.slane %v7013_v57, 5  ;;  %v5762_v21 = vld [vmem:[%s5896_s25 + $0x5c] sm:$0x1] }
 0x101   : > { %v2121_v5 = vrot.slane %v2119_v22, 5  ;;  %v7144_v38 = vsel %vm6120_vm6, %v4929_v56, %v3943_v62  ;;  %v7148_v12 = vsel %vm6120_vm6, %v3945_v10, %v3946_v25  ;;  %v2132_v30 = vor.u32 %v2131_v41, %v2127_v46  ;;  %v5746_v10 = vld [vmem:[%s5896_s25 + $0x60] sm:$0xff]  }
 0x102   : > { %v3953_v6 = vrot.slane %v7016_v16, 5  ;;  %v2137_v7 = vrot.slane %v2135_v53, 5  ;;  %v3952_v49 = vrot.slane %v3950_v29, 4  ;;  %v2140_v60 = vshrl.u32 %v4697_v36, 16 }
 0x103   : > { %v2122_v63 = vor.u32 %v2121_v5, %v2118_v58  ;;  %v4940_v33 = vcombine.low %v3937_v44, %v3940_v1  ;;  %v2133_v57 = vrot.slane %v2132_v30, 4  ;;  %v2143_v27 = vshll.u32 %v4697_v36, 16  ;;  %v4703_v44 = vld [vmem:[%s5896_s25 + $0x60] sm:$0xf] }
 0x104   : > { %v2162_v14 = vsel %vm5928_vm3, %v7122_v20, %v7099_v19  ;;  %v3951_v34 = vsel %vm6120_vm6, %v4930_v3, %v3950_v29  ;;  %v3954_v16 = vsel %vm6120_vm6, %v3952_v49, %v3953_v6  ;;  %v2142_v11 = vrot.slane %v2140_v60, 4  ;;  %v4924_v20 = vld [vmem:[%s5896_s25 + $0x60] sm:$0xe] }
 0x105   : > { %v2123_v55 = vrot.slane %v2122_v63, 4  ;;  %v4941_v43 = vcombine.low %v7144_v38, %v7148_v12  ;;  %v2145_v45 = vrot.slane %v2143_v27, 5  ;;  %v3957_v9 = vrot.slane %v7030_v40, 5 }
 0x106   : > { %5312 = vmatmul.mubr.msk.bf16.gmra.mrb[8].mxu1 %vm594_vm2, %v5744_v0  ;;  %v2138_v18 = vsel %vm5928_vm3, %v2133_v57, %v2137_v7  ;;  %v4931_v50 = vrot.slane %v4923_v48, 9  ;;  %v2164_v59 = vshrl.u32 %v4700_v8, 16  ;;  %v4942_v35 = vcombine.low %v3951_v34, %v3954_v16 }
 0x107   : > { %5444 = vmatmul.mubr.msk.bf16.vlgmr.msra.gmra.mrb[0].mxu0 %vm594_vm2, %v4939_v2  ;;  %5315 = vmatprep.mubr.msk.bf16.mxu1 %vm594_vm2, %v5745_v51  ;;  %v2128_v19 = vsel %vm5928_vm3, %v2123_v55, %v2127_v46  ;;  %v2146_v52 = vor.u32 %v2145_v45, %v2142_v11  ;;  %v2167_v40 = vshll.u32 %v4700_v8, 16  ;;  %v2175_v62 = vrot.slane %v2173_v26, 5  ;;  %v5763_v51 = vld [vmem:[%s5896_s25 + $0x68] sm:$0x1]  ;;  %s4513_s25 = sshll.u32 %s7447_s18, 4 }
 0x108   : > { %5447 = vmatprep.mubr.msk.bf16.mxu0 %vm594_vm2, %v4940_v33  ;;  %v3960_v56 = vrot.slane %v7033_v42, 5  ;;  %v2166_v25 = vrot.slane %v2164_v59, 4  ;;  %v2179_v61 = vrot.slane %v2177_v15, 4  ;;  %v2183_v2 = vshll.u32 %v5762_v21, 16  ;;  %s308_s12 = sadd.s32 %s4514_s11, %s4513_s25 }
 0x109   : > { %v4714_v22 = vcombine.low %v2128_v19, %v2138_v18  ;;  %v2147_v58 = vrot.slane %v2146_v52, 4  ;;  %v3959_v46 = vrot.slane %v3957_v9, 4  ;;  %v2169_v41 = vrot.slane %v2167_v40, 5  ;;  %s7227_s13 = sshll.u32 %s308_s12, 2 }
 0x10a   : > { %v2180_v23 = vor.u32 %v2179_v61, %v2175_v62  ;;  %v2185_v53 = vrot.slane %v2183_v2, 5  ;;  %v4932_v36 = vrot.slane %v4924_v20, 9  ;;  %v3964_v26 = vrot.slane %v7045_v31, 5  ;;  %s7235_s16 = scalar_lea.vmem %s7365_s3, %s7227_s13  ;;  %s7241_s18 = scalar_lea.vmem %s7366_s4, %s7227_s13  ;;  %v7248_v61 = vld [vmem:[%s7364_s2] ss:$0 sm:$0xff] }
 0x10b   : > { %v2152_v42 = vsel %vm5928_vm3, %v2147_v58, %v6465_v28  ;;  %v2170_v1 = vor.u32 %v2169_v41, %v2166_v25  ;;  %v2188_v13 = vshrl.u32 %v4703_v44, 16  ;;  %v2191_v15 = vshll.u32 %v4703_v44, 16  ;;  %v5055_v20 = vld [vmem:[%s7235_s16 + $0x8] sm:$0xff]   ;;  %s7270_s30 = scalar_lea.vmem %s7367_s5, %s7227_s13 }
 0x10c   : > { %v4715_v5 = vcombine.low %v2152_v42, %v2162_v14  ;;  %v2181_v3 = vrot.slane %v2180_v23, 4  ;;  %v3966_v29 = vrot.slane %v3964_v26, 4  ;;  %v3967_v0 = vrot.slane %v7048_v37, 5  ;;  %v5062_v21 = vld [vmem:[%s7241_s18 + $0x8] sm:$0xff]  }
 0x10d   : > { %v2171_v38 = vrot.slane %v2170_v1, 4  ;;  %v2190_v12 = vrot.slane %v2188_v13, 4  ;;  %v2193_v30 = vrot.slane %v2191_v15, 5  ;;  %v2199_v31 = vrot.slane %v2197_v54, 5 }
 0x10e   : > { %5316 = vmatmul.mubr.msk.bf16.gmra.mrb[12].mxu1 %vm594_vm2, %v5746_v10  ;;  %v3958_v28 = vsel %vm6120_vm6, %v4931_v50, %v3957_v9  ;;  %v3961_v6 = vsel %vm6120_vm6, %v3959_v46, %v3960_v56  ;;  %v2203_v37 = vrot.slane %v2201_v17, 4  ;;  %v2207_v63 = vshll.u32 %v5763_v51, 16  ;;  %v4992_v56 = vld [vmem:[%s7235_s16] sm:$0xff]  }
 0x10f   : > { %5448 = vmatmul.mubr.msk.bf16.gmra.mrb[4].mxu0 %vm594_vm2, %v4941_v43  ;;  %5331 = vmatprep.mubr.msk.bf16.mxu1 %vm594_vm2, %v4714_v22  ;;  %v2176_v54 = vsel %vm5928_vm3, %v2171_v38, %v2175_v62  ;;  %v2186_v7 = vsel %vm5928_vm3, %v2181_v3, %v2185_v53  ;;  %v2194_v49 = vor.u32 %v2193_v30, %v2190_v12  ;;  %v3971_v17 = vrot.slane %v7062_v39, 5  ;;  %v5024_v22 = vld [vmem:[%s7241_s18] sm:$0xff]   ;;  %v5057_v3 = vld [vmem:[%s7235_s16 + $0x18] sm:$0xff]  }
 0x110   : > { %5451 = vmatprep.mubr.msk.bf16.mxu0 %vm594_vm2, %v4942_v35  ;;  %v3965_v60 = vsel %vm6120_vm6, %v4932_v36, %v3964_v26  ;;  %v3968_v33 = vsel %vm6120_vm6, %v3966_v29, %v3967_v0  ;;  %v2204_v57 = vor.u32 %v2203_v37, %v2199_v31  ;;  %v4943_v27 = vcombine.low %v3958_v28, %v3961_v6  ;;  %v5056_v29 = vld [vmem:[%s7235_s16 + $0x10] sm:$0xff]   ;;  %v7258_v30 = vld [vmem:[%s7241_s18 + $0x18] sm:$0xff]  }
 0x111   : > { %v4716_v14 = vcombine.low %v2176_v54, %v2186_v7  ;;  %v2195_v48 = vrot.slane %v2194_v49, 4  ;;  %v2209_v55 = vrot.slane %v2207_v63, 5  ;;  %v4944_v34 = vcombine.low %v3965_v60, %v3968_v33  ;;  %v7262_v37 = vld [vmem:[%s7241_s18 + $0x10] sm:$0xff]  }
 0x112   : > { %v2205_v8 = vrot.slane %v2204_v57, 4  ;;  %v4933_v16 = vrot.slane %v4925_v24, 9  ;;  %v3973_v11 = vrot.slane %v3971_v17, 4  ;;  %v3974_v43 = vrot.slane %v7065_v4, 5 }
 0x113   : > { %v2200_v39 = vsel %vm5928_vm3, %v2195_v48, %v2199_v31  ;;  %v4997_v44 = vunpack.c.l.bf16 %v5055_v20  ;;  %v4993_v46 = vunpack.c.l.bf16 %v4992_v56  ;;  %v5029_v53 = vunpack.c.l.bf16 %v5062_v21 }
 0x114   : > { %v2210_v45 = vsel %vm5928_vm3, %v2205_v8, %v2209_v55  ;;  %v3972_v9 = vsel %vm6120_vm6, %v4933_v16, %v3971_v17  ;;  %v3975_v4 = vsel %vm6120_vm6, %v3973_v11, %v3974_v43  ;;  %v4998_v26 = vunpack.c.h.bf16 %v5055_v20 }
 0x115   : > { %v4717_v19 = vcombine.low %v2200_v39, %v2210_v45  ;;  %v4945_v18 = vcombine.low %v3972_v9, %v3975_v4  ;;  %v5025_v13 = vunpack.c.l.bf16 %v5024_v22  ;;  %v5030_v12 = vunpack.c.h.bf16 %v5062_v21 }
 0x116   : > { %5332 = vmatmul.mubr.msk.bf16.vlgmr.msra.gmra.mrb[8].mxu1 %vm594_vm2, %v4715_v5  ;;  %v4994_v5 = vunpack.c.h.bf16 %v4992_v56  ;;  %v5026_v6 = vunpack.c.h.bf16 %v5024_v22  ;;  %v5005_v54 = vunpack.c.l.bf16 %v5057_v3  ;;  %v5001_v7 = vunpack.c.l.bf16 %v5056_v29 }
 0x117   : > { %5452 = vmatmul.mubr.msk.bf16.gmra.mrb[8].mxu0 %vm594_vm2, %v4943_v27  ;;  %5335 = vmatprep.mubr.msk.bf16.mxu1 %vm594_vm2, %v4716_v14  ;;  %v5037_v57 = vunpack.c.l.bf16 %v7258_v30  ;;  %v5006_v24 = vunpack.c.h.bf16 %v5057_v3  ;;  %v5033_v8 = vunpack.c.l.bf16 %v7262_v37  ;;  %v5002_v43 = vunpack.c.h.bf16 %v5056_v29 }
 0x118   : > { %5455 = vmatprep.mubr.msk.bf16.mxu0 %vm594_vm2, %v4944_v34  ;;  %v5038_v56 = vunpack.c.h.bf16 %v7258_v30 }
 0x11e   : > { %5336 = vmatmul.mubr.msk.bf16.gmra.mrb[12].mxu1 %vm594_vm2, %v4717_v19 }
 0x11f   : > { %5456 = vmatmul.mubr.msk.bf16.gmra.mrb[12].mxu0 %vm594_vm2, %v4945_v18 }
 0x1c9   : > { %v5305_v50 = vpop.f32.mrb[0].mxu1 }
 0x1ca   : > { %v1916_v59 = vpop.f32.mrb[1].mxu1 }
 0x1cb   : > { %v5306_v35 = vpop.f32.mrb[2].mxu1 }
 0x1cc   : > { %v1919_v52 = vpop.f32.mrb[3].mxu1 }
 0x1d1   : > { %v5309_v32 = vpop.f32.mrb[4].mxu1 }
 0x1d2   : > { %v1932_v40 = vpop.f32.mrb[5].mxu1 }
 0x1d3   : > { %v5310_v47 = vpop.f32.mrb[6].mxu1 }
 0x1d4   : > { %v7229_v62 = vpop.f32.mrb[7].mxu1 }
 0x1da   : > { %v5445_v25 = vpop.f32.mrb[0].mxu0 }
 0x1db   : > { %v5463_v2 = vadd.f32 %v5445_v25, %v5305_v50  ;;  %v4075_v10 = vpop.f32.mrb[1].mxu0  ;;  %v7286_v25 = vld [vmem:[%s7241_s18 + $0x28] sm:$0xff]  }
 0x1dc   : > { %v5464_v58 = vadd.f32 %v4075_v10, %v1916_v59  ;;  %v5446_v41 = vpop.f32.mrb[2].mxu0  ;;  %v7293_v10 = vld [vmem:[%s7241_s18 + $0x20] sm:$0xff]  }
 0x1dd   : > { %v4163_v23 = vadd.f32 %v5463_v2, %v7248_v61  ;;  %v5465_v36 = vadd.f32 %v5446_v41, %v5306_v35  ;;  %v4078_v42 = vpop.f32.mrb[3].mxu0 }
 0x1de   : > { %v4161_v1 = vadd.f32 %v5464_v58, %v7248_v61  ;;  %v5466_v15 = vadd.f32 %v4078_v42, %v1919_v52  ;;  %v7276_v52 = vld [vmem:[%s7235_s16 + $0x28] sm:$0xff]   ;;  %v5045_v42 = vunpack.c.l.bf16 %v7286_v25 }
 0x1df   : > { %v4211_v0 = vadd.f32 %v4997_v44, %v4163_v23  ;;  %v4164_v38 = vadd.f32 %v5465_v36, %v7248_v61  ;;  %v5034_v44 = vunpack.c.h.bf16 %v7262_v37  ;;  %v5013_v41 = vunpack.c.l.bf16 %v7276_v52 }
 0x1e0   : > { %v4209_v31 = vadd.f32 %v4993_v46, %v4161_v1  ;;  %v4162_v28 = vadd.f32 %v5466_v15, %v7248_v61 }
 0x1e1   : > { %v4259_v51 = vadd.f32 %v5029_v53, %v4211_v0  ;;  %v4212_v63 = vadd.f32 %v4998_v26, %v4164_v38  ;;  %v5041_v0 = vunpack.c.l.bf16 %v7293_v10 }
 0x1e2   : > { %v4257_v49 = vadd.f32 %v5025_v13, %v4209_v31  ;;  %v4210_v60 = vadd.f32 %v4994_v5, %v4162_v28  ;;  %v5449_v33 = vpop.f32.mrb[4].mxu0  ;;  %v5014_v13 = vunpack.c.h.bf16 %v7276_v52 }
 0x1e3   : > { %v4275_v17 = vmax.f32 %v4259_v51, 0.0  ;;  %v4260_v27 = vadd.f32 %v5030_v12, %v4212_v63  ;;  %v5467_v14 = vadd.f32 %v5449_v33, %v5309_v32  ;;  %v4091_v48 = vpop.f32.mrb[5].mxu0  ;;  %v7279_v32 = vld [vmem:[%s7235_s16 + $0x20] sm:$0xff]  }
 0x1e4   : > { %v4273_v55 = vmax.f32 %v4257_v49, 0.0  ;;  %v4258_v34 = vadd.f32 %v5026_v6, %v4210_v60  ;;  %v5468_v16 = vadd.f32 %v4091_v48, %v1932_v40  ;;  %v5450_v11 = vpop.f32.mrb[6].mxu0  ;;  %v5009_v23 = vunpack.c.l.bf16 %v7279_v32 }
 0x1e5   : > { %v4977_v39 = vpack.c.bf16 %v4275_v17, %v4275_v17  ;;  %v4276_v45 = vmax.f32 %v4260_v27, 0.0  ;;  %v4167_v9 = vadd.f32 %v5467_v14, %v7248_v61  ;;  %v5469_v4 = vadd.f32 %v5450_v11, %v5310_v47  ;;  %v4094_v19 = vpop.f32.mrb[7].mxu0  ;;  %v5061_v17 = vld [vmem:[%s7235_s16 + $0x38] sm:$0xff]   ;;  %v7309_v27 = vld [vmem:[%s7235_s16 + $0x30] sm:$0xff]  }
 0x1e6   : > { %v4975_v18 = vpack.c.bf16 %v4273_v55, %v4273_v55  ;;  %v4274_v50 = vmax.f32 %v4258_v34, 0.0  ;;  %v4165_v59 = vadd.f32 %v5468_v16, %v7248_v61  ;;  %v5470_v35 = vadd.f32 %v4094_v19, %v7229_v62  ;;  %v5068_v34 = vld [vmem:[%s7241_s18 + $0x38] sm:$0xff]  }
 0x1e7   : > { %4356 = vst.msk [vmem:[%s7270_s30 + $0x8] sm:$0xf] %vm4353_vm13, %v4977_v39  ;;  %v4978_v40 = vpack.c.bf16 %v4276_v45, %v4276_v45  ;;  %v4215_v20 = vadd.f32 %v5005_v54, %v4167_v9  ;;  %v4168_v47 = vadd.f32 %v5469_v4, %v7248_v61  ;;  %v5010_v37 = vunpack.c.h.bf16 %v7279_v32  ;;  %v5067_v45 = vld [vmem:[%s7241_s18 + $0x30] sm:$0xff]  }
 0x1e8   : > { %4354 = vst.msk [vmem:[%s7270_s30] sm:$0xf] %vm4353_vm13, %v4975_v18  ;;  %v4976_v21 = vpack.c.bf16 %v4274_v50, %v4274_v50  ;;  %v4213_v2 = vadd.f32 %v5001_v7, %v4165_v59  ;;  %v4166_v62 = vadd.f32 %v5470_v35, %v7248_v61  ;;  %v5046_v55 = vunpack.c.h.bf16 %v7286_v25 }
 0x1e9   : > { %4357 = vst.msk [vmem:[%s7270_s30 + $0xc] sm:$0xf] %vm4353_vm13, %v4978_v40  ;;  %v4263_v22 = vadd.f32 %v5037_v57, %v4215_v20  ;;  %v4216_v58 = vadd.f32 %v5006_v24, %v4168_v47  ;;  %v5333_v46 = vpop.f32.mrb[8].mxu1  ;;  %v5042_v39 = vunpack.c.h.bf16 %v7293_v10  ;;  %v5021_v18 = vunpack.c.l.bf16 %v5061_v17 }
 0x1ea   : > { %4355 = vst.msk [vmem:[%s7270_s30 + $0x4] sm:$0xf] %vm4353_vm13, %v4976_v21  ;;  %v4261_v53 = vadd.f32 %v5033_v8, %v4213_v2  ;;  %v4214_v36 = vadd.f32 %v5002_v43, %v4166_v62  ;;  %v5453_v26 = vpop.f32.mrb[8].mxu0  ;;  %v2342_v1 = vpop.f32.mrb[9].mxu1  ;;  %v5017_v50 = vunpack.c.l.bf16 %v7309_v27  ;;  %v5053_v32 = vunpack.c.l.bf16 %v5068_v34 }
 0x1eb   : > { %v4279_v15 = vmax.f32 %v4263_v22, 0.0  ;;  %v4264_v5 = vadd.f32 %v5038_v56, %v4216_v58  ;;  %v5471_v3 = vadd.f32 %v5453_v26, %v5333_v46  ;;  %v4107_v29 = vpop.f32.mrb[9].mxu0  ;;  %v5334_v38 = vpop.f32.mrb[10].mxu1  ;;  %v5022_v20 = vunpack.c.h.bf16 %v5061_v17 }
 0x1ec   : > { %v4277_v12 = vmax.f32 %v4261_v53, 0.0  ;;  %v4262_v30 = vadd.f32 %v5034_v44, %v4214_v36  ;;  %v5472_v31 = vadd.f32 %v4107_v29, %v2342_v1  ;;  %v5454_v28 = vpop.f32.mrb[10].mxu0  ;;  %v2345_v6 = vpop.f32.mrb[11].mxu1  ;;  %v5049_v2 = vunpack.c.l.bf16 %v5067_v45 }
 0x1ed   : > { %v4981_v51 = vpack.c.bf16 %v4279_v15, %v4279_v15  ;;  %v4280_v63 = vmax.f32 %v4264_v5, 0.0  ;;  %v4171_v54 = vadd.f32 %v5471_v3, %v7248_v61  ;;  %v5473_v7 = vadd.f32 %v5454_v28, %v5334_v38  ;;  %v4110_v49 = vpop.f32.mrb[11].mxu0 }
 0x1ee   : > { %v4979_v60 = vpack.c.bf16 %v4277_v12, %v4277_v12  ;;  %v4278_v33 = vmax.f32 %v4262_v30, 0.0  ;;  %v4169_v57 = vadd.f32 %v5472_v31, %v7248_v61  ;;  %v5474_v24 = vadd.f32 %v4110_v49, %v2345_v6 }
 0x1ef   : > { %4360 = vst.msk [vmem:[%s7270_s30 + $0x18] sm:$0xf] %vm4353_vm13, %v4981_v51  ;;  %v4982_v14 = vpack.c.bf16 %v4280_v63, %v4280_v63  ;;  %v4219_v48 = vadd.f32 %v5013_v41, %v4171_v54  ;;  %v4172_v8 = vadd.f32 %v5473_v7, %v7248_v61  ;;  %v5018_v41 = vunpack.c.h.bf16 %v7309_v27 }
 0x1f0   : > { %4358 = vst.msk [vmem:[%s7270_s30 + $0x10] sm:$0xf] %vm4353_vm13, %v4979_v60  ;;  %v4980_v16 = vpack.c.bf16 %v4278_v33, %v4278_v33  ;;  %v4217_v11 = vadd.f32 %v5009_v23, %v4169_v57  ;;  %v4170_v43 = vadd.f32 %v5474_v24, %v7248_v61  ;;  %v5054_v38 = vunpack.c.h.bf16 %v5068_v34 }
 0x1f1   : > { %4361 = vst.msk [vmem:[%s7270_s30 + $0x1c] sm:$0xf] %vm4353_vm13, %v4982_v14  ;;  %v4267_v9 = vadd.f32 %v5045_v42, %v4219_v48  ;;  %v4220_v4 = vadd.f32 %v5014_v13, %v4172_v8  ;;  %v5337_v19 = vpop.f32.mrb[12].mxu1  ;;  %v5050_v28 = vunpack.c.h.bf16 %v5067_v45 }
 0x1f2   : > { %4359 = vst.msk [vmem:[%s7270_s30 + $0x14] sm:$0xf] %vm4353_vm13, %v4980_v16  ;;  %v4265_v59 = vadd.f32 %v5041_v0, %v4217_v11  ;;  %v4218_v35 = vadd.f32 %v5010_v37, %v4170_v43  ;;  %v5457_v52 = vpop.f32.mrb[12].mxu0  ;;  %v2358_v40 = vpop.f32.mrb[13].mxu1 }
 0x1f3   : > { %v4283_v47 = vmax.f32 %v4267_v9, 0.0  ;;  %v4268_v56 = vadd.f32 %v5046_v55, %v4220_v4  ;;  %v5475_v25 = vadd.f32 %v5457_v52, %v5337_v19  ;;  %v4123_v21 = vpop.f32.mrb[13].mxu0  ;;  %v5338_v62 = vpop.f32.mrb[14].mxu1 }
 0x1f4   : > { %v4281_v44 = vmax.f32 %v4265_v59, 0.0  ;;  %v4266_v10 = vadd.f32 %v5042_v39, %v4218_v35  ;;  %v5476_v22 = vadd.f32 %v4123_v21, %v2358_v40  ;;  %v5458_v58 = vpop.f32.mrb[14].mxu0  ;;  %v2361_v46 = vpop.f32.mrb[15].mxu1 }
 0x1f5   : > { %v4985_v23 = vpack.c.bf16 %v4283_v47, %v4283_v47  ;;  %v4284_v53 = vmax.f32 %v4268_v56, 0.0  ;;  %v4175_v36 = vadd.f32 %v5475_v25, %v7248_v61  ;;  %v5477_v26 = vadd.f32 %v5458_v58, %v5338_v62  ;;  %v4126_v42 = vpop.f32.mrb[15].mxu0 }
 0x1f6   : > { %v4983_v1 = vpack.c.bf16 %v4281_v44, %v4281_v44  ;;  %v4282_v13 = vmax.f32 %v4266_v10, 0.0  ;;  %v4173_v15 = vadd.f32 %v5476_v22, %v7248_v61  ;;  %v5478_v5 = vadd.f32 %v4126_v42, %v2361_v46 }
 0x1f7   : > { %4364 = vst.msk [vmem:[%s7270_s30 + $0x28] sm:$0xf] %vm4353_vm13, %v4985_v23  ;;  %v4986_v3 = vpack.c.bf16 %v4284_v53, %v4284_v53  ;;  %v4223_v29 = vadd.f32 %v5021_v18, %v4175_v36  ;;  %v4176_v0 = vadd.f32 %v5477_v26, %v7248_v61 }
 0x1f8   : > { %4362 = vst.msk [vmem:[%s7270_s30 + $0x20] sm:$0xf] %vm4353_vm13, %v4983_v1  ;;  %v4984_v12 = vpack.c.bf16 %v4282_v13, %v4282_v13  ;;  %v4221_v30 = vadd.f32 %v5017_v50, %v4173_v15  ;;  %v4174_v31 = vadd.f32 %v5478_v5, %v7248_v61 }
 0x1f9   : > { %4365 = vst.msk [vmem:[%s7270_s30 + $0x2c] sm:$0xf] %vm4353_vm13, %v4986_v3  ;;  %v4271_v6 = vadd.f32 %v5053_v32, %v4223_v29  ;;  %v4224_v37 = vadd.f32 %v5022_v20, %v4176_v0 }
 0x1fa   : > { %4363 = vst.msk [vmem:[%s7270_s30 + $0x24] sm:$0xf] %vm4353_vm13, %v4984_v12  ;;  %v4269_v51 = vadd.f32 %v5049_v2, %v4221_v30  ;;  %v4222_v63 = vadd.f32 %v5018_v41, %v4174_v31 }
 0x1fb   : > { %v4287_v54 = vmax.f32 %v4271_v6, 0.0  ;;  %v4272_v7 = vadd.f32 %v5054_v38, %v4224_v37 }
 0x1fc   : > { %v4285_v49 = vmax.f32 %v4269_v51, 0.0  ;;  %v4270_v60 = vadd.f32 %v5050_v28, %v4222_v63 }
 0x1fd   : > { %v4989_v33 = vpack.c.bf16 %v4287_v54, %v4287_v54  ;;  %v4288_v57 = vmax.f32 %v4272_v7, 0.0 }
 0x1fe   : > { %v4987_v61 = vpack.c.bf16 %v4285_v49, %v4285_v49  ;;  %v4286_v24 = vmax.f32 %v4270_v60, 0.0 }
 0x1ff   : > { %4368 = vst.msk [vmem:[%s7270_s30 + $0x38] sm:$0xf] %vm4353_vm13, %v4989_v33  ;;  %v4990_v17 = vpack.c.bf16 %v4288_v57, %v4288_v57 }
 0x200   : > { %4366 = vst.msk [vmem:[%s7270_s30 + $0x30] sm:$0xf] %vm4353_vm13, %v4987_v61  ;;  %v4988_v27 = vpack.c.bf16 %v4286_v24, %v4286_v24 }
 0x201   : > { %4369 = vst.msk [vmem:[%s7270_s30 + $0x3c] sm:$0xf] %vm4353_vm13, %v4990_v17 }
 0x202   : > { %4367 = vst.msk [vmem:[%s7270_s30 + $0x34] sm:$0xf] %vm4353_vm13, %v4988_v27 }
 0x203 PF: > { %s15_s22 = sadd.s32 1, %s5802_s22   ;;  %s7434_s18 = smov %s5794_s20 }
 0x204   : > { %p12_p7 = scmp.ge.s32.totalorder %s15_s22, 6   ;;  %s7435_s19 = smov %s5798_s21 }
 0x205   : > { %s7436_s20 = smov %s7439_s23  ;;  %s7437_s21 = smov %s7443_s24 }
 0x206   :  { %14 = sbr.rel (!%p12_p7) target bundleno = 3 (0x3), region = 90 }

// kernel: coding_hh_lossless_forward.9
= control target key start
LH: loop header
LB: loop body
LE: loop exit
PB: predicated region body
PF: predicated region fallthrough
CT: control target
= control target key end

     0   :  { %s5480_s12 = smov 0   ;;  %s5482_s13 = smov 0   ;;  %s6946_s0 = inlined_call_operand.vmem [shape: bf16[2,2,12,20,32], index: 0, kind: input, shape index: {}]   ;;  %s6947_s1 = inlined_call_operand.vmem [shape: bf16[13,32,32], index: 1, kind: input, shape index: {}]   ;;  %s6948_s2 = inlined_call_operand.vmem [shape: f32[1,32], index: 2, kind: input, shape index: {}]   ;;  %s6949_s3 = inlined_call_operand.vmem [shape: bf16[2,2,8,16,32], index: 3, kind: output, shape index: {}]  }
   0x1   :  { %s5484_s14 = smov 0   ;;  %s5486_s15 = smov 0  }
   0x2   :  { %s5488_s16 = smov 0  }
   0x3 LB: > { %s22_s17 = sadd.s32 1, %s5450_s14  ;;  %s25_s18 = sadd.s32 1, %s5454_s15  ;;  %s5458_s16 = sphi %s5488_s16, %s13_s16   ;;  %s5454_s15 = sphi %s5486_s15, %s7019_s15   ;;  %s5450_s14 = sphi %s5484_s14, %s7018_s14   ;;  %s5446_s13 = sphi %s5482_s13, %s7017_s13   ;;  %s5442_s12 = sphi %s5480_s12, %s7016_s12  }
   0x4   : > { %p23_p0 = scmp.ge.s32.totalorder %s22_s17, 2  ;;  %p4251_p1 = scmp.ge.s32.totalorder %s5458_s16, 1 }
   0x5   : > { %p157_p2 = scmp.lt.s32.totalorder %s5458_s16, 5 }
   0x6   : > { %s7021_s17 = smov (%p23_p0, %s22_s17), 0  ;;  %s7023_s18 = smov (!%p23_p0, %s25_s18), %s5454_s15 }
   0x7   : > { %p158_p3 = pnand %p4251_p1, %p157_p2  ;;  %p27_p4 = scmp.ge.s32.totalorder %s7023_s18, 2 }
   0x9   : > { %s7025_s18 = smov (%p27_p4, %s7023_s18), 0  ;;  %161 = sbr.rel (%p158_p3) target bundleno = 511 (0x1ff), region = 32 }
  0x10   : > { %v5353_v0 = vld [vmem:[%s6947_s1 + $0x10] sm:$0xff]   ;;  %p189_p5 = scmp.lt.s32.totalorder %s5446_s13, 1  ;;  %v5354_v1 = vld [vmem:[%s6947_s1 + $0x60] sm:$0xff]   ;;  %p191_p6 = scmp.lt.s32.totalorder %s5442_s12, 1  ;;  %v5355_v2 = vld [vmem:[%s6947_s1 + $0x18] sm:$0xff]   ;;  %vm472_vm2 = vcmask 261120  }
  0x11   : > { %4855 = vmatprep.subr.bf16.mxu1 %v5353_v0  ;;  %4975 = vmatprep.subr.bf16.mxu0 %v5354_v1  ;;  %v5356_v3 = vld [vmem:[%s6947_s1 + $0x68] sm:$0xff]   ;;  %v5531_v4 = vld [vmem:[%s6947_s1] sm:$0xff]   ;;  %v5536_v5 = vld [vmem:[%s6947_s1 + $0x70] sm:$0xff]   ;;  %vm236_vm0 = vsmask.f32 3328  ;;  %v6974_v30 = vmov 0 }
  0x12   : > { %s7027_s13 = smov (!%p189_p5, %s5446_s13), 1  ;;  %4856 = vmatpush3.bf16.msra.mxu1 %v5353_v0  ;;  %s7029_s12 = smov (!%p191_p6, %s5442_s12), 1  ;;  %4976 = vmatpush3.bf16.msra.mxu0 %v5354_v1  ;;  %vm237_vm1 = vsmask.f32 7440  ;;  %vm791_vm4 = vcmask 1042432   ;;  %vm792_vm5 = vcmask 1046532  }
  0x13   : > { %4857 = vmatprep.subr.bf16.mxu1 %v5355_v2  ;;  %s5312_s27 = smul.u32 72, %s7027_s13  ;;  %4977 = vmatprep.subr.bf16.mxu0 %v5356_v3  ;;  %vm5574_vm3 = vmor %vm236_vm0, %vm237_vm1  ;;  %vm1036_vm7 = vsmask.f32 2304  ;;  %vm1037_vm8 = vsmask.f32 6416  ;;  %vm1425_vm10 = vcmask 1041408  }
  0x14   : > { %s5311_s28 = smul.u32 36, %s7029_s12  ;;  %v6975_v30 = vsel %vm5574_vm3, 4294967295, %v6974_v30  ;;  %vm5766_vm6 = vmor %vm791_vm4, %vm792_vm5  ;;  %vm1426_vm11 = vcmask 1045508   ;;  %s4254_s24 = sshll.u32 %s7027_s13, 5  ;;  %vm4135_vm13 = vcmask 257024  }
  0x15   : > { %6976 = vst [vmem:[#allocation4_spill] sm:$0xff] %v6975_v30  ;;  %vm5986_vm9 = vmor %vm1036_vm7, %vm1037_vm8 }
  0x16   : > { %4858 = vmatpush3.bf16.msra.mxu1 %v5355_v2  ;;  %s195_s4 = sadd.s32 %s5312_s27, %s5311_s28  ;;  %4978 = vmatpush3.bf16.msra.mxu0 %v5356_v3  ;;  %vm6220_vm12 = vmor %vm1425_vm10, %vm1426_vm11 }
  0x17   : > { %s4252_s7 = sshll.u32 %s195_s4, 2  ;;  %4875 = vmatprep.subr.bf16.mxu1 %v5531_v4  ;;  %4995 = vmatprep.subr.bf16.mxu0 %v5536_v5 }
  0x18   : > { %s5542_s10 = scalar_lea.vmem %s6946_s0, %s4252_s7 }
  0x19   : > { %v5546_v6 = vld [vmem:[%s5542_s10] sm:$0xf]  ;;  %v5549_v7 = vld [vmem:[%s5542_s10 + $0x4] sm:$0xf]  ;;  %v5552_v8 = vld [vmem:[%s5542_s10 + $0x8] sm:$0x1] }
  0x1a   : > { %v240_v9 = vshrl.u32 %v5546_v6, 16  ;;  %v243_v10 = vshll.u32 %v5546_v6, 16  ;;  %v249_v11 = vshll.u32 %v5549_v7, 16  ;;  %v253_v12 = vshrl.u32 %v5549_v7, 16  ;;  %v4416_v13 = vld [vmem:[%s5542_s10 + $0xc] sm:$0xf] }
  0x1b   : > { %v259_v14 = vshll.u32 %v5552_v8, 16  ;;  %v5562_v16 = vld [vmem:[%s5542_s10 + $0x10] sm:$0xf]  ;;  %v5565_v21 = vld [vmem:[%s5542_s10 + $0x14] sm:$0x1]  ;;  %v1898_v25 = vshrl.u32 %v4416_v13, 16 }
  0x1c   : > { %v242_v17 = vrot.slane %v240_v9, 4  ;;  %v245_v18 = vrot.slane %v243_v10, 5  ;;  %v251_v19 = vrot.slane %v249_v11, 5  ;;  %v255_v20 = vrot.slane %v253_v12, 4  ;;  %v5582_v35 = vld [vmem:[%s5542_s10 + $0xc] sm:$0xf] }
  0x1d   : > { %v261_v22 = vrot.slane %v259_v14, 5  ;;  %v5567_v23 = vrot.slane %v253_v12, 5  ;;  %v5569_v24 = vrot.slane %v249_v11, 6  ;;  %v1901_v28 = vshll.u32 %v4416_v13, 16  ;;  %v5585_v40 = vld [vmem:[%s5542_s10 + $0x10] sm:$0xf] }
  0x1e   : > { %v246_v26 = vor.u32 %v245_v18, %v242_v17  ;;  %v256_v27 = vor.u32 %v255_v20, %v251_v19  ;;  %v1907_v29 = vshll.u32 %v5562_v16, 16  ;;  %v1900_v31 = vrot.slane %v1898_v25, 4  ;;  %v5592_v45 = vld [vmem:[%s5542_s10 + $0x14] sm:$0x1]  ;;  %v4419_v58 = vld [vmem:[%s5542_s10 + $0x18] sm:$0xf] }
  0x1f   : > { %6972 = vst [vmem:[#allocation2_spill] sm:$0xff] %v5567_v23  ;;  %6973 = vst [vmem:[#allocation3_spill] sm:$0xff] %v5569_v24  ;;  %v1911_v32 = vshrl.u32 %v5562_v16, 16  ;;  %v1917_v33 = vshll.u32 %v5565_v21, 16  ;;  %v2304_v34 = vrot.slane %v5565_v21, 5  ;;  %v1903_v38 = vrot.slane %v1901_v28, 5 }
  0x20   : > { %v247_v36 = vrot.slane %v246_v26, 4  ;;  %v257_v37 = vrot.slane %v256_v27, 4  ;;  %v1909_v39 = vrot.slane %v1907_v29, 5  ;;  %v5589_v44 = vrot.slane %v1907_v29, 6  ;;  %v5607_v63 = vld [vmem:[%s5542_s10 + $0x1c] sm:$0xf] }
  0x21   : > { %v1913_v41 = vrot.slane %v1911_v32, 4  ;;  %v1919_v42 = vrot.slane %v1917_v33, 5  ;;  %v5587_v43 = vrot.slane %v1911_v32, 5  ;;  %v1904_v48 = vor.u32 %v1903_v38, %v1900_v31  ;;  %v5614_v12 = vld [vmem:[%s5542_s10 + $0x20] sm:$0x1] }
  0x22   : > { %v252_v46 = vsel %vm5574_vm3, %v247_v36, %v251_v19  ;;  %v262_v47 = vsel %vm5574_vm3, %v257_v37, %v261_v22  ;;  %v264_v49 = vshrl.u32 %v5582_v35, 16  ;;  %v267_v52 = vshll.u32 %v5582_v35, 16  ;;  %v5623_v32 = vld [vmem:[%s5542_s10 + $0x18] sm:$0xf]  ;;  %v5762_v36 = vld [vmem:[%s5542_s10 + $0x40] sm:$0xf] }
  0x23   : > { %v4260_v50 = vcombine.low %v252_v46, %v262_v47  ;;  %v1914_v51 = vor.u32 %v1913_v41, %v1909_v39  ;;  %v273_v53 = vshll.u32 %v5585_v40, 16  ;;  %v1905_v54 = vrot.slane %v1904_v48, 4  ;;  %v5635_v48 = vld [vmem:[%s5542_s10 + $0x20] sm:$0x1]  ;;  %v5785_v62 = vld [vmem:[%s5542_s10 + $0x18] sm:$0xe] }
  0x24   : > { %v266_v55 = vrot.slane %v264_v49, 4  ;;  %v277_v56 = vshrl.u32 %v5585_v40, 16  ;;  %v283_v57 = vshll.u32 %v5592_v45, 16  ;;  %v269_v60 = vrot.slane %v267_v52, 5  ;;  %v5921_v24 = vld [vmem:[%s5542_s10 + $0x64] sm:$0xf] }
  0x25   : > { %4859 = vmatprep.mubr.msk.bf16.mxu1 %vm472_vm2, %v4260_v50  ;;  %v1915_v59 = vrot.slane %v1914_v51, 4  ;;  %v275_v61 = vrot.slane %v273_v53, 5  ;;  %v1910_v0 = vsel %vm5574_vm3, %v1905_v54, %v1909_v39  ;;  %v1072_v11 = vrot.slane %v273_v53, 6  ;;  %v5630_v39 = vld [vmem:[%s5542_s10 + $0x1c] sm:$0xf]  ;;  %v5360_v53 = vld [vmem:[%s6947_s1 + $0x8] sm:$0xff]  }
  0x26   : > { %v279_v1 = vrot.slane %v277_v56, 4  ;;  %v285_v2 = vrot.slane %v283_v57, 5  ;;  %v1071_v3 = vrot.slane %v277_v56, 5  ;;  %v270_v10 = vor.u32 %v269_v60, %v266_v55 }
  0x27   : > { %v1920_v9 = vsel %vm5574_vm3, %v1915_v59, %v1919_v42  ;;  %v1922_v13 = vshrl.u32 %v4419_v58, 16  ;;  %v1925_v18 = vshll.u32 %v4419_v58, 16  ;;  %v1931_v19 = vshll.u32 %v5607_v63, 16  ;;  %v4422_v58 = vld [vmem:[%s5542_s10 + $0x24] sm:$0xf] }
  0x28   : > { %v4444_v14 = vcombine.low %v1910_v0, %v1920_v9  ;;  %v280_v17 = vor.u32 %v279_v1, %v275_v61  ;;  %v271_v20 = vrot.slane %v270_v10, 4  ;;  %v5617_v22 = vor.u32 %v1072_v11, %v1071_v3  ;;  %v5650_v1 = vld [vmem:[%s5542_s10 + $0x28] sm:$0xf]  ;;  %v5660_v11 = vld [vmem:[%s5542_s10 + $0x2c] sm:$0x1] }
  0x29   : > { %v1924_v25 = vrot.slane %v1922_v13, 4  ;;  %v1935_v26 = vshrl.u32 %v5607_v63, 16  ;;  %v1927_v28 = vrot.slane %v1925_v18, 5  ;;  %v1933_v29 = vrot.slane %v1931_v19, 5  ;;  %v5666_v18 = vld [vmem:[%s5542_s10 + $0x24] sm:$0xf] }
  0x2a   : > { %6977 = vst [vmem:[#allocation5_spill] sm:$0xff] %v5617_v22  ;;  %4979 = vmatprep.mubr.msk.bf16.mxu0 %vm472_vm2, %v4444_v14  ;;  %v281_v27 = vrot.slane %v280_v17, 4  ;;  %v1941_v31 = vshll.u32 %v5614_v12, 16  ;;  %v276_v33 = vsel %vm5574_vm3, %v271_v20, %v275_v61  ;;  %v2311_v38 = vrot.slane %v5614_v12, 5  ;;  %v5892_v14 = vld [vmem:[%s5542_s10 + $0x4c] sm:$0xf] }
  0x2b   : > { %v1937_v37 = vrot.slane %v1935_v26, 4  ;;  %v1928_v42 = vor.u32 %v1927_v28, %v1924_v25  ;;  %v2573_v47 = vrot.slane %v1935_v26, 5  ;;  %v2574_v51 = vrot.slane %v1931_v19, 6  ;;  %v5671_v19 = vld [vmem:[%s6947_s1 + $0x20] sm:$0xff]   ;;  %v5359_v28 = vld [vmem:[%s6947_s1 + $0x78] sm:$0xff]  }
  0x2c   : > { %v286_v41 = vsel %vm5574_vm3, %v281_v27, %v285_v2  ;;  %v1943_v46 = vrot.slane %v1941_v31, 5  ;;  %v288_v52 = vshrl.u32 %v5623_v32, 16  ;;  %v291_v55 = vshll.u32 %v5623_v32, 16 }
  0x2d   : > { %v4261_v49 = vcombine.low %v276_v33, %v286_v41  ;;  %v1938_v50 = vor.u32 %v1937_v37, %v1933_v29  ;;  %v1929_v54 = vrot.slane %v1928_v42, 4  ;;  %v6952_v56 = vshll.u32 %v5630_v39, 16  ;;  %v5680_v41 = vld [vmem:[%s5542_s10 + $0x28] sm:$0xf] }
  0x2e   : > { %v6955_v57 = vshrl.u32 %v5630_v39, 16  ;;  %v5646_v60 = vor.u32 %v2574_v51, %v2573_v47  ;;  %v290_v61 = vrot.slane %v288_v52, 4  ;;  %v307_v0 = vshll.u32 %v5635_v48, 16 }
  0x2f   : > { %4860 = vmatmul.mubr.msk.bf16.vlgmr.msra.gmra.mrb[0].mxu1 %vm472_vm2, %v4261_v49  ;;  %v1939_v59 = vrot.slane %v1938_v50, 4  ;;  %v1934_v2 = vsel %vm5574_vm3, %v1929_v54, %v1933_v29  ;;  %v293_v3 = vrot.slane %v291_v55, 5  ;;  %v299_v9 = vrot.slane %v6952_v56, 5  ;;  %v5684_v49 = vld [vmem:[%s5542_s10 + $0x2c] sm:$0x1] }
  0x30   : > { %4876 = vmatpush3.bf16.msra.mxu1 %v5531_v4  ;;  %v303_v10 = vrot.slane %v6955_v57, 4  ;;  %v309_v17 = vrot.slane %v307_v0, 5  ;;  %v1946_v4 = vshrl.u32 %v4422_v58, 16  ;;  %v1949_v27 = vshll.u32 %v4422_v58, 16  ;;  %v4425_v58 = vld [vmem:[%s5542_s10 + $0x30] sm:$0xf] }
  0x31   : > { %v1944_v13 = vsel %vm5574_vm3, %v1939_v59, %v1943_v46  ;;  %4877 = vmatprep.subr.bf16.mxu1 %v5360_v53  ;;  %v294_v25 = vor.u32 %v293_v3, %v290_v61  ;;  %v6964_v31 = vshll.u32 %v5650_v1, 16  ;;  %v6965_v33 = vshrl.u32 %v5650_v1, 16  ;;  %v5702_v0 = vld [vmem:[%s6947_s1 + $0x80] sm:$0xff]  }
  0x32   : > { %v4445_v20 = vcombine.low %v1934_v2, %v1944_v13  ;;  %v304_v26 = vor.u32 %v303_v10, %v299_v9  ;;  %v1948_v29 = vrot.slane %v1946_v4, 4  ;;  %v1965_v37 = vshll.u32 %v5660_v11, 16  ;;  %v5706_v4 = vld [vmem:[%s5542_s10 + $0x34] sm:$0xf] }
  0x33   : > { %v295_v42 = vrot.slane %v294_v25, 4  ;;  %v1951_v47 = vrot.slane %v1949_v27, 5  ;;  %v312_v50 = vshrl.u32 %v5666_v18, 16  ;;  %v1957_v51 = vrot.slane %v6964_v31, 5  ;;  %v5711_v25 = vld [vmem:[%s5542_s10 + $0x38] sm:$0x1] }
  0x34   : > { %4980 = vmatmul.mubr.msk.bf16.vlgmr.msra.gmra.mrb[0].mxu0 %vm472_vm2, %v4445_v20  ;;  %v305_v46 = vrot.slane %v304_v26, 4  ;;  %4878 = vmatpush3.bf16.msra.mxu1 %v5360_v53  ;;  %v1961_v52 = vrot.slane %v6965_v33, 4  ;;  %v1967_v54 = vrot.slane %v1965_v37, 5  ;;  %v315_v55 = vshll.u32 %v5666_v18, 16  ;;  %v4436_v33 = vld [vmem:[%s5542_s10 + $0x5c] sm:$0x1] }
  0x35   : > { %4996 = vmatpush3.bf16.msra.mxu0 %v5536_v5  ;;  %4895 = vmatprep.subr.bf16.mxu1 %v5671_v19  ;;  %v300_v59 = vsel %vm5574_vm3, %v295_v42, %v299_v9  ;;  %v1952_v53 = vor.u32 %v1951_v47, %v1948_v29  ;;  %v314_v61 = vrot.slane %v312_v50, 4  ;;  %v6950_v13 = vshll.u32 %v5680_v41, 16 }
  0x36   : > { %v310_v5 = vsel %vm5574_vm3, %v305_v46, %v309_v17  ;;  %4997 = vmatprep.subr.bf16.mxu0 %v5359_v28  ;;  %v1962_v3 = vor.u32 %v1961_v52, %v1957_v51  ;;  %v317_v10 = vrot.slane %v315_v55, 5  ;;  %v6951_v17 = vshrl.u32 %v5680_v41, 16  ;;  %v5717_v46 = vld [vmem:[%s5542_s10 + $0x30] sm:$0xf] }
  0x37   : > { %v4262_v2 = vcombine.low %v300_v59, %v310_v5  ;;  %v1953_v9 = vrot.slane %v1952_v53, 4  ;;  %v331_v20 = vshll.u32 %v5684_v49, 16  ;;  %v1970_v26 = vshrl.u32 %v4425_v58, 16 }
  0x38   : > { %v1963_v27 = vrot.slane %v1962_v3, 4  ;;  %v318_v29 = vor.u32 %v317_v10, %v314_v61  ;;  %v323_v37 = vrot.slane %v6950_v13, 5  ;;  %v1973_v42 = vshll.u32 %v4425_v58, 16  ;;  %v5730_v3 = vld [vmem:[%s5542_s10 + $0x34] sm:$0xf] }
  0x39   : > { %4863 = vmatprep.mubr.msk.bf16.mxu1 %vm472_vm2, %v4262_v2  ;;  %4998 = vmatpush3.bf16.msra.mxu0 %v5359_v28  ;;  %v1958_v47 = vsel %vm5574_vm3, %v1953_v9, %v1957_v51  ;;  %v327_v50 = vrot.slane %v6951_v17, 4  ;;  %v333_v52 = vrot.slane %v331_v20, 5  ;;  %v1972_v55 = vrot.slane %v1970_v26, 4  ;;  %v5737_v20 = vld [vmem:[%s5542_s10 + $0x38] sm:$0x1] }
  0x3a   : > { %5015 = vmatprep.subr.bf16.mxu0 %v5702_v0  ;;  %v1968_v59 = vsel %vm5574_vm3, %v1963_v27, %v1967_v54  ;;  %v319_v5 = vrot.slane %v318_v29, 4  ;;  %v1975_v58 = vrot.slane %v1973_v42, 5  ;;  %v6956_v28 = vshll.u32 %v5706_v4, 16 }
  0x3b   : > { %v4446_v53 = vcombine.low %v1958_v47, %v1968_v59  ;;  %v328_v61 = vor.u32 %v327_v50, %v323_v37  ;;  %v6961_v2 = vshrl.u32 %v5706_v4, 16  ;;  %v1989_v51 = vshll.u32 %v5711_v25, 16 }
  0x3c   : > { %v324_v10 = vsel %vm5574_vm3, %v319_v5, %v323_v37  ;;  %v1976_v9 = vor.u32 %v1975_v58, %v1972_v55  ;;  %v1981_v54 = vrot.slane %v6956_v28, 5  ;;  %v336_v26 = vshrl.u32 %v5717_v46, 16  ;;  %v5747_v5 = vld [vmem:[%s5542_s10 + $0xc] sm:$0xe] }
  0x3d   : > { %4983 = vmatprep.mubr.msk.bf16.mxu0 %vm472_vm2, %v4446_v53  ;;  %v329_v27 = vrot.slane %v328_v61, 4  ;;  %v1985_v29 = vrot.slane %v6961_v2, 4  ;;  %v1991_v42 = vrot.slane %v1989_v51, 5  ;;  %v339_v47 = vshll.u32 %v5717_v46, 16  ;;  %v5753_v51 = vld [vmem:[%s5542_s10 + $0x3c] sm:$0xf] }
  0x3e   : > { %v1977_v37 = vrot.slane %v1976_v9, 4  ;;  %v338_v50 = vrot.slane %v336_v26, 4  ;;  %v6953_v55 = vshll.u32 %v5730_v3, 16  ;;  %v6954_v59 = vshrl.u32 %v5730_v3, 16  ;;  %v5853_v2 = vld [vmem:[%s5542_s10 + $0x30] sm:$0xe] }
  0x3f   : > { %v334_v58 = vsel %vm5574_vm3, %v329_v27, %v333_v52  ;;  %v1986_v53 = vor.u32 %v1985_v29, %v1981_v54  ;;  %v341_v61 = vrot.slane %v339_v47, 5  ;;  %v355_v13 = vshll.u32 %v5737_v20, 16  ;;  %v6876_v47 = vld [vmem:[%s6948_s2] ss:$0 sm:$0xff] }
  0x40   : > { %v4263_v17 = vcombine.low %v324_v10, %v334_v58  ;;  %v1982_v9 = vsel %vm5574_vm3, %v1977_v37, %v1981_v54  ;;  %v347_v26 = vrot.slane %v6953_v55, 5  ;;  %v351_v56 = vrot.slane %v6954_v59, 4  ;;  %v5774_v58 = vld [vmem:[%s5542_s10 + $0x44] sm:$0x1] }
  0x41   : > { %v1987_v52 = vrot.slane %v1986_v53, 4  ;;  %v342_v27 = vor.u32 %v341_v61, %v338_v50  ;;  %v357_v29 = vrot.slane %v355_v13, 5  ;;  %v4470_v10 = vrot.slane %v5747_v5, 9 }
  0x42   : > { %4864 = vmatmul.mubr.msk.bf16.gmra.mrb[4].mxu1 %vm472_vm2, %v4263_v17  ;;  %v352_v54 = vor.u32 %v351_v56, %v347_v26  ;;  %v2301_v37 = vrot.slane %v5562_v16, 5  ;;  %v360_v50 = vshrl.u32 %v5753_v51, 16  ;;  %v363_v13 = vshll.u32 %v5753_v51, 16 }
  0x43   : > { %v1992_v53 = vsel %vm5574_vm3, %v1987_v52, %v1991_v42  ;;  %v343_v61 = vrot.slane %v342_v27, 4  ;;  %v6957_v55 = vshll.u32 %v5762_v36, 16  ;;  %v6960_v59 = vshrl.u32 %v5762_v36, 16  ;;  %v5792_v27 = vld [vmem:[%s5542_s10 + $0x48] sm:$0xf] }
  0x44   : > { %v4447_v17 = vcombine.low %v1982_v9, %v1992_v53  ;;  %v353_v56 = vrot.slane %v352_v54, 4  ;;  %v2302_v16 = vsel %vm5766_vm6, %v4470_v10, %v2301_v37  ;;  %v2303_v57 = vrot.slane %v2301_v37, 4  ;;  %v5805_v37 = vld [vmem:[%s5542_s10 + $0x4c] sm:$0xf] }
  0x45   : > { %v348_v15 = vsel %vm5574_vm3, %v343_v61, %v347_v26  ;;  %v362_v28 = vrot.slane %v360_v50, 4  ;;  %v365_v42 = vrot.slane %v363_v13, 5  ;;  %v371_v52 = vrot.slane %v6957_v55, 5  ;;  %v5830_v55 = vld [vmem:[%s5542_s10 + $0x54] sm:$0xf] }
  0x46   : > { %4984 = vmatmul.mubr.msk.bf16.gmra.mrb[4].mxu0 %vm472_vm2, %v4447_v17  ;;  %v358_v9 = vsel %vm5574_vm3, %v353_v56, %v357_v29  ;;  %v2305_v10 = vsel %vm5766_vm6, %v2303_v57, %v2304_v34  ;;  %v375_v26 = vrot.slane %v6960_v59, 4  ;;  %v379_v54 = vshll.u32 %v5774_v58, 16  ;;  %v5809_v17 = vld [vmem:[%s5542_s10 + $0x50] sm:$0x1]  ;;  %v5814_v57 = vld [vmem:[%s5542_s10 + $0x24] sm:$0xe] }
  0x47   : > { %v4264_v50 = vcombine.low %v348_v15, %v358_v9  ;;  %v4482_v13 = vcombine.low %v2302_v16, %v2305_v10  ;;  %v366_v53 = vor.u32 %v365_v42, %v362_v28  ;;  %v4471_v61 = vrot.slane %v5785_v62, 9  ;;  %6980 = vst [vmem:[#allocation6_spill] sm:$0xff] %v5809_v17  ;;  %v5844_v59 = vld [vmem:[%s5542_s10 + $0x5c] sm:$0x1] }
  0x48   : > { %v376_v29 = vor.u32 %v375_v26, %v371_v52  ;;  %v381_v56 = vrot.slane %v379_v54, 5  ;;  %v2308_v21 = vrot.slane %v5607_v63, 5  ;;  %v384_v34 = vshrl.u32 %v5792_v27, 16  ;;  %6981 = vst [vmem:[#allocation7_spill] sm:$0xff] %v5844_v59 }
  0x49   : > { %4867 = vmatprep.mubr.msk.bf16.mxu1 %vm472_vm2, %v4264_v50  ;;  %4999 = vmatprep.mubr.msk.bf16.mxu0 %vm472_vm2, %v4482_v13  ;;  %v367_v15 = vrot.slane %v366_v53, 4  ;;  %v387_v28 = vshll.u32 %v5792_v27, 16  ;;  %v6958_v16 = vshll.u32 %v5805_v37, 16  ;;  %v6959_v42 = vshrl.u32 %v5805_v37, 16 }
  0x4a   : > { %v377_v9 = vrot.slane %v376_v29, 4  ;;  %v2309_v63 = vsel %vm5766_vm6, %v4471_v61, %v2308_v21  ;;  %v2310_v10 = vrot.slane %v2308_v21, 4  ;;  %v386_v26 = vrot.slane %v384_v34, 4  ;;  %v5841_v34 = vld [vmem:[%s5542_s10 + $0x58] sm:$0xf] }
  0x4b   : > { %v372_v54 = vsel %vm5574_vm3, %v367_v15, %v371_v52  ;;  %v389_v50 = vrot.slane %v387_v28, 5  ;;  %v395_v13 = vrot.slane %v6958_v16, 5  ;;  %v399_v53 = vrot.slane %v6959_v42, 4 }
  0x4c   : > { %v382_v29 = vsel %vm5574_vm3, %v377_v9, %v381_v56  ;;  %v2312_v61 = vsel %vm5766_vm6, %v2310_v10, %v2311_v38  ;;  %v403_v52 = vshll.u32 %v5809_v17, 16  ;;  %v4472_v21 = vrot.slane %v5814_v57, 9  ;;  %v5364_v56 = vld [vmem:[%s6947_s1 + $0x88] sm:$0xff]  }
  0x4d   : > { %v4265_v15 = vcombine.low %v372_v54, %v382_v29  ;;  %v4483_v28 = vcombine.low %v2309_v63, %v2312_v61  ;;  %v390_v16 = vor.u32 %v389_v50, %v386_v26  ;;  %v400_v42 = vor.u32 %v399_v53, %v395_v13 }
  0x4e   : > { %v405_v12 = vrot.slane %v403_v52, 5  ;;  %v2315_v9 = vrot.slane %v5650_v1, 5  ;;  %v2318_v38 = vrot.slane %v5660_v11, 5  ;;  %v408_v10 = vshrl.u32 %v5830_v55, 16  ;;  %v5866_v52 = vld [vmem:[%s6947_s1 + $0x90] sm:$0xff]  }
  0x4f   : > { %4868 = vmatmul.mubr.msk.bf16.gmra.mrb[8].mxu1 %vm472_vm2, %v4265_v15  ;;  %5000 = vmatmul.mubr.msk.bf16.vlgmr.msra.gmra.mrb[0].mxu0 %vm472_vm2, %v4483_v28  ;;  %v391_v63 = vrot.slane %v390_v16, 4  ;;  %v401_v26 = vrot.slane %v400_v42, 4  ;;  %v411_v54 = vshll.u32 %v5830_v55, 16  ;;  %v6962_v50 = vshll.u32 %v5841_v34, 16  ;;  %v5875_v15 = vld [vmem:[%s5542_s10 + $0x3c] sm:$0xe] }
  0x50   : > { %5016 = vmatpush3.bf16.msra.mxu0 %v5702_v0  ;;  %v2316_v11 = vsel %vm5766_vm6, %v4472_v21, %v2315_v9  ;;  %v2317_v53 = vrot.slane %v2315_v9, 4  ;;  %v410_v29 = vrot.slane %v408_v10, 4  ;;  %v6963_v61 = vshrl.u32 %v5841_v34, 16 }
  0x51   : > { %v396_v16 = vsel %vm5574_vm3, %v391_v63, %v395_v13  ;;  %v406_v0 = vsel %vm5574_vm3, %v401_v26, %v405_v12  ;;  %v413_v42 = vrot.slane %v411_v54, 5  ;;  %v419_v21 = vrot.slane %v6962_v50, 5  ;;  %5017 = vmatprep.subr.bf16.mxu0 %v5364_v56  ;;  %v5883_v12 = vld [vmem:[%s5542_s10 + $0x40] sm:$0xf] }
  0x52   : > { %v4266_v28 = vcombine.low %v396_v16, %v406_v0  ;;  %v2319_v9 = vsel %vm5766_vm6, %v2317_v53, %v2318_v38  ;;  %v423_v13 = vrot.slane %v6963_v61, 4  ;;  %v427_v10 = vshll.u32 %v5844_v59, 16  ;;  %v4430_v16 = vld [vmem:[%s5542_s10 + $0x44] sm:$0x1] }
  0x53   : > { %v4484_v63 = vcombine.low %v2316_v11, %v2319_v9  ;;  %v414_v26 = vor.u32 %v413_v42, %v410_v29  ;;  %v4473_v54 = vrot.slane %v5853_v2, 9  ;;  %v2322_v50 = vrot.slane %v5706_v4, 5  ;;  %v5895_v11 = vld [vmem:[%s5542_s10 + $0x50] sm:$0x1]  ;;  %v5898_v29 = vld [vmem:[%s5542_s10 + $0x48] sm:$0xe] }
  0x54   : > { %4871 = vmatprep.mubr.msk.bf16.mxu1 %vm472_vm2, %v4266_v28  ;;  %v424_v0 = vor.u32 %v423_v13, %v419_v21  ;;  %v429_v38 = vrot.slane %v427_v10, 5  ;;  %v2325_v53 = vrot.slane %v5711_v25, 5  ;;  %v4474_v61 = vrot.slane %v5875_v15, 9  ;;  %5018 = vmatpush3.bf16.msra.mxu0 %v5364_v56  ;;  %v5905_v13 = vld [vmem:[%s5542_s10 + $0x58] sm:$0xf] }
  0x55   : > { %5003 = vmatprep.mubr.msk.bf16.mxu0 %vm472_vm2, %v4484_v63  ;;  %v415_v42 = vrot.slane %v414_v26, 4  ;;  %v2323_v28 = vsel %vm5766_vm6, %v4473_v54, %v2322_v50  ;;  %v2324_v9 = vrot.slane %v2322_v50, 4  ;;  %v2329_v25 = vrot.slane %v5883_v12, 5  ;;  %5035 = vmatprep.subr.bf16.mxu0 %v5866_v52  ;;  %v5912_v63 = vld [vmem:[%s5542_s10 + $0x54] sm:$0xe] }
  0x56   : > { %v425_v10 = vrot.slane %v424_v0, 4  ;;  %v4278_v31 = vcombine.low %v5546_v6, %v5549_v7  ;;  %v2332_v56 = vrot.slane %v4430_v16, 5  ;;  %v4279_v0 = vcombine.low %v5582_v35, %v5585_v40 }
  0x57   : > { %v420_v26 = vsel %vm5574_vm3, %v415_v42, %v419_v21  ;;  %v2326_v50 = vsel %vm5766_vm6, %v2324_v9, %v2325_v53  ;;  %v2330_v54 = vsel %vm5766_vm6, %v4474_v61, %v2329_v25  ;;  %v2331_v22 = vrot.slane %v2329_v25, 4  ;;  %v5929_v21 = vld [vmem:[%s5542_s10 + $0x60] sm:$0xe] }
  0x58   : > { %v430_v6 = vsel %vm5574_vm3, %v425_v10, %v429_v38  ;;  %v4485_v16 = vcombine.low %v2323_v28, %v2326_v50  ;;  %v4475_v23 = vrot.slane %v5898_v29, 9  ;;  %v2336_v42 = vrot.slane %v5892_v14, 5  ;;  %v4439_v10 = vld [vmem:[%s5542_s10 + $0x68] sm:$0x1] }
  0x59   : > { %v4267_v53 = vcombine.low %v420_v26, %v430_v6  ;;  %v2333_v61 = vsel %vm5766_vm6, %v2331_v22, %v2332_v56  ;;  %v2339_v9 = vrot.slane %v5895_v11, 5  ;;  %v4280_v28 = vcombine.low %v5623_v32, %v5630_v39 }
  0x5a   : > { %5004 = vmatmul.mubr.msk.bf16.gmra.mrb[4].mxu0 %vm472_vm2, %v4485_v16  ;;  %v4486_v38 = vcombine.low %v2330_v54, %v2333_v61  ;;  %v4476_v35 = vrot.slane %v5912_v63, 9  ;;  %v2343_v25 = vrot.slane %v5905_v13, 5  ;;  %v2337_v22 = vsel %vm5766_vm6, %v4475_v23, %v2336_v42  ;;  %v5957_v61 = vld [vmem:[%s5542_s10 + $0x14] sm:$0x3] }
  0x5b   : > { %4872 = vmatmul.mubr.msk.bf16.gmra.mrb[12].mxu1 %vm472_vm2, %v4267_v53  ;;  %v2338_v56 = vrot.slane %v2336_v42, 4  ;;  %v2346_v26 = vrot.slane %v4436_v33, 5  ;;  %v4477_v6 = vrot.slane %v5929_v21, 9  ;;  %v2350_v16 = vrot.slane %v5921_v24, 5 }
  0x5c   : > { %4879 = vmatprep.mubr.msk.bf16.mxu1 %vm472_vm2, %v4278_v31  ;;  %5007 = vmatprep.mubr.msk.bf16.mxu0 %vm472_vm2, %v4486_v38  ;;  %v2344_v32 = vsel %vm5766_vm6, %v4476_v35, %v2343_v25  ;;  %v2345_v54 = vrot.slane %v2343_v25, 4  ;;  %v2353_v33 = vrot.slane %v4439_v10, 5  ;;  %v5964_v25 = vld [vmem:[%s5542_s10 + $0x20] sm:$0x3]  ;;  %v2545_v10 = vshll.u32 %v5747_v5, 16 }
  0x5d   : > { %v2340_v23 = vsel %vm5766_vm6, %v2338_v56, %v2339_v9  ;;  %v2351_v38 = vsel %vm5766_vm6, %v4477_v6, %v2350_v16  ;;  %v2352_v35 = vrot.slane %v2350_v16, 4  ;;  %v2542_v9 = vshrl.u32 %v5747_v5, 16 }
  0x5e   : > { %v4487_v31 = vcombine.low %v2337_v22, %v2340_v23  ;;  %v2347_v42 = vsel %vm5766_vm6, %v2345_v54, %v2346_v26  ;;  %v2552_v56 = vor.u32 %v5589_v44, %v5587_v43  ;;  %v2556_v23 = vshrl.u32 %v5957_v61, 16 }
  0x5f   : > { %v4488_v50 = vcombine.low %v2344_v32, %v2347_v42  ;;  %v2354_v22 = vsel %vm5766_vm6, %v2352_v35, %v2353_v33  ;;  %v2559_v26 = vshll.u32 %v5957_v61, 16  ;;  %v5369_v32 = vld [vmem:[%s6947_s1 + $0x28] sm:$0xff]   ;;  %v2544_v16 = vrot.slane %v2542_v9, 5 }
  0x60   : > { %v4489_v6 = vcombine.low %v2351_v38, %v2354_v22  ;;  %v2547_v5 = vrot.slane %v2545_v10, 6  ;;  %v2554_v42 = vrot.slane %v2552_v56, 4  ;;  %v2558_v43 = vrot.slane %v2556_v23, 5  ;;  %v5997_v23 = vld [vmem:[%s5542_s10 + $0x2c] sm:$0x3] }
  0x61   : > { %v2561_v44 = vrot.slane %v2559_v26, 6  ;;  %v2565_v33 = vshrl.u32 %v5785_v62, 16  ;;  %v2568_v35 = vshll.u32 %v5785_v62, 16  ;;  %v2582_v10 = vshll.u32 %v5964_v25, 16 }
  0x62   : > { %5008 = vmatmul.mubr.msk.bf16.gmra.mrb[8].mxu0 %vm472_vm2, %v4487_v31  ;;  %v2548_v9 = vor.u32 %v2547_v5, %v2544_v16  ;;  %v2579_v31 = vshrl.u32 %v5964_v25, 16  ;;  %v2588_v26 = vshrl.u32 %v5814_v57, 16  ;;  %v6003_v16 = vld [vmem:[%s6947_s1 + $0x30] sm:$0xff]   ;;  %v2602_v17 = vshrl.u32 %v5997_v23, 16 }
  0x63   : > { %4880 = vmatmul.mubr.msk.bf16.vlgmr.msra.gmra.mrb[0].mxu1 %vm472_vm2, %v4279_v0  ;;  %5011 = vmatprep.mubr.msk.bf16.mxu0 %vm472_vm2, %v4488_v50  ;;  %v2562_v62 = vor.u32 %v2561_v44, %v2558_v43  ;;  %v2567_v0 = vrot.slane %v2565_v33, 5  ;;  %v2570_v50 = vrot.slane %v2568_v35, 6  ;;  %v2584_v22 = vrot.slane %v2582_v10, 6 }
  0x64   : > { %4896 = vmatpush3.bf16.msra.mxu1 %v5671_v19  ;;  %4883 = vmatprep.mubr.msk.bf16.mxu1 %vm472_vm2, %v4280_v28  ;;  %v2549_v5 = vrot.slane %v2548_v9, 4  ;;  %v2581_v54 = vrot.slane %v2579_v31, 5  ;;  %v2591_v19 = vshll.u32 %v5814_v57, 16  ;;  %v2590_v44 = vrot.slane %v2588_v26, 5 }
  0x65   : > { %4897 = vmatprep.subr.bf16.mxu1 %v5369_v32  ;;  %v2563_v28 = vsel %vm5986_vm9, %v2554_v42, %v2562_v62  ;;  %v2571_v43 = vor.u32 %v2570_v50, %v2567_v0  ;;  %v6984_v33 = vshrl.u32 %v5650_v1, 16  ;;  %v6985_v9 = vshll.u32 %v5650_v1, 16  ;;  %v6017_v62 = vld [vmem:[%s5542_s10 + $0x38] sm:$0x3] }
  0x66   : > { %v2553_v53 = vsel %vm5986_vm9, %v2549_v5, %v2552_v56  ;;  %v2585_v30 = vor.u32 %v2584_v22, %v2581_v54  ;;  %v2593_v59 = vrot.slane %v2591_v19, 6  ;;  %v2605_v42 = vshll.u32 %v5997_v23, 16  ;;  %v6026_v22 = vld [vmem:[%s5542_s10] sm:$0xe] }
  0x67   : > { %v2596_v35 = vrot.slane %v6984_v33, 5  ;;  %v2597_v31 = vrot.slane %v6985_v9, 6  ;;  %v4512_v10 = vcombine.low %v2553_v53, %v2563_v28  ;;  %v2572_v57 = vrot.slane %v2571_v43, 4 }
  0x68   : > { %4898 = vmatpush3.bf16.msra.mxu1 %v5369_v32  ;;  %v6986_v0 = vrot.slane %v5646_v60, 4  ;;  %v2594_v56 = vor.u32 %v2593_v59, %v2590_v44  ;;  %v4285_v1 = vcombine.low %v5830_v55, %v5841_v34  ;;  %v2604_v32 = vrot.slane %v2602_v17, 5 }
  0x69   : > { %v2598_v54 = vor.u32 %v2597_v31, %v2596_v35  ;;  %4915 = vmatprep.subr.bf16.mxu1 %v6003_v16  ;;  %v2576_v53 = vsel %vm5986_vm9, %v2572_v57, %v5646_v60  ;;  %v2607_v26 = vrot.slane %v2605_v42, 6  ;;  %v2611_v5 = vshrl.u32 %v5853_v2, 16 }
  0x6a   : > { %v2586_v50 = vsel %vm5986_vm9, %v6986_v0, %v2585_v30  ;;  %5012 = vmatmul.mubr.msk.bf16.gmra.mrb[12].mxu0 %vm472_vm2, %v4489_v6  ;;  %v6987_v30 = vcombine.low %v5666_v18, %v5680_v41  ;;  %v2595_v19 = vrot.slane %v2594_v56, 4  ;;  %v2614_v6 = vshll.u32 %v5853_v2, 16 }
  0x6b   : > { %5019 = vmatprep.mubr.msk.bf16.mxu0 %vm472_vm2, %v4512_v10  ;;  %v4513_v59 = vcombine.low %v2576_v53, %v2586_v50  ;;  %v2600_v28 = vrot.slane %v2598_v54, 4  ;;  %v6988_v43 = vcombine.low %v5717_v46, %v5730_v3  ;;  %v2608_v60 = vor.u32 %v2607_v26, %v2604_v32  ;;  %v6057_v32 = vld [vmem:[%s5542_s10 + $0x44] sm:$0x3] }
  0x6c   : > { %4884 = vmatmul.mubr.msk.bf16.gmra.mrb[4].mxu1 %vm472_vm2, %v6987_v30  ;;  %v2613_v17 = vrot.slane %v2611_v5, 5  ;;  %v6989_v44 = vshrl.u32 %v5706_v4, 16  ;;  %v6990_v33 = vshll.u32 %v5706_v4, 16  ;;  %v2599_v9 = vsel %vm5986_vm9, %v2595_v19, %v2598_v54 }
  0x6d   : > { %4887 = vmatprep.mubr.msk.bf16.mxu1 %vm472_vm2, %v6988_v43  ;;  %v2616_v31 = vrot.slane %v2614_v6, 6  ;;  %v2625_v2 = vshrl.u32 %v6017_v62, 16  ;;  %v2628_v10 = vshll.u32 %v6017_v62, 16  ;;  %v2609_v46 = vsel %vm5986_vm9, %v2600_v28, %v2608_v60  ;;  %v5375_v43 = vld [vmem:[%s6947_s1 + $0x98] sm:$0xff]   ;;  %v6070_v60 = vld [vmem:[%s5542_s10 + $0xc] sm:$0xe] }
  0x6e   : > { %v2619_v18 = vrot.slane %v6989_v44, 5  ;;  %v2620_v35 = vrot.slane %v6990_v33, 6  ;;  %v4296_v42 = vrot.slane %v6026_v22, 9  ;;  %v796_v0 = vrot.slane %v5549_v7, 5 }
  0x6f   : > { %v4514_v50 = vcombine.low %v2599_v9, %v2609_v46  ;;  %v2617_v4 = vor.u32 %v2616_v31, %v2613_v17  ;;  %v2627_v56 = vrot.slane %v2625_v2, 5  ;;  %v2630_v53 = vrot.slane %v2628_v10, 6 }
  0x70   : > { %v2621_v57 = vor.u32 %v2620_v35, %v2619_v18  ;;  %v6061_v26 = vsel %vm5766_vm6, %v4296_v42, %v796_v0  ;;  %v798_v5 = vrot.slane %v796_v0, 4  ;;  %v2003_v30 = vshll.u32 %v5883_v12, 16 }
  0x71   : > { %v2618_v19 = vrot.slane %v2617_v4, 4  ;;  %v2631_v28 = vor.u32 %v2630_v53, %v2627_v56  ;;  %v2007_v6 = vshrl.u32 %v5883_v12, 16  ;;  %v2634_v7 = vshrl.u32 %v5875_v15, 16 }
  0x72   : > { %v2623_v54 = vrot.slane %v2621_v57, 4  ;;  %5020 = vmatmul.mubr.msk.bf16.vlgmr.msra.gmra.mrb[0].mxu0 %vm472_vm2, %v4513_v59  ;;  %v6991_v17 = vrot.slane %v5552_v8, 5  ;;  %v2637_v18 = vshll.u32 %v5875_v15, 16  ;;  %v2643_v33 = vrot.slane %v2003_v30, 6 }
  0x73   : > { %v2648_v35 = vshrl.u32 %v6057_v32, 16  ;;  %v6992_v9 = vcombine.low %v5753_v51, %v5762_v36  ;;  %5036 = vmatpush3.bf16.msra.mxu0 %v5866_v52  ;;  %v2622_v8 = vsel %vm5986_vm9, %v2618_v19, %v2621_v57  ;;  %v2636_v31 = vrot.slane %v2634_v7, 5  ;;  %5023 = vmatprep.mubr.msk.bf16.mxu0 %vm472_vm2, %v4514_v50  ;;  %v6101_v57 = vld [vmem:[%s6947_s1 + $0xa0] sm:$0xff]   ;;  %v6114_v7 = vld [vmem:[%s5542_s10 + $0x50] sm:$0x3] }
  0x74   : > { %v800_v44 = vsel %vm5766_vm6, %v798_v5, %v6991_v17  ;;  %v2632_v59 = vsel %vm5986_vm9, %v2623_v54, %v2631_v28  ;;  %v6993_v2 = vcombine.low %v5792_v27, %v5805_v37  ;;  %v2639_v10 = vrot.slane %v2637_v18, 6  ;;  %5037 = vmatprep.subr.bf16.mxu0 %v5375_v43 }
  0x75   : > { %4888 = vmatmul.mubr.msk.bf16.gmra.mrb[8].mxu1 %vm472_vm2, %v6992_v9  ;;  %v4308_v15 = vcombine.low %v6061_v26, %v800_v44  ;;  %v4515_v51 = vcombine.low %v2622_v8, %v2632_v59  ;;  %v2642_v52 = vrot.slane %v2007_v6, 5  ;;  %v2650_v46 = vrot.slane %v2648_v35, 5 }
  0x76   : > { %4891 = vmatprep.mubr.msk.bf16.mxu1 %vm472_vm2, %v6993_v2  ;;  %v2651_v42 = vshll.u32 %v6057_v32, 16  ;;  %v4297_v27 = vrot.slane %v6070_v60, 9  ;;  %v803_v0 = vrot.slane %v5585_v40, 5  ;;  %v2027_v50 = vshll.u32 %v5892_v14, 16 }
  0x77   : > { %v2640_v4 = vor.u32 %v2639_v10, %v2636_v31  ;;  %v2644_v56 = vor.u32 %v2643_v33, %v2642_v52  ;;  %v2031_v53 = vshrl.u32 %v5892_v14, 16  ;;  %v2657_v54 = vshrl.u32 %v5898_v29, 16  ;;  %5038 = vmatpush3.bf16.msra.mxu0 %v5375_v43  ;;  %v6125_v31 = vld [vmem:[%s5542_s10 + $0x18] sm:$0xe] }
  0x78   : > { %v2653_v26 = vrot.slane %v2651_v42, 6  ;;  %v804_v5 = vsel %vm5766_vm6, %v4297_v27, %v803_v0  ;;  %v805_v19 = vrot.slane %v803_v0, 4  ;;  %v6111_v28 = vrot.slane %v2027_v50, 5  ;;  %5055 = vmatprep.subr.bf16.mxu0 %v6101_v57 }
  0x79   : > { %v2641_v40 = vrot.slane %v2640_v4, 4  ;;  %v2646_v17 = vrot.slane %v2644_v56, 4  ;;  %v6116_v44 = vrot.slane %v2031_v53, 4  ;;  %v2659_v18 = vrot.slane %v2657_v54, 5 }
  0x7a   : > { %v2654_v33 = vor.u32 %v2653_v26, %v2650_v46  ;;  %v6994_v35 = vrot.slane %v5592_v45, 5  ;;  %v2660_v8 = vshll.u32 %v5898_v29, 16  ;;  %v2665_v59 = vrot.slane %v2031_v53, 5  ;;  %5024 = vmatmul.mubr.msk.bf16.gmra.mrb[4].mxu0 %vm472_vm2, %v4515_v51 }
  0x7b   : > { %v2037_v43 = vshll.u32 %v5895_v11, 16  ;;  %v2645_v2 = vsel %vm5986_vm9, %v2641_v40, %v2644_v56  ;;  %v2034_v10 = vor.u32 %v6116_v44, %v6111_v28  ;;  %v2666_v52 = vrot.slane %v2027_v50, 6  ;;  %v4655_v11 = vld [vmem:[%s5542_s10 + $0x3c] sm:$0xe] }
  0x7c   : > { %v807_v9 = vsel %vm5766_vm6, %v805_v19, %v6994_v35  ;;  %v2655_v45 = vsel %vm5986_vm9, %v2646_v17, %v2654_v33  ;;  %v2662_v29 = vrot.slane %v2660_v8, 6  ;;  %v2671_v46 = vshrl.u32 %v6114_v7, 16  ;;  %v6149_v19 = vld [vmem:[%s5542_s10 + $0x5c] sm:$0x3]  ;;  %v6160_v8 = vld [vmem:[%s5542_s10 + $0x24] sm:$0xe] }
  0x7d   : > { %4892 = vmatmul.mubr.msk.bf16.gmra.mrb[12].mxu1 %vm472_vm2, %v4285_v1  ;;  %v2674_v51 = vshll.u32 %v6114_v7, 16  ;;  %v4516_v42 = vcombine.low %v2645_v2, %v2655_v45  ;;  %v4309_v27 = vcombine.low %v804_v5, %v807_v9  ;;  %v2667_v0 = vor.u32 %v2666_v52, %v2665_v59  ;;  %v5376_v45 = vld [vmem:[%s6947_s1 + $0x38] sm:$0xff]  }
  0x7e   : > { %4899 = vmatprep.mubr.msk.bf16.mxu1 %vm472_vm2, %v4308_v15  ;;  %v4298_v50 = vrot.slane %v6125_v31, 9  ;;  %v2663_v4 = vor.u32 %v2662_v29, %v2659_v18  ;;  %v2673_v55 = vrot.slane %v2671_v46, 5  ;;  %v810_v1 = vrot.slane %v5630_v39, 5 }
  0x7f   : > { %v2676_v56 = vrot.slane %v2674_v51, 6  ;;  %5027 = vmatprep.mubr.msk.bf16.mxu0 %vm472_vm2, %v4516_v42  ;;  %v2669_v53 = vrot.slane %v2667_v0, 4  ;;  %v813_v54 = vrot.slane %v5635_v48, 5  ;;  %v2051_v26 = vshll.u32 %v5905_v13, 16 }
  0x80   : > { %v2055_v15 = vshrl.u32 %v5905_v13, 16  ;;  %v2664_v5 = vrot.slane %v2663_v4, 4  ;;  %v811_v17 = vsel %vm5766_vm6, %v4298_v50, %v810_v1  ;;  %v812_v18 = vrot.slane %v810_v1, 4 }
  0x81   : > { %v2677_v40 = vor.u32 %v2676_v56, %v2673_v55  ;;  %v2680_v33 = vshrl.u32 %v5912_v63, 16  ;;  %v2683_v35 = vshll.u32 %v5912_v63, 16  ;;  %v2689_v48 = vrot.slane %v2051_v26, 6 }
  0x82   : > { %v2688_v9 = vrot.slane %v2055_v15, 5  ;;  %v2668_v59 = vsel %vm5986_vm9, %v2664_v5, %v2667_v0  ;;  %v814_v52 = vsel %vm5766_vm6, %v812_v18, %v813_v54  ;;  %v2694_v63 = vshrl.u32 %v6149_v19, 16  ;;  %v6181_v5 = vld [vmem:[%s5542_s10 + $0x68] sm:$0x3] }
  0x83   : > { %v2678_v2 = vsel %vm5986_vm9, %v2669_v53, %v2677_v40  ;;  %v4310_v46 = vcombine.low %v811_v17, %v814_v52  ;;  %v2682_v51 = vrot.slane %v2680_v33, 5  ;;  %v2685_v42 = vrot.slane %v2683_v35, 6  ;;  %v6192_v33 = vld [vmem:[%s5542_s10 + $0x30] sm:$0xe] }
  0x84   : > { %v4517_v29 = vcombine.low %v2668_v59, %v2678_v2  ;;  %v2690_v0 = vor.u32 %v2689_v48, %v2688_v9  ;;  %v2696_v50 = vrot.slane %v2694_v63, 5  ;;  %v2697_v4 = vshll.u32 %v6149_v19, 16 }
  0x85   : > { %4900 = vmatmul.mubr.msk.bf16.vlgmr.msra.gmra.mrb[0].mxu1 %vm472_vm2, %v4309_v27  ;;  %v4299_v55 = vrot.slane %v6160_v8, 9  ;;  %v2686_v56 = vor.u32 %v2685_v42, %v2682_v51  ;;  %v817_v1 = vrot.slane %v5680_v41, 5  ;;  %v820_v53 = vrot.slane %v5684_v49, 5  ;;  %v6186_v27 = vld [vmem:[%s6947_s1 + $0x40] sm:$0xff]  }
  0x86   : > { %4916 = vmatpush3.bf16.msra.mxu1 %v6003_v16  ;;  %5028 = vmatmul.mubr.msk.bf16.gmra.mrb[8].mxu0 %vm472_vm2, %v4517_v29  ;;  %v2075_v54 = vshll.u32 %v5921_v24, 16  ;;  %v2692_v40 = vrot.slane %v2690_v0, 4  ;;  %v2699_v16 = vrot.slane %v2697_v4, 6  ;;  %v2079_v17 = vshrl.u32 %v5921_v24, 16 }
  0x87   : > { %4903 = vmatprep.mubr.msk.bf16.mxu1 %vm472_vm2, %v4310_v46  ;;  %v2703_v18 = vshrl.u32 %v5929_v21, 16  ;;  %4917 = vmatprep.subr.bf16.mxu1 %v5376_v45  ;;  %v2687_v49 = vrot.slane %v2686_v56, 4  ;;  %v818_v35 = vsel %vm5766_vm6, %v4299_v55, %v817_v1  ;;  %v819_v9 = vrot.slane %v817_v1, 4  ;;  %v4530_v56 = vld [vmem:[%s5542_s10 + $0xc] sm:$0xc] }
  0x88   : > { %v2706_v48 = vshll.u32 %v5929_v21, 16  ;;  %v2700_v59 = vor.u32 %v2699_v16, %v2696_v50  ;;  %v2711_v52 = vrot.slane %v2079_v17, 5  ;;  %v2712_v63 = vrot.slane %v2075_v54, 6  ;;  %v6211_v1 = vld [vmem:[%s5542_s10 + $0x3c] sm:$0xe] }
  0x89   : > { %v2705_v2 = vrot.slane %v2703_v18, 5  ;;  %v2691_v29 = vsel %vm5986_vm9, %v2687_v49, %v2690_v0  ;;  %v821_v46 = vsel %vm5766_vm6, %v819_v9, %v820_v53  ;;  %v2717_v42 = vshrl.u32 %v6181_v5, 16 }
  0x8a   : > { %v2708_v51 = vrot.slane %v2706_v48, 6  ;;  %4918 = vmatpush3.bf16.msra.mxu1 %v5376_v45  ;;  %v2701_v21 = vsel %vm5986_vm9, %v2692_v40, %v2700_v59  ;;  %v4311_v50 = vcombine.low %v818_v35, %v821_v46  ;;  %v2713_v4 = vor.u32 %v2712_v63, %v2711_v52 }
  0x8b   : > { %v2720_v55 = vshll.u32 %v6181_v5, 16  ;;  %4935 = vmatprep.subr.bf16.mxu1 %v6186_v27  ;;  %v4518_v0 = vcombine.low %v2691_v29, %v2701_v21  ;;  %v2719_v16 = vrot.slane %v2717_v42, 5  ;;  %v4300_v18 = vrot.slane %v6192_v33, 9  ;;  %v4531_v29 = vld [vmem:[%s5542_s10 + $0x18] sm:$0xc] }
  0x8c   : > { %v2709_v53 = vor.u32 %v2708_v51, %v2705_v2  ;;  %v2715_v45 = vrot.slane %v2713_v4, 4  ;;  %v824_v49 = vrot.slane %v5730_v3, 5  ;;  %v827_v35 = vrot.slane %v5737_v20, 5  ;;  %v5403_v2 = vld [vmem:[%s5542_s10 + $0x10] sm:$0xf] }
  0x8d   : > { %4904 = vmatmul.mubr.msk.bf16.gmra.mrb[4].mxu1 %vm472_vm2, %v4311_v50  ;;  %v2722_v40 = vrot.slane %v2720_v55, 6  ;;  %5031 = vmatprep.mubr.msk.bf16.mxu0 %vm472_vm2, %v4518_v0  ;;  %v4538_v59 = vrot.slane %v4530_v56, 10  ;;  %v2929_v52 = vrot.slane %v5403_v2, 6  ;;  %v2932_v63 = vrot.slane %v5957_v61, 6  ;;  %v6250_v2 = vld [vmem:[%s5542_s10 + $0x54] sm:$0xe] }
  0x8e   : > { %v2710_v48 = vrot.slane %v2709_v53, 4  ;;  %v825_v20 = vsel %vm5766_vm6, %v4300_v18, %v824_v49  ;;  %v826_v51 = vrot.slane %v824_v49, 4  ;;  %v4301_v42 = vrot.slane %v6211_v1, 9  ;;  %v6242_v18 = vld [vmem:[%s5542_s10 + $0x48] sm:$0xe] }
  0x8f   : > { %v2723_v46 = vor.u32 %v2722_v40, %v2719_v16  ;;  %v2930_v50 = vsel %vm6220_vm12, %v4538_v59, %v2929_v52  ;;  %v2931_v55 = vrot.slane %v2929_v52, 4  ;;  %v831_v56 = vrot.slane %v5762_v36, 5  ;;  %v4532_v40 = vld [vmem:[%s5542_s10 + $0x24] sm:$0xc] }
  0x90   : > { %v2714_v21 = vsel %vm5986_vm9, %v2710_v48, %v2713_v4  ;;  %v828_v0 = vsel %vm5766_vm6, %v826_v51, %v827_v35  ;;  %v834_v53 = vrot.slane %v5774_v58, 5  ;;  %v4539_v16 = vrot.slane %v4531_v29, 10  ;;  %v5404_v35 = vld [vmem:[%s5542_s10 + $0x1c] sm:$0xf] }
  0x91   : > { %v2724_v61 = vsel %vm5986_vm9, %v2715_v45, %v2723_v46  ;;  %v4312_v49 = vcombine.low %v825_v20, %v828_v0  ;;  %v2933_v48 = vsel %vm6220_vm12, %v2931_v55, %v2932_v63  ;;  %v832_v59 = vsel %vm5766_vm6, %v4301_v42, %v831_v56  ;;  %v6997_v20 = vld [vmem:[#allocation6_spill] sm:$0xff]  ;;  %v5405_v55 = vld [vmem:[%s5542_s10 + $0x28] sm:$0xf] }
  0x92   : > { %v4519_v4 = vcombine.low %v2714_v21, %v2724_v61  ;;  %v4550_v45 = vcombine.low %v2930_v50, %v2933_v48  ;;  %v833_v52 = vrot.slane %v831_v56, 4  ;;  %v2936_v46 = vrot.slane %v5404_v35, 6 }
  0x93   : > { %v2939_v58 = vrot.slane %v5964_v25, 6  ;;  %4907 = vmatprep.mubr.msk.bf16.mxu1 %vm472_vm2, %v4312_v49  ;;  %v4302_v29 = vrot.slane %v6242_v18, 9  ;;  %v838_v63 = vrot.slane %v5805_v37, 5  ;;  %v841_v51 = vrot.slane %v6997_v20, 5  ;;  %v5406_v20 = vld [vmem:[%s5542_s10 + $0x34] sm:$0xf] }
  0x94   : > { %5032 = vmatmul.mubr.msk.bf16.gmra.mrb[12].mxu0 %vm472_vm2, %v4519_v4  ;;  %v4540_v42 = vrot.slane %v4532_v40, 10  ;;  %v835_v21 = vsel %vm5766_vm6, %v833_v52, %v834_v53  ;;  %v2937_v25 = vsel %vm6220_vm12, %v4539_v16, %v2936_v46  ;;  %v2938_v50 = vrot.slane %v2936_v46, 4  ;;  %v4533_v40 = vld [vmem:[%s5542_s10 + $0x30] sm:$0xc] }
  0x95   : > { %5039 = vmatprep.mubr.msk.bf16.mxu0 %vm472_vm2, %v4550_v45  ;;  %v2943_v56 = vrot.slane %v5405_v55, 6  ;;  %v4313_v61 = vcombine.low %v832_v59, %v835_v21  ;;  %v839_v0 = vsel %vm5766_vm6, %v4302_v29, %v838_v63  ;;  %v840_v4 = vrot.slane %v838_v63, 4  ;;  %v6283_v21 = vld [vmem:[%s5542_s10 + $0x8] sm:$0x3] }
  0x96   : > { %v2946_v49 = vrot.slane %v5997_v23, 6  ;;  %v2940_v48 = vsel %vm6220_vm12, %v2938_v50, %v2939_v58  ;;  %v4303_v45 = vrot.slane %v6250_v2, 9  ;;  %v845_v35 = vrot.slane %v5841_v34, 5  ;;  %v6998_v23 = vld [vmem:[#allocation7_spill] sm:$0xff] }
  0x97   : > { %v2944_v53 = vsel %vm6220_vm12, %v4540_v42, %v2943_v56  ;;  %v2945_v16 = vrot.slane %v2943_v56, 4  ;;  %4908 = vmatmul.mubr.msk.bf16.gmra.mrb[8].mxu1 %vm472_vm2, %v4313_v61  ;;  %v4551_v59 = vcombine.low %v2937_v25, %v2940_v48  ;;  %v842_v52 = vsel %vm5766_vm6, %v840_v4, %v841_v51  ;;  %v5379_v56 = vld [vmem:[%s6947_s1 + $0xa8] sm:$0xff]  }
  0x98   : > { %v848_v46 = vrot.slane %v6998_v23, 5  ;;  %v4314_v29 = vcombine.low %v839_v0, %v842_v52  ;;  %v4541_v63 = vrot.slane %v4533_v40, 10  ;;  %v2950_v42 = vrot.slane %v5406_v20, 6  ;;  %v6999_v40 = vld [vmem:[#allocation2_spill] sm:$0xff]  ;;  %v7000_v48 = vld [vmem:[#allocation3_spill] sm:$0xff] }
  0x99   : > { %v2947_v58 = vsel %vm6220_vm12, %v2945_v16, %v2946_v49  ;;  %v846_v25 = vsel %vm5766_vm6, %v4303_v45, %v845_v35  ;;  %v847_v55 = vrot.slane %v845_v35, 4  ;;  %v2953_v51 = vrot.slane %v6017_v62, 6  ;;  %v4534_v52 = vld [vmem:[%s5542_s10 + $0x3c] sm:$0xc] }
  0x9a   : > { %v4552_v50 = vcombine.low %v2944_v53, %v2947_v58  ;;  %4911 = vmatprep.mubr.msk.bf16.mxu1 %vm472_vm2, %v4314_v29  ;;  %v2951_v61 = vsel %vm6220_vm12, %v4541_v63, %v2950_v42  ;;  %v2952_v0 = vrot.slane %v2950_v42, 4  ;;  %v1040_v4 = vshrl.u32 %v6026_v22, 16  ;;  %v6309_v29 = vld [vmem:[%s5542_s10 + $0x14] sm:$0x3] }
  0x9b   : > { %v1043_v49 = vshll.u32 %v6026_v22, 16  ;;  %v849_v62 = vsel %vm5766_vm6, %v847_v55, %v848_v46  ;;  %v1050_v53 = vor.u32 %v7000_v48, %v6999_v40  ;;  %v1054_v16 = vshrl.u32 %v6283_v21, 16 }
  0x9c   : > { %5040 = vmatmul.mubr.msk.bf16.vlgmr.msra.gmra.mrb[0].mxu0 %vm472_vm2, %v4551_v59  ;;  %v1057_v45 = vshll.u32 %v6283_v21, 16  ;;  %v4315_v35 = vcombine.low %v846_v25, %v849_v62  ;;  %v2954_v22 = vsel %vm6220_vm12, %v2952_v0, %v2953_v51  ;;  %v1042_v59 = vrot.slane %v1040_v4, 5 }
  0x9d   : > { %5056 = vmatpush3.bf16.msra.mxu0 %v6101_v57  ;;  %5043 = vmatprep.mubr.msk.bf16.mxu0 %vm472_vm2, %v4552_v50  ;;  %v1045_v23 = vrot.slane %v1043_v49, 6  ;;  %v4553_v46 = vcombine.low %v2951_v61, %v2954_v22  ;;  %v1052_v58 = vrot.slane %v1050_v53, 4  ;;  %v1056_v63 = vrot.slane %v1054_v16, 5  ;;  %v6314_v57 = vld [vmem:[%s6947_s1 + $0xb0] sm:$0xff]   ;;  %v4535_v49 = vld [vmem:[%s5542_s10 + $0x48] sm:$0xc] }
  0x9e   : > { %v1059_v20 = vrot.slane %v1057_v45, 6  ;;  %5057 = vmatprep.subr.bf16.mxu0 %v5379_v56  ;;  %v4542_v50 = vrot.slane %v4534_v52, 10  ;;  %v2957_v25 = vrot.slane %v5883_v12, 6  ;;  %v2960_v55 = vrot.slane %v6057_v32, 6 }
  0x9f   : > { %v1046_v42 = vor.u32 %v1045_v23, %v1042_v59  ;;  %4912 = vmatmul.mubr.msk.bf16.gmra.mrb[12].mxu1 %vm472_vm2, %v4315_v35  ;;  %v1063_v61 = vshrl.u32 %v6070_v60, 16  ;;  %v1066_v0 = vshll.u32 %v6070_v60, 16  ;;  %v1077_v4 = vshrl.u32 %v6309_v29, 16 }
  0xa0   : > { %v1060_v51 = vor.u32 %v1059_v20, %v1056_v63  ;;  %v2958_v40 = vsel %vm6220_vm12, %v4542_v50, %v2957_v25  ;;  %v2959_v48 = vrot.slane %v2957_v25, 4  ;;  %v1080_v16 = vshll.u32 %v6309_v29, 16  ;;  %v6337_v25 = vld [vmem:[%s5542_s10 + $0x20] sm:$0x3] }
  0xa1   : > { %v1047_v62 = vrot.slane %v1046_v42, 4  ;;  %5058 = vmatpush3.bf16.msra.mxu0 %v5379_v56  ;;  %v1065_v45 = vrot.slane %v1063_v61, 5  ;;  %v1068_v52 = vrot.slane %v1066_v0, 6  ;;  %v1079_v35 = vrot.slane %v1077_v4, 5  ;;  %v7002_v4 = vld [vmem:[#allocation5_spill] sm:$0xff] }
  0xa2   : > { %v1061_v32 = vsel %vm5986_vm9, %v1052_v58, %v1060_v51  ;;  %5075 = vmatprep.subr.bf16.mxu0 %v6314_v57  ;;  %v2961_v22 = vsel %vm6220_vm12, %v2959_v48, %v2960_v55  ;;  %v1082_v59 = vrot.slane %v1080_v16, 6  ;;  %v4543_v23 = vrot.slane %v4535_v49, 10  ;;  %v4536_v16 = vld [vmem:[%s5542_s10 + $0x54] sm:$0xc] }
  0xa3   : > { %v1051_v60 = vsel %vm5986_vm9, %v1047_v62, %v1050_v53  ;;  %v4554_v63 = vcombine.low %v2958_v40, %v2961_v22  ;;  %v1069_v20 = vor.u32 %v1068_v52, %v1065_v45  ;;  %v2964_v58 = vrot.slane %v5892_v14, 6 }
  0xa4   : > { %5044 = vmatmul.mubr.msk.bf16.gmra.mrb[4].mxu0 %vm472_vm2, %v4553_v46  ;;  %v4330_v56 = vcombine.low %v1051_v60, %v1061_v32  ;;  %v1083_v42 = vor.u32 %v1082_v59, %v1079_v35  ;;  %v2967_v50 = vrot.slane %v6114_v7, 6  ;;  %v1086_v53 = vshrl.u32 %v6125_v31, 16 }
  0xa5   : > { %v1089_v51 = vshll.u32 %v6125_v31, 16  ;;  %5047 = vmatprep.mubr.msk.bf16.mxu0 %vm472_vm2, %v4554_v63  ;;  %v1070_v46 = vrot.slane %v1069_v20, 4  ;;  %v2965_v55 = vsel %vm6220_vm12, %v4543_v23, %v2964_v58  ;;  %v2966_v61 = vrot.slane %v2964_v58, 4 }
  0xa6   : > { %4919 = vmatprep.mubr.msk.bf16.mxu1 %vm472_vm2, %v4330_v56  ;;  %v7001_v14 = vshrl.u32 %v5630_v39, 16  ;;  %v7003_v7 = vrot.slane %v7002_v4, 4  ;;  %v1088_v62 = vrot.slane %v1086_v53, 5  ;;  %v7004_v31 = vshll.u32 %v5630_v39, 16  ;;  %v5380_v39 = vld [vmem:[%s6947_s1 + $0x48] sm:$0xff]  }
  0xa7   : > { %v1091_v40 = vrot.slane %v1089_v51, 6  ;;  %v1074_v32 = vsel %vm5986_vm9, %v1070_v46, %v7002_v4  ;;  %v2968_v45 = vsel %vm6220_vm12, %v2966_v61, %v2967_v50  ;;  %v1100_v52 = vshrl.u32 %v6337_v25, 16  ;;  %v6368_v51 = vld [vmem:[%s5542_s10 + $0x2c] sm:$0x3] }
  0xa8   : > { %v1094_v0 = vrot.slane %v7001_v14, 5  ;;  %v1084_v49 = vsel %vm5986_vm9, %v7003_v7, %v1083_v42  ;;  %v1095_v48 = vrot.slane %v7004_v31, 6  ;;  %v1103_v35 = vshll.u32 %v6337_v25, 16 }
  0xa9   : > { %v4331_v60 = vcombine.low %v1074_v32, %v1084_v49  ;;  %v4555_v22 = vcombine.low %v2965_v55, %v2968_v45  ;;  %v1092_v59 = vor.u32 %v1091_v40, %v1088_v62  ;;  %v1102_v56 = vrot.slane %v1100_v52, 5  ;;  %v6391_v32 = vld [vmem:[%s6947_s1 + $0x50] sm:$0xff]  }
  0xaa   : > { %v1096_v23 = vor.u32 %v1095_v48, %v1094_v0  ;;  %v1105_v63 = vrot.slane %v1103_v35, 6  ;;  %v4544_v20 = vrot.slane %v4536_v16, 10  ;;  %v2971_v58 = vrot.slane %v5905_v13, 6 }
  0xab   : > { %4920 = vmatmul.mubr.msk.bf16.vlgmr.msra.gmra.mrb[0].mxu1 %vm472_vm2, %v4331_v60  ;;  %v1093_v42 = vrot.slane %v1092_v59, 4  ;;  %v2974_v53 = vrot.slane %v6149_v19, 6  ;;  %v1109_v46 = vshrl.u32 %v6160_v8, 16  ;;  %v1112_v0 = vshll.u32 %v6160_v8, 16 }
  0xac   : > { %v1098_v50 = vrot.slane %v1096_v23, 4  ;;  %4936 = vmatpush3.bf16.msra.mxu1 %v6186_v27  ;;  %5048 = vmatmul.mubr.msk.bf16.gmra.mrb[8].mxu0 %vm472_vm2, %v4555_v22  ;;  %v1106_v55 = vor.u32 %v1105_v63, %v1102_v56  ;;  %v2972_v61 = vsel %vm6220_vm12, %v4544_v20, %v2971_v58  ;;  %v2973_v14 = vrot.slane %v2971_v58, 4  ;;  %v4537_v27 = vld [vmem:[%s5542_s10 + $0x60] sm:$0xc]  ;;  %v6399_v58 = vld [vmem:[%s5542_s10 + $0x38] sm:$0x3] }
  0xad   : > { %v1097_v4 = vsel %vm5986_vm9, %v1093_v42, %v1096_v23  ;;  %v1111_v7 = vrot.slane %v1109_v46, 5  ;;  %v7005_v19 = vshrl.u32 %v5680_v41, 16  ;;  %v7006_v62 = vshll.u32 %v5680_v41, 16  ;;  %4937 = vmatprep.subr.bf16.mxu1 %v5380_v39 }
  0xae   : > { %v1107_v31 = vsel %vm5986_vm9, %v1098_v50, %v1106_v55  ;;  %v2975_v48 = vsel %vm6220_vm12, %v2973_v14, %v2974_v53  ;;  %v1114_v16 = vrot.slane %v1112_v0, 6  ;;  %v1123_v8 = vshrl.u32 %v6368_v51, 16 }
  0xaf   : > { %v1117_v49 = vrot.slane %v7005_v19, 5  ;;  %v1118_v40 = vrot.slane %v7006_v62, 6  ;;  %v4332_v45 = vcombine.low %v1097_v4, %v1107_v31  ;;  %v4556_v41 = vcombine.low %v2972_v61, %v2975_v48 }
  0xb0   : > { %v1126_v35 = vshll.u32 %v6368_v51, 16  ;;  %v1115_v60 = vor.u32 %v1114_v16, %v1111_v7  ;;  %v1125_v22 = vrot.slane %v1123_v8, 5  ;;  %v4545_v59 = vrot.slane %v4537_v27, 10  ;;  %4938 = vmatpush3.bf16.msra.mxu1 %v5380_v39  ;;  %v6420_v16 = vld [vmem:[%s5542_s10 + $0x44] sm:$0x3] }
  0xb1   : > { %v1119_v52 = vor.u32 %v1118_v40, %v1117_v49  ;;  %v2978_v23 = vrot.slane %v5921_v24, 6  ;;  %4923 = vmatprep.mubr.msk.bf16.mxu1 %vm472_vm2, %v4332_v45  ;;  %5051 = vmatprep.mubr.msk.bf16.mxu0 %vm472_vm2, %v4556_v41  ;;  %v2981_v20 = vrot.slane %v6181_v5, 6  ;;  %v1132_v42 = vshrl.u32 %v6192_v33, 16  ;;  %v4659_v24 = vld [vmem:[%s5542_s10 + $0x6c] sm:$0xe] }
  0xb2   : > { %v1128_v63 = vrot.slane %v1126_v35, 6  ;;  %v1116_v50 = vrot.slane %v1115_v60, 4  ;;  %v1135_v39 = vshll.u32 %v6192_v33, 16  ;;  %4955 = vmatprep.subr.bf16.mxu1 %v6391_v32  ;;  %v7007_v14 = vshrl.u32 %v5730_v3, 16  ;;  %v5381_v33 = vld [vmem:[%s5542_s10 + $0x18] sm:$0xff]  }
  0xb3   : > { %v1121_v56 = vrot.slane %v1119_v52, 4  ;;  %v2979_v53 = vsel %vm6220_vm12, %v4545_v59, %v2978_v23  ;;  %v2980_v46 = vrot.slane %v2978_v23, 4  ;;  %v1134_v61 = vrot.slane %v1132_v42, 5 }
  0xb4   : > { %v1129_v55 = vor.u32 %v1128_v63, %v1125_v22  ;;  %v1140_v5 = vrot.slane %v7007_v14, 5  ;;  %v7008_v0 = vshll.u32 %v5730_v3, 16  ;;  %v1120_v7 = vsel %vm5986_vm9, %v1116_v50, %v1119_v52  ;;  %v6437_v14 = vld [vmem:[%s5542_s10 + $0x50] sm:$0x3] }
  0xb5   : > { %v2982_v19 = vsel %vm6220_vm12, %v2980_v46, %v2981_v20  ;;  %v1137_v49 = vrot.slane %v1135_v39, 6  ;;  %v1146_v62 = vshrl.u32 %v6399_v58, 16  ;;  %v1149_v48 = vshll.u32 %v6399_v58, 16 }
  0xb6   : > { %v1141_v4 = vrot.slane %v7008_v0, 6  ;;  %v1130_v40 = vsel %vm5986_vm9, %v1121_v56, %v1129_v55  ;;  %v4557_v27 = vcombine.low %v2979_v53, %v2982_v19  ;;  %v1155_v41 = vshrl.u32 %v6211_v1, 16 }
  0xb7   : > { %v4333_v3 = vcombine.low %v1120_v7, %v1130_v40  ;;  %v1138_v8 = vor.u32 %v1137_v49, %v1134_v61  ;;  %v1148_v45 = vrot.slane %v1146_v62, 5  ;;  %v1151_v35 = vrot.slane %v1149_v48, 6  ;;  %v5383_v7 = vld [vmem:[%s5542_s10 + $0x24] sm:$0xff]  }
  0xb8   : > { %v1142_v31 = vor.u32 %v1141_v4, %v1140_v5  ;;  %5052 = vmatmul.mubr.msk.bf16.gmra.mrb[12].mxu0 %vm472_vm2, %v4557_v27  ;;  %v1158_v60 = vshll.u32 %v6211_v1, 16  ;;  %v7009_v22 = vshrl.u32 %v5762_v36, 16  ;;  %v1157_v56 = vrot.slane %v1155_v41, 5  ;;  %v5388_v41 = vld [vmem:[%s6947_s1 + $0xb8] sm:$0xff]  }
  0xb9   : > { %4924 = vmatmul.mubr.msk.bf16.gmra.mrb[4].mxu1 %vm472_vm2, %v4333_v3  ;;  %v1139_v23 = vrot.slane %v1138_v8, 4  ;;  %5059 = vmatprep.mubr.msk.bf16.mxu0 %vm472_vm2, %v5381_v33  ;;  %v7010_v63 = vshll.u32 %v5762_v36, 16  ;;  %v1169_v42 = vshrl.u32 %v6420_v16, 16  ;;  %v1152_v50 = vor.u32 %v1151_v35, %v1148_v45 }
  0xba   : > { %v1144_v52 = vrot.slane %v1142_v31, 4  ;;  %v1163_v59 = vrot.slane %v7009_v22, 5  ;;  %v1160_v53 = vrot.slane %v1158_v60, 6  ;;  %v1172_v46 = vshll.u32 %v6420_v16, 16 }
  0xbb   : > { %v1164_v20 = vrot.slane %v7010_v63, 6  ;;  %v1178_v1 = vshrl.u32 %v6242_v18, 16  ;;  %v1143_v39 = vsel %vm5986_vm9, %v1139_v23, %v1142_v31  ;;  %v1171_v61 = vrot.slane %v1169_v42, 5  ;;  %v5384_v31 = vld [vmem:[%s5542_s10 + $0x30] sm:$0xff]   ;;  %v6462_v63 = vld [vmem:[%s5542_s10 + $0x5c] sm:$0x3] }
  0xbc   : > { %v1181_v5 = vshll.u32 %v6242_v18, 16  ;;  %v1153_v36 = vsel %vm5986_vm9, %v1144_v52, %v1152_v50  ;;  %v1161_v0 = vor.u32 %v1160_v53, %v1157_v56  ;;  %v1174_v4 = vrot.slane %v1172_v46, 6  ;;  %v1401_v53 = vld [vmem:[%s5542_s10] sm:$0xc] }
  0xbd   : > { %v1165_v55 = vor.u32 %v1164_v20, %v1163_v59  ;;  %v1180_v19 = vrot.slane %v1178_v1, 5  ;;  %v4334_v49 = vcombine.low %v1143_v39, %v1153_v36  ;;  %v7011_v40 = vshrl.u32 %v5805_v37, 16 }
  0xbe   : > { %v1183_v33 = vrot.slane %v1181_v5, 6  ;;  %v1162_v48 = vrot.slane %v1161_v0, 4  ;;  %v1175_v3 = vor.u32 %v1174_v4, %v1171_v61  ;;  %v7012_v8 = vshll.u32 %v5805_v37, 16 }
  0xbf   : > { %v1167_v62 = vrot.slane %v1165_v55, 4  ;;  %v1186_v27 = vrot.slane %v7011_v40, 5  ;;  %v1192_v45 = vshrl.u32 %v6437_v14, 16  ;;  %4927 = vmatprep.mubr.msk.bf16.mxu1 %vm472_vm2, %v4334_v49  ;;  %v1195_v35 = vshll.u32 %v6437_v14, 16  ;;  %v5385_v49 = vld [vmem:[%s5542_s10 + $0x3c] sm:$0xff]  }
  0xc0   : > { %v1187_v18 = vrot.slane %v7012_v8, 6  ;;  %v1184_v52 = vor.u32 %v1183_v33, %v1180_v19  ;;  %v1201_v60 = vshrl.u32 %v6250_v2, 16  ;;  %v1204_v22 = vshll.u32 %v6250_v2, 16  ;;  %5060 = vmatmul.mubr.msk.bf16.vlgmr.msra.gmra.mrb[0].mxu0 %vm472_vm2, %v5383_v7  ;;  %v5407_v33 = vld [vmem:[%s5542_s10 + $0x4] sm:$0xf] }
  0xc1   : > { %v1166_v37 = vsel %vm5986_vm9, %v1162_v48, %v1165_v55  ;;  %v1176_v59 = vsel %vm5986_vm9, %v1167_v62, %v1175_v3  ;;  %v1194_v56 = vrot.slane %v1192_v45, 5  ;;  %5076 = vmatpush3.bf16.msra.mxu0 %v6314_v57  ;;  %v1197_v50 = vrot.slane %v1195_v35, 6  ;;  %5063 = vmatprep.mubr.msk.bf16.mxu0 %vm472_vm2, %v5384_v31  ;;  %v6474_v57 = vld [vmem:[%s6947_s1 + $0xc0] sm:$0xff]   ;;  %v1403_v45 = vld [vmem:[%s5542_s10 + $0x18] sm:$0xc] }
  0xc2   : > { %v1188_v23 = vor.u32 %v1187_v18, %v1186_v27  ;;  %v4335_v20 = vcombine.low %v1166_v37, %v1176_v59  ;;  %v1185_v42 = vrot.slane %v1184_v52, 4  ;;  %v1203_v2 = vrot.slane %v1201_v60, 5  ;;  %5077 = vmatprep.subr.bf16.mxu0 %v5388_v41  ;;  %v1402_v27 = vld [vmem:[%s5542_s10 + $0xc] sm:$0xc] }
  0xc3   : > { %v1206_v1 = vrot.slane %v1204_v22, 6  ;;  %v7013_v39 = vshrl.u32 %v5841_v34, 16  ;;  %v7014_v61 = vshll.u32 %v5841_v34, 16  ;;  %v1198_v0 = vor.u32 %v1197_v50, %v1194_v56  ;;  %v5387_v18 = vld [vmem:[%s5542_s10 + $0x48] sm:$0xff]   ;;  %v5408_v56 = vld [vmem:[%s5542_s10 + $0x10] sm:$0xf] }
  0xc4   : > { %v1190_v46 = vrot.slane %v1188_v23, 4  ;;  %4928 = vmatmul.mubr.msk.bf16.gmra.mrb[8].mxu1 %vm472_vm2, %v4335_v20  ;;  %v1189_v36 = vsel %vm5986_vm9, %v1185_v42, %v1188_v23  ;;  %v1215_v4 = vshrl.u32 %v6462_v63, 16  ;;  %v1218_v7 = vshll.u32 %v6462_v63, 16  ;;  %v5409_v50 = vld [vmem:[%s5542_s10 + $0x1c] sm:$0xf] }
  0xc5   : > { %v1209_v55 = vrot.slane %v7013_v39, 5  ;;  %v1210_v5 = vrot.slane %v7014_v61, 6  ;;  %v1207_v34 = vor.u32 %v1206_v1, %v1203_v2  ;;  %v4348_v62 = vrot.slane %v1401_v53, 10  ;;  %5078 = vmatpush3.bf16.msra.mxu0 %v5388_v41  ;;  %v1404_v53 = vld [vmem:[%s5542_s10 + $0x24] sm:$0xc] }
  0xc6   : > { %v1430_v40 = vrot.slane %v5407_v33, 6  ;;  %v1199_v31 = vsel %vm5986_vm9, %v1190_v46, %v1198_v0  ;;  %v1217_v48 = vrot.slane %v1215_v4, 5  ;;  %v1220_v3 = vrot.slane %v1218_v7, 6  ;;  %5095 = vmatprep.subr.bf16.mxu0 %v6474_v57  ;;  %v5389_v33 = vld [vmem:[%s5542_s10 + $0x54] sm:$0xff]  }
  0xc7   : > { %v1211_v19 = vor.u32 %v1210_v5, %v1209_v55  ;;  %v1433_v8 = vrot.slane %v6283_v21, 6  ;;  %v4336_v52 = vcombine.low %v1189_v36, %v1199_v31  ;;  %v1208_v35 = vrot.slane %v1207_v34, 4  ;;  %v5410_v34 = vld [vmem:[%s5542_s10 + $0x28] sm:$0xf]  ;;  %v5411_v31 = vld [vmem:[%s5542_s10 + $0x34] sm:$0xf] }
  0xc8   : > { %v1431_v22 = vsel %vm6220_vm12, %v4348_v62, %v1430_v40  ;;  %v1221_v37 = vor.u32 %v1220_v3, %v1217_v48  ;;  %v1432_v59 = vrot.slane %v1430_v40, 4  ;;  %v4349_v23 = vrot.slane %v1402_v27, 10  ;;  %5064 = vmatmul.mubr.msk.bf16.gmra.mrb[4].mxu0 %vm472_vm2, %v5385_v49  ;;  %v4606_v49 = vld [vmem:[%s5542_s10 + $0x18] sm:$0xf]  ;;  %v6522_v3 = vld [vmem:[%s5542_s10 + $0x1c] sm:$0xf] }
  0xc9   : > { %v1213_v60 = vrot.slane %v1211_v19, 4  ;;  %v1437_v20 = vrot.slane %v5408_v56, 6  ;;  %4931 = vmatprep.mubr.msk.bf16.mxu1 %vm472_vm2, %v4336_v52  ;;  %v1212_v21 = vsel %vm5986_vm9, %v1208_v35, %v1211_v19  ;;  %v1440_v41 = vrot.slane %v6309_v29, 6  ;;  %5067 = vmatprep.mubr.msk.bf16.mxu0 %vm472_vm2, %v5387_v18  ;;  %v1405_v29 = vld [vmem:[%s5542_s10 + $0x30] sm:$0xc] }
  0xca   : > { %v4350_v42 = vrot.slane %v1403_v45, 10  ;;  %v1444_v2 = vrot.slane %v5409_v50, 6  ;;  %v1434_v1 = vsel %vm6220_vm12, %v1432_v59, %v1433_v8  ;;  %v1447_v4 = vrot.slane %v6337_v25, 6  ;;  %v5390_v8 = vld [vmem:[%s5542_s10 + $0x60] sm:$0xff]  }
  0xcb   : > { %v1222_v46 = vsel %vm5986_vm9, %v1213_v60, %v1221_v37  ;;  %v1438_v39 = vsel %vm6220_vm12, %v4349_v23, %v1437_v20  ;;  %v1439_v55 = vrot.slane %v1437_v20, 4  ;;  %v4360_v5 = vcombine.low %v1431_v22, %v1434_v1  ;;  %v1406_v20 = vld [vmem:[%s5542_s10 + $0x3c] sm:$0xc] }
  0xcc   : > { %v4337_v61 = vcombine.low %v1212_v21, %v1222_v46  ;;  %v6510_v38 = vsel %vm6220_vm12, %v4350_v42, %v1444_v2  ;;  %v1446_v36 = vrot.slane %v1444_v2, 4  ;;  %v4351_v7 = vrot.slane %v1404_v53, 10  ;;  %v4609_v2 = vld [vmem:[%s5542_s10 + $0x24] sm:$0xf] }
  0xcd   : > { %v1441_v0 = vsel %vm6220_vm12, %v1439_v55, %v1440_v41  ;;  %v1451_v19 = vrot.slane %v5410_v34, 6  ;;  %v1454_v40 = vrot.slane %v6368_v51, 6  ;;  %v4352_v27 = vrot.slane %v1405_v29, 10  ;;  %v6534_v51 = vld [vmem:[%s5542_s10 + $0x20] sm:$0x1]  ;;  %v5392_v29 = vld [vmem:[%s6947_s1 + $0x58] sm:$0xff]  }
  0xce   : > { %4932 = vmatmul.mubr.msk.bf16.gmra.mrb[12].mxu1 %vm472_vm2, %v4337_v61  ;;  %v4361_v62 = vcombine.low %v1438_v39, %v1441_v0  ;;  %v1458_v48 = vrot.slane %v5411_v31, 6  ;;  %v1448_v25 = vsel %vm6220_vm12, %v1446_v36, %v1447_v4  ;;  %v1461_v52 = vrot.slane %v6399_v58, 6  ;;  %v6561_v55 = vld [vmem:[%s5542_s10 + $0x28] sm:$0xf]  ;;  %v6569_v34 = vld [vmem:[%s5542_s10 + $0x2c] sm:$0x1] }
  0xcf   : > { %4939 = vmatprep.mubr.msk.bf16.mxu1 %vm472_vm2, %v4360_v5  ;;  %v6530_v18 = vsel %vm6220_vm12, %v4351_v7, %v1451_v19  ;;  %v1453_v45 = vrot.slane %v1451_v19, 4  ;;  %v4362_v35 = vcombine.low %v6510_v38, %v1448_v25  ;;  %v3397_v37 = vshrl.u32 %v4606_v49, 16  ;;  %v5412_v38 = vld [vmem:[%s5542_s10 + $0x40] sm:$0xf] }
  0xd0   : > { %v6539_v60 = vsel %vm6220_vm12, %v4352_v27, %v1458_v48  ;;  %v1460_v22 = vrot.slane %v1458_v48, 4  ;;  %v3400_v23 = vshll.u32 %v4606_v49, 16  ;;  %v3406_v56 = vshll.u32 %v6522_v3, 16  ;;  %5068 = vmatmul.mubr.msk.bf16.gmra.mrb[8].mxu0 %vm472_vm2, %v5389_v33  ;;  %v5391_v33 = vld [vmem:[%s5542_s10 + $0x6c] sm:$0xff]  }
  0xd1   : > { %v6543_v59 = vsel %vm6220_vm12, %v1453_v45, %v1454_v40  ;;  %v3410_v58 = vshrl.u32 %v6522_v3, 16  ;;  %v3399_v42 = vrot.slane %v3397_v37, 4  ;;  %v3416_v50 = vshll.u32 %v6534_v51, 16  ;;  %5071 = vmatprep.mubr.msk.bf16.mxu0 %vm472_vm2, %v5390_v8  ;;  %v1407_v45 = vld [vmem:[%s5542_s10 + $0x48] sm:$0xc] }
  0xd2   : > { %v4363_v21 = vcombine.low %v6530_v18, %v6543_v59  ;;  %v6553_v41 = vsel %vm6220_vm12, %v1460_v22, %v1461_v52  ;;  %v3402_v46 = vrot.slane %v3400_v23, 5  ;;  %v3408_v1 = vrot.slane %v3406_v56, 5  ;;  %v4612_v56 = vld [vmem:[%s5542_s10 + $0x30] sm:$0xf] }
  0xd3   : > { %v4364_v53 = vcombine.low %v6539_v60, %v6553_v41  ;;  %v3412_v39 = vrot.slane %v3410_v58, 4  ;;  %v3418_v61 = vrot.slane %v3416_v50, 5  ;;  %v4353_v5 = vrot.slane %v1406_v20, 10  ;;  %v6595_v50 = vld [vmem:[%s5542_s10 + $0x34] sm:$0xf]  ;;  %v5395_v60 = vld [vmem:[%s6947_s1 + $0xc8] sm:$0xff]  }
  0xd4   : > { %v1465_v36 = vrot.slane %v5412_v38, 6  ;;  %v1468_v0 = vrot.slane %v6420_v16, 6  ;;  %v3403_v4 = vor.u32 %v3402_v46, %v3399_v42  ;;  %v3421_v19 = vshrl.u32 %v4609_v2, 16 }
  0xd5   : > { %v3413_v7 = vor.u32 %v3412_v39, %v3408_v1  ;;  %v3424_v49 = vshll.u32 %v4609_v2, 16  ;;  %v3430_v31 = vshll.u32 %v6561_v55, 16  ;;  %v3434_v16 = vshrl.u32 %v6561_v55, 16 }
  0xd6   : > { %4940 = vmatmul.mubr.msk.bf16.vlgmr.msra.gmra.mrb[0].mxu1 %vm472_vm2, %v4361_v62  ;;  %v6575_v40 = vsel %vm6220_vm12, %v4353_v5, %v1465_v36  ;;  %v1467_v27 = vrot.slane %v1465_v36, 4  ;;  %v3404_v48 = vrot.slane %v3403_v4, 4  ;;  %v3423_v8 = vrot.slane %v3421_v19, 4  ;;  %v5413_v36 = vld [vmem:[%s5542_s10 + $0x4c] sm:$0xf] }
  0xd7   : > { %4956 = vmatpush3.bf16.msra.mxu1 %v6391_v32  ;;  %4943 = vmatprep.mubr.msk.bf16.mxu1 %vm472_vm2, %v4362_v35  ;;  %v3414_v25 = vrot.slane %v3413_v7, 4  ;;  %v3426_v62 = vrot.slane %v3424_v49, 5  ;;  %v3432_v22 = vrot.slane %v3430_v31, 5  ;;  %v3436_v37 = vrot.slane %v3434_v16, 4 }
  0xd8   : > { %4957 = vmatprep.subr.bf16.mxu1 %v5392_v29  ;;  %v6584_v52 = vsel %vm6220_vm12, %v1467_v27, %v1468_v0  ;;  %v3440_v23 = vshll.u32 %v6569_v34, 16  ;;  %v3409_v35 = vsel %vm5574_vm3, %v3404_v48, %v3408_v1  ;;  %5072 = vmatmul.mubr.msk.bf16.gmra.mrb[12].mxu0 %vm472_vm2, %v5391_v33  ;;  %v4354_v5 = vrot.slane %v1407_v45, 10  ;;  %v1408_v27 = vld [vmem:[%s5542_s10 + $0x54] sm:$0xc] }
  0xd9   : > { %v3419_v58 = vsel %vm5574_vm3, %v3414_v25, %v3418_v61  ;;  %v4365_v20 = vcombine.low %v6575_v40, %v6584_v52  ;;  %v3427_v42 = vor.u32 %v3426_v62, %v3423_v8  ;;  %v3437_v46 = vor.u32 %v3436_v37, %v3432_v22  ;;  %v6601_v61 = vld [vmem:[%s5542_s10 + $0x38] sm:$0x1] }
  0xda   : > { %v4634_v2 = vcombine.low %v3409_v35, %v3419_v58  ;;  %v3442_v39 = vrot.slane %v3440_v23, 5  ;;  %v1472_v1 = vrot.slane %v5413_v36, 6  ;;  %v1475_v0 = vrot.slane %v6437_v14, 6  ;;  %v5415_v58 = vld [vmem:[%s5542_s10 + $0x58] sm:$0xf] }
  0xdb   : > { %4958 = vmatpush3.bf16.msra.mxu1 %v5392_v29  ;;  %v3428_v38 = vrot.slane %v3427_v42, 4  ;;  %v3445_v4 = vshrl.u32 %v4612_v56, 16  ;;  %v3438_v7 = vrot.slane %v3437_v46, 4  ;;  %v3448_v19 = vshll.u32 %v4612_v56, 16  ;;  %v6610_v29 = vld [vmem:[%s6947_s1 + $0x60] sm:$0xff]  }
  0xdc   : > { %5079 = vmatprep.mubr.msk.bf16.mxu0 %vm472_vm2, %v4634_v2  ;;  %v3454_v49 = vshll.u32 %v6595_v50, 16  ;;  %v3458_v33 = vshrl.u32 %v6595_v50, 16  ;;  %5115 = vmatprep.subr.bf16.mxu1 %v6610_v29  ;;  %v1473_v31 = vsel %vm6220_vm12, %v4354_v5, %v1472_v1  ;;  %v1474_v16 = vrot.slane %v1472_v1, 4  ;;  %v6633_v2 = vld [vmem:[%s5542_s10 + $0x40] sm:$0xf] }
  0xdd   : > { %v3433_v14 = vsel %vm5574_vm3, %v3428_v38, %v3432_v22  ;;  %v3447_v48 = vrot.slane %v3445_v4, 4  ;;  %v3443_v25 = vsel %vm5574_vm3, %v3438_v7, %v3442_v39  ;;  %v3450_v8 = vrot.slane %v3448_v19, 5  ;;  %v4615_v22 = vld [vmem:[%s5542_s10 + $0x3c] sm:$0xf]  ;;  %v6640_v46 = vld [vmem:[%s5542_s10 + $0x44] sm:$0x1] }
  0xde   : > { %4944 = vmatmul.mubr.msk.bf16.gmra.mrb[4].mxu1 %vm472_vm2, %v4363_v21  ;;  %v3456_v62 = vrot.slane %v3454_v49, 5  ;;  %v3460_v45 = vrot.slane %v3458_v33, 4  ;;  %v4635_v37 = vcombine.low %v3433_v14, %v3443_v25  ;;  %v1476_v18 = vsel %vm6220_vm12, %v1474_v16, %v1475_v0  ;;  %v4618_v49 = vld [vmem:[%s5542_s10 + $0x48] sm:$0xf]  ;;  %v6662_v16 = vld [vmem:[%s5542_s10 + $0x50] sm:$0x1] }
  0xdf   : > { %4947 = vmatprep.mubr.msk.bf16.mxu1 %vm472_vm2, %v4364_v53  ;;  %v3464_v59 = vshll.u32 %v6601_v61, 16  ;;  %v4355_v21 = vrot.slane %v1408_v27, 10  ;;  %v4366_v23 = vcombine.low %v1473_v31, %v1476_v18  ;;  %v3451_v56 = vor.u32 %v3450_v8, %v3447_v48  ;;  %v6676_v40 = vld [vmem:[%s5542_s10 + $0x58] sm:$0xf] }
  0xe0   : > { %v3461_v35 = vor.u32 %v3460_v45, %v3456_v62  ;;  %v1479_v42 = vrot.slane %v5415_v58, 6  ;;  %v1482_v53 = vrot.slane %v6462_v63, 6  ;;  %v3469_v39 = vshrl.u32 %v4615_v22, 16  ;;  %5080 = vmatmul.mubr.msk.bf16.vlgmr.msra.gmra.mrb[0].mxu0 %vm472_vm2, %v4635_v37 }
  0xe1   : > { %v3466_v41 = vrot.slane %v3464_v59, 5  ;;  %v3472_v5 = vshll.u32 %v4615_v22, 16  ;;  %v3452_v38 = vrot.slane %v3451_v56, 4  ;;  %5096 = vmatpush3.bf16.msra.mxu0 %v6474_v57  ;;  %v3478_v7 = vshll.u32 %v6633_v2, 16  ;;  %v6659_v57 = vld [vmem:[%s5542_s10 + $0x4c] sm:$0xf] }
  0xe2   : > { %v3462_v36 = vrot.slane %v3461_v35, 4  ;;  %v6645_v1 = vsel %vm6220_vm12, %v4355_v21, %v1479_v42  ;;  %v1481_v0 = vrot.slane %v1479_v42, 4  ;;  %v3471_v4 = vrot.slane %v3469_v39, 4  ;;  %5097 = vmatprep.subr.bf16.mxu0 %v5395_v60  ;;  %v6679_v42 = vld [vmem:[%s5542_s10 + $0x5c] sm:$0x1] }
  0xe3   : > { %v3474_v63 = vrot.slane %v3472_v5, 5  ;;  %v3482_v19 = vshrl.u32 %v6633_v2, 16  ;;  %v3457_v33 = vsel %vm5574_vm3, %v3452_v38, %v3456_v62  ;;  %v3488_v31 = vshll.u32 %v6640_v46, 16  ;;  %v4621_v62 = vld [vmem:[%s5542_s10 + $0x54] sm:$0xf] }
  0xe4   : > { %v3467_v27 = vsel %vm5574_vm3, %v3462_v36, %v3466_v41  ;;  %v1483_v14 = vsel %vm6220_vm12, %v1481_v0, %v1482_v53  ;;  %v3480_v45 = vrot.slane %v3478_v7, 5  ;;  %v3493_v37 = vshrl.u32 %v4618_v49, 16  ;;  %v4624_v38 = vld [vmem:[%s5542_s10 + $0x60] sm:$0xf] }
  0xe5   : > { %v4636_v48 = vcombine.low %v3457_v33, %v3467_v27  ;;  %v4367_v25 = vcombine.low %v6645_v1, %v1483_v14  ;;  %v3475_v8 = vor.u32 %v3474_v63, %v3471_v4  ;;  %v3484_v9 = vrot.slane %v3482_v19, 4  ;;  %5098 = vmatpush3.bf16.msra.mxu0 %v5395_v60  ;;  %v5394_v63 = vld [vmem:[%s5542_s10 + $0xc] sm:$0xff]  }
  0xe6   : > { %4948 = vmatmul.mubr.msk.bf16.gmra.mrb[8].mxu1 %vm472_vm2, %v4365_v20  ;;  %v3490_v22 = vrot.slane %v3488_v31, 5  ;;  %v3496_v18 = vshll.u32 %v4618_v49, 16  ;;  %v3502_v21 = vshll.u32 %v6659_v57, 16  ;;  %v3506_v56 = vshrl.u32 %v6659_v57, 16  ;;  %v6691_v31 = vld [vmem:[%s5542_s10 + $0x64] sm:$0xf] }
  0xe7   : > { %4951 = vmatprep.mubr.msk.bf16.mxu1 %vm472_vm2, %v4366_v23  ;;  %5083 = vmatprep.mubr.msk.bf16.mxu0 %vm472_vm2, %v4636_v48  ;;  %v3476_v59 = vrot.slane %v3475_v8, 4  ;;  %v3512_v35 = vshll.u32 %v6662_v16, 16  ;;  %v3485_v52 = vor.u32 %v3484_v9, %v3480_v45  ;;  %v3495_v20 = vrot.slane %v3493_v37, 4  ;;  %v6694_v37 = vld [vmem:[%s5542_s10 + $0x68] sm:$0x1] }
  0xe8   : > { %v3498_v58 = vrot.slane %v3496_v18, 5  ;;  %v3517_v41 = vshrl.u32 %v4621_v62, 16  ;;  %v3504_v53 = vrot.slane %v3502_v21, 5  ;;  %v3508_v39 = vrot.slane %v3506_v56, 4  ;;  %v4627_v56 = vld [vmem:[%s5542_s10 + $0x6c] sm:$0xf] }
  0xe9   : > { %v3481_v23 = vsel %vm5574_vm3, %v3476_v59, %v3480_v45  ;;  %v3514_v5 = vrot.slane %v3512_v35, 5  ;;  %v3486_v36 = vrot.slane %v3485_v52, 4  ;;  %v3520_v4 = vshll.u32 %v4621_v62, 16 }
  0xea   : > { %v3499_v1 = vor.u32 %v3498_v58, %v3495_v20  ;;  %v3519_v0 = vrot.slane %v3517_v41, 4  ;;  %v3509_v7 = vor.u32 %v3508_v39, %v3504_v53  ;;  %v3526_v19 = vshll.u32 %v6676_v40, 16  ;;  %v6708_v39 = vld [vmem:[%s5542_s10 + $0x70] sm:$0xf] }
  0xeb   : > { %v3530_v49 = vshrl.u32 %v6676_v40, 16  ;;  %v3536_v60 = vshll.u32 %v6679_v42, 16  ;;  %v3491_v33 = vsel %vm5574_vm3, %v3486_v36, %v3490_v22  ;;  %v3522_v14 = vrot.slane %v3520_v4, 5  ;;  %v6711_v4 = vld [vmem:[%s5542_s10 + $0x74] sm:$0x1] }
  0xec   : > { %v3500_v27 = vrot.slane %v3499_v1, 4  ;;  %v3541_v48 = vshrl.u32 %v4624_v38, 16  ;;  %v4637_v8 = vcombine.low %v3481_v23, %v3491_v33  ;;  %v3510_v45 = vrot.slane %v3509_v7, 4 }
  0xed   : > { %v3528_v62 = vrot.slane %v3526_v19, 5  ;;  %v3532_v9 = vrot.slane %v3530_v49, 4  ;;  %v3523_v59 = vor.u32 %v3522_v14, %v3519_v0  ;;  %v3538_v21 = vrot.slane %v3536_v60, 5  ;;  %v4652_v60 = vld [vmem:[%s5542_s10 + $0x18] sm:$0xe] }
  0xee   : > { %4952 = vmatmul.mubr.msk.bf16.gmra.mrb[12].mxu1 %vm472_vm2, %v4367_v25  ;;  %v3505_v18 = vsel %vm5574_vm3, %v3500_v27, %v3504_v53  ;;  %v3543_v22 = vrot.slane %v3541_v48, 4  ;;  %5084 = vmatmul.mubr.msk.bf16.gmra.mrb[4].mxu0 %vm472_vm2, %v4637_v8  ;;  %v3515_v35 = vsel %vm5574_vm3, %v3510_v45, %v3514_v5  ;;  %v3544_v20 = vshll.u32 %v4624_v38, 16  ;;  %v5396_v38 = vld [vmem:[%s5542_s10 + $0x18] sm:$0xff]   ;;  %v5397_v45 = vld [vmem:[%s5542_s10 + $0x24] sm:$0xff]  }
  0xef   : > { %4959 = vmatprep.mubr.msk.bf16.mxu1 %vm472_vm2, %v5394_v63  ;;  %v3533_v52 = vor.u32 %v3532_v9, %v3528_v62  ;;  %v3550_v25 = vshll.u32 %v6691_v31, 16  ;;  %v4638_v58 = vcombine.low %v3505_v18, %v3515_v35  ;;  %v3524_v41 = vrot.slane %v3523_v59, 4  ;;  %v4653_v35 = vld [vmem:[%s5542_s10 + $0x24] sm:$0xe] }
  0xf0   : > { %v3554_v23 = vshrl.u32 %v6691_v31, 16  ;;  %v3560_v53 = vshll.u32 %v6694_v37, 16  ;;  %v3546_v1 = vrot.slane %v3544_v20, 5  ;;  %v3565_v5 = vshrl.u32 %v4627_v56, 16 }
  0xf1   : > { %v3534_v36 = vrot.slane %v3533_v52, 4  ;;  %v3552_v0 = vrot.slane %v3550_v25, 5  ;;  %5087 = vmatprep.mubr.msk.bf16.mxu0 %vm472_vm2, %v4638_v58  ;;  %v3529_v63 = vsel %vm5574_vm3, %v3524_v41, %v3528_v62  ;;  %v3568_v49 = vshll.u32 %v4627_v56, 16 }
  0xf2   : > { %v3556_v7 = vrot.slane %v3554_v23, 4  ;;  %v3562_v19 = vrot.slane %v3560_v53, 5  ;;  %v3547_v27 = vor.u32 %v3546_v1, %v3543_v22  ;;  %v3567_v14 = vrot.slane %v3565_v5, 4 }
  0xf3   : > { %v3539_v33 = vsel %vm5574_vm3, %v3534_v36, %v3538_v21  ;;  %v3574_v48 = vshll.u32 %v6708_v39, 16  ;;  %v3570_v18 = vrot.slane %v3568_v49, 5  ;;  %v3578_v59 = vshrl.u32 %v6708_v39, 16 }
  0xf4   : > { %v4639_v8 = vcombine.low %v3529_v63, %v3539_v33  ;;  %v3557_v9 = vor.u32 %v3556_v7, %v3552_v0  ;;  %v3548_v52 = vrot.slane %v3547_v27, 4  ;;  %v3584_v20 = vshll.u32 %v6711_v4, 16 }
  0xf5   : > { %v3576_v62 = vrot.slane %v3574_v48, 5  ;;  %v4660_v56 = vrot.slane %v4652_v60, 9  ;;  %v3571_v21 = vor.u32 %v3570_v18, %v3567_v14  ;;  %v3580_v22 = vrot.slane %v3578_v59, 4  ;;  %v5398_v60 = vld [vmem:[%s5542_s10 + $0x30] sm:$0xff]   ;;  %v5399_v14 = vld [vmem:[%s5542_s10 + $0x3c] sm:$0xff]  }
  0xf6   : > { %4960 = vmatmul.mubr.msk.bf16.vlgmr.msra.gmra.mrb[0].mxu1 %vm472_vm2, %v5396_v38  ;;  %v3558_v25 = vrot.slane %v3557_v9, 4  ;;  %v3800_v58 = vrot.slane %v6522_v3, 5  ;;  %5088 = vmatmul.mubr.msk.bf16.gmra.mrb[8].mxu0 %vm472_vm2, %v4639_v8  ;;  %v3553_v41 = vsel %vm5574_vm3, %v3548_v52, %v3552_v0  ;;  %v3586_v23 = vrot.slane %v3584_v20, 5  ;;  %v4654_v38 = vld [vmem:[%s5542_s10 + $0x30] sm:$0xe] }
  0xf7   : > { %5117 = vmatpush3.bf16.msra.mxu1 %v6610_v29  ;;  %v3803_v53 = vrot.slane %v6534_v51, 5  ;;  %v4661_v36 = vrot.slane %v4653_v35, 9  ;;  %4963 = vmatprep.mubr.msk.bf16.mxu1 %vm472_vm2, %v5397_v45  ;;  %v3572_v5 = vrot.slane %v3571_v21, 4  ;;  %v3581_v3 = vor.u32 %v3580_v22, %v3576_v62  ;;  %v5416_v29 = vld [vmem:[%s6947_s1 + $0x68] sm:$0xff]  }
  0xf8   : > { %v3563_v1 = vsel %vm5574_vm3, %v3558_v25, %v3562_v19  ;;  %5116 = vmatprep.subr.bf16.mxu1 %v5416_v29  ;;  %v3801_v0 = vsel %vm5766_vm6, %v4660_v56, %v3800_v58  ;;  %v3802_v63 = vrot.slane %v3800_v58, 4  ;;  %v3807_v7 = vrot.slane %v6561_v55, 5  ;;  %v4656_v21 = vld [vmem:[%s5542_s10 + $0x48] sm:$0xe] }
  0xf9   : > { %v4640_v51 = vcombine.low %v3553_v41, %v3563_v1  ;;  %v3810_v49 = vrot.slane %v6569_v34, 5  ;;  %v6745_v19 = vrot.slane %v2037_v43, 5  ;;  %v3577_v33 = vsel %vm5574_vm3, %v3572_v5, %v3576_v62  ;;  %v4428_v43 = vld [vmem:[%s5542_s10 + $0x3c] sm:$0xf] }
  0xfa   : > { %v3582_v27 = vrot.slane %v3581_v3, 4  ;;  %v3814_v48 = vrot.slane %v6595_v50, 5  ;;  %v3804_v8 = vsel %vm5766_vm6, %v3802_v63, %v3803_v53  ;;  %v3809_v55 = vrot.slane %v3807_v7, 4 }
  0xfb   : > { %5091 = vmatprep.mubr.msk.bf16.mxu0 %vm472_vm2, %v4640_v51  ;;  %5118 = vmatpush3.bf16.msra.mxu1 %v5416_v29  ;;  %v4662_v34 = vrot.slane %v4654_v38, 9  ;;  %v4672_v9 = vcombine.low %v3801_v0, %v3804_v8  ;;  %v3808_v18 = vsel %vm5766_vm6, %v4661_v36, %v3807_v7  ;;  %v3817_v50 = vrot.slane %v6601_v61, 5  ;;  %v4431_v36 = vld [vmem:[%s5542_s10 + $0x48] sm:$0xf]  ;;  %v5401_v51 = vld [vmem:[%s5542_s10 + $0x54] sm:$0xff]  }
  0xfc   : > { %v3587_v45 = vsel %vm5574_vm3, %v3582_v27, %v3586_v23  ;;  %v3811_v35 = vsel %vm5766_vm6, %v3809_v55, %v3810_v49  ;;  %v3816_v52 = vrot.slane %v3814_v48, 4  ;;  %v3821_v62 = vrot.slane %v6633_v2, 5  ;;  %v5417_v23 = vld [vmem:[%s5542_s10 + $0x44] sm:$0x1]  ;;  %v5400_v0 = vld [vmem:[%s5542_s10 + $0x48] sm:$0xff]  }
  0xfd   : > { %v4641_v59 = vcombine.low %v3577_v33, %v3587_v45  ;;  %v6768_v20 = vrot.slane %v2034_v10, 4  ;;  %v4663_v56 = vrot.slane %v4655_v11, 9  ;;  %v3824_v25 = vrot.slane %v6640_v46, 5  ;;  %v4434_v8 = vld [vmem:[%s5542_s10 + $0x54] sm:$0xf] }
  0xfe   : > { %4964 = vmatmul.mubr.msk.bf16.gmra.mrb[4].mxu1 %vm472_vm2, %v5398_v60  ;;  %v1994_v61 = vshrl.u32 %v4428_v43, 16  ;;  %v4673_v2 = vcombine.low %v3808_v18, %v3811_v35  ;;  %v3815_v44 = vsel %vm5766_vm6, %v4662_v34, %v3814_v48  ;;  %v3823_v10 = vrot.slane %v3821_v62, 4  ;;  %v4657_v48 = vld [vmem:[%s5542_s10 + $0x54] sm:$0xe] }
  0xff   : > { %5092 = vmatmul.mubr.msk.bf16.gmra.mrb[12].mxu0 %vm472_vm2, %v4641_v59  ;;  %4967 = vmatprep.mubr.msk.bf16.mxu1 %vm472_vm2, %v5399_v14  ;;  %v1997_v22 = vshll.u32 %v4428_v43, 16  ;;  %v2005_v46 = vrot.slane %v2003_v30, 5  ;;  %v2009_v41 = vrot.slane %v2007_v6, 4  ;;  %v2013_v53 = vshll.u32 %v5417_v23, 16 }
 0x100   : > { %5099 = vmatprep.mubr.msk.bf16.mxu0 %vm472_vm2, %v4672_v9  ;;  %v1996_v58 = vrot.slane %v1994_v61, 4  ;;  %v3818_v1 = vsel %vm5766_vm6, %v3816_v52, %v3817_v50  ;;  %v4664_v3 = vrot.slane %v4656_v21, 9  ;;  %v3828_v29 = vrot.slane %v6659_v57, 5  ;;  %v5418_v21 = vld [vmem:[%s5542_s10 + $0x5c] sm:$0x1] }
 0x101   : > { %v1999_v5 = vrot.slane %v1997_v22, 5  ;;  %v6790_v38 = vsel %vm5766_vm6, %v4663_v56, %v3821_v62  ;;  %v6794_v12 = vsel %vm5766_vm6, %v3823_v10, %v3824_v25  ;;  %v2010_v30 = vor.u32 %v2009_v41, %v2005_v46  ;;  %v5402_v10 = vld [vmem:[%s5542_s10 + $0x60] sm:$0xff]  }
 0x102   : > { %v3831_v6 = vrot.slane %v6662_v16, 5  ;;  %v2015_v7 = vrot.slane %v2013_v53, 5  ;;  %v3830_v49 = vrot.slane %v3828_v29, 4  ;;  %v2018_v60 = vshrl.u32 %v4431_v36, 16 }
 0x103   : > { %v2000_v63 = vor.u32 %v1999_v5, %v1996_v58  ;;  %v4674_v33 = vcombine.low %v3815_v44, %v3818_v1  ;;  %v2011_v57 = vrot.slane %v2010_v30, 4  ;;  %v2021_v27 = vshll.u32 %v4431_v36, 16  ;;  %v4437_v44 = vld [vmem:[%s5542_s10 + $0x60] sm:$0xf] }
 0x104   : > { %v2040_v14 = vsel %vm5574_vm3, %v6768_v20, %v6745_v19  ;;  %v3829_v34 = vsel %vm5766_vm6, %v4664_v3, %v3828_v29  ;;  %v3832_v16 = vsel %vm5766_vm6, %v3830_v49, %v3831_v6  ;;  %v2020_v11 = vrot.slane %v2018_v60, 4  ;;  %v4658_v20 = vld [vmem:[%s5542_s10 + $0x60] sm:$0xe] }
 0x105   : > { %v2001_v55 = vrot.slane %v2000_v63, 4  ;;  %v4675_v43 = vcombine.low %v6790_v38, %v6794_v12  ;;  %v2023_v45 = vrot.slane %v2021_v27, 5  ;;  %v3835_v9 = vrot.slane %v6676_v40, 5 }
 0x106   : > { %4968 = vmatmul.mubr.msk.bf16.gmra.mrb[8].mxu1 %vm472_vm2, %v5400_v0  ;;  %v2016_v18 = vsel %vm5574_vm3, %v2011_v57, %v2015_v7  ;;  %v4665_v50 = vrot.slane %v4657_v48, 9  ;;  %v2042_v59 = vshrl.u32 %v4434_v8, 16  ;;  %v4676_v35 = vcombine.low %v3829_v34, %v3832_v16 }
 0x107   : > { %5100 = vmatmul.mubr.msk.bf16.vlgmr.msra.gmra.mrb[0].mxu0 %vm472_vm2, %v4673_v2  ;;  %4971 = vmatprep.mubr.msk.bf16.mxu1 %vm472_vm2, %v5401_v51  ;;  %v2006_v19 = vsel %vm5574_vm3, %v2001_v55, %v2005_v46  ;;  %v2024_v52 = vor.u32 %v2023_v45, %v2020_v11  ;;  %v2045_v40 = vshll.u32 %v4434_v8, 16  ;;  %v2053_v62 = vrot.slane %v2051_v26, 5  ;;  %v5419_v51 = vld [vmem:[%s5542_s10 + $0x68] sm:$0x1]  ;;  %s4253_s10 = sshll.u32 %s7029_s12, 4 }
 0x108   : > { %5103 = vmatprep.mubr.msk.bf16.mxu0 %vm472_vm2, %v4674_v33  ;;  %v3838_v56 = vrot.slane %v6679_v42, 5  ;;  %v2044_v25 = vrot.slane %v2042_v59, 4  ;;  %v2057_v61 = vrot.slane %v2055_v15, 4  ;;  %v2061_v2 = vshll.u32 %v5418_v21, 16  ;;  %s204_s25 = sadd.s32 %s4254_s24, %s4253_s10 }
 0x109   : > { %v4448_v22 = vcombine.low %v2006_v19, %v2016_v18  ;;  %v2025_v58 = vrot.slane %v2024_v52, 4  ;;  %v3837_v46 = vrot.slane %v3835_v9, 4  ;;  %v2047_v41 = vrot.slane %v2045_v40, 5  ;;  %s4255_s28 = sshll.u32 %s204_s25, 2 }
 0x10a   : > { %v2058_v23 = vor.u32 %v2057_v61, %v2053_v62  ;;  %v2063_v53 = vrot.slane %v2061_v2, 5  ;;  %v4666_v36 = vrot.slane %v4658_v20, 9  ;;  %v3842_v26 = vrot.slane %v6691_v31, 5  ;;  %s6884_s29 = scalar_lea.vmem %s6949_s3, %s4255_s28 }
 0x10b   : > { %v2030_v42 = vsel %vm5574_vm3, %v2025_v58, %v6111_v28  ;;  %v2048_v1 = vor.u32 %v2047_v41, %v2044_v25  ;;  %v2066_v13 = vshrl.u32 %v4437_v44, 16  ;;  %v2069_v15 = vshll.u32 %v4437_v44, 16 }
 0x10c   : > { %v4449_v5 = vcombine.low %v2030_v42, %v2040_v14  ;;  %v2059_v3 = vrot.slane %v2058_v23, 4  ;;  %v3844_v29 = vrot.slane %v3842_v26, 4  ;;  %v3845_v0 = vrot.slane %v6694_v37, 5 }
 0x10d   : > { %v2049_v38 = vrot.slane %v2048_v1, 4  ;;  %v2068_v12 = vrot.slane %v2066_v13, 4  ;;  %v2071_v30 = vrot.slane %v2069_v15, 5  ;;  %v2077_v31 = vrot.slane %v2075_v54, 5 }
 0x10e   : > { %4972 = vmatmul.mubr.msk.bf16.gmra.mrb[12].mxu1 %vm472_vm2, %v5402_v10  ;;  %v3836_v28 = vsel %vm5766_vm6, %v4665_v50, %v3835_v9  ;;  %v3839_v6 = vsel %vm5766_vm6, %v3837_v46, %v3838_v56  ;;  %v2081_v37 = vrot.slane %v2079_v17, 4  ;;  %v2085_v63 = vshll.u32 %v5419_v51, 16 }
 0x10f   : > { %5104 = vmatmul.mubr.msk.bf16.gmra.mrb[4].mxu0 %vm472_vm2, %v4675_v43  ;;  %4987 = vmatprep.mubr.msk.bf16.mxu1 %vm472_vm2, %v4448_v22  ;;  %v2054_v54 = vsel %vm5574_vm3, %v2049_v38, %v2053_v62  ;;  %v2064_v7 = vsel %vm5574_vm3, %v2059_v3, %v2063_v53  ;;  %v2072_v49 = vor.u32 %v2071_v30, %v2068_v12  ;;  %v3849_v17 = vrot.slane %v6708_v39, 5 }
 0x110   : > { %5107 = vmatprep.mubr.msk.bf16.mxu0 %vm472_vm2, %v4676_v35  ;;  %v3843_v60 = vsel %vm5766_vm6, %v4666_v36, %v3842_v26  ;;  %v3846_v33 = vsel %vm5766_vm6, %v3844_v29, %v3845_v0  ;;  %v2082_v57 = vor.u32 %v2081_v37, %v2077_v31  ;;  %v4677_v27 = vcombine.low %v3836_v28, %v3839_v6 }
 0x111   : > { %v4450_v14 = vcombine.low %v2054_v54, %v2064_v7  ;;  %v2073_v48 = vrot.slane %v2072_v49, 4  ;;  %v2087_v55 = vrot.slane %v2085_v63, 5  ;;  %v4678_v34 = vcombine.low %v3843_v60, %v3846_v33 }
 0x112   : > { %v2083_v8 = vrot.slane %v2082_v57, 4  ;;  %v4667_v16 = vrot.slane %v4659_v24, 9  ;;  %v3851_v11 = vrot.slane %v3849_v17, 4  ;;  %v3852_v43 = vrot.slane %v6711_v4, 5 }
 0x113   : > { %v2078_v45 = vsel %vm5574_vm3, %v2073_v48, %v2077_v31 }
 0x114   : > { %v2088_v39 = vsel %vm5574_vm3, %v2083_v8, %v2087_v55  ;;  %v3850_v9 = vsel %vm5766_vm6, %v4667_v16, %v3849_v17  ;;  %v3853_v4 = vsel %vm5766_vm6, %v3851_v11, %v3852_v43 }
 0x115   : > { %v4451_v19 = vcombine.low %v2078_v45, %v2088_v39  ;;  %v4679_v18 = vcombine.low %v3850_v9, %v3853_v4 }
 0x116   : > { %4988 = vmatmul.mubr.msk.bf16.vlgmr.msra.gmra.mrb[8].mxu1 %vm472_vm2, %v4449_v5 }
 0x117   : > { %5108 = vmatmul.mubr.msk.bf16.gmra.mrb[8].mxu0 %vm472_vm2, %v4677_v27  ;;  %4991 = vmatprep.mubr.msk.bf16.mxu1 %vm472_vm2, %v4450_v14 }
 0x118   : > { %5111 = vmatprep.mubr.msk.bf16.mxu0 %vm472_vm2, %v4678_v34 }
 0x11e   : > { %4992 = vmatmul.mubr.msk.bf16.gmra.mrb[12].mxu1 %vm472_vm2, %v4451_v19 }
 0x11f   : > { %5112 = vmatmul.mubr.msk.bf16.gmra.mrb[12].mxu0 %vm472_vm2, %v4679_v18 }
 0x1c9   : > { %v4961_v50 = vpop.f32.mrb[0].mxu1 }
 0x1ca   : > { %v1794_v59 = vpop.f32.mrb[1].mxu1 }
 0x1cb   : > { %v4962_v32 = vpop.f32.mrb[2].mxu1 }
 0x1cc   : > { %v1797_v35 = vpop.f32.mrb[3].mxu1 }
 0x1d1   : > { %v4965_v52 = vpop.f32.mrb[4].mxu1 }
 0x1d2   : > { %v1810_v40 = vpop.f32.mrb[5].mxu1 }
 0x1d3   : > { %v4966_v62 = vpop.f32.mrb[6].mxu1 }
 0x1d4   : > { %v1813_v20 = vpop.f32.mrb[7].mxu1 }
 0x1da   : > { %v5101_v56 = vpop.f32.mrb[0].mxu0 }
 0x1db   : > { %v5119_v25 = vadd.f32 %v5101_v56, %v4961_v50  ;;  %v3953_v61 = vpop.f32.mrb[1].mxu0 }
 0x1dc   : > { %v5120_v21 = vadd.f32 %v3953_v61, %v1794_v59  ;;  %v5102_v2 = vpop.f32.mrb[2].mxu0 }
 0x1dd   : > { %v4041_v44 = vadd.f32 %v5119_v25, %v6876_v47  ;;  %v5121_v10 = vadd.f32 %v5102_v2, %v4962_v32  ;;  %v3956_v22 = vpop.f32.mrb[3].mxu0 }
 0x1de   : > { %v4039_v58 = vadd.f32 %v5120_v21, %v6876_v47  ;;  %v5122_v46 = vadd.f32 %v3956_v22, %v1797_v35 }
 0x1df   : > { %v4057_v41 = vmax.f32 %v4041_v44, 0.0  ;;  %v4042_v23 = vadd.f32 %v5121_v10, %v6876_v47 }
 0x1e0   : > { %v4055_v53 = vmax.f32 %v4039_v58, 0.0  ;;  %v4040_v36 = vadd.f32 %v5122_v46, %v6876_v47 }
 0x1e1   : > { %v4711_v26 = vpack.c.bf16 %v4057_v41, %v4057_v41  ;;  %v4058_v42 = vmax.f32 %v4042_v23, 0.0 }
 0x1e2   : > { %v4709_v1 = vpack.c.bf16 %v4055_v53, %v4055_v53  ;;  %v4056_v13 = vmax.f32 %v4040_v36, 0.0  ;;  %v5105_v15 = vpop.f32.mrb[4].mxu0 }
 0x1e3   : > { %4138 = vst.msk [vmem:[%s6884_s29 + $0x8] sm:$0xf] %vm4135_vm13, %v4711_v26  ;;  %v4712_v5 = vpack.c.bf16 %v4058_v42, %v4058_v42  ;;  %v5123_v3 = vadd.f32 %v5105_v15, %v4965_v52  ;;  %v3969_v29 = vpop.f32.mrb[5].mxu0 }
 0x1e4   : > { %4136 = vst.msk [vmem:[%s6884_s29] sm:$0xf] %vm4135_vm13, %v4709_v1  ;;  %v4710_v0 = vpack.c.bf16 %v4056_v13, %v4056_v13  ;;  %v5124_v38 = vadd.f32 %v3969_v29, %v1810_v40  ;;  %v5106_v12 = vpop.f32.mrb[6].mxu0 }
 0x1e5   : > { %4139 = vst.msk [vmem:[%s6884_s29 + $0xc] sm:$0xf] %vm4135_vm13, %v4712_v5  ;;  %v4045_v30 = vadd.f32 %v5123_v3, %v6876_v47  ;;  %v5125_v31 = vadd.f32 %v5106_v12, %v4966_v62  ;;  %v3972_v28 = vpop.f32.mrb[7].mxu0 }
 0x1e6   : > { %4137 = vst.msk [vmem:[%s6884_s29 + $0x4] sm:$0xf] %vm4135_vm13, %v4710_v0  ;;  %v4043_v6 = vadd.f32 %v5124_v38, %v6876_v47  ;;  %v5126_v37 = vadd.f32 %v3972_v28, %v1813_v20 }
 0x1e7   : > { %v4061_v51 = vmax.f32 %v4045_v30, 0.0  ;;  %v4046_v63 = vadd.f32 %v5125_v31, %v6876_v47 }
 0x1e8   : > { %v4059_v54 = vmax.f32 %v4043_v6, 0.0  ;;  %v4044_v7 = vadd.f32 %v5126_v37, %v6876_v47 }
 0x1e9   : > { %v4715_v49 = vpack.c.bf16 %v4061_v51, %v4061_v51  ;;  %v4062_v60 = vmax.f32 %v4046_v63, 0.0  ;;  %v4989_v33 = vpop.f32.mrb[8].mxu1 }
 0x1ea   : > { %v4713_v57 = vpack.c.bf16 %v4059_v54, %v4059_v54  ;;  %v4060_v24 = vmax.f32 %v4044_v7, 0.0  ;;  %v5109_v17 = vpop.f32.mrb[8].mxu0  ;;  %v2220_v27 = vpop.f32.mrb[9].mxu1 }
 0x1eb   : > { %4142 = vst.msk [vmem:[%s6884_s29 + $0x18] sm:$0xf] %vm4135_vm13, %v4715_v49  ;;  %v4716_v14 = vpack.c.bf16 %v4062_v60, %v4062_v60  ;;  %v5127_v48 = vadd.f32 %v5109_v17, %v4989_v33  ;;  %v3985_v8 = vpop.f32.mrb[9].mxu0  ;;  %v4990_v55 = vpop.f32.mrb[10].mxu1 }
 0x1ec   : > { %4140 = vst.msk [vmem:[%s6884_s29 + $0x10] sm:$0xf] %vm4135_vm13, %v4713_v57  ;;  %v4714_v34 = vpack.c.bf16 %v4060_v24, %v4060_v24  ;;  %v5128_v16 = vadd.f32 %v3985_v8, %v2220_v27  ;;  %v5110_v11 = vpop.f32.mrb[10].mxu0  ;;  %v2223_v43 = vpop.f32.mrb[11].mxu1 }
 0x1ed   : > { %4143 = vst.msk [vmem:[%s6884_s29 + $0x1c] sm:$0xf] %vm4135_vm13, %v4716_v14  ;;  %v4049_v45 = vadd.f32 %v5127_v48, %v6876_v47  ;;  %v5129_v39 = vadd.f32 %v5110_v11, %v4990_v55  ;;  %v3988_v9 = vpop.f32.mrb[11].mxu0 }
 0x1ee   : > { %4141 = vst.msk [vmem:[%s6884_s29 + $0x14] sm:$0xf] %vm4135_vm13, %v4714_v34  ;;  %v4047_v4 = vadd.f32 %v5128_v16, %v6876_v47  ;;  %v5130_v19 = vadd.f32 %v3988_v9, %v2223_v43 }
 0x1ef   : > { %v4065_v18 = vmax.f32 %v4049_v45, 0.0  ;;  %v4050_v50 = vadd.f32 %v5129_v39, %v6876_v47 }
 0x1f0   : > { %v4063_v59 = vmax.f32 %v4047_v4, 0.0  ;;  %v4048_v32 = vadd.f32 %v5130_v19, %v6876_v47 }
 0x1f1   : > { %v4719_v35 = vpack.c.bf16 %v4065_v18, %v4065_v18  ;;  %v4066_v52 = vmax.f32 %v4050_v50, 0.0  ;;  %v4993_v40 = vpop.f32.mrb[12].mxu1 }
 0x1f2   : > { %v4717_v62 = vpack.c.bf16 %v4063_v59, %v4063_v59  ;;  %v4064_v20 = vmax.f32 %v4048_v32, 0.0  ;;  %v5113_v56 = vpop.f32.mrb[12].mxu0  ;;  %v2236_v25 = vpop.f32.mrb[13].mxu1 }
 0x1f3   : > { %4146 = vst.msk [vmem:[%s6884_s29 + $0x28] sm:$0xf] %vm4135_vm13, %v4719_v35  ;;  %v4720_v61 = vpack.c.bf16 %v4066_v52, %v4066_v52  ;;  %v5131_v21 = vadd.f32 %v5113_v56, %v4993_v40  ;;  %v4001_v2 = vpop.f32.mrb[13].mxu0  ;;  %v4994_v44 = vpop.f32.mrb[14].mxu1 }
 0x1f4   : > { %4144 = vst.msk [vmem:[%s6884_s29 + $0x20] sm:$0xf] %vm4135_vm13, %v4717_v62  ;;  %v4718_v10 = vpack.c.bf16 %v4064_v20, %v4064_v20  ;;  %v5132_v22 = vadd.f32 %v4001_v2, %v2236_v25  ;;  %v5114_v58 = vpop.f32.mrb[14].mxu0  ;;  %v2239_v46 = vpop.f32.mrb[15].mxu1 }
 0x1f5   : > { %4147 = vst.msk [vmem:[%s6884_s29 + $0x2c] sm:$0xf] %vm4135_vm13, %v4720_v61  ;;  %v4053_v41 = vadd.f32 %v5131_v21, %v6876_v47  ;;  %v5133_v23 = vadd.f32 %v5114_v58, %v4994_v44  ;;  %v4004_v53 = vpop.f32.mrb[15].mxu0 }
 0x1f6   : > { %4145 = vst.msk [vmem:[%s6884_s29 + $0x24] sm:$0xf] %vm4135_vm13, %v4718_v10  ;;  %v4051_v36 = vadd.f32 %v5132_v22, %v6876_v47  ;;  %v5134_v26 = vadd.f32 %v4004_v53, %v2239_v46 }
 0x1f7   : > { %v4069_v42 = vmax.f32 %v4053_v41, 0.0  ;;  %v4054_v1 = vadd.f32 %v5133_v23, %v6876_v47 }
 0x1f8   : > { %v4067_v13 = vmax.f32 %v4051_v36, 0.0  ;;  %v4052_v15 = vadd.f32 %v5134_v26, %v6876_v47 }
 0x1f9   : > { %v4723_v5 = vpack.c.bf16 %v4069_v42, %v4069_v42  ;;  %v4070_v3 = vmax.f32 %v4054_v1, 0.0 }
 0x1fa   : > { %v4721_v29 = vpack.c.bf16 %v4067_v13, %v4067_v13  ;;  %v4068_v0 = vmax.f32 %v4052_v15, 0.0 }
 0x1fb   : > { %4150 = vst.msk [vmem:[%s6884_s29 + $0x38] sm:$0xf] %vm4135_vm13, %v4723_v5  ;;  %v4724_v38 = vpack.c.bf16 %v4070_v3, %v4070_v3 }
 0x1fc   : > { %4148 = vst.msk [vmem:[%s6884_s29 + $0x30] sm:$0xf] %vm4135_vm13, %v4721_v29  ;;  %v4722_v12 = vpack.c.bf16 %v4068_v0, %v4068_v0 }
 0x1fd   : > { %4151 = vst.msk [vmem:[%s6884_s29 + $0x3c] sm:$0xf] %vm4135_vm13, %v4724_v38 }
 0x1fe   : > { %4149 = vst.msk [vmem:[%s6884_s29 + $0x34] sm:$0xf] %vm4135_vm13, %v4722_v12 }
 0x1ff PF: > { %s13_s16 = sadd.s32 1, %s5458_s16   ;;  %s7016_s12 = smov %s5450_s14 }
 0x200   : > { %p10_p7 = scmp.ge.s32.totalorder %s13_s16, 6   ;;  %s7017_s13 = smov %s5454_s15 }
 0x201   : > { %s7018_s14 = smov %s7021_s17  ;;  %s7019_s15 = smov %s7025_s18 }
 0x202   :  { %12 = sbr.rel (!%p10_p7) target bundleno = 3 (0x3), region = 76 }

</bundles_post_ra>
